<compile_context>
chip_gen: v7x
topology: tpu7x:2x2x1
jax: 0.10.0
libtpu: 0.0.40
codegen_flags: <defaults>
</compile_context>

<pallas_src>
import functools

import jax
import jax.numpy as jnp
from jax.experimental import pallas as pl
from jax.experimental.pallas import tpu as pltpu


def _cdiv(a, b):
    return -(-a // b)


def _round_up(a, b):
    return _cdiv(a, b) * b


def _patch_select_kernel(q_ref, k_ref, idx_ref, rel_ref, acc_ref, *,
                         hq, wq, out_h, out_w, stride, inv_d):
    """One grid step = one block of `bt` batch items.

    q_ref:   (Hq, Wq, C, bt)  query (channel = sublane dim, batch = lane dim)
    k_ref:   (Hk, Wk, C, bt)  key
    idx_ref: (1, 1, bt) int32   first-argmin patch index per batch item
    rel_ref: (1, 1, bt) float32 min mean-abs-diff per batch item
    acc_ref: (out_h, out_w, C, bt) float32 VMEM scratch accumulator
    """
    acc_ref[...] = jnp.zeros_like(acc_ref)

    def _win(dy, dx):
        # dy/dx land on the two MAJOR dims only: each read is a base-offset
        # load of whole (C, bt) tiles from the VMEM-resident key block.
        if stride == 1:
            return k_ref[pl.ds(dy, out_h), pl.ds(dx, out_w), :, :]
        # TODO(synk): stride > 1 uses strided major-dim reads; verify lowering
        # against the reference on all generations before relying on it.
        return k_ref[pl.ds(dy, out_h, stride=stride),
                     pl.ds(dx, out_w, stride=stride), :, :]

    def dy_body(dy, carry):
        # fori_loop over dy bounds live ranges; the static dx loop gives a
        # modest (Wq-wide) unroll the LLO scheduler can still see through.
        for dx in range(wq):
            win = _win(dy, dx)                               # (oh, ow, C, bt)
            qv = q_ref[pl.ds(dy, 1), pl.ds(dx, 1), :, :]     # (1, 1, C, bt)
            acc_ref[...] += jnp.abs(win - qv)
        return carry

    jax.lax.fori_loop(0, hq, dy_body, 0)

    # Sum over C (the sublane axis) once, after all Hq*Wq shifts.
    y = jnp.sum(acc_ref[...], axis=2) * inv_d                # (oh, ow, bt)

    # Batched min / first-argmin over all patches, vectorized across lanes.
    rel = jnp.min(jnp.min(y, axis=0, keepdims=True), axis=1, keepdims=True)
    row = jax.lax.broadcasted_iota(jnp.int32, (out_h, out_w, 1), 0)
    col = jax.lax.broadcasted_iota(jnp.int32, (out_h, out_w, 1), 1)
    lin = row * out_w + col                                  # linear patch id
    big = jnp.int32(2 ** 30)
    hits = jnp.where(y == rel, lin, big)                     # (oh, ow, bt)
    idx = jnp.min(jnp.min(hits, axis=0, keepdims=True), axis=1, keepdims=True)

    idx_ref[...] = idx
    rel_ref[...] = rel


def patch_select(query, key, stride=1):
    """Pallas equivalent of PatchSelect.forward(query, key)."""
    query = jnp.asarray(query, jnp.float32)
    key = jnp.asarray(key, jnp.float32)
    B, C, Hq, Wq = query.shape
    Bk, Ck, Hk, Wk = key.shape
    assert B == Bk and C == Ck

    P = Wk - Wq + 1
    out_h = (Hk - Hq) // stride + 1
    out_w = (Wk - Wq) // stride + 1
    D = C * Hq * Wq

    # ---- choose bt from the real (padded) VMEM footprint -------------------
    sub_c = _round_up(C, 8)                       # channels ride the sublanes
    elems_per_lane_group = sub_c * 128 * (        # one full 128-lane batch group
        2 * Hk * Wk                               #   key block, double-buffered
        + 2 * Hq * Wq                             #   query block, double-buffered
        + out_h * out_w)                          #   accumulator scratch
    budget = 24 << 20                             # fits v7x's 64 MiB with headroom
    groups = max(1, budget // (4 * elems_per_lane_group))
    bt_cap = groups * 128                         # multiple of 128 -> full lanes
    bt = B if B <= bt_cap else bt_cap
    if B >= 256 and bt >= B:
        # Keep >= 2 grid steps so the "parallel" batch axis feeds both v7x TCs.
        bt = _round_up(_cdiv(B, 2), 128)
    gb = _cdiv(B, bt)
    b_pad = gb * bt

    # ---- lane-dense re-layout: (B, C, H, W) -> (H, W, C, B) ----------------
    qT = jnp.transpose(query, (2, 3, 1, 0))       # (Hq, Wq, C, B)
    kT = jnp.transpose(key, (2, 3, 1, 0))         # (Hk, Wk, C, B)
    if b_pad != B:
        pad = ((0, 0), (0, 0), (0, 0), (0, b_pad - B))
        qT = jnp.pad(qT, pad)
        kT = jnp.pad(kT, pad)

    lane_bt = _round_up(bt, 128)
    vmem_need = 4 * sub_c * lane_bt * (2 * (Hk * Wk + Hq * Wq) + out_h * out_w)
    vmem_limit = int(min(100 << 20, max(32 << 20, vmem_need + (8 << 20))))
    # TODO(synk): tile C / Hk with a running min/first-argmin accumulator for
    # key blocks too large for a single VMEM block (relevant on v7x's 64 MiB).

    kernel = functools.partial(
        _patch_select_kernel, hq=Hq, wq=Wq, out_h=out_h, out_w=out_w,
        stride=stride, inv_d=1.0 / D)

    idx, rel = pl.pallas_call(
        kernel,
        out_shape=(jax.ShapeDtypeStruct((gb, 1, bt), jnp.int32),
                   jax.ShapeDtypeStruct((gb, 1, bt), jnp.float32)),
        grid=(gb,),
        in_specs=[
            pl.BlockSpec((Hq, Wq, C, bt), lambda g: (0, 0, 0, g)),
            pl.BlockSpec((Hk, Wk, C, bt), lambda g: (0, 0, 0, g)),
        ],
        out_specs=(
            pl.BlockSpec((1, 1, bt), lambda g: (g, 0, 0)),
            pl.BlockSpec((1, 1, bt), lambda g: (g, 0, 0)),
        ),
        scratch_shapes=[pltpu.VMEM((out_h, out_w, C, bt), jnp.float32)],
        compiler_params=pltpu.CompilerParams(
            dimension_semantics=("parallel",),
            vmem_limit_bytes=vmem_limit),
    )(qT, kT)

    hard_indices = idx.reshape(-1)[:B]                    # (B,)   like .view(-1)
    relavance_maps = rel.reshape(-1)[:B].reshape(B, 1)    # (B, 1) keepdim=True
    return hard_indices, P, relavance_maps


def _reference(query, key, stride=1):
    B, C, Hq, Wq = query.shape
    _, _, Hk, Wk = key.shape
    out_h = (Hk - Hq) // stride + 1
    out_w = (Wk - Wq) // stride + 1
    D = C * Hq * Wq
    patches = []
    for i in range(out_h):
        for j in range(out_w):
            p = key[:, :, i * stride:i * stride + Hq, j * stride:j * stride + Wq]
            patches.append(p.reshape(B, D))
    kp = jnp.stack(patches, axis=1)                              # (B, L, D)
    y = jnp.mean(jnp.abs(kp - query.reshape(B, 1, D)), axis=2)   # (B, L)
    ref_rel = jnp.min(y, axis=1, keepdims=True)
    ref_idx = jnp.argmin(y, axis=1)
    return ref_idx, Wk - Wq + 1, ref_rel


if __name__ == "__main__":
    rng = jax.random.PRNGKey(0)
    kq, kk = jax.random.split(rng)
    # query (B, C, Hq, Wq), key (B, C, Hk, Wk)
    query = jax.random.normal(kq, (2, 4, 8, 8), dtype=jnp.float32)
    key = jax.random.normal(kk, (2, 4, 16, 16), dtype=jnp.float32)

    hard_idx, P, rel = patch_select(query, key, stride=1)
    jax.block_until_ready((hard_idx, rel))

    ref_idx, ref_P, ref_rel = _reference(query, key, stride=1)
    assert P == ref_P
    assert bool(jnp.all(hard_idx == ref_idx.astype(jnp.int32)))
    assert bool(jnp.allclose(rel, ref_rel, rtol=1e-5, atol=1e-5))

    print("KERNEL_OK")
</pallas_src>

<mosaic_0001>
module attributes {stable_mosaic.version = 11 : i64} {
  func.func @_patch_select_kernel(%arg0: i32, %arg1: memref<8x8x4x2xf32, #tpu.memory_space<vmem>>, %arg2: memref<16x16x4x2xf32, #tpu.memory_space<vmem>>, %arg3: memref<1x1x2xi32, #tpu.memory_space<vmem>>, %arg4: memref<1x1x2xf32, #tpu.memory_space<vmem>>, %arg5: memref<9x9x4x2xf32, #tpu.memory_space<vmem>>) attributes {dimension_semantics = [#tpu.dimension_semantics<parallel>], iteration_bounds = array<i64: 1>, scalar_prefetch = 0 : i64, scratch_operands = 1 : i64, tpu.core_type = #tpu.core_type<tc>, window_params = [{transform_indices = @transform_0, window_bounds = array<i64: 8, 8, 4, 2>}, {transform_indices = @transform_1, window_bounds = array<i64: 16, 16, 4, 2>}, {transform_indices = @transform_2, window_bounds = array<i64: 1, 1, 2>}, {transform_indices = @transform_3, window_bounds = array<i64: 1, 1, 2>}]} {
    %cst = arith.constant 0.000000e+00 : f32
    %0 = vector.broadcast %cst : f32 to vector<9x9x4x2xf32>
    %c0 = arith.constant 0 : index
    %c0_0 = arith.constant 0 : index
    %c0_1 = arith.constant 0 : index
    %c0_2 = arith.constant 0 : index
    %1 = vector.load %arg5[%c0, %c0_0, %c0_1, %c0_2] : memref<9x9x4x2xf32, #tpu.memory_space<vmem>>, vector<9x9x4x2xf32>
    tpu.vector_store %arg5[%c0, %c0_0, %c0_1, %c0_2], %0 {strides = array<i32>} : memref<9x9x4x2xf32, #tpu.memory_space<vmem>>, vector<9x9x4x2xf32>,
    %c0_i32 = arith.constant 0 : i32
    %c8_i32 = arith.constant 8 : i32
    %2 = arith.addi %c0_i32, %c8_i32 : i32
    %c1_i32 = arith.constant 1 : i32
    scf.for %arg6 = %c0_i32 to %2 step %c1_i32  : i32 {
      %28 = arith.index_cast %arg6 : i32 to index
      %c0_20 = arith.constant 0 : index
      %c0_21 = arith.constant 0 : index
      %c0_22 = arith.constant 0 : index
      %29 = vector.load %arg2[%28, %c0_20, %c0_21, %c0_22] : memref<16x16x4x2xf32, #tpu.memory_space<vmem>>, vector<9x9x4x2xf32>
      %30 = arith.index_cast %arg6 : i32 to index
      %c0_23 = arith.constant 0 : index
      %c0_24 = arith.constant 0 : index
      %c0_25 = arith.constant 0 : index
      %31 = vector.load %arg1[%30, %c0_23, %c0_24, %c0_25] : memref<8x8x4x2xf32, #tpu.memory_space<vmem>>, vector<1x1x4x2xf32>
      %c0_26 = arith.constant 0 : index
      %c0_27 = arith.constant 0 : index
      %c0_28 = arith.constant 0 : index
      %c0_29 = arith.constant 0 : index
      %32 = vector.load %arg5[%c0_26, %c0_27, %c0_28, %c0_29] : memref<9x9x4x2xf32, #tpu.memory_space<vmem>>, vector<9x9x4x2xf32>
      %33 = vector.broadcast %31 : vector<1x1x4x2xf32> to vector<9x9x4x2xf32>
      %34 = arith.subf %29, %33 : vector<9x9x4x2xf32>
      %35 = math.absf %34 : vector<9x9x4x2xf32>
      %36 = arith.addf %32, %35 : vector<9x9x4x2xf32>
      %c0_30 = arith.constant 0 : index
      %c0_31 = arith.constant 0 : index
      %c0_32 = arith.constant 0 : index
      %c0_33 = arith.constant 0 : index
      %37 = vector.load %arg5[%c0_30, %c0_31, %c0_32, %c0_33] : memref<9x9x4x2xf32, #tpu.memory_space<vmem>>, vector<9x9x4x2xf32>
      tpu.vector_store %arg5[%c0_30, %c0_31, %c0_32, %c0_33], %36 {strides = array<i32>} : memref<9x9x4x2xf32, #tpu.memory_space<vmem>>, vector<9x9x4x2xf32>,
      %38 = arith.index_cast %arg6 : i32 to index
      %c1 = arith.constant 1 : index
      %c0_34 = arith.constant 0 : index
      %c0_35 = arith.constant 0 : index
      %39 = vector.load %arg2[%38, %c1, %c0_34, %c0_35] : memref<16x16x4x2xf32, #tpu.memory_space<vmem>>, vector<9x9x4x2xf32>
      %40 = arith.index_cast %arg6 : i32 to index
      %c1_36 = arith.constant 1 : index
      %c0_37 = arith.constant 0 : index
      %c0_38 = arith.constant 0 : index
      %41 = vector.load %arg1[%40, %c1_36, %c0_37, %c0_38] : memref<8x8x4x2xf32, #tpu.memory_space<vmem>>, vector<1x1x4x2xf32>
      %c0_39 = arith.constant 0 : index
      %c0_40 = arith.constant 0 : index
      %c0_41 = arith.constant 0 : index
      %c0_42 = arith.constant 0 : index
      %42 = vector.load %arg5[%c0_39, %c0_40, %c0_41, %c0_42] : memref<9x9x4x2xf32, #tpu.memory_space<vmem>>, vector<9x9x4x2xf32>
      %43 = vector.broadcast %41 : vector<1x1x4x2xf32> to vector<9x9x4x2xf32>
      %44 = arith.subf %39, %43 : vector<9x9x4x2xf32>
      %45 = math.absf %44 : vector<9x9x4x2xf32>
      %46 = arith.addf %42, %45 : vector<9x9x4x2xf32>
      %c0_43 = arith.constant 0 : index
      %c0_44 = arith.constant 0 : index
      %c0_45 = arith.constant 0 : index
      %c0_46 = arith.constant 0 : index
      %47 = vector.load %arg5[%c0_43, %c0_44, %c0_45, %c0_46] : memref<9x9x4x2xf32, #tpu.memory_space<vmem>>, vector<9x9x4x2xf32>
      tpu.vector_store %arg5[%c0_43, %c0_44, %c0_45, %c0_46], %46 {strides = array<i32>} : memref<9x9x4x2xf32, #tpu.memory_space<vmem>>, vector<9x9x4x2xf32>,
      %48 = arith.index_cast %arg6 : i32 to index
      %c2 = arith.constant 2 : index
      %c0_47 = arith.constant 0 : index
      %c0_48 = arith.constant 0 : index
      %49 = vector.load %arg2[%48, %c2, %c0_47, %c0_48] : memref<16x16x4x2xf32, #tpu.memory_space<vmem>>, vector<9x9x4x2xf32>
      %50 = arith.index_cast %arg6 : i32 to index
      %c2_49 = arith.constant 2 : index
      %c0_50 = arith.constant 0 : index
      %c0_51 = arith.constant 0 : index
      %51 = vector.load %arg1[%50, %c2_49, %c0_50, %c0_51] : memref<8x8x4x2xf32, #tpu.memory_space<vmem>>, vector<1x1x4x2xf32>
      %c0_52 = arith.constant 0 : index
      %c0_53 = arith.constant 0 : index
      %c0_54 = arith.constant 0 : index
      %c0_55 = arith.constant 0 : index
      %52 = vector.load %arg5[%c0_52, %c0_53, %c0_54, %c0_55] : memref<9x9x4x2xf32, #tpu.memory_space<vmem>>, vector<9x9x4x2xf32>
      %53 = vector.broadcast %51 : vector<1x1x4x2xf32> to vector<9x9x4x2xf32>
      %54 = arith.subf %49, %53 : vector<9x9x4x2xf32>
      %55 = math.absf %54 : vector<9x9x4x2xf32>
      %56 = arith.addf %52, %55 : vector<9x9x4x2xf32>
      %c0_56 = arith.constant 0 : index
      %c0_57 = arith.constant 0 : index
      %c0_58 = arith.constant 0 : index
      %c0_59 = arith.constant 0 : index
      %57 = vector.load %arg5[%c0_56, %c0_57, %c0_58, %c0_59] : memref<9x9x4x2xf32, #tpu.memory_space<vmem>>, vector<9x9x4x2xf32>
      tpu.vector_store %arg5[%c0_56, %c0_57, %c0_58, %c0_59], %56 {strides = array<i32>} : memref<9x9x4x2xf32, #tpu.memory_space<vmem>>, vector<9x9x4x2xf32>,
      %58 = arith.index_cast %arg6 : i32 to index
      %c3 = arith.constant 3 : index
      %c0_60 = arith.constant 0 : index
      %c0_61 = arith.constant 0 : index
      %59 = vector.load %arg2[%58, %c3, %c0_60, %c0_61] : memref<16x16x4x2xf32, #tpu.memory_space<vmem>>, vector<9x9x4x2xf32>
      %60 = arith.index_cast %arg6 : i32 to index
      %c3_62 = arith.constant 3 : index
      %c0_63 = arith.constant 0 : index
      %c0_64 = arith.constant 0 : index
      %61 = vector.load %arg1[%60, %c3_62, %c0_63, %c0_64] : memref<8x8x4x2xf32, #tpu.memory_space<vmem>>, vector<1x1x4x2xf32>
      %c0_65 = arith.constant 0 : index
      %c0_66 = arith.constant 0 : index
      %c0_67 = arith.constant 0 : index
      %c0_68 = arith.constant 0 : index
      %62 = vector.load %arg5[%c0_65, %c0_66, %c0_67, %c0_68] : memref<9x9x4x2xf32, #tpu.memory_space<vmem>>, vector<9x9x4x2xf32>
      %63 = vector.broadcast %61 : vector<1x1x4x2xf32> to vector<9x9x4x2xf32>
      %64 = arith.subf %59, %63 : vector<9x9x4x2xf32>
      %65 = math.absf %64 : vector<9x9x4x2xf32>
      %66 = arith.addf %62, %65 : vector<9x9x4x2xf32>
      %c0_69 = arith.constant 0 : index
      %c0_70 = arith.constant 0 : index
      %c0_71 = arith.constant 0 : index
      %c0_72 = arith.constant 0 : index
      %67 = vector.load %arg5[%c0_69, %c0_70, %c0_71, %c0_72] : memref<9x9x4x2xf32, #tpu.memory_space<vmem>>, vector<9x9x4x2xf32>
      tpu.vector_store %arg5[%c0_69, %c0_70, %c0_71, %c0_72], %66 {strides = array<i32>} : memref<9x9x4x2xf32, #tpu.memory_space<vmem>>, vector<9x9x4x2xf32>,
      %68 = arith.index_cast %arg6 : i32 to index
      %c4 = arith.constant 4 : index
      %c0_73 = arith.constant 0 : index
      %c0_74 = arith.constant 0 : index
      %69 = vector.load %arg2[%68, %c4, %c0_73, %c0_74] : memref<16x16x4x2xf32, #tpu.memory_space<vmem>>, vector<9x9x4x2xf32>
      %70 = arith.index_cast %arg6 : i32 to index
      %c4_75 = arith.constant 4 : index
      %c0_76 = arith.constant 0 : index
      %c0_77 = arith.constant 0 : index
      %71 = vector.load %arg1[%70, %c4_75, %c0_76, %c0_77] : memref<8x8x4x2xf32, #tpu.memory_space<vmem>>, vector<1x1x4x2xf32>
      %c0_78 = arith.constant 0 : index
      %c0_79 = arith.constant 0 : index
      %c0_80 = arith.constant 0 : index
      %c0_81 = arith.constant 0 : index
      %72 = vector.load %arg5[%c0_78, %c0_79, %c0_80, %c0_81] : memref<9x9x4x2xf32, #tpu.memory_space<vmem>>, vector<9x9x4x2xf32>
      %73 = vector.broadcast %71 : vector<1x1x4x2xf32> to vector<9x9x4x2xf32>
      %74 = arith.subf %69, %73 : vector<9x9x4x2xf32>
      %75 = math.absf %74 : vector<9x9x4x2xf32>
      %76 = arith.addf %72, %75 : vector<9x9x4x2xf32>
      %c0_82 = arith.constant 0 : index
      %c0_83 = arith.constant 0 : index
      %c0_84 = arith.constant 0 : index
      %c0_85 = arith.constant 0 : index
      %77 = vector.load %arg5[%c0_82, %c0_83, %c0_84, %c0_85] : memref<9x9x4x2xf32, #tpu.memory_space<vmem>>, vector<9x9x4x2xf32>
      tpu.vector_store %arg5[%c0_82, %c0_83, %c0_84, %c0_85], %76 {strides = array<i32>} : memref<9x9x4x2xf32, #tpu.memory_space<vmem>>, vector<9x9x4x2xf32>,
      %78 = arith.index_cast %arg6 : i32 to index
      %c5 = arith.constant 5 : index
      %c0_86 = arith.constant 0 : index
      %c0_87 = arith.constant 0 : index
      %79 = vector.load %arg2[%78, %c5, %c0_86, %c0_87] : memref<16x16x4x2xf32, #tpu.memory_space<vmem>>, vector<9x9x4x2xf32>
      %80 = arith.index_cast %arg6 : i32 to index
      %c5_88 = arith.constant 5 : index
      %c0_89 = arith.constant 0 : index
      %c0_90 = arith.constant 0 : index
      %81 = vector.load %arg1[%80, %c5_88, %c0_89, %c0_90] : memref<8x8x4x2xf32, #tpu.memory_space<vmem>>, vector<1x1x4x2xf32>
      %c0_91 = arith.constant 0 : index
      %c0_92 = arith.constant 0 : index
      %c0_93 = arith.constant 0 : index
      %c0_94 = arith.constant 0 : index
      %82 = vector.load %arg5[%c0_91, %c0_92, %c0_93, %c0_94] : memref<9x9x4x2xf32, #tpu.memory_space<vmem>>, vector<9x9x4x2xf32>
      %83 = vector.broadcast %81 : vector<1x1x4x2xf32> to vector<9x9x4x2xf32>
      %84 = arith.subf %79, %83 : vector<9x9x4x2xf32>
      %85 = math.absf %84 : vector<9x9x4x2xf32>
      %86 = arith.addf %82, %85 : vector<9x9x4x2xf32>
      %c0_95 = arith.constant 0 : index
      %c0_96 = arith.constant 0 : index
      %c0_97 = arith.constant 0 : index
      %c0_98 = arith.constant 0 : index
      %87 = vector.load %arg5[%c0_95, %c0_96, %c0_97, %c0_98] : memref<9x9x4x2xf32, #tpu.memory_space<vmem>>, vector<9x9x4x2xf32>
      tpu.vector_store %arg5[%c0_95, %c0_96, %c0_97, %c0_98], %86 {strides = array<i32>} : memref<9x9x4x2xf32, #tpu.memory_space<vmem>>, vector<9x9x4x2xf32>,
      %88 = arith.index_cast %arg6 : i32 to index
      %c6 = arith.constant 6 : index
      %c0_99 = arith.constant 0 : index
      %c0_100 = arith.constant 0 : index
      %89 = vector.load %arg2[%88, %c6, %c0_99, %c0_100] : memref<16x16x4x2xf32, #tpu.memory_space<vmem>>, vector<9x9x4x2xf32>
      %90 = arith.index_cast %arg6 : i32 to index
      %c6_101 = arith.constant 6 : index
      %c0_102 = arith.constant 0 : index
      %c0_103 = arith.constant 0 : index
      %91 = vector.load %arg1[%90, %c6_101, %c0_102, %c0_103] : memref<8x8x4x2xf32, #tpu.memory_space<vmem>>, vector<1x1x4x2xf32>
      %c0_104 = arith.constant 0 : index
      %c0_105 = arith.constant 0 : index
      %c0_106 = arith.constant 0 : index
      %c0_107 = arith.constant 0 : index
      %92 = vector.load %arg5[%c0_104, %c0_105, %c0_106, %c0_107] : memref<9x9x4x2xf32, #tpu.memory_space<vmem>>, vector<9x9x4x2xf32>
      %93 = vector.broadcast %91 : vector<1x1x4x2xf32> to vector<9x9x4x2xf32>
      %94 = arith.subf %89, %93 : vector<9x9x4x2xf32>
      %95 = math.absf %94 : vector<9x9x4x2xf32>
      %96 = arith.addf %92, %95 : vector<9x9x4x2xf32>
      %c0_108 = arith.constant 0 : index
      %c0_109 = arith.constant 0 : index
      %c0_110 = arith.constant 0 : index
      %c0_111 = arith.constant 0 : index
      %97 = vector.load %arg5[%c0_108, %c0_109, %c0_110, %c0_111] : memref<9x9x4x2xf32, #tpu.memory_space<vmem>>, vector<9x9x4x2xf32>
      tpu.vector_store %arg5[%c0_108, %c0_109, %c0_110, %c0_111], %96 {strides = array<i32>} : memref<9x9x4x2xf32, #tpu.memory_space<vmem>>, vector<9x9x4x2xf32>,
      %98 = arith.index_cast %arg6 : i32 to index
      %c7 = arith.constant 7 : index
      %c0_112 = arith.constant 0 : index
      %c0_113 = arith.constant 0 : index
      %99 = vector.load %arg2[%98, %c7, %c0_112, %c0_113] : memref<16x16x4x2xf32, #tpu.memory_space<vmem>>, vector<9x9x4x2xf32>
      %100 = arith.index_cast %arg6 : i32 to index
      %c7_114 = arith.constant 7 : index
      %c0_115 = arith.constant 0 : index
      %c0_116 = arith.constant 0 : index
      %101 = vector.load %arg1[%100, %c7_114, %c0_115, %c0_116] : memref<8x8x4x2xf32, #tpu.memory_space<vmem>>, vector<1x1x4x2xf32>
      %c0_117 = arith.constant 0 : index
      %c0_118 = arith.constant 0 : index
      %c0_119 = arith.constant 0 : index
      %c0_120 = arith.constant 0 : index
      %102 = vector.load %arg5[%c0_117, %c0_118, %c0_119, %c0_120] : memref<9x9x4x2xf32, #tpu.memory_space<vmem>>, vector<9x9x4x2xf32>
      %103 = vector.broadcast %101 : vector<1x1x4x2xf32> to vector<9x9x4x2xf32>
      %104 = arith.subf %99, %103 : vector<9x9x4x2xf32>
      %105 = math.absf %104 : vector<9x9x4x2xf32>
      %106 = arith.addf %102, %105 : vector<9x9x4x2xf32>
      %c0_121 = arith.constant 0 : index
      %c0_122 = arith.constant 0 : index
      %c0_123 = arith.constant 0 : index
      %c0_124 = arith.constant 0 : index
      %107 = vector.load %arg5[%c0_121, %c0_122, %c0_123, %c0_124] : memref<9x9x4x2xf32, #tpu.memory_space<vmem>>, vector<9x9x4x2xf32>
      tpu.vector_store %arg5[%c0_121, %c0_122, %c0_123, %c0_124], %106 {strides = array<i32>} : memref<9x9x4x2xf32, #tpu.memory_space<vmem>>, vector<9x9x4x2xf32>,
    }
    %c8_i32_3 = arith.constant 8 : i32
    %c0_4 = arith.constant 0 : index
    %c0_5 = arith.constant 0 : index
    %c0_6 = arith.constant 0 : index
    %c0_7 = arith.constant 0 : index
    %3 = vector.load %arg5[%c0_4, %c0_5, %c0_6, %c0_7] : memref<9x9x4x2xf32, #tpu.memory_space<vmem>>, vector<9x9x4x2xf32>
    %cst_8 = arith.constant dense<0.000000e+00> : vector<9x9x2xf32>
    %4 = vector.multi_reduction <add>, %3, %cst_8 [2] : vector<9x9x4x2xf32> to vector<9x9x2xf32>
    %cst_9 = arith.constant 3.906250e-03 : f32
    %5 = vector.broadcast %cst_9 : f32 to vector<9x9x2xf32>
    %6 = arith.mulf %4, %5 : vector<9x9x2xf32>
    %cst_10 = arith.constant dense<0x7F800000> : vector<9x2xf32>
    %7 = vector.multi_reduction <minimumf>, %6, %cst_10 [0] : vector<9x9x2xf32> to vector<9x2xf32>
    %8 = vector.shape_cast %7 : vector<9x2xf32> to vector<1x9x2xf32>
    %cst_11 = arith.constant dense<0x7F800000> : vector<1x2xf32>
    %9 = vector.multi_reduction <minimumf>, %8, %cst_11 [1] : vector<1x9x2xf32> to vector<1x2xf32>
    %10 = vector.shape_cast %9 : vector<1x2xf32> to vector<1x1x2xf32>
    %11 = tpu.iota {dimensions = array<i32: 0>} : vector<9x9x1xi32>
    %12 = tpu.iota {dimensions = array<i32: 1>} : vector<9x9x1xi32>
    %c9_i32 = arith.constant 9 : i32
    %13 = vector.broadcast %c9_i32 : i32 to vector<9x9x1xi32>
    %14 = arith.muli %11, %13 : vector<9x9x1xi32>
    %15 = arith.addi %14, %12 : vector<9x9x1xi32>
    %16 = vector.broadcast %10 : vector<1x1x2xf32> to vector<9x9x2xf32>
    %17 = arith.cmpf oeq, %6, %16 : vector<9x9x2xf32>
    %c1073741824_i32 = arith.constant 1073741824 : i32
    %18 = vector.shape_cast %15 : vector<9x9x1xi32> to vector<9x9x1xi32>
    %19 = vector.broadcast %18 : vector<9x9x1xi32> to vector<9x9x2xi32>
    %20 = vector.broadcast %c1073741824_i32 : i32 to vector<9x9x2xi32>
    %21 = arith.select %17, %19, %20 : vector<9x9x2xi1>, vector<9x9x2xi32>
    %cst_12 = arith.constant dense<2147483647> : vector<9x2xi32>
    %22 = vector.multi_reduction <minsi>, %21, %cst_12 [0] : vector<9x9x2xi32> to vector<9x2xi32>
    %23 = vector.shape_cast %22 : vector<9x2xi32> to vector<1x9x2xi32>
    %cst_13 = arith.constant dense<2147483647> : vector<1x2xi32>
    %24 = vector.multi_reduction <minsi>, %23, %cst_13 [1] : vector<1x9x2xi32> to vector<1x2xi32>
    %25 = vector.shape_cast %24 : vector<1x2xi32> to vector<1x1x2xi32>
    %c0_14 = arith.constant 0 : index
    %c0_15 = arith.constant 0 : index
    %c0_16 = arith.constant 0 : index
    %26 = vector.load %arg3[%c0_14, %c0_15, %c0_16] : memref<1x1x2xi32, #tpu.memory_space<vmem>>, vector<1x1x2xi32>
    tpu.vector_store %arg3[%c0_14, %c0_15, %c0_16], %25 {strides = array<i32>} : memref<1x1x2xi32, #tpu.memory_space<vmem>>, vector<1x1x2xi32>,
    %c0_17 = arith.constant 0 : index
    %c0_18 = arith.constant 0 : index
    %c0_19 = arith.constant 0 : index
    %27 = vector.load %arg4[%c0_17, %c0_18, %c0_19] : memref<1x1x2xf32, #tpu.memory_space<vmem>>, vector<1x1x2xf32>
    tpu.vector_store %arg4[%c0_17, %c0_18, %c0_19], %10 {strides = array<i32>} : memref<1x1x2xf32, #tpu.memory_space<vmem>>, vector<1x1x2xf32>,
    return
  }
  func.func @transform_0(%arg0: i32) -> (i32, i32, i32, i32) {
    %c0_i32 = arith.constant 0 : i32
    %c0_i32_0 = arith.constant 0 : i32
    %c0_i32_1 = arith.constant 0 : i32
    %c0_i32_2 = arith.constant 0 : i32
    return %c0_i32, %c0_i32_0, %c0_i32_1, %arg0 : i32, i32, i32, i32
  }
  func.func @transform_1(%arg0: i32) -> (i32, i32, i32, i32) {
    %c0_i32 = arith.constant 0 : i32
    %c0_i32_0 = arith.constant 0 : i32
    %c0_i32_1 = arith.constant 0 : i32
    %c0_i32_2 = arith.constant 0 : i32
    return %c0_i32, %c0_i32_0, %c0_i32_1, %arg0 : i32, i32, i32, i32
  }
  func.func @transform_2(%arg0: i32) -> (i32, i32, i32) {
    %c0_i32 = arith.constant 0 : i32
    %c0_i32_0 = arith.constant 0 : i32
    %c0_i32_1 = arith.constant 0 : i32
    return %arg0, %c0_i32, %c0_i32_0 : i32, i32, i32
  }
  func.func @transform_3(%arg0: i32) -> (i32, i32, i32) {
    %c0_i32 = arith.constant 0 : i32
    %c0_i32_0 = arith.constant 0 : i32
    %c0_i32_1 = arith.constant 0 : i32
    return %arg0, %c0_i32, %c0_i32_0 : i32, i32, i32
  }
}

</mosaic_0001>

<bundles_post_ra>
// kernel: tpu_custom_call.1
= control target key start
LH: loop header
LB: loop body
LE: loop exit
PB: predicated region body
PF: predicated region fallthrough
CT: control target
= control target key end

     0   :  { %9 = vsyncpa [#allocation4], 0  ;;  %s10190_s0 = inlined_call_operand.vmem [shape: f32[8,8,4,2], index: 0, kind: input, shape index: {}]   ;;  %s10191_s1 = inlined_call_operand.vmem [shape: f32[16,16,4,2], index: 1, kind: input, shape index: {}]   ;;  %s10192_s2 = inlined_call_operand.hbm [shape: s32[1,1,2], index: 2, kind: output, shape index: {0}]   ;;  %s10193_s3 = inlined_call_operand.hbm [shape: f32[1,1,2], index: 3, kind: output, shape index: {1}]  }
   0x1   :  { %10 = vsyncpa [#allocation6], 0  ;;  %vm15_vm0 = vcmask 11264   ;;  %v6164_v0 = vmov 0.0   ;;  %s6349_s12 = smov 0  }
   0x2   :  { %16 = vst.msk [vmem:[#allocation2] sm:$0xf] %vm15_vm0, %v6164_v0  ;;  %17 = vst.msk [vmem:[#allocation2 + $0x4] sm:$0xf] %vm15_vm0, %v6164_v0 }
   0x3   :  { %18 = vst.msk [vmem:[#allocation2 + $0x8] sm:$0xf] %vm15_vm0, %v6164_v0  ;;  %19 = vst.msk [vmem:[#allocation2 + $0xc] sm:$0xf] %vm15_vm0, %v6164_v0 }
   0x4   :  { %20 = vst.msk [vmem:[#allocation2 + $0x10] sm:$0xf] %vm15_vm0, %v6164_v0  ;;  %21 = vst.msk [vmem:[#allocation2 + $0x14] sm:$0xf] %vm15_vm0, %v6164_v0 }
   0x5   :  { %22 = vst.msk [vmem:[#allocation2 + $0x18] sm:$0xf] %vm15_vm0, %v6164_v0  ;;  %23 = vst.msk [vmem:[#allocation2 + $0x1c] sm:$0xf] %vm15_vm0, %v6164_v0 }
   0x6   :  { %24 = vst.msk [vmem:[#allocation2 + $0x20] sm:$0xf] %vm15_vm0, %v6164_v0  ;;  %25 = vst.msk [vmem:[#allocation2 + $0x24] sm:$0xf] %vm15_vm0, %v6164_v0 }
   0x7   :  { %26 = vst.msk [vmem:[#allocation2 + $0x28] sm:$0xf] %vm15_vm0, %v6164_v0  ;;  %27 = vst.msk [vmem:[#allocation2 + $0x2c] sm:$0xf] %vm15_vm0, %v6164_v0 }
   0x8   :  { %28 = vst.msk [vmem:[#allocation2 + $0x30] sm:$0xf] %vm15_vm0, %v6164_v0  ;;  %29 = vst.msk [vmem:[#allocation2 + $0x34] sm:$0xf] %vm15_vm0, %v6164_v0 }
   0x9   :  { %30 = vst.msk [vmem:[#allocation2 + $0x38] sm:$0xf] %vm15_vm0, %v6164_v0  ;;  %31 = vst.msk [vmem:[#allocation2 + $0x3c] sm:$0xf] %vm15_vm0, %v6164_v0 }
   0xa   :  { %32 = vst.msk [vmem:[#allocation2 + $0x40] sm:$0xf] %vm15_vm0, %v6164_v0  ;;  %33 = vst.msk [vmem:[#allocation2 + $0x44] sm:$0xf] %vm15_vm0, %v6164_v0 }
   0xb   :  { %34 = vst.msk [vmem:[#allocation2 + $0x48] sm:$0xf] %vm15_vm0, %v6164_v0  ;;  %35 = vst.msk [vmem:[#allocation2 + $0x4c] sm:$0xf] %vm15_vm0, %v6164_v0 }
   0xc   :  { %36 = vst.msk [vmem:[#allocation2 + $0x50] sm:$0xf] %vm15_vm0, %v6164_v0  ;;  %37 = vst.msk [vmem:[#allocation2 + $0x54] sm:$0xf] %vm15_vm0, %v6164_v0 }
   0xd   :  { %38 = vst.msk [vmem:[#allocation2 + $0x58] sm:$0xf] %vm15_vm0, %v6164_v0  ;;  %39 = vst.msk [vmem:[#allocation2 + $0x5c] sm:$0xf] %vm15_vm0, %v6164_v0 }
   0xe   :  { %40 = vst.msk [vmem:[#allocation2 + $0x60] sm:$0xf] %vm15_vm0, %v6164_v0  ;;  %41 = vst.msk [vmem:[#allocation2 + $0x64] sm:$0xf] %vm15_vm0, %v6164_v0 }
   0xf   :  { %42 = vst.msk [vmem:[#allocation2 + $0x68] sm:$0xf] %vm15_vm0, %v6164_v0  ;;  %43 = vst.msk [vmem:[#allocation2 + $0x6c] sm:$0xf] %vm15_vm0, %v6164_v0 }
  0x10   :  { %44 = vst.msk [vmem:[#allocation2 + $0x70] sm:$0xf] %vm15_vm0, %v6164_v0  ;;  %45 = vst.msk [vmem:[#allocation2 + $0x74] sm:$0xf] %vm15_vm0, %v6164_v0 }
  0x11   :  { %46 = vst.msk [vmem:[#allocation2 + $0x78] sm:$0xf] %vm15_vm0, %v6164_v0  ;;  %47 = vst.msk [vmem:[#allocation2 + $0x7c] sm:$0xf] %vm15_vm0, %v6164_v0 }
  0x12   :  { %48 = vst.msk [vmem:[#allocation2 + $0x80] sm:$0xf] %vm15_vm0, %v6164_v0  ;;  %49 = vst.msk [vmem:[#allocation2 + $0x84] sm:$0xf] %vm15_vm0, %v6164_v0 }
  0x13   :  { %50 = vst.msk [vmem:[#allocation2 + $0x88] sm:$0xf] %vm15_vm0, %v6164_v0  ;;  %51 = vst.msk [vmem:[#allocation2 + $0x8c] sm:$0xf] %vm15_vm0, %v6164_v0 }
  0x14   :  { %52 = vst.msk [vmem:[#allocation2 + $0x90] sm:$0xf] %vm15_vm0, %v6164_v0  ;;  %53 = vst.msk [vmem:[#allocation2 + $0x94] sm:$0xf] %vm15_vm0, %v6164_v0 }
  0x15   :  { %54 = vst.msk [vmem:[#allocation2 + $0x98] sm:$0xf] %vm15_vm0, %v6164_v0  ;;  %55 = vst.msk [vmem:[#allocation2 + $0x9c] sm:$0xf] %vm15_vm0, %v6164_v0 }
  0x16   :  { %56 = vst.msk [vmem:[#allocation2 + $0xa0] sm:$0xf] %vm15_vm0, %v6164_v0  ;;  %57 = vst.msk [vmem:[#allocation2 + $0xa4] sm:$0xf] %vm15_vm0, %v6164_v0 }
  0x17   :  { %58 = vst.msk [vmem:[#allocation2 + $0xa8] sm:$0xf] %vm15_vm0, %v6164_v0  ;;  %59 = vst.msk [vmem:[#allocation2 + $0xac] sm:$0xf] %vm15_vm0, %v6164_v0 }
  0x18   :  { %60 = vst.msk [vmem:[#allocation2 + $0xb0] sm:$0xf] %vm15_vm0, %v6164_v0  ;;  %61 = vst.msk [vmem:[#allocation2 + $0xb4] sm:$0xf] %vm15_vm0, %v6164_v0 }
  0x19   :  { %62 = vst.msk [vmem:[#allocation2 + $0xb8] sm:$0xf] %vm15_vm0, %v6164_v0  ;;  %63 = vst.msk [vmem:[#allocation2 + $0xbc] sm:$0xf] %vm15_vm0, %v6164_v0 }
  0x1a   :  { %64 = vst.msk [vmem:[#allocation2 + $0xc0] sm:$0xf] %vm15_vm0, %v6164_v0  ;;  %65 = vst.msk [vmem:[#allocation2 + $0xc4] sm:$0xf] %vm15_vm0, %v6164_v0 }
  0x1b   :  { %66 = vst.msk [vmem:[#allocation2 + $0xc8] sm:$0xf] %vm15_vm0, %v6164_v0  ;;  %67 = vst.msk [vmem:[#allocation2 + $0xcc] sm:$0xf] %vm15_vm0, %v6164_v0 }
  0x1c   :  { %68 = vst.msk [vmem:[#allocation2 + $0xd0] sm:$0xf] %vm15_vm0, %v6164_v0  ;;  %69 = vst.msk [vmem:[#allocation2 + $0xd4] sm:$0xf] %vm15_vm0, %v6164_v0 }
  0x1d   :  { %70 = vst.msk [vmem:[#allocation2 + $0xd8] sm:$0xf] %vm15_vm0, %v6164_v0  ;;  %71 = vst.msk [vmem:[#allocation2 + $0xdc] sm:$0xf] %vm15_vm0, %v6164_v0 }
  0x1e   :  { %72 = vst.msk [vmem:[#allocation2 + $0xe0] sm:$0xf] %vm15_vm0, %v6164_v0  ;;  %73 = vst.msk [vmem:[#allocation2 + $0xe4] sm:$0xf] %vm15_vm0, %v6164_v0 }
  0x1f   :  { %74 = vst.msk [vmem:[#allocation2 + $0xe8] sm:$0xf] %vm15_vm0, %v6164_v0  ;;  %75 = vst.msk [vmem:[#allocation2 + $0xec] sm:$0xf] %vm15_vm0, %v6164_v0 }
  0x20   :  { %76 = vst.msk [vmem:[#allocation2 + $0xf0] sm:$0xf] %vm15_vm0, %v6164_v0  ;;  %77 = vst.msk [vmem:[#allocation2 + $0xf4] sm:$0xf] %vm15_vm0, %v6164_v0 }
  0x21   :  { %78 = vst.msk [vmem:[#allocation2 + $0xf8] sm:$0xf] %vm15_vm0, %v6164_v0  ;;  %79 = vst.msk [vmem:[#allocation2 + $0xfc] sm:$0xf] %vm15_vm0, %v6164_v0 }
  0x22   :  { %80 = vst.msk [vmem:[#allocation2 + $0x100] sm:$0xf] %vm15_vm0, %v6164_v0  ;;  %81 = vst.msk [vmem:[#allocation2 + $0x104] sm:$0xf] %vm15_vm0, %v6164_v0 }
  0x23   :  { %82 = vst.msk [vmem:[#allocation2 + $0x108] sm:$0xf] %vm15_vm0, %v6164_v0  ;;  %83 = vst.msk [vmem:[#allocation2 + $0x10c] sm:$0xf] %vm15_vm0, %v6164_v0 }
  0x24   :  { %84 = vst.msk [vmem:[#allocation2 + $0x110] sm:$0xf] %vm15_vm0, %v6164_v0  ;;  %85 = vst.msk [vmem:[#allocation2 + $0x114] sm:$0xf] %vm15_vm0, %v6164_v0 }
  0x25   :  { %86 = vst.msk [vmem:[#allocation2 + $0x118] sm:$0xf] %vm15_vm0, %v6164_v0  ;;  %87 = vst.msk [vmem:[#allocation2 + $0x11c] sm:$0xf] %vm15_vm0, %v6164_v0 }
  0x26   :  { %88 = vst.msk [vmem:[#allocation2 + $0x120] sm:$0xf] %vm15_vm0, %v6164_v0  ;;  %89 = vst.msk [vmem:[#allocation2 + $0x124] sm:$0xf] %vm15_vm0, %v6164_v0 }
  0x27   :  { %90 = vst.msk [vmem:[#allocation2 + $0x128] sm:$0xf] %vm15_vm0, %v6164_v0  ;;  %91 = vst.msk [vmem:[#allocation2 + $0x12c] sm:$0xf] %vm15_vm0, %v6164_v0 }
  0x28   :  { %92 = vst.msk [vmem:[#allocation2 + $0x130] sm:$0xf] %vm15_vm0, %v6164_v0  ;;  %93 = vst.msk [vmem:[#allocation2 + $0x134] sm:$0xf] %vm15_vm0, %v6164_v0 }
  0x29   :  { %94 = vst.msk [vmem:[#allocation2 + $0x138] sm:$0xf] %vm15_vm0, %v6164_v0  ;;  %95 = vst.msk [vmem:[#allocation2 + $0x13c] sm:$0xf] %vm15_vm0, %v6164_v0 }
  0x2a   :  { %96 = vst.msk [vmem:[#allocation2 + $0x140] sm:$0xf] %vm15_vm0, %v6164_v0 }
  0x2b LB: > { %s5507_s13 = sshll.u32 %s6162_s12, 6  ;;  %s5508_s14 = sshll.u32 %s6162_s12, 5  ;;  %v189_v3 = vld [vmem:[#allocation2] sm:$0xf]  ;;  %v190_v5 = vld [vmem:[#allocation2 + $0x4] sm:$0xf]  ;;  %s6162_s12 = sphi %s6349_s12, %s102_s12  }
  0x2c   : > { %s6359_s17 = scalar_lea.vmem %s10191_s1, %s5507_s13  ;;  %s6364_s20 = scalar_lea.vmem %s10190_s0, %s5508_s14  ;;  %v191_v9 = vld [vmem:[#allocation2 + $0x8] sm:$0xf]  ;;  %v192_v11 = vld [vmem:[#allocation2 + $0xc] sm:$0xf]  ;;  %v193_v13 = vld [vmem:[#allocation2 + $0x10] sm:$0xf] }
  0x2d   : > { %v105_v1 = vld [vmem:[%s6359_s17] sm:$0xf]  ;;  %v106_v4 = vld [vmem:[%s6359_s17 + $0x4] sm:$0xf]  ;;  %v107_v8 = vld [vmem:[%s6359_s17 + $0x8] sm:$0xf] }
  0x2e   : > { %v6368_v2 = vld [vmem:[%s6364_s20] sm:$0xf]  ;;  %v108_v10 = vld [vmem:[%s6359_s17 + $0xc] sm:$0xf]  ;;  %v109_v12 = vld [vmem:[%s6359_s17 + $0x10] sm:$0xf] }
  0x2f   : > { %v270_v6 = vsub.f32 %v105_v1, %v6368_v2  ;;  %v271_v7 = vsub.f32 %v106_v4, %v6368_v2  ;;  %v272_v14 = vsub.f32 %v107_v8, %v6368_v2  ;;  %v273_v15 = vsub.f32 %v108_v10, %v6368_v2  ;;  %v110_v17 = vld [vmem:[%s6359_s17 + $0x14] sm:$0xf]  ;;  %v111_v19 = vld [vmem:[%s6359_s17 + $0x18] sm:$0xf]  ;;  %v112_v21 = vld [vmem:[%s6359_s17 + $0x1c] sm:$0xf] }
  0x30   : > { %v274_v16 = vsub.f32 %v109_v12, %v6368_v2  ;;  %v194_v18 = vld [vmem:[#allocation2 + $0x14] sm:$0xf]  ;;  %v195_v20 = vld [vmem:[#allocation2 + $0x18] sm:$0xf]  ;;  %v275_v24 = vsub.f32 %v110_v17, %v6368_v2  ;;  %v276_v25 = vsub.f32 %v111_v19, %v6368_v2  ;;  %v196_v26 = vld [vmem:[#allocation2 + $0x1c] sm:$0xf]  ;;  %v277_v31 = vsub.f32 %v112_v21, %v6368_v2 }
  0x31   : > { %v351_v22 = vand.u32 2147483647, %v270_v6  ;;  %v352_v23 = vand.u32 2147483647, %v271_v7  ;;  %v113_v27 = vld [vmem:[%s6359_s17 + $0x20] sm:$0xf] }
  0x32   : > { %v353_v28 = vand.u32 2147483647, %v272_v14  ;;  %v354_v29 = vand.u32 2147483647, %v273_v15  ;;  %v355_v30 = vand.u32 2147483647, %v274_v16  ;;  %v278_v47 = vsub.f32 %v113_v27, %v6368_v2 }
  0x33   : > { %v432_v32 = vadd.f32 %v351_v22, %v189_v3  ;;  %v433_v33 = vadd.f32 %v352_v23, %v190_v5  ;;  %v356_v34 = vand.u32 2147483647, %v275_v24  ;;  %v357_v35 = vand.u32 2147483647, %v276_v25  ;;  %v114_v36 = vld [vmem:[%s6359_s17 + $0x40] sm:$0xf] }
  0x34   : > { %v434_v37 = vadd.f32 %v353_v28, %v191_v9  ;;  %v435_v38 = vadd.f32 %v354_v29, %v192_v11  ;;  %v436_v39 = vadd.f32 %v355_v30, %v193_v13  ;;  %v358_v40 = vand.u32 2147483647, %v277_v31  ;;  %v197_v41 = vld [vmem:[#allocation2 + $0x20] sm:$0xf]  ;;  %v198_v42 = vld [vmem:[#allocation2 + $0x24] sm:$0xf] }
  0x35   : > { %v115_v43 = vld [vmem:[%s6359_s17 + $0x44] sm:$0xf]  ;;  %v116_v44 = vld [vmem:[%s6359_s17 + $0x48] sm:$0xf]  ;;  %513 = vst.msk [vmem:[#allocation2] sm:$0xf] %vm15_vm0, %v432_v32  ;;  %v437_v45 = vadd.f32 %v356_v34, %v194_v18  ;;  %v438_v46 = vadd.f32 %v357_v35, %v195_v20  ;;  %v279_v48 = vsub.f32 %v114_v36, %v6368_v2 }
  0x36   : > { %514 = vst.msk [vmem:[#allocation2 + $0x4] sm:$0xf] %vm15_vm0, %v433_v33  ;;  %v199_v49 = vld [vmem:[#allocation2 + $0x28] sm:$0xf]  ;;  %v200_v50 = vld [vmem:[#allocation2 + $0x2c] sm:$0xf]  ;;  %v439_v53 = vadd.f32 %v358_v40, %v196_v26  ;;  %v280_v54 = vsub.f32 %v115_v43, %v6368_v2  ;;  %v281_v55 = vsub.f32 %v116_v44, %v6368_v2 }
  0x37   : > { %v117_v51 = vld [vmem:[%s6359_s17 + $0x4c] sm:$0xf]  ;;  %v201_v52 = vld [vmem:[#allocation2 + $0x30] sm:$0xf]  ;;  %515 = vst.msk [vmem:[#allocation2 + $0x8] sm:$0xf] %vm15_vm0, %v434_v37 }
  0x38   : > { %516 = vst.msk [vmem:[#allocation2 + $0xc] sm:$0xf] %vm15_vm0, %v435_v38  ;;  %517 = vst.msk [vmem:[#allocation2 + $0x10] sm:$0xf] %vm15_vm0, %v436_v39  ;;  %v282_v56 = vsub.f32 %v117_v51, %v6368_v2  ;;  %v118_v57 = vld [vmem:[%s6359_s17 + $0x50] sm:$0xf] }
  0x39   : > { %v202_v58 = vld [vmem:[#allocation2 + $0x34] sm:$0xf]  ;;  %518 = vst.msk [vmem:[#allocation2 + $0x14] sm:$0xf] %vm15_vm0, %v437_v45  ;;  %519 = vst.msk [vmem:[#allocation2 + $0x18] sm:$0xf] %vm15_vm0, %v438_v46  ;;  %v283_v62 = vsub.f32 %v118_v57, %v6368_v2 }
  0x3a   : > { %v119_v59 = vld [vmem:[%s6359_s17 + $0x54] sm:$0xf]  ;;  %v359_v60 = vand.u32 2147483647, %v278_v47  ;;  %v360_v61 = vand.u32 2147483647, %v279_v48 }
  0x3b   : > { %v203_v63 = vld [vmem:[#allocation2 + $0x38] sm:$0xf]  ;;  %v284_v0 = vsub.f32 %v119_v59, %v6368_v2  ;;  %520 = vst.msk [vmem:[#allocation2 + $0x1c] sm:$0xf] %vm15_vm0, %v439_v53  ;;  %v361_v1 = vand.u32 2147483647, %v280_v54 }
  0x3c   : > { %v362_v3 = vand.u32 2147483647, %v281_v55  ;;  %v363_v4 = vand.u32 2147483647, %v282_v56  ;;  %v440_v5 = vadd.f32 %v359_v60, %v197_v41  ;;  %v441_v6 = vadd.f32 %v360_v61, %v198_v42  ;;  %v120_v9 = vld [vmem:[%s6359_s17 + $0x58] sm:$0xf] }
  0x3d   : > { %v364_v7 = vand.u32 2147483647, %v283_v62  ;;  %v365_v8 = vand.u32 2147483647, %v284_v0  ;;  %v442_v10 = vadd.f32 %v361_v1, %v199_v49  ;;  %v204_v13 = vld [vmem:[#allocation2 + $0x3c] sm:$0xf]  ;;  %v285_v14 = vsub.f32 %v120_v9, %v6368_v2 }
  0x3e   : > { %v443_v11 = vadd.f32 %v362_v3, %v200_v50  ;;  %v444_v12 = vadd.f32 %v363_v4, %v201_v52  ;;  %v121_v15 = vld [vmem:[%s6359_s17 + $0x5c] sm:$0xf]  ;;  %v205_v16 = vld [vmem:[#allocation2 + $0x40] sm:$0xf]  ;;  %521 = vst.msk [vmem:[#allocation2 + $0x20] sm:$0xf] %vm15_vm0, %v440_v5 }
  0x3f   : > { %522 = vst.msk [vmem:[#allocation2 + $0x24] sm:$0xf] %vm15_vm0, %v441_v6  ;;  %v445_v17 = vadd.f32 %v364_v7, %v202_v58  ;;  %v446_v18 = vadd.f32 %v365_v8, %v203_v63  ;;  %v286_v19 = vsub.f32 %v121_v15, %v6368_v2  ;;  %v122_v20 = vld [vmem:[%s6359_s17 + $0x60] sm:$0xf]  ;;  %v206_v21 = vld [vmem:[#allocation2 + $0x44] sm:$0xf] }
  0x40   : > { %v123_v22 = vld [vmem:[%s6359_s17 + $0x80] sm:$0xf]  ;;  %523 = vst.msk [vmem:[#allocation2 + $0x28] sm:$0xf] %vm15_vm0, %v442_v10  ;;  %524 = vst.msk [vmem:[#allocation2 + $0x2c] sm:$0xf] %vm15_vm0, %v443_v11  ;;  %v287_v24 = vsub.f32 %v122_v20, %v6368_v2 }
  0x41   : > { %525 = vst.msk [vmem:[#allocation2 + $0x30] sm:$0xf] %vm15_vm0, %v444_v12  ;;  %v366_v23 = vand.u32 2147483647, %v285_v14  ;;  %v207_v25 = vld [vmem:[#allocation2 + $0x48] sm:$0xf]  ;;  %v288_v26 = vsub.f32 %v123_v22, %v6368_v2 }
  0x42   : > { %v124_v27 = vld [vmem:[%s6359_s17 + $0x84] sm:$0xf]  ;;  %526 = vst.msk [vmem:[#allocation2 + $0x34] sm:$0xf] %vm15_vm0, %v445_v17  ;;  %527 = vst.msk [vmem:[#allocation2 + $0x38] sm:$0xf] %vm15_vm0, %v446_v18 }
  0x43   : > { %v367_v28 = vand.u32 2147483647, %v286_v19  ;;  %v208_v29 = vld [vmem:[#allocation2 + $0x4c] sm:$0xf]  ;;  %v289_v30 = vsub.f32 %v124_v27, %v6368_v2  ;;  %v125_v31 = vld [vmem:[%s6359_s17 + $0x88] sm:$0xf]  ;;  %v447_v32 = vadd.f32 %v366_v23, %v204_v13 }
  0x44   : > { %v368_v33 = vand.u32 2147483647, %v287_v24  ;;  %v369_v34 = vand.u32 2147483647, %v288_v26  ;;  %v209_v35 = vld [vmem:[#allocation2 + $0x50] sm:$0xf]  ;;  %v290_v36 = vsub.f32 %v125_v31, %v6368_v2 }
  0x45   : > { %v448_v37 = vadd.f32 %v367_v28, %v205_v16  ;;  %v370_v38 = vand.u32 2147483647, %v289_v30  ;;  %v126_v39 = vld [vmem:[%s6359_s17 + $0x8c] sm:$0xf]  ;;  %v210_v40 = vld [vmem:[#allocation2 + $0x54] sm:$0xf] }
  0x46   : > { %528 = vst.msk [vmem:[#allocation2 + $0x3c] sm:$0xf] %vm15_vm0, %v447_v32  ;;  %v449_v41 = vadd.f32 %v368_v33, %v206_v21  ;;  %v450_v42 = vadd.f32 %v369_v34, %v207_v25  ;;  %v371_v43 = vand.u32 2147483647, %v290_v36  ;;  %v291_v44 = vsub.f32 %v126_v39, %v6368_v2  ;;  %v127_v45 = vld [vmem:[%s6359_s17 + $0x90] sm:$0xf] }
  0x47   : > { %v211_v46 = vld [vmem:[#allocation2 + $0x58] sm:$0xf]  ;;  %529 = vst.msk [vmem:[#allocation2 + $0x40] sm:$0xf] %vm15_vm0, %v448_v37  ;;  %v451_v47 = vadd.f32 %v370_v38, %v208_v29  ;;  %v292_v48 = vsub.f32 %v127_v45, %v6368_v2  ;;  %v128_v49 = vld [vmem:[%s6359_s17 + $0x94] sm:$0xf] }
  0x48   : > { %v212_v50 = vld [vmem:[#allocation2 + $0x5c] sm:$0xf]  ;;  %v129_v51 = vld [vmem:[%s6359_s17 + $0x98] sm:$0xf]  ;;  %530 = vst.msk [vmem:[#allocation2 + $0x44] sm:$0xf] %vm15_vm0, %v449_v41  ;;  %v452_v52 = vadd.f32 %v371_v43, %v209_v35  ;;  %v293_v54 = vsub.f32 %v128_v49, %v6368_v2 }
  0x49   : > { %531 = vst.msk [vmem:[#allocation2 + $0x48] sm:$0xf] %vm15_vm0, %v450_v42  ;;  %v372_v53 = vand.u32 2147483647, %v291_v44  ;;  %v213_v55 = vld [vmem:[#allocation2 + $0x60] sm:$0xf]  ;;  %v294_v56 = vsub.f32 %v129_v51, %v6368_v2 }
  0x4a   : > { %v130_v57 = vld [vmem:[%s6359_s17 + $0x9c] sm:$0xf]  ;;  %532 = vst.msk [vmem:[#allocation2 + $0x4c] sm:$0xf] %vm15_vm0, %v451_v47  ;;  %v373_v58 = vand.u32 2147483647, %v292_v48 }
  0x4b   : > { %v214_v59 = vld [vmem:[#allocation2 + $0x64] sm:$0xf]  ;;  %v295_v60 = vsub.f32 %v130_v57, %v6368_v2  ;;  %v131_v61 = vld [vmem:[%s6359_s17 + $0xa0] sm:$0xf]  ;;  %533 = vst.msk [vmem:[#allocation2 + $0x50] sm:$0xf] %vm15_vm0, %v452_v52  ;;  %v453_v62 = vadd.f32 %v372_v53, %v210_v40 }
  0x4c   : > { %v374_v63 = vand.u32 2147483647, %v293_v54  ;;  %v375_v0 = vand.u32 2147483647, %v294_v56  ;;  %v215_v1 = vld [vmem:[#allocation2 + $0x68] sm:$0xf]  ;;  %v296_v3 = vsub.f32 %v131_v61, %v6368_v2  ;;  %v454_v4 = vadd.f32 %v373_v58, %v211_v46 }
  0x4d   : > { %v376_v5 = vand.u32 2147483647, %v295_v60  ;;  %v132_v6 = vld [vmem:[%s6359_s17 + $0xc0] sm:$0xf]  ;;  %v216_v7 = vld [vmem:[#allocation2 + $0x6c] sm:$0xf] }
  0x4e   : > { %534 = vst.msk [vmem:[#allocation2 + $0x54] sm:$0xf] %vm15_vm0, %v453_v62  ;;  %v455_v8 = vadd.f32 %v374_v63, %v212_v50  ;;  %v456_v9 = vadd.f32 %v375_v0, %v213_v55  ;;  %v377_v10 = vand.u32 2147483647, %v296_v3  ;;  %v297_v11 = vsub.f32 %v132_v6, %v6368_v2  ;;  %v133_v12 = vld [vmem:[%s6359_s17 + $0xc4] sm:$0xf] }
  0x4f   : > { %v217_v13 = vld [vmem:[#allocation2 + $0x70] sm:$0xf]  ;;  %535 = vst.msk [vmem:[#allocation2 + $0x58] sm:$0xf] %vm15_vm0, %v454_v4  ;;  %v457_v14 = vadd.f32 %v376_v5, %v214_v59  ;;  %v298_v15 = vsub.f32 %v133_v12, %v6368_v2  ;;  %v134_v16 = vld [vmem:[%s6359_s17 + $0xc8] sm:$0xf] }
  0x50   : > { %v218_v17 = vld [vmem:[#allocation2 + $0x74] sm:$0xf]  ;;  %v135_v18 = vld [vmem:[%s6359_s17 + $0xcc] sm:$0xf]  ;;  %536 = vst.msk [vmem:[#allocation2 + $0x5c] sm:$0xf] %vm15_vm0, %v455_v8  ;;  %v458_v19 = vadd.f32 %v377_v10, %v215_v1  ;;  %v299_v21 = vsub.f32 %v134_v16, %v6368_v2 }
  0x51   : > { %537 = vst.msk [vmem:[#allocation2 + $0x60] sm:$0xf] %vm15_vm0, %v456_v9  ;;  %v378_v20 = vand.u32 2147483647, %v297_v11  ;;  %v219_v22 = vld [vmem:[#allocation2 + $0x78] sm:$0xf]  ;;  %v300_v23 = vsub.f32 %v135_v18, %v6368_v2 }
  0x52   : > { %v136_v24 = vld [vmem:[%s6359_s17 + $0xd0] sm:$0xf]  ;;  %538 = vst.msk [vmem:[#allocation2 + $0x64] sm:$0xf] %vm15_vm0, %v457_v14  ;;  %v379_v25 = vand.u32 2147483647, %v298_v15 }
  0x53   : > { %v220_v26 = vld [vmem:[#allocation2 + $0x7c] sm:$0xf]  ;;  %v301_v27 = vsub.f32 %v136_v24, %v6368_v2  ;;  %v137_v28 = vld [vmem:[%s6359_s17 + $0xd4] sm:$0xf]  ;;  %539 = vst.msk [vmem:[#allocation2 + $0x68] sm:$0xf] %vm15_vm0, %v458_v19  ;;  %v459_v29 = vadd.f32 %v378_v20, %v216_v7 }
  0x54   : > { %v380_v30 = vand.u32 2147483647, %v299_v21  ;;  %v381_v31 = vand.u32 2147483647, %v300_v23  ;;  %v221_v32 = vld [vmem:[#allocation2 + $0x80] sm:$0xf]  ;;  %v302_v33 = vsub.f32 %v137_v28, %v6368_v2  ;;  %v460_v34 = vadd.f32 %v379_v25, %v217_v13 }
  0x55   : > { %v382_v35 = vand.u32 2147483647, %v301_v27  ;;  %v138_v36 = vld [vmem:[%s6359_s17 + $0xd8] sm:$0xf]  ;;  %v222_v37 = vld [vmem:[#allocation2 + $0x84] sm:$0xf] }
  0x56   : > { %540 = vst.msk [vmem:[#allocation2 + $0x6c] sm:$0xf] %vm15_vm0, %v459_v29  ;;  %v461_v38 = vadd.f32 %v380_v30, %v218_v17  ;;  %v462_v39 = vadd.f32 %v381_v31, %v219_v22  ;;  %v383_v40 = vand.u32 2147483647, %v302_v33  ;;  %v303_v41 = vsub.f32 %v138_v36, %v6368_v2  ;;  %v139_v42 = vld [vmem:[%s6359_s17 + $0xdc] sm:$0xf] }
  0x57   : > { %v223_v43 = vld [vmem:[#allocation2 + $0x88] sm:$0xf]  ;;  %541 = vst.msk [vmem:[#allocation2 + $0x70] sm:$0xf] %vm15_vm0, %v460_v34  ;;  %v463_v44 = vadd.f32 %v382_v35, %v220_v26  ;;  %v304_v45 = vsub.f32 %v139_v42, %v6368_v2  ;;  %v140_v46 = vld [vmem:[%s6359_s17 + $0xe0] sm:$0xf] }
  0x58   : > { %v224_v47 = vld [vmem:[#allocation2 + $0x8c] sm:$0xf]  ;;  %v141_v48 = vld [vmem:[%s6359_s17 + $0x100] sm:$0xf]  ;;  %542 = vst.msk [vmem:[#allocation2 + $0x74] sm:$0xf] %vm15_vm0, %v461_v38  ;;  %v464_v49 = vadd.f32 %v383_v40, %v221_v32  ;;  %v305_v51 = vsub.f32 %v140_v46, %v6368_v2 }
  0x59   : > { %543 = vst.msk [vmem:[#allocation2 + $0x78] sm:$0xf] %vm15_vm0, %v462_v39  ;;  %v384_v50 = vand.u32 2147483647, %v303_v41  ;;  %v225_v52 = vld [vmem:[#allocation2 + $0x90] sm:$0xf]  ;;  %v306_v53 = vsub.f32 %v141_v48, %v6368_v2 }
  0x5a   : > { %v142_v54 = vld [vmem:[%s6359_s17 + $0x104] sm:$0xf]  ;;  %544 = vst.msk [vmem:[#allocation2 + $0x7c] sm:$0xf] %vm15_vm0, %v463_v44  ;;  %v385_v55 = vand.u32 2147483647, %v304_v45 }
  0x5b   : > { %v226_v56 = vld [vmem:[#allocation2 + $0x94] sm:$0xf]  ;;  %v307_v57 = vsub.f32 %v142_v54, %v6368_v2  ;;  %v143_v58 = vld [vmem:[%s6359_s17 + $0x108] sm:$0xf]  ;;  %545 = vst.msk [vmem:[#allocation2 + $0x80] sm:$0xf] %vm15_vm0, %v464_v49  ;;  %v465_v59 = vadd.f32 %v384_v50, %v222_v37 }
  0x5c   : > { %v386_v60 = vand.u32 2147483647, %v305_v51  ;;  %v387_v61 = vand.u32 2147483647, %v306_v53  ;;  %v227_v62 = vld [vmem:[#allocation2 + $0x98] sm:$0xf]  ;;  %v308_v63 = vsub.f32 %v143_v58, %v6368_v2  ;;  %v466_v0 = vadd.f32 %v385_v55, %v223_v43 }
  0x5d   : > { %v388_v1 = vand.u32 2147483647, %v307_v57  ;;  %v144_v3 = vld [vmem:[%s6359_s17 + $0x10c] sm:$0xf]  ;;  %v228_v4 = vld [vmem:[#allocation2 + $0x9c] sm:$0xf] }
  0x5e   : > { %546 = vst.msk [vmem:[#allocation2 + $0x84] sm:$0xf] %vm15_vm0, %v465_v59  ;;  %v467_v5 = vadd.f32 %v386_v60, %v224_v47  ;;  %v468_v6 = vadd.f32 %v387_v61, %v225_v52  ;;  %v389_v7 = vand.u32 2147483647, %v308_v63  ;;  %v309_v8 = vsub.f32 %v144_v3, %v6368_v2  ;;  %v145_v9 = vld [vmem:[%s6359_s17 + $0x110] sm:$0xf] }
  0x5f   : > { %v229_v10 = vld [vmem:[#allocation2 + $0xa0] sm:$0xf]  ;;  %547 = vst.msk [vmem:[#allocation2 + $0x88] sm:$0xf] %vm15_vm0, %v466_v0  ;;  %v469_v11 = vadd.f32 %v388_v1, %v226_v56  ;;  %v310_v12 = vsub.f32 %v145_v9, %v6368_v2  ;;  %v146_v13 = vld [vmem:[%s6359_s17 + $0x114] sm:$0xf] }
  0x60   : > { %v230_v14 = vld [vmem:[#allocation2 + $0xa4] sm:$0xf]  ;;  %v147_v15 = vld [vmem:[%s6359_s17 + $0x118] sm:$0xf]  ;;  %548 = vst.msk [vmem:[#allocation2 + $0x8c] sm:$0xf] %vm15_vm0, %v467_v5  ;;  %v470_v16 = vadd.f32 %v389_v7, %v227_v62  ;;  %v311_v18 = vsub.f32 %v146_v13, %v6368_v2 }
  0x61   : > { %549 = vst.msk [vmem:[#allocation2 + $0x90] sm:$0xf] %vm15_vm0, %v468_v6  ;;  %v390_v17 = vand.u32 2147483647, %v309_v8  ;;  %v231_v19 = vld [vmem:[#allocation2 + $0xa8] sm:$0xf]  ;;  %v312_v20 = vsub.f32 %v147_v15, %v6368_v2 }
  0x62   : > { %v148_v21 = vld [vmem:[%s6359_s17 + $0x11c] sm:$0xf]  ;;  %550 = vst.msk [vmem:[#allocation2 + $0x94] sm:$0xf] %vm15_vm0, %v469_v11  ;;  %v391_v22 = vand.u32 2147483647, %v310_v12 }
  0x63   : > { %v232_v23 = vld [vmem:[#allocation2 + $0xac] sm:$0xf]  ;;  %v313_v24 = vsub.f32 %v148_v21, %v6368_v2  ;;  %v149_v25 = vld [vmem:[%s6359_s17 + $0x120] sm:$0xf]  ;;  %551 = vst.msk [vmem:[#allocation2 + $0x98] sm:$0xf] %vm15_vm0, %v470_v16  ;;  %v471_v26 = vadd.f32 %v390_v17, %v228_v4 }
  0x64   : > { %v392_v27 = vand.u32 2147483647, %v311_v18  ;;  %v393_v28 = vand.u32 2147483647, %v312_v20  ;;  %v233_v29 = vld [vmem:[#allocation2 + $0xb0] sm:$0xf]  ;;  %v314_v30 = vsub.f32 %v149_v25, %v6368_v2  ;;  %v472_v31 = vadd.f32 %v391_v22, %v229_v10 }
  0x65   : > { %v394_v32 = vand.u32 2147483647, %v313_v24  ;;  %v150_v33 = vld [vmem:[%s6359_s17 + $0x140] sm:$0xf]  ;;  %v234_v34 = vld [vmem:[#allocation2 + $0xb4] sm:$0xf] }
  0x66   : > { %552 = vst.msk [vmem:[#allocation2 + $0x9c] sm:$0xf] %vm15_vm0, %v471_v26  ;;  %v473_v35 = vadd.f32 %v392_v27, %v230_v14  ;;  %v474_v36 = vadd.f32 %v393_v28, %v231_v19  ;;  %v395_v37 = vand.u32 2147483647, %v314_v30  ;;  %v315_v38 = vsub.f32 %v150_v33, %v6368_v2  ;;  %v151_v39 = vld [vmem:[%s6359_s17 + $0x144] sm:$0xf] }
  0x67   : > { %v235_v40 = vld [vmem:[#allocation2 + $0xb8] sm:$0xf]  ;;  %553 = vst.msk [vmem:[#allocation2 + $0xa0] sm:$0xf] %vm15_vm0, %v472_v31  ;;  %v475_v41 = vadd.f32 %v394_v32, %v232_v23  ;;  %v316_v42 = vsub.f32 %v151_v39, %v6368_v2  ;;  %v152_v43 = vld [vmem:[%s6359_s17 + $0x148] sm:$0xf] }
  0x68   : > { %v236_v44 = vld [vmem:[#allocation2 + $0xbc] sm:$0xf]  ;;  %v153_v45 = vld [vmem:[%s6359_s17 + $0x14c] sm:$0xf]  ;;  %554 = vst.msk [vmem:[#allocation2 + $0xa4] sm:$0xf] %vm15_vm0, %v473_v35  ;;  %v476_v46 = vadd.f32 %v395_v37, %v233_v29  ;;  %v317_v48 = vsub.f32 %v152_v43, %v6368_v2 }
  0x69   : > { %555 = vst.msk [vmem:[#allocation2 + $0xa8] sm:$0xf] %vm15_vm0, %v474_v36  ;;  %v396_v47 = vand.u32 2147483647, %v315_v38  ;;  %v237_v49 = vld [vmem:[#allocation2 + $0xc0] sm:$0xf]  ;;  %v318_v50 = vsub.f32 %v153_v45, %v6368_v2 }
  0x6a   : > { %v154_v51 = vld [vmem:[%s6359_s17 + $0x150] sm:$0xf]  ;;  %556 = vst.msk [vmem:[#allocation2 + $0xac] sm:$0xf] %vm15_vm0, %v475_v41  ;;  %v397_v52 = vand.u32 2147483647, %v316_v42 }
  0x6b   : > { %v238_v53 = vld [vmem:[#allocation2 + $0xc4] sm:$0xf]  ;;  %v319_v54 = vsub.f32 %v154_v51, %v6368_v2  ;;  %v155_v55 = vld [vmem:[%s6359_s17 + $0x154] sm:$0xf]  ;;  %557 = vst.msk [vmem:[#allocation2 + $0xb0] sm:$0xf] %vm15_vm0, %v476_v46  ;;  %v477_v56 = vadd.f32 %v396_v47, %v234_v34 }
  0x6c   : > { %v398_v57 = vand.u32 2147483647, %v317_v48  ;;  %v399_v58 = vand.u32 2147483647, %v318_v50  ;;  %v239_v59 = vld [vmem:[#allocation2 + $0xc8] sm:$0xf]  ;;  %v320_v60 = vsub.f32 %v155_v55, %v6368_v2  ;;  %v478_v61 = vadd.f32 %v397_v52, %v235_v40 }
  0x6d   : > { %v400_v62 = vand.u32 2147483647, %v319_v54  ;;  %v156_v63 = vld [vmem:[%s6359_s17 + $0x158] sm:$0xf]  ;;  %v240_v0 = vld [vmem:[#allocation2 + $0xcc] sm:$0xf] }
  0x6e   : > { %558 = vst.msk [vmem:[#allocation2 + $0xb4] sm:$0xf] %vm15_vm0, %v477_v56  ;;  %v479_v1 = vadd.f32 %v398_v57, %v236_v44  ;;  %v480_v3 = vadd.f32 %v399_v58, %v237_v49  ;;  %v401_v4 = vand.u32 2147483647, %v320_v60  ;;  %v321_v5 = vsub.f32 %v156_v63, %v6368_v2  ;;  %v157_v6 = vld [vmem:[%s6359_s17 + $0x15c] sm:$0xf] }
  0x6f   : > { %v241_v7 = vld [vmem:[#allocation2 + $0xd0] sm:$0xf]  ;;  %559 = vst.msk [vmem:[#allocation2 + $0xb8] sm:$0xf] %vm15_vm0, %v478_v61  ;;  %v481_v8 = vadd.f32 %v400_v62, %v238_v53  ;;  %v322_v9 = vsub.f32 %v157_v6, %v6368_v2  ;;  %v158_v10 = vld [vmem:[%s6359_s17 + $0x160] sm:$0xf] }
  0x70   : > { %v242_v11 = vld [vmem:[#allocation2 + $0xd4] sm:$0xf]  ;;  %v159_v12 = vld [vmem:[%s6359_s17 + $0x180] sm:$0xf]  ;;  %560 = vst.msk [vmem:[#allocation2 + $0xbc] sm:$0xf] %vm15_vm0, %v479_v1  ;;  %v482_v13 = vadd.f32 %v401_v4, %v239_v59  ;;  %v323_v15 = vsub.f32 %v158_v10, %v6368_v2 }
  0x71   : > { %561 = vst.msk [vmem:[#allocation2 + $0xc0] sm:$0xf] %vm15_vm0, %v480_v3  ;;  %v402_v14 = vand.u32 2147483647, %v321_v5  ;;  %v243_v16 = vld [vmem:[#allocation2 + $0xd8] sm:$0xf]  ;;  %v324_v17 = vsub.f32 %v159_v12, %v6368_v2 }
  0x72   : > { %v160_v18 = vld [vmem:[%s6359_s17 + $0x184] sm:$0xf]  ;;  %562 = vst.msk [vmem:[#allocation2 + $0xc4] sm:$0xf] %vm15_vm0, %v481_v8  ;;  %v403_v19 = vand.u32 2147483647, %v322_v9 }
  0x73   : > { %v244_v20 = vld [vmem:[#allocation2 + $0xdc] sm:$0xf]  ;;  %v325_v21 = vsub.f32 %v160_v18, %v6368_v2  ;;  %v161_v22 = vld [vmem:[%s6359_s17 + $0x188] sm:$0xf]  ;;  %563 = vst.msk [vmem:[#allocation2 + $0xc8] sm:$0xf] %vm15_vm0, %v482_v13  ;;  %v483_v23 = vadd.f32 %v402_v14, %v240_v0 }
  0x74   : > { %v404_v24 = vand.u32 2147483647, %v323_v15  ;;  %v405_v25 = vand.u32 2147483647, %v324_v17  ;;  %v245_v26 = vld [vmem:[#allocation2 + $0xe0] sm:$0xf]  ;;  %v326_v27 = vsub.f32 %v161_v22, %v6368_v2  ;;  %v484_v28 = vadd.f32 %v403_v19, %v241_v7 }
  0x75   : > { %v406_v29 = vand.u32 2147483647, %v325_v21  ;;  %v162_v30 = vld [vmem:[%s6359_s17 + $0x18c] sm:$0xf]  ;;  %v246_v31 = vld [vmem:[#allocation2 + $0xe4] sm:$0xf] }
  0x76   : > { %564 = vst.msk [vmem:[#allocation2 + $0xcc] sm:$0xf] %vm15_vm0, %v483_v23  ;;  %v485_v32 = vadd.f32 %v404_v24, %v242_v11  ;;  %v486_v33 = vadd.f32 %v405_v25, %v243_v16  ;;  %v407_v34 = vand.u32 2147483647, %v326_v27  ;;  %v327_v35 = vsub.f32 %v162_v30, %v6368_v2  ;;  %v163_v36 = vld [vmem:[%s6359_s17 + $0x190] sm:$0xf] }
  0x77   : > { %v247_v37 = vld [vmem:[#allocation2 + $0xe8] sm:$0xf]  ;;  %565 = vst.msk [vmem:[#allocation2 + $0xd0] sm:$0xf] %vm15_vm0, %v484_v28  ;;  %v487_v38 = vadd.f32 %v406_v29, %v244_v20  ;;  %v328_v39 = vsub.f32 %v163_v36, %v6368_v2  ;;  %v164_v40 = vld [vmem:[%s6359_s17 + $0x194] sm:$0xf] }
  0x78   : > { %v248_v41 = vld [vmem:[#allocation2 + $0xec] sm:$0xf]  ;;  %v165_v42 = vld [vmem:[%s6359_s17 + $0x198] sm:$0xf]  ;;  %566 = vst.msk [vmem:[#allocation2 + $0xd4] sm:$0xf] %vm15_vm0, %v485_v32  ;;  %v488_v43 = vadd.f32 %v407_v34, %v245_v26  ;;  %v329_v45 = vsub.f32 %v164_v40, %v6368_v2 }
  0x79   : > { %567 = vst.msk [vmem:[#allocation2 + $0xd8] sm:$0xf] %vm15_vm0, %v486_v33  ;;  %v408_v44 = vand.u32 2147483647, %v327_v35  ;;  %v249_v46 = vld [vmem:[#allocation2 + $0xf0] sm:$0xf]  ;;  %v330_v47 = vsub.f32 %v165_v42, %v6368_v2 }
  0x7a   : > { %v166_v48 = vld [vmem:[%s6359_s17 + $0x19c] sm:$0xf]  ;;  %568 = vst.msk [vmem:[#allocation2 + $0xdc] sm:$0xf] %vm15_vm0, %v487_v38  ;;  %v409_v49 = vand.u32 2147483647, %v328_v39 }
  0x7b   : > { %v250_v50 = vld [vmem:[#allocation2 + $0xf4] sm:$0xf]  ;;  %v331_v51 = vsub.f32 %v166_v48, %v6368_v2  ;;  %v167_v52 = vld [vmem:[%s6359_s17 + $0x1a0] sm:$0xf]  ;;  %569 = vst.msk [vmem:[#allocation2 + $0xe0] sm:$0xf] %vm15_vm0, %v488_v43  ;;  %v489_v53 = vadd.f32 %v408_v44, %v246_v31 }
  0x7c   : > { %v410_v54 = vand.u32 2147483647, %v329_v45  ;;  %v411_v55 = vand.u32 2147483647, %v330_v47  ;;  %v251_v56 = vld [vmem:[#allocation2 + $0xf8] sm:$0xf]  ;;  %v332_v57 = vsub.f32 %v167_v52, %v6368_v2  ;;  %v490_v58 = vadd.f32 %v409_v49, %v247_v37 }
  0x7d   : > { %v412_v59 = vand.u32 2147483647, %v331_v51  ;;  %v168_v60 = vld [vmem:[%s6359_s17 + $0x1c0] sm:$0xf]  ;;  %v252_v61 = vld [vmem:[#allocation2 + $0xfc] sm:$0xf] }
  0x7e   : > { %570 = vst.msk [vmem:[#allocation2 + $0xe4] sm:$0xf] %vm15_vm0, %v489_v53  ;;  %v491_v62 = vadd.f32 %v410_v54, %v248_v41  ;;  %v492_v63 = vadd.f32 %v411_v55, %v249_v46  ;;  %v413_v0 = vand.u32 2147483647, %v332_v57  ;;  %v333_v1 = vsub.f32 %v168_v60, %v6368_v2  ;;  %v169_v3 = vld [vmem:[%s6359_s17 + $0x1c4] sm:$0xf] }
  0x7f   : > { %v253_v4 = vld [vmem:[#allocation2 + $0x100] sm:$0xf]  ;;  %571 = vst.msk [vmem:[#allocation2 + $0xe8] sm:$0xf] %vm15_vm0, %v490_v58  ;;  %v493_v5 = vadd.f32 %v412_v59, %v250_v50  ;;  %v334_v6 = vsub.f32 %v169_v3, %v6368_v2  ;;  %v170_v7 = vld [vmem:[%s6359_s17 + $0x1c8] sm:$0xf] }
  0x80   : > { %v254_v8 = vld [vmem:[#allocation2 + $0x104] sm:$0xf]  ;;  %v171_v9 = vld [vmem:[%s6359_s17 + $0x1cc] sm:$0xf]  ;;  %572 = vst.msk [vmem:[#allocation2 + $0xec] sm:$0xf] %vm15_vm0, %v491_v62  ;;  %v494_v10 = vadd.f32 %v413_v0, %v251_v56  ;;  %v335_v12 = vsub.f32 %v170_v7, %v6368_v2 }
  0x81   : > { %573 = vst.msk [vmem:[#allocation2 + $0xf0] sm:$0xf] %vm15_vm0, %v492_v63  ;;  %v414_v11 = vand.u32 2147483647, %v333_v1  ;;  %v255_v13 = vld [vmem:[#allocation2 + $0x108] sm:$0xf]  ;;  %v336_v14 = vsub.f32 %v171_v9, %v6368_v2 }
  0x82   : > { %v172_v15 = vld [vmem:[%s6359_s17 + $0x1d0] sm:$0xf]  ;;  %574 = vst.msk [vmem:[#allocation2 + $0xf4] sm:$0xf] %vm15_vm0, %v493_v5  ;;  %v415_v16 = vand.u32 2147483647, %v334_v6 }
  0x83   : > { %v256_v17 = vld [vmem:[#allocation2 + $0x10c] sm:$0xf]  ;;  %v337_v18 = vsub.f32 %v172_v15, %v6368_v2  ;;  %v173_v19 = vld [vmem:[%s6359_s17 + $0x1d4] sm:$0xf]  ;;  %575 = vst.msk [vmem:[#allocation2 + $0xf8] sm:$0xf] %vm15_vm0, %v494_v10  ;;  %v495_v20 = vadd.f32 %v414_v11, %v252_v61 }
  0x84   : > { %v416_v21 = vand.u32 2147483647, %v335_v12  ;;  %v417_v22 = vand.u32 2147483647, %v336_v14  ;;  %v257_v23 = vld [vmem:[#allocation2 + $0x110] sm:$0xf]  ;;  %v338_v24 = vsub.f32 %v173_v19, %v6368_v2  ;;  %v496_v25 = vadd.f32 %v415_v16, %v253_v4 }
  0x85   : > { %v418_v26 = vand.u32 2147483647, %v337_v18  ;;  %v174_v27 = vld [vmem:[%s6359_s17 + $0x1d8] sm:$0xf]  ;;  %v258_v28 = vld [vmem:[#allocation2 + $0x114] sm:$0xf] }
  0x86   : > { %576 = vst.msk [vmem:[#allocation2 + $0xfc] sm:$0xf] %vm15_vm0, %v495_v20  ;;  %v497_v29 = vadd.f32 %v416_v21, %v254_v8  ;;  %v498_v30 = vadd.f32 %v417_v22, %v255_v13  ;;  %v419_v31 = vand.u32 2147483647, %v338_v24  ;;  %v339_v32 = vsub.f32 %v174_v27, %v6368_v2  ;;  %v175_v33 = vld [vmem:[%s6359_s17 + $0x1dc] sm:$0xf] }
  0x87   : > { %v259_v34 = vld [vmem:[#allocation2 + $0x118] sm:$0xf]  ;;  %577 = vst.msk [vmem:[#allocation2 + $0x100] sm:$0xf] %vm15_vm0, %v496_v25  ;;  %v499_v35 = vadd.f32 %v418_v26, %v256_v17  ;;  %v340_v36 = vsub.f32 %v175_v33, %v6368_v2  ;;  %v176_v37 = vld [vmem:[%s6359_s17 + $0x1e0] sm:$0xf] }
  0x88   : > { %v260_v38 = vld [vmem:[#allocation2 + $0x11c] sm:$0xf]  ;;  %v177_v39 = vld [vmem:[%s6359_s17 + $0x200] sm:$0xf]  ;;  %578 = vst.msk [vmem:[#allocation2 + $0x104] sm:$0xf] %vm15_vm0, %v497_v29  ;;  %v500_v40 = vadd.f32 %v419_v31, %v257_v23  ;;  %v341_v42 = vsub.f32 %v176_v37, %v6368_v2 }
  0x89   : > { %579 = vst.msk [vmem:[#allocation2 + $0x108] sm:$0xf] %vm15_vm0, %v498_v30  ;;  %v420_v41 = vand.u32 2147483647, %v339_v32  ;;  %v261_v43 = vld [vmem:[#allocation2 + $0x120] sm:$0xf]  ;;  %v342_v44 = vsub.f32 %v177_v39, %v6368_v2 }
  0x8a   : > { %v178_v45 = vld [vmem:[%s6359_s17 + $0x204] sm:$0xf]  ;;  %580 = vst.msk [vmem:[#allocation2 + $0x10c] sm:$0xf] %vm15_vm0, %v499_v35  ;;  %v421_v46 = vand.u32 2147483647, %v340_v36 }
  0x8b   : > { %v262_v47 = vld [vmem:[#allocation2 + $0x124] sm:$0xf]  ;;  %v343_v48 = vsub.f32 %v178_v45, %v6368_v2  ;;  %v179_v49 = vld [vmem:[%s6359_s17 + $0x208] sm:$0xf]  ;;  %581 = vst.msk [vmem:[#allocation2 + $0x110] sm:$0xf] %vm15_vm0, %v500_v40  ;;  %v501_v50 = vadd.f32 %v420_v41, %v258_v28 }
  0x8c   : > { %v422_v51 = vand.u32 2147483647, %v341_v42  ;;  %v423_v52 = vand.u32 2147483647, %v342_v44  ;;  %v263_v53 = vld [vmem:[#allocation2 + $0x128] sm:$0xf]  ;;  %v344_v54 = vsub.f32 %v179_v49, %v6368_v2  ;;  %v502_v55 = vadd.f32 %v421_v46, %v259_v34 }
  0x8d   : > { %v424_v56 = vand.u32 2147483647, %v343_v48  ;;  %v180_v57 = vld [vmem:[%s6359_s17 + $0x20c] sm:$0xf]  ;;  %582 = vst.msk [vmem:[#allocation2 + $0x114] sm:$0xf] %vm15_vm0, %v501_v50 }
  0x8e   : > { %v264_v58 = vld [vmem:[#allocation2 + $0x12c] sm:$0xf]  ;;  %v503_v59 = vadd.f32 %v422_v51, %v260_v38  ;;  %v504_v60 = vadd.f32 %v423_v52, %v261_v43  ;;  %v425_v61 = vand.u32 2147483647, %v344_v54  ;;  %v345_v62 = vsub.f32 %v180_v57, %v6368_v2  ;;  %v181_v63 = vld [vmem:[%s6359_s17 + $0x210] sm:$0xf] }
  0x8f   : > { %v265_v0 = vld [vmem:[#allocation2 + $0x130] sm:$0xf]  ;;  %583 = vst.msk [vmem:[#allocation2 + $0x118] sm:$0xf] %vm15_vm0, %v502_v55  ;;  %v505_v1 = vadd.f32 %v424_v56, %v262_v47  ;;  %v346_v3 = vsub.f32 %v181_v63, %v6368_v2  ;;  %v182_v4 = vld [vmem:[%s6359_s17 + $0x214] sm:$0xf] }
  0x90   : > { %v266_v5 = vld [vmem:[#allocation2 + $0x134] sm:$0xf]  ;;  %v183_v6 = vld [vmem:[%s6359_s17 + $0x218] sm:$0xf]  ;;  %584 = vst.msk [vmem:[#allocation2 + $0x11c] sm:$0xf] %vm15_vm0, %v503_v59  ;;  %v506_v7 = vadd.f32 %v425_v61, %v263_v53  ;;  %v347_v9 = vsub.f32 %v182_v4, %v6368_v2 }
  0x91   : > { %585 = vst.msk [vmem:[#allocation2 + $0x120] sm:$0xf] %vm15_vm0, %v504_v60  ;;  %v426_v8 = vand.u32 2147483647, %v345_v62  ;;  %v267_v10 = vld [vmem:[#allocation2 + $0x138] sm:$0xf]  ;;  %v348_v11 = vsub.f32 %v183_v6, %v6368_v2 }
  0x92   : > { %v184_v12 = vld [vmem:[%s6359_s17 + $0x21c] sm:$0xf]  ;;  %586 = vst.msk [vmem:[#allocation2 + $0x124] sm:$0xf] %vm15_vm0, %v505_v1  ;;  %v427_v13 = vand.u32 2147483647, %v346_v3 }
  0x93   : > { %v268_v14 = vld [vmem:[#allocation2 + $0x13c] sm:$0xf]  ;;  %v349_v15 = vsub.f32 %v184_v12, %v6368_v2  ;;  %v185_v16 = vld [vmem:[%s6359_s17 + $0x220] sm:$0xf]  ;;  %587 = vst.msk [vmem:[#allocation2 + $0x128] sm:$0xf] %vm15_vm0, %v506_v7  ;;  %v507_v17 = vadd.f32 %v426_v8, %v264_v58 }
  0x94   : > { %v428_v18 = vand.u32 2147483647, %v347_v9  ;;  %v429_v19 = vand.u32 2147483647, %v348_v11  ;;  %v269_v20 = vld [vmem:[#allocation2 + $0x140] sm:$0xf]  ;;  %v350_v21 = vsub.f32 %v185_v16, %v6368_v2  ;;  %v508_v22 = vadd.f32 %v427_v13, %v265_v0 }
  0x95   : > { %v430_v23 = vand.u32 2147483647, %v349_v15  ;;  %v5510_v24 = vld [vmem:[%s6359_s17 + $0x4] sm:$0xf]  ;;  %588 = vst.msk [vmem:[#allocation2 + $0x12c] sm:$0xf] %vm15_vm0, %v507_v17 }
  0x96   : > { %v6608_v25 = vld [vmem:[%s6364_s20 + $0x4] sm:$0xf]  ;;  %v509_v26 = vadd.f32 %v428_v18, %v266_v5  ;;  %v510_v27 = vadd.f32 %v429_v19, %v267_v10  ;;  %v431_v28 = vand.u32 2147483647, %v350_v21  ;;  %v5511_v30 = vld [vmem:[%s6359_s17 + $0x8] sm:$0xf] }
  0x97   : > { %v761_v29 = vsub.f32 %v5510_v24, %v6608_v25  ;;  %589 = vst.msk [vmem:[#allocation2 + $0x130] sm:$0xf] %vm15_vm0, %v508_v22  ;;  %v511_v31 = vadd.f32 %v430_v23, %v268_v14  ;;  %v680_v2 = vld [vmem:[#allocation2] sm:$0xf]  ;;  %v681_v32 = vld [vmem:[#allocation2 + $0x4] sm:$0xf]  ;;  %v762_v33 = vsub.f32 %v5511_v30, %v6608_v25 }
  0x98   : > { %v5512_v34 = vld [vmem:[%s6359_s17 + $0xc] sm:$0xf]  ;;  %590 = vst.msk [vmem:[#allocation2 + $0x134] sm:$0xf] %vm15_vm0, %v509_v26  ;;  %591 = vst.msk [vmem:[#allocation2 + $0x138] sm:$0xf] %vm15_vm0, %v510_v27  ;;  %v512_v35 = vadd.f32 %v431_v28, %v269_v20 }
  0x99   : > { %v842_v36 = vand.u32 2147483647, %v761_v29  ;;  %v682_v37 = vld [vmem:[#allocation2 + $0x8] sm:$0xf]  ;;  %v763_v38 = vsub.f32 %v5512_v34, %v6608_v25  ;;  %v5513_v39 = vld [vmem:[%s6359_s17 + $0x10] sm:$0xf] }
  0x9a   : > { %592 = vst.msk [vmem:[#allocation2 + $0x13c] sm:$0xf] %vm15_vm0, %v511_v31  ;;  %v843_v40 = vand.u32 2147483647, %v762_v33  ;;  %v683_v41 = vld [vmem:[#allocation2 + $0xc] sm:$0xf]  ;;  %v764_v42 = vsub.f32 %v5513_v39, %v6608_v25 }
  0x9b   : > { %v5514_v43 = vld [vmem:[%s6359_s17 + $0x14] sm:$0xf]  ;;  %593 = vst.msk [vmem:[#allocation2 + $0x140] sm:$0xf] %vm15_vm0, %v512_v35  ;;  %v923_v44 = vadd.f32 %v842_v36, %v680_v2  ;;  %v844_v45 = vand.u32 2147483647, %v763_v38 }
  0x9c   : > { %v684_v46 = vld [vmem:[#allocation2 + $0x10] sm:$0xf]  ;;  %v765_v47 = vsub.f32 %v5514_v43, %v6608_v25  ;;  %v5515_v48 = vld [vmem:[%s6359_s17 + $0x18] sm:$0xf]  ;;  %v924_v49 = vadd.f32 %v843_v40, %v681_v32  ;;  %v845_v50 = vand.u32 2147483647, %v764_v42 }
  0x9d   : > { %v685_v51 = vld [vmem:[#allocation2 + $0x14] sm:$0xf]  ;;  %v766_v52 = vsub.f32 %v5515_v48, %v6608_v25  ;;  %v5516_v53 = vld [vmem:[%s6359_s17 + $0x1c] sm:$0xf]  ;;  %1004 = vst.msk [vmem:[#allocation2] sm:$0xf] %vm15_vm0, %v923_v44  ;;  %v925_v54 = vadd.f32 %v844_v45, %v682_v37 }
  0x9e   : > { %v846_v55 = vand.u32 2147483647, %v765_v47  ;;  %v686_v56 = vld [vmem:[#allocation2 + $0x18] sm:$0xf]  ;;  %v767_v57 = vsub.f32 %v5516_v53, %v6608_v25  ;;  %v5517_v58 = vld [vmem:[%s6359_s17 + $0x20] sm:$0xf]  ;;  %v926_v59 = vadd.f32 %v845_v50, %v683_v41 }
  0x9f   : > { %1005 = vst.msk [vmem:[#allocation2 + $0x4] sm:$0xf] %vm15_vm0, %v924_v49  ;;  %v847_v60 = vand.u32 2147483647, %v766_v52  ;;  %v687_v61 = vld [vmem:[#allocation2 + $0x1c] sm:$0xf]  ;;  %v768_v62 = vsub.f32 %v5517_v58, %v6608_v25 }
  0xa0   : > { %v5518_v63 = vld [vmem:[%s6359_s17 + $0x24] sm:$0xf]  ;;  %1006 = vst.msk [vmem:[#allocation2 + $0x8] sm:$0xf] %vm15_vm0, %v925_v54  ;;  %v927_v0 = vadd.f32 %v846_v55, %v684_v46  ;;  %v848_v1 = vand.u32 2147483647, %v767_v57 }
  0xa1   : > { %v688_v3 = vld [vmem:[#allocation2 + $0x20] sm:$0xf]  ;;  %v769_v4 = vsub.f32 %v5518_v63, %v6608_v25  ;;  %v5519_v5 = vld [vmem:[%s6359_s17 + $0x44] sm:$0xf]  ;;  %1007 = vst.msk [vmem:[#allocation2 + $0xc] sm:$0xf] %vm15_vm0, %v926_v59  ;;  %v928_v6 = vadd.f32 %v847_v60, %v685_v51 }
  0xa2   : > { %v849_v7 = vand.u32 2147483647, %v768_v62  ;;  %v689_v8 = vld [vmem:[#allocation2 + $0x24] sm:$0xf]  ;;  %v770_v9 = vsub.f32 %v5519_v5, %v6608_v25  ;;  %v5520_v10 = vld [vmem:[%s6359_s17 + $0x48] sm:$0xf]  ;;  %v929_v11 = vadd.f32 %v848_v1, %v686_v56 }
  0xa3   : > { %1008 = vst.msk [vmem:[#allocation2 + $0x10] sm:$0xf] %vm15_vm0, %v927_v0  ;;  %v850_v12 = vand.u32 2147483647, %v769_v4  ;;  %v690_v13 = vld [vmem:[#allocation2 + $0x28] sm:$0xf]  ;;  %v771_v14 = vsub.f32 %v5520_v10, %v6608_v25 }
  0xa4   : > { %v5521_v15 = vld [vmem:[%s6359_s17 + $0x4c] sm:$0xf]  ;;  %1009 = vst.msk [vmem:[#allocation2 + $0x14] sm:$0xf] %vm15_vm0, %v928_v6  ;;  %v930_v16 = vadd.f32 %v849_v7, %v687_v61  ;;  %v851_v17 = vand.u32 2147483647, %v770_v9 }
  0xa5   : > { %v691_v18 = vld [vmem:[#allocation2 + $0x2c] sm:$0xf]  ;;  %v772_v19 = vsub.f32 %v5521_v15, %v6608_v25  ;;  %v5522_v20 = vld [vmem:[%s6359_s17 + $0x50] sm:$0xf]  ;;  %1010 = vst.msk [vmem:[#allocation2 + $0x18] sm:$0xf] %vm15_vm0, %v929_v11  ;;  %v931_v21 = vadd.f32 %v850_v12, %v688_v3 }
  0xa6   : > { %v852_v22 = vand.u32 2147483647, %v771_v14  ;;  %v692_v23 = vld [vmem:[#allocation2 + $0x30] sm:$0xf]  ;;  %v773_v24 = vsub.f32 %v5522_v20, %v6608_v25  ;;  %v5523_v26 = vld [vmem:[%s6359_s17 + $0x54] sm:$0xf]  ;;  %v932_v27 = vadd.f32 %v851_v17, %v689_v8 }
  0xa7   : > { %1011 = vst.msk [vmem:[#allocation2 + $0x1c] sm:$0xf] %vm15_vm0, %v930_v16  ;;  %v853_v28 = vand.u32 2147483647, %v772_v19  ;;  %v693_v29 = vld [vmem:[#allocation2 + $0x34] sm:$0xf]  ;;  %v774_v30 = vsub.f32 %v5523_v26, %v6608_v25 }
  0xa8   : > { %v5524_v31 = vld [vmem:[%s6359_s17 + $0x58] sm:$0xf]  ;;  %1012 = vst.msk [vmem:[#allocation2 + $0x20] sm:$0xf] %vm15_vm0, %v931_v21  ;;  %v933_v2 = vadd.f32 %v852_v22, %v690_v13  ;;  %v854_v32 = vand.u32 2147483647, %v773_v24 }
  0xa9   : > { %v694_v33 = vld [vmem:[#allocation2 + $0x38] sm:$0xf]  ;;  %v775_v34 = vsub.f32 %v5524_v31, %v6608_v25  ;;  %v5525_v35 = vld [vmem:[%s6359_s17 + $0x5c] sm:$0xf]  ;;  %1013 = vst.msk [vmem:[#allocation2 + $0x24] sm:$0xf] %vm15_vm0, %v932_v27  ;;  %v934_v36 = vadd.f32 %v853_v28, %v691_v18 }
  0xaa   : > { %v855_v37 = vand.u32 2147483647, %v774_v30  ;;  %v695_v38 = vld [vmem:[#allocation2 + $0x3c] sm:$0xf]  ;;  %v776_v39 = vsub.f32 %v5525_v35, %v6608_v25  ;;  %v5526_v40 = vld [vmem:[%s6359_s17 + $0x60] sm:$0xf]  ;;  %v935_v41 = vadd.f32 %v854_v32, %v692_v23 }
  0xab   : > { %1014 = vst.msk [vmem:[#allocation2 + $0x28] sm:$0xf] %vm15_vm0, %v933_v2  ;;  %v856_v42 = vand.u32 2147483647, %v775_v34  ;;  %v696_v43 = vld [vmem:[#allocation2 + $0x40] sm:$0xf]  ;;  %v777_v44 = vsub.f32 %v5526_v40, %v6608_v25 }
  0xac   : > { %v5527_v45 = vld [vmem:[%s6359_s17 + $0x64] sm:$0xf]  ;;  %1015 = vst.msk [vmem:[#allocation2 + $0x2c] sm:$0xf] %vm15_vm0, %v934_v36  ;;  %v936_v46 = vadd.f32 %v855_v37, %v693_v29  ;;  %v857_v47 = vand.u32 2147483647, %v776_v39 }
  0xad   : > { %v697_v48 = vld [vmem:[#allocation2 + $0x44] sm:$0xf]  ;;  %v778_v49 = vsub.f32 %v5527_v45, %v6608_v25  ;;  %1016 = vst.msk [vmem:[#allocation2 + $0x30] sm:$0xf] %vm15_vm0, %v935_v41  ;;  %v937_v51 = vadd.f32 %v856_v42, %v694_v33  ;;  %v858_v52 = vand.u32 2147483647, %v777_v44 }
  0xae   : > { %v5528_v50 = vld [vmem:[%s6359_s17 + $0x84] sm:$0xf]  ;;  %v698_v53 = vld [vmem:[#allocation2 + $0x48] sm:$0xf]  ;;  %1017 = vst.msk [vmem:[#allocation2 + $0x34] sm:$0xf] %vm15_vm0, %v936_v46  ;;  %v938_v56 = vadd.f32 %v857_v47, %v695_v38 }
  0xaf   : > { %v779_v54 = vsub.f32 %v5528_v50, %v6608_v25  ;;  %v5529_v55 = vld [vmem:[%s6359_s17 + $0x88] sm:$0xf]  ;;  %v859_v57 = vand.u32 2147483647, %v778_v49  ;;  %v699_v58 = vld [vmem:[#allocation2 + $0x4c] sm:$0xf]  ;;  %v939_v61 = vadd.f32 %v858_v52, %v696_v43 }
  0xb0   : > { %v780_v59 = vsub.f32 %v5529_v55, %v6608_v25  ;;  %v5530_v60 = vld [vmem:[%s6359_s17 + $0x8c] sm:$0xf]  ;;  %1018 = vst.msk [vmem:[#allocation2 + $0x38] sm:$0xf] %vm15_vm0, %v937_v51  ;;  %v700_v63 = vld [vmem:[#allocation2 + $0x50] sm:$0xf] }
  0xb1   : > { %v860_v62 = vand.u32 2147483647, %v779_v54  ;;  %v781_v0 = vsub.f32 %v5530_v60, %v6608_v25  ;;  %v5531_v1 = vld [vmem:[%s6359_s17 + $0x90] sm:$0xf]  ;;  %1019 = vst.msk [vmem:[#allocation2 + $0x3c] sm:$0xf] %vm15_vm0, %v938_v56  ;;  %v940_v3 = vadd.f32 %v859_v57, %v697_v48 }
  0xb2   : > { %v861_v4 = vand.u32 2147483647, %v780_v59  ;;  %v701_v5 = vld [vmem:[#allocation2 + $0x54] sm:$0xf]  ;;  %v782_v6 = vsub.f32 %v5531_v1, %v6608_v25  ;;  %1020 = vst.msk [vmem:[#allocation2 + $0x40] sm:$0xf] %vm15_vm0, %v939_v61 }
  0xb3   : > { %v5532_v7 = vld [vmem:[%s6359_s17 + $0x94] sm:$0xf]  ;;  %v941_v8 = vadd.f32 %v860_v62, %v698_v53  ;;  %v862_v9 = vand.u32 2147483647, %v781_v0  ;;  %v702_v10 = vld [vmem:[#allocation2 + $0x58] sm:$0xf] }
  0xb4   : > { %v783_v11 = vsub.f32 %v5532_v7, %v6608_v25  ;;  %v5533_v12 = vld [vmem:[%s6359_s17 + $0x98] sm:$0xf]  ;;  %1021 = vst.msk [vmem:[#allocation2 + $0x44] sm:$0xf] %vm15_vm0, %v940_v3  ;;  %v942_v13 = vadd.f32 %v861_v4, %v699_v58  ;;  %v863_v14 = vand.u32 2147483647, %v782_v6 }
  0xb5   : > { %v703_v15 = vld [vmem:[#allocation2 + $0x5c] sm:$0xf]  ;;  %v784_v16 = vsub.f32 %v5533_v12, %v6608_v25  ;;  %1022 = vst.msk [vmem:[#allocation2 + $0x48] sm:$0xf] %vm15_vm0, %v941_v8  ;;  %v943_v18 = vadd.f32 %v862_v9, %v700_v63  ;;  %v704_v20 = vld [vmem:[#allocation2 + $0x60] sm:$0xf] }
  0xb6   : > { %v5534_v17 = vld [vmem:[%s6359_s17 + $0x9c] sm:$0xf]  ;;  %v864_v19 = vand.u32 2147483647, %v783_v11  ;;  %v5535_v22 = vld [vmem:[%s6359_s17 + $0xa0] sm:$0xf]  ;;  %v944_v23 = vadd.f32 %v863_v14, %v701_v5 }
  0xb7   : > { %v785_v21 = vsub.f32 %v5534_v17, %v6608_v25  ;;  %1023 = vst.msk [vmem:[#allocation2 + $0x4c] sm:$0xf] %vm15_vm0, %v942_v13  ;;  %v865_v24 = vand.u32 2147483647, %v784_v16  ;;  %v705_v26 = vld [vmem:[#allocation2 + $0x64] sm:$0xf]  ;;  %v786_v27 = vsub.f32 %v5535_v22, %v6608_v25 }
  0xb8   : > { %v5536_v28 = vld [vmem:[%s6359_s17 + $0xa4] sm:$0xf]  ;;  %1024 = vst.msk [vmem:[#allocation2 + $0x50] sm:$0xf] %vm15_vm0, %v943_v18  ;;  %v945_v29 = vadd.f32 %v864_v19, %v702_v10  ;;  %v706_v31 = vld [vmem:[#allocation2 + $0x68] sm:$0xf] }
  0xb9   : > { %v866_v30 = vand.u32 2147483647, %v785_v21  ;;  %v787_v2 = vsub.f32 %v5536_v28, %v6608_v25  ;;  %v5537_v32 = vld [vmem:[%s6359_s17 + $0xc4] sm:$0xf]  ;;  %1025 = vst.msk [vmem:[#allocation2 + $0x54] sm:$0xf] %vm15_vm0, %v944_v23  ;;  %v946_v33 = vadd.f32 %v865_v24, %v703_v15 }
  0xba   : > { %v867_v34 = vand.u32 2147483647, %v786_v27  ;;  %v707_v35 = vld [vmem:[#allocation2 + $0x6c] sm:$0xf]  ;;  %v788_v36 = vsub.f32 %v5537_v32, %v6608_v25  ;;  %v5538_v37 = vld [vmem:[%s6359_s17 + $0xc8] sm:$0xf] }
  0xbb   : > { %1026 = vst.msk [vmem:[#allocation2 + $0x58] sm:$0xf] %vm15_vm0, %v945_v29  ;;  %v947_v38 = vadd.f32 %v866_v30, %v704_v20  ;;  %v868_v39 = vand.u32 2147483647, %v787_v2  ;;  %v708_v40 = vld [vmem:[#allocation2 + $0x70] sm:$0xf]  ;;  %v789_v41 = vsub.f32 %v5538_v37, %v6608_v25 }
  0xbc   : > { %v5539_v42 = vld [vmem:[%s6359_s17 + $0xcc] sm:$0xf]  ;;  %1027 = vst.msk [vmem:[#allocation2 + $0x5c] sm:$0xf] %vm15_vm0, %v946_v33  ;;  %v948_v43 = vadd.f32 %v867_v34, %v705_v26  ;;  %v869_v44 = vand.u32 2147483647, %v788_v36 }
  0xbd   : > { %v709_v45 = vld [vmem:[#allocation2 + $0x74] sm:$0xf]  ;;  %v790_v46 = vsub.f32 %v5539_v42, %v6608_v25  ;;  %v5540_v47 = vld [vmem:[%s6359_s17 + $0xd0] sm:$0xf]  ;;  %1028 = vst.msk [vmem:[#allocation2 + $0x60] sm:$0xf] %vm15_vm0, %v947_v38  ;;  %v949_v48 = vadd.f32 %v868_v39, %v706_v31 }
  0xbe   : > { %v870_v49 = vand.u32 2147483647, %v789_v41  ;;  %v710_v50 = vld [vmem:[#allocation2 + $0x78] sm:$0xf]  ;;  %v791_v51 = vsub.f32 %v5540_v47, %v6608_v25  ;;  %v5541_v52 = vld [vmem:[%s6359_s17 + $0xd4] sm:$0xf]  ;;  %v950_v53 = vadd.f32 %v869_v44, %v707_v35 }
  0xbf   : > { %1029 = vst.msk [vmem:[#allocation2 + $0x64] sm:$0xf] %vm15_vm0, %v948_v43  ;;  %v871_v54 = vand.u32 2147483647, %v790_v46  ;;  %v711_v55 = vld [vmem:[#allocation2 + $0x7c] sm:$0xf]  ;;  %v792_v56 = vsub.f32 %v5541_v52, %v6608_v25 }
  0xc0   : > { %v5542_v57 = vld [vmem:[%s6359_s17 + $0xd8] sm:$0xf]  ;;  %1030 = vst.msk [vmem:[#allocation2 + $0x68] sm:$0xf] %vm15_vm0, %v949_v48  ;;  %v951_v58 = vadd.f32 %v870_v49, %v708_v40  ;;  %v872_v59 = vand.u32 2147483647, %v791_v51 }
  0xc1   : > { %v712_v60 = vld [vmem:[#allocation2 + $0x80] sm:$0xf]  ;;  %v793_v61 = vsub.f32 %v5542_v57, %v6608_v25  ;;  %v5543_v62 = vld [vmem:[%s6359_s17 + $0xdc] sm:$0xf]  ;;  %1031 = vst.msk [vmem:[#allocation2 + $0x6c] sm:$0xf] %vm15_vm0, %v950_v53  ;;  %v952_v63 = vadd.f32 %v871_v54, %v709_v45 }
  0xc2   : > { %v873_v0 = vand.u32 2147483647, %v792_v56  ;;  %v713_v1 = vld [vmem:[#allocation2 + $0x84] sm:$0xf]  ;;  %v794_v3 = vsub.f32 %v5543_v62, %v6608_v25  ;;  %v5544_v4 = vld [vmem:[%s6359_s17 + $0xe0] sm:$0xf]  ;;  %v953_v5 = vadd.f32 %v872_v59, %v710_v50 }
  0xc3   : > { %1032 = vst.msk [vmem:[#allocation2 + $0x70] sm:$0xf] %vm15_vm0, %v951_v58  ;;  %v874_v6 = vand.u32 2147483647, %v793_v61  ;;  %v714_v7 = vld [vmem:[#allocation2 + $0x88] sm:$0xf]  ;;  %v795_v8 = vsub.f32 %v5544_v4, %v6608_v25 }
  0xc4   : > { %v5545_v9 = vld [vmem:[%s6359_s17 + $0xe4] sm:$0xf]  ;;  %1033 = vst.msk [vmem:[#allocation2 + $0x74] sm:$0xf] %vm15_vm0, %v952_v63  ;;  %v954_v10 = vadd.f32 %v873_v0, %v711_v55  ;;  %v875_v11 = vand.u32 2147483647, %v794_v3 }
  0xc5   : > { %v715_v12 = vld [vmem:[#allocation2 + $0x8c] sm:$0xf]  ;;  %v796_v13 = vsub.f32 %v5545_v9, %v6608_v25  ;;  %v5546_v14 = vld [vmem:[%s6359_s17 + $0x104] sm:$0xf]  ;;  %1034 = vst.msk [vmem:[#allocation2 + $0x78] sm:$0xf] %vm15_vm0, %v953_v5  ;;  %v955_v15 = vadd.f32 %v874_v6, %v712_v60 }
  0xc6   : > { %v876_v16 = vand.u32 2147483647, %v795_v8  ;;  %v716_v17 = vld [vmem:[#allocation2 + $0x90] sm:$0xf]  ;;  %v797_v18 = vsub.f32 %v5546_v14, %v6608_v25  ;;  %v5547_v19 = vld [vmem:[%s6359_s17 + $0x108] sm:$0xf]  ;;  %v956_v20 = vadd.f32 %v875_v11, %v713_v1 }
  0xc7   : > { %1035 = vst.msk [vmem:[#allocation2 + $0x7c] sm:$0xf] %vm15_vm0, %v954_v10  ;;  %v877_v21 = vand.u32 2147483647, %v796_v13  ;;  %v717_v22 = vld [vmem:[#allocation2 + $0x94] sm:$0xf]  ;;  %v798_v23 = vsub.f32 %v5547_v19, %v6608_v25 }
  0xc8   : > { %v5548_v24 = vld [vmem:[%s6359_s17 + $0x10c] sm:$0xf]  ;;  %1036 = vst.msk [vmem:[#allocation2 + $0x80] sm:$0xf] %vm15_vm0, %v955_v15  ;;  %v957_v26 = vadd.f32 %v876_v16, %v714_v7  ;;  %v878_v27 = vand.u32 2147483647, %v797_v18 }
  0xc9   : > { %v718_v28 = vld [vmem:[#allocation2 + $0x98] sm:$0xf]  ;;  %v799_v29 = vsub.f32 %v5548_v24, %v6608_v25  ;;  %v5549_v30 = vld [vmem:[%s6359_s17 + $0x110] sm:$0xf]  ;;  %1037 = vst.msk [vmem:[#allocation2 + $0x84] sm:$0xf] %vm15_vm0, %v956_v20  ;;  %v958_v31 = vadd.f32 %v877_v21, %v715_v12 }
  0xca   : > { %v879_v2 = vand.u32 2147483647, %v798_v23  ;;  %v719_v32 = vld [vmem:[#allocation2 + $0x9c] sm:$0xf]  ;;  %v800_v33 = vsub.f32 %v5549_v30, %v6608_v25  ;;  %v5550_v34 = vld [vmem:[%s6359_s17 + $0x114] sm:$0xf]  ;;  %v959_v35 = vadd.f32 %v878_v27, %v716_v17 }
  0xcb   : > { %1038 = vst.msk [vmem:[#allocation2 + $0x88] sm:$0xf] %vm15_vm0, %v957_v26  ;;  %v880_v36 = vand.u32 2147483647, %v799_v29  ;;  %v720_v37 = vld [vmem:[#allocation2 + $0xa0] sm:$0xf]  ;;  %v801_v38 = vsub.f32 %v5550_v34, %v6608_v25 }
  0xcc   : > { %v5551_v39 = vld [vmem:[%s6359_s17 + $0x118] sm:$0xf]  ;;  %1039 = vst.msk [vmem:[#allocation2 + $0x8c] sm:$0xf] %vm15_vm0, %v958_v31  ;;  %v960_v40 = vadd.f32 %v879_v2, %v717_v22  ;;  %v881_v41 = vand.u32 2147483647, %v800_v33 }
  0xcd   : > { %v721_v42 = vld [vmem:[#allocation2 + $0xa4] sm:$0xf]  ;;  %v802_v43 = vsub.f32 %v5551_v39, %v6608_v25  ;;  %v5552_v44 = vld [vmem:[%s6359_s17 + $0x11c] sm:$0xf]  ;;  %1040 = vst.msk [vmem:[#allocation2 + $0x90] sm:$0xf] %vm15_vm0, %v959_v35  ;;  %v961_v45 = vadd.f32 %v880_v36, %v718_v28 }
  0xce   : > { %v882_v46 = vand.u32 2147483647, %v801_v38  ;;  %v722_v47 = vld [vmem:[#allocation2 + $0xa8] sm:$0xf]  ;;  %v803_v48 = vsub.f32 %v5552_v44, %v6608_v25  ;;  %v5553_v49 = vld [vmem:[%s6359_s17 + $0x120] sm:$0xf]  ;;  %v962_v50 = vadd.f32 %v881_v41, %v719_v32 }
  0xcf   : > { %1041 = vst.msk [vmem:[#allocation2 + $0x94] sm:$0xf] %vm15_vm0, %v960_v40  ;;  %v883_v51 = vand.u32 2147483647, %v802_v43  ;;  %v723_v52 = vld [vmem:[#allocation2 + $0xac] sm:$0xf]  ;;  %v804_v53 = vsub.f32 %v5553_v49, %v6608_v25 }
  0xd0   : > { %v5554_v54 = vld [vmem:[%s6359_s17 + $0x124] sm:$0xf]  ;;  %1042 = vst.msk [vmem:[#allocation2 + $0x98] sm:$0xf] %vm15_vm0, %v961_v45  ;;  %v963_v55 = vadd.f32 %v882_v46, %v720_v37  ;;  %v884_v56 = vand.u32 2147483647, %v803_v48 }
  0xd1   : > { %v724_v57 = vld [vmem:[#allocation2 + $0xb0] sm:$0xf]  ;;  %v805_v58 = vsub.f32 %v5554_v54, %v6608_v25  ;;  %v5555_v59 = vld [vmem:[%s6359_s17 + $0x144] sm:$0xf]  ;;  %1043 = vst.msk [vmem:[#allocation2 + $0x9c] sm:$0xf] %vm15_vm0, %v962_v50  ;;  %v964_v60 = vadd.f32 %v883_v51, %v721_v42 }
  0xd2   : > { %v885_v61 = vand.u32 2147483647, %v804_v53  ;;  %v725_v62 = vld [vmem:[#allocation2 + $0xb4] sm:$0xf]  ;;  %v806_v63 = vsub.f32 %v5555_v59, %v6608_v25  ;;  %v5556_v0 = vld [vmem:[%s6359_s17 + $0x148] sm:$0xf]  ;;  %v965_v1 = vadd.f32 %v884_v56, %v722_v47 }
  0xd3   : > { %1044 = vst.msk [vmem:[#allocation2 + $0xa0] sm:$0xf] %vm15_vm0, %v963_v55  ;;  %v886_v3 = vand.u32 2147483647, %v805_v58  ;;  %v726_v4 = vld [vmem:[#allocation2 + $0xb8] sm:$0xf]  ;;  %v807_v5 = vsub.f32 %v5556_v0, %v6608_v25 }
  0xd4   : > { %v5557_v6 = vld [vmem:[%s6359_s17 + $0x14c] sm:$0xf]  ;;  %1045 = vst.msk [vmem:[#allocation2 + $0xa4] sm:$0xf] %vm15_vm0, %v964_v60  ;;  %v966_v7 = vadd.f32 %v885_v61, %v723_v52  ;;  %v887_v8 = vand.u32 2147483647, %v806_v63 }
  0xd5   : > { %v727_v9 = vld [vmem:[#allocation2 + $0xbc] sm:$0xf]  ;;  %v808_v10 = vsub.f32 %v5557_v6, %v6608_v25  ;;  %v5558_v11 = vld [vmem:[%s6359_s17 + $0x150] sm:$0xf]  ;;  %1046 = vst.msk [vmem:[#allocation2 + $0xa8] sm:$0xf] %vm15_vm0, %v965_v1  ;;  %v967_v12 = vadd.f32 %v886_v3, %v724_v57 }
  0xd6   : > { %v888_v13 = vand.u32 2147483647, %v807_v5  ;;  %v728_v14 = vld [vmem:[#allocation2 + $0xc0] sm:$0xf]  ;;  %v809_v15 = vsub.f32 %v5558_v11, %v6608_v25  ;;  %v5559_v16 = vld [vmem:[%s6359_s17 + $0x154] sm:$0xf]  ;;  %v968_v17 = vadd.f32 %v887_v8, %v725_v62 }
  0xd7   : > { %1047 = vst.msk [vmem:[#allocation2 + $0xac] sm:$0xf] %vm15_vm0, %v966_v7  ;;  %v889_v18 = vand.u32 2147483647, %v808_v10  ;;  %v729_v19 = vld [vmem:[#allocation2 + $0xc4] sm:$0xf]  ;;  %v810_v20 = vsub.f32 %v5559_v16, %v6608_v25 }
  0xd8   : > { %v5560_v21 = vld [vmem:[%s6359_s17 + $0x158] sm:$0xf]  ;;  %1048 = vst.msk [vmem:[#allocation2 + $0xb0] sm:$0xf] %vm15_vm0, %v967_v12  ;;  %v969_v22 = vadd.f32 %v888_v13, %v726_v4  ;;  %v890_v23 = vand.u32 2147483647, %v809_v15 }
  0xd9   : > { %v730_v24 = vld [vmem:[#allocation2 + $0xc8] sm:$0xf]  ;;  %v811_v26 = vsub.f32 %v5560_v21, %v6608_v25  ;;  %v5561_v27 = vld [vmem:[%s6359_s17 + $0x15c] sm:$0xf]  ;;  %1049 = vst.msk [vmem:[#allocation2 + $0xb4] sm:$0xf] %vm15_vm0, %v968_v17  ;;  %v970_v28 = vadd.f32 %v889_v18, %v727_v9 }
  0xda   : > { %v891_v29 = vand.u32 2147483647, %v810_v20  ;;  %v731_v30 = vld [vmem:[#allocation2 + $0xcc] sm:$0xf]  ;;  %v812_v31 = vsub.f32 %v5561_v27, %v6608_v25  ;;  %v5562_v2 = vld [vmem:[%s6359_s17 + $0x160] sm:$0xf]  ;;  %v971_v32 = vadd.f32 %v890_v23, %v728_v14 }
  0xdb   : > { %1050 = vst.msk [vmem:[#allocation2 + $0xb8] sm:$0xf] %vm15_vm0, %v969_v22  ;;  %v892_v33 = vand.u32 2147483647, %v811_v26  ;;  %v732_v34 = vld [vmem:[#allocation2 + $0xd0] sm:$0xf]  ;;  %v813_v35 = vsub.f32 %v5562_v2, %v6608_v25 }
  0xdc   : > { %v5563_v36 = vld [vmem:[%s6359_s17 + $0x164] sm:$0xf]  ;;  %1051 = vst.msk [vmem:[#allocation2 + $0xbc] sm:$0xf] %vm15_vm0, %v970_v28  ;;  %v972_v37 = vadd.f32 %v891_v29, %v729_v19  ;;  %v893_v38 = vand.u32 2147483647, %v812_v31 }
  0xdd   : > { %v733_v39 = vld [vmem:[#allocation2 + $0xd4] sm:$0xf]  ;;  %v814_v40 = vsub.f32 %v5563_v36, %v6608_v25  ;;  %v5564_v41 = vld [vmem:[%s6359_s17 + $0x184] sm:$0xf]  ;;  %1052 = vst.msk [vmem:[#allocation2 + $0xc0] sm:$0xf] %vm15_vm0, %v971_v32  ;;  %v973_v42 = vadd.f32 %v892_v33, %v730_v24 }
  0xde   : > { %v894_v43 = vand.u32 2147483647, %v813_v35  ;;  %v734_v44 = vld [vmem:[#allocation2 + $0xd8] sm:$0xf]  ;;  %v815_v45 = vsub.f32 %v5564_v41, %v6608_v25  ;;  %v5565_v46 = vld [vmem:[%s6359_s17 + $0x188] sm:$0xf]  ;;  %v974_v47 = vadd.f32 %v893_v38, %v731_v30 }
  0xdf   : > { %1053 = vst.msk [vmem:[#allocation2 + $0xc4] sm:$0xf] %vm15_vm0, %v972_v37  ;;  %v895_v48 = vand.u32 2147483647, %v814_v40  ;;  %v735_v49 = vld [vmem:[#allocation2 + $0xdc] sm:$0xf]  ;;  %v816_v50 = vsub.f32 %v5565_v46, %v6608_v25 }
  0xe0   : > { %v5566_v51 = vld [vmem:[%s6359_s17 + $0x18c] sm:$0xf]  ;;  %1054 = vst.msk [vmem:[#allocation2 + $0xc8] sm:$0xf] %vm15_vm0, %v973_v42  ;;  %v975_v52 = vadd.f32 %v894_v43, %v732_v34  ;;  %v896_v53 = vand.u32 2147483647, %v815_v45 }
  0xe1   : > { %v736_v54 = vld [vmem:[#allocation2 + $0xe0] sm:$0xf]  ;;  %v817_v55 = vsub.f32 %v5566_v51, %v6608_v25  ;;  %v5567_v56 = vld [vmem:[%s6359_s17 + $0x190] sm:$0xf]  ;;  %1055 = vst.msk [vmem:[#allocation2 + $0xcc] sm:$0xf] %vm15_vm0, %v974_v47  ;;  %v976_v57 = vadd.f32 %v895_v48, %v733_v39 }
  0xe2   : > { %v897_v58 = vand.u32 2147483647, %v816_v50  ;;  %v737_v59 = vld [vmem:[#allocation2 + $0xe4] sm:$0xf]  ;;  %v818_v60 = vsub.f32 %v5567_v56, %v6608_v25  ;;  %v5568_v61 = vld [vmem:[%s6359_s17 + $0x194] sm:$0xf]  ;;  %v977_v62 = vadd.f32 %v896_v53, %v734_v44 }
  0xe3   : > { %1056 = vst.msk [vmem:[#allocation2 + $0xd0] sm:$0xf] %vm15_vm0, %v975_v52  ;;  %v898_v63 = vand.u32 2147483647, %v817_v55  ;;  %v738_v0 = vld [vmem:[#allocation2 + $0xe8] sm:$0xf]  ;;  %v819_v1 = vsub.f32 %v5568_v61, %v6608_v25 }
  0xe4   : > { %v5569_v3 = vld [vmem:[%s6359_s17 + $0x198] sm:$0xf]  ;;  %1057 = vst.msk [vmem:[#allocation2 + $0xd4] sm:$0xf] %vm15_vm0, %v976_v57  ;;  %v978_v4 = vadd.f32 %v897_v58, %v735_v49  ;;  %v899_v5 = vand.u32 2147483647, %v818_v60 }
  0xe5   : > { %v739_v6 = vld [vmem:[#allocation2 + $0xec] sm:$0xf]  ;;  %v820_v7 = vsub.f32 %v5569_v3, %v6608_v25  ;;  %v5570_v8 = vld [vmem:[%s6359_s17 + $0x19c] sm:$0xf]  ;;  %1058 = vst.msk [vmem:[#allocation2 + $0xd8] sm:$0xf] %vm15_vm0, %v977_v62  ;;  %v979_v9 = vadd.f32 %v898_v63, %v736_v54 }
  0xe6   : > { %v900_v10 = vand.u32 2147483647, %v819_v1  ;;  %v740_v11 = vld [vmem:[#allocation2 + $0xf0] sm:$0xf]  ;;  %v821_v12 = vsub.f32 %v5570_v8, %v6608_v25  ;;  %v5571_v13 = vld [vmem:[%s6359_s17 + $0x1a0] sm:$0xf]  ;;  %v980_v14 = vadd.f32 %v899_v5, %v737_v59 }
  0xe7   : > { %1059 = vst.msk [vmem:[#allocation2 + $0xdc] sm:$0xf] %vm15_vm0, %v978_v4  ;;  %v901_v15 = vand.u32 2147483647, %v820_v7  ;;  %v741_v16 = vld [vmem:[#allocation2 + $0xf4] sm:$0xf]  ;;  %v822_v17 = vsub.f32 %v5571_v13, %v6608_v25 }
  0xe8   : > { %v5572_v18 = vld [vmem:[%s6359_s17 + $0x1a4] sm:$0xf]  ;;  %1060 = vst.msk [vmem:[#allocation2 + $0xe0] sm:$0xf] %vm15_vm0, %v979_v9  ;;  %v981_v19 = vadd.f32 %v900_v10, %v738_v0  ;;  %v902_v20 = vand.u32 2147483647, %v821_v12 }
  0xe9   : > { %v742_v21 = vld [vmem:[#allocation2 + $0xf8] sm:$0xf]  ;;  %v823_v22 = vsub.f32 %v5572_v18, %v6608_v25  ;;  %v5573_v23 = vld [vmem:[%s6359_s17 + $0x1c4] sm:$0xf]  ;;  %1061 = vst.msk [vmem:[#allocation2 + $0xe4] sm:$0xf] %vm15_vm0, %v980_v14  ;;  %v982_v24 = vadd.f32 %v901_v15, %v739_v6 }
  0xea   : > { %v903_v26 = vand.u32 2147483647, %v822_v17  ;;  %v743_v27 = vld [vmem:[#allocation2 + $0xfc] sm:$0xf]  ;;  %v824_v28 = vsub.f32 %v5573_v23, %v6608_v25  ;;  %v5574_v29 = vld [vmem:[%s6359_s17 + $0x1c8] sm:$0xf]  ;;  %v983_v30 = vadd.f32 %v902_v20, %v740_v11 }
  0xeb   : > { %1062 = vst.msk [vmem:[#allocation2 + $0xe8] sm:$0xf] %vm15_vm0, %v981_v19  ;;  %v904_v31 = vand.u32 2147483647, %v823_v22  ;;  %v744_v2 = vld [vmem:[#allocation2 + $0x100] sm:$0xf]  ;;  %v825_v32 = vsub.f32 %v5574_v29, %v6608_v25 }
  0xec   : > { %v5575_v33 = vld [vmem:[%s6359_s17 + $0x1cc] sm:$0xf]  ;;  %1063 = vst.msk [vmem:[#allocation2 + $0xec] sm:$0xf] %vm15_vm0, %v982_v24  ;;  %v984_v34 = vadd.f32 %v903_v26, %v741_v16  ;;  %v905_v35 = vand.u32 2147483647, %v824_v28 }
  0xed   : > { %v745_v36 = vld [vmem:[#allocation2 + $0x104] sm:$0xf]  ;;  %v826_v37 = vsub.f32 %v5575_v33, %v6608_v25  ;;  %v5576_v38 = vld [vmem:[%s6359_s17 + $0x1d0] sm:$0xf]  ;;  %1064 = vst.msk [vmem:[#allocation2 + $0xf0] sm:$0xf] %vm15_vm0, %v983_v30  ;;  %v985_v39 = vadd.f32 %v904_v31, %v742_v21 }
  0xee   : > { %v906_v40 = vand.u32 2147483647, %v825_v32  ;;  %v746_v41 = vld [vmem:[#allocation2 + $0x108] sm:$0xf]  ;;  %v827_v42 = vsub.f32 %v5576_v38, %v6608_v25  ;;  %v5577_v43 = vld [vmem:[%s6359_s17 + $0x1d4] sm:$0xf]  ;;  %v986_v44 = vadd.f32 %v905_v35, %v743_v27 }
  0xef   : > { %1065 = vst.msk [vmem:[#allocation2 + $0xf4] sm:$0xf] %vm15_vm0, %v984_v34  ;;  %v907_v45 = vand.u32 2147483647, %v826_v37  ;;  %v747_v46 = vld [vmem:[#allocation2 + $0x10c] sm:$0xf]  ;;  %v828_v47 = vsub.f32 %v5577_v43, %v6608_v25 }
  0xf0   : > { %v5578_v48 = vld [vmem:[%s6359_s17 + $0x1d8] sm:$0xf]  ;;  %1066 = vst.msk [vmem:[#allocation2 + $0xf8] sm:$0xf] %vm15_vm0, %v985_v39  ;;  %v987_v49 = vadd.f32 %v906_v40, %v744_v2  ;;  %v908_v50 = vand.u32 2147483647, %v827_v42 }
  0xf1   : > { %v748_v51 = vld [vmem:[#allocation2 + $0x110] sm:$0xf]  ;;  %v829_v52 = vsub.f32 %v5578_v48, %v6608_v25  ;;  %v5579_v53 = vld [vmem:[%s6359_s17 + $0x1dc] sm:$0xf]  ;;  %1067 = vst.msk [vmem:[#allocation2 + $0xfc] sm:$0xf] %vm15_vm0, %v986_v44  ;;  %v988_v54 = vadd.f32 %v907_v45, %v745_v36 }
  0xf2   : > { %v909_v55 = vand.u32 2147483647, %v828_v47  ;;  %v749_v56 = vld [vmem:[#allocation2 + $0x114] sm:$0xf]  ;;  %v830_v57 = vsub.f32 %v5579_v53, %v6608_v25  ;;  %v5580_v58 = vld [vmem:[%s6359_s17 + $0x1e0] sm:$0xf]  ;;  %v989_v59 = vadd.f32 %v908_v50, %v746_v41 }
  0xf3   : > { %1068 = vst.msk [vmem:[#allocation2 + $0x100] sm:$0xf] %vm15_vm0, %v987_v49  ;;  %v910_v60 = vand.u32 2147483647, %v829_v52  ;;  %v750_v61 = vld [vmem:[#allocation2 + $0x118] sm:$0xf]  ;;  %v831_v62 = vsub.f32 %v5580_v58, %v6608_v25 }
  0xf4   : > { %v5581_v63 = vld [vmem:[%s6359_s17 + $0x1e4] sm:$0xf]  ;;  %1069 = vst.msk [vmem:[#allocation2 + $0x104] sm:$0xf] %vm15_vm0, %v988_v54  ;;  %v990_v0 = vadd.f32 %v909_v55, %v747_v46  ;;  %v911_v1 = vand.u32 2147483647, %v830_v57 }
  0xf5   : > { %v751_v3 = vld [vmem:[#allocation2 + $0x11c] sm:$0xf]  ;;  %v832_v4 = vsub.f32 %v5581_v63, %v6608_v25  ;;  %v5582_v5 = vld [vmem:[%s6359_s17 + $0x204] sm:$0xf]  ;;  %1070 = vst.msk [vmem:[#allocation2 + $0x108] sm:$0xf] %vm15_vm0, %v989_v59  ;;  %v991_v6 = vadd.f32 %v910_v60, %v748_v51 }
  0xf6   : > { %v912_v7 = vand.u32 2147483647, %v831_v62  ;;  %v752_v8 = vld [vmem:[#allocation2 + $0x120] sm:$0xf]  ;;  %v833_v9 = vsub.f32 %v5582_v5, %v6608_v25  ;;  %v5583_v10 = vld [vmem:[%s6359_s17 + $0x208] sm:$0xf]  ;;  %v992_v11 = vadd.f32 %v911_v1, %v749_v56 }
  0xf7   : > { %1071 = vst.msk [vmem:[#allocation2 + $0x10c] sm:$0xf] %vm15_vm0, %v990_v0  ;;  %v913_v12 = vand.u32 2147483647, %v832_v4  ;;  %v753_v13 = vld [vmem:[#allocation2 + $0x124] sm:$0xf]  ;;  %v834_v14 = vsub.f32 %v5583_v10, %v6608_v25 }
  0xf8   : > { %v5584_v15 = vld [vmem:[%s6359_s17 + $0x20c] sm:$0xf]  ;;  %1072 = vst.msk [vmem:[#allocation2 + $0x110] sm:$0xf] %vm15_vm0, %v991_v6  ;;  %v993_v16 = vadd.f32 %v912_v7, %v750_v61  ;;  %v914_v17 = vand.u32 2147483647, %v833_v9 }
  0xf9   : > { %v754_v18 = vld [vmem:[#allocation2 + $0x128] sm:$0xf]  ;;  %v835_v19 = vsub.f32 %v5584_v15, %v6608_v25  ;;  %v5585_v20 = vld [vmem:[%s6359_s17 + $0x210] sm:$0xf]  ;;  %1073 = vst.msk [vmem:[#allocation2 + $0x114] sm:$0xf] %vm15_vm0, %v992_v11  ;;  %v994_v21 = vadd.f32 %v913_v12, %v751_v3 }
  0xfa   : > { %v915_v22 = vand.u32 2147483647, %v834_v14  ;;  %v755_v23 = vld [vmem:[#allocation2 + $0x12c] sm:$0xf]  ;;  %v836_v24 = vsub.f32 %v5585_v20, %v6608_v25  ;;  %v5586_v26 = vld [vmem:[%s6359_s17 + $0x214] sm:$0xf]  ;;  %v995_v27 = vadd.f32 %v914_v17, %v752_v8 }
  0xfb   : > { %1074 = vst.msk [vmem:[#allocation2 + $0x118] sm:$0xf] %vm15_vm0, %v993_v16  ;;  %v916_v28 = vand.u32 2147483647, %v835_v19  ;;  %v756_v29 = vld [vmem:[#allocation2 + $0x130] sm:$0xf]  ;;  %v837_v30 = vsub.f32 %v5586_v26, %v6608_v25 }
  0xfc   : > { %v5587_v31 = vld [vmem:[%s6359_s17 + $0x218] sm:$0xf]  ;;  %1075 = vst.msk [vmem:[#allocation2 + $0x11c] sm:$0xf] %vm15_vm0, %v994_v21  ;;  %v996_v2 = vadd.f32 %v915_v22, %v753_v13  ;;  %v917_v32 = vand.u32 2147483647, %v836_v24 }
  0xfd   : > { %v757_v33 = vld [vmem:[#allocation2 + $0x134] sm:$0xf]  ;;  %v838_v34 = vsub.f32 %v5587_v31, %v6608_v25  ;;  %v5588_v35 = vld [vmem:[%s6359_s17 + $0x21c] sm:$0xf]  ;;  %1076 = vst.msk [vmem:[#allocation2 + $0x120] sm:$0xf] %vm15_vm0, %v995_v27  ;;  %v997_v36 = vadd.f32 %v916_v28, %v754_v18 }
  0xfe   : > { %v918_v37 = vand.u32 2147483647, %v837_v30  ;;  %v758_v38 = vld [vmem:[#allocation2 + $0x138] sm:$0xf]  ;;  %v839_v39 = vsub.f32 %v5588_v35, %v6608_v25  ;;  %v5589_v40 = vld [vmem:[%s6359_s17 + $0x220] sm:$0xf]  ;;  %v998_v41 = vadd.f32 %v917_v32, %v755_v23 }
  0xff   : > { %1077 = vst.msk [vmem:[#allocation2 + $0x124] sm:$0xf] %vm15_vm0, %v996_v2  ;;  %v919_v42 = vand.u32 2147483647, %v838_v34  ;;  %v759_v43 = vld [vmem:[#allocation2 + $0x13c] sm:$0xf]  ;;  %v840_v44 = vsub.f32 %v5589_v40, %v6608_v25 }
 0x100   : > { %v5590_v45 = vld [vmem:[%s6359_s17 + $0x224] sm:$0xf]  ;;  %1078 = vst.msk [vmem:[#allocation2 + $0x128] sm:$0xf] %vm15_vm0, %v997_v36  ;;  %v999_v46 = vadd.f32 %v918_v37, %v756_v29  ;;  %v920_v47 = vand.u32 2147483647, %v839_v39 }
 0x101   : > { %v841_v48 = vsub.f32 %v5590_v45, %v6608_v25  ;;  %v5594_v49 = vld [vmem:[%s6359_s17 + $0x8] sm:$0xf]  ;;  %1079 = vst.msk [vmem:[#allocation2 + $0x12c] sm:$0xf] %vm15_vm0, %v998_v41  ;;  %v1000_v51 = vadd.f32 %v919_v42, %v757_v33  ;;  %v921_v52 = vand.u32 2147483647, %v840_v44 }
 0x102   : > { %v6854_v50 = vld [vmem:[%s6364_s20 + $0x8] sm:$0xf]  ;;  %v760_v53 = vld [vmem:[#allocation2 + $0x140] sm:$0xf]  ;;  %v5595_v55 = vld [vmem:[%s6359_s17 + $0xc] sm:$0xf]  ;;  %v1001_v56 = vadd.f32 %v920_v47, %v758_v38 }
 0x103   : > { %v1252_v54 = vsub.f32 %v5594_v49, %v6854_v50  ;;  %1080 = vst.msk [vmem:[#allocation2 + $0x130] sm:$0xf] %vm15_vm0, %v999_v46  ;;  %v922_v57 = vand.u32 2147483647, %v841_v48  ;;  %v1171_v58 = vld [vmem:[#allocation2] sm:$0xf]  ;;  %v1253_v25 = vsub.f32 %v5595_v55, %v6854_v50  ;;  %v1002_v60 = vadd.f32 %v921_v52, %v759_v43 }
 0x104   : > { %v5596_v59 = vld [vmem:[%s6359_s17 + $0x10] sm:$0xf]  ;;  %1081 = vst.msk [vmem:[#allocation2 + $0x134] sm:$0xf] %vm15_vm0, %v1000_v51  ;;  %v1172_v62 = vld [vmem:[#allocation2 + $0x4] sm:$0xf] }
 0x105   : > { %v1333_v61 = vand.u32 2147483647, %v1252_v54  ;;  %v1254_v63 = vsub.f32 %v5596_v59, %v6854_v50  ;;  %v5597_v0 = vld [vmem:[%s6359_s17 + $0x14] sm:$0xf]  ;;  %1082 = vst.msk [vmem:[#allocation2 + $0x138] sm:$0xf] %vm15_vm0, %v1001_v56  ;;  %v1003_v1 = vadd.f32 %v922_v57, %v760_v53 }
 0x106   : > { %v1334_v3 = vand.u32 2147483647, %v1253_v25  ;;  %v1173_v4 = vld [vmem:[#allocation2 + $0x8] sm:$0xf]  ;;  %v1255_v5 = vsub.f32 %v5597_v0, %v6854_v50  ;;  %v5598_v6 = vld [vmem:[%s6359_s17 + $0x18] sm:$0xf] }
 0x107   : > { %1083 = vst.msk [vmem:[#allocation2 + $0x13c] sm:$0xf] %vm15_vm0, %v1002_v60  ;;  %v1414_v7 = vadd.f32 %v1333_v61, %v1171_v58  ;;  %v1335_v8 = vand.u32 2147483647, %v1254_v63  ;;  %v1174_v9 = vld [vmem:[#allocation2 + $0xc] sm:$0xf]  ;;  %v1256_v10 = vsub.f32 %v5598_v6, %v6854_v50 }
 0x108   : > { %v5599_v11 = vld [vmem:[%s6359_s17 + $0x1c] sm:$0xf]  ;;  %1084 = vst.msk [vmem:[#allocation2 + $0x140] sm:$0xf] %vm15_vm0, %v1003_v1  ;;  %v1415_v12 = vadd.f32 %v1334_v3, %v1172_v62  ;;  %v1336_v13 = vand.u32 2147483647, %v1255_v5 }
 0x109   : > { %v1175_v14 = vld [vmem:[#allocation2 + $0x10] sm:$0xf]  ;;  %v1257_v15 = vsub.f32 %v5599_v11, %v6854_v50  ;;  %v5600_v16 = vld [vmem:[%s6359_s17 + $0x20] sm:$0xf]  ;;  %1495 = vst.msk [vmem:[#allocation2] sm:$0xf] %vm15_vm0, %v1414_v7  ;;  %v1416_v17 = vadd.f32 %v1335_v8, %v1173_v4 }
 0x10a   : > { %v1337_v18 = vand.u32 2147483647, %v1256_v10  ;;  %v1176_v19 = vld [vmem:[#allocation2 + $0x14] sm:$0xf]  ;;  %v1258_v20 = vsub.f32 %v5600_v16, %v6854_v50  ;;  %v5601_v21 = vld [vmem:[%s6359_s17 + $0x24] sm:$0xf]  ;;  %v1417_v22 = vadd.f32 %v1336_v13, %v1174_v9 }
 0x10b   : > { %1496 = vst.msk [vmem:[#allocation2 + $0x4] sm:$0xf] %vm15_vm0, %v1415_v12  ;;  %v1338_v23 = vand.u32 2147483647, %v1257_v15  ;;  %v1177_v24 = vld [vmem:[#allocation2 + $0x18] sm:$0xf]  ;;  %v1259_v26 = vsub.f32 %v5601_v21, %v6854_v50 }
 0x10c   : > { %v5602_v27 = vld [vmem:[%s6359_s17 + $0x28] sm:$0xf]  ;;  %1497 = vst.msk [vmem:[#allocation2 + $0x8] sm:$0xf] %vm15_vm0, %v1416_v17  ;;  %v1418_v28 = vadd.f32 %v1337_v18, %v1175_v14  ;;  %v1339_v29 = vand.u32 2147483647, %v1258_v20 }
 0x10d   : > { %v1178_v30 = vld [vmem:[#allocation2 + $0x1c] sm:$0xf]  ;;  %v1260_v31 = vsub.f32 %v5602_v27, %v6854_v50  ;;  %v5603_v2 = vld [vmem:[%s6359_s17 + $0x48] sm:$0xf]  ;;  %1498 = vst.msk [vmem:[#allocation2 + $0xc] sm:$0xf] %vm15_vm0, %v1417_v22  ;;  %v1419_v32 = vadd.f32 %v1338_v23, %v1176_v19 }
 0x10e   : > { %v1340_v33 = vand.u32 2147483647, %v1259_v26  ;;  %v1179_v34 = vld [vmem:[#allocation2 + $0x20] sm:$0xf]  ;;  %v1261_v35 = vsub.f32 %v5603_v2, %v6854_v50  ;;  %v5604_v36 = vld [vmem:[%s6359_s17 + $0x4c] sm:$0xf]  ;;  %v1420_v37 = vadd.f32 %v1339_v29, %v1177_v24 }
 0x10f   : > { %1499 = vst.msk [vmem:[#allocation2 + $0x10] sm:$0xf] %vm15_vm0, %v1418_v28  ;;  %v1341_v38 = vand.u32 2147483647, %v1260_v31  ;;  %v1180_v39 = vld [vmem:[#allocation2 + $0x24] sm:$0xf]  ;;  %v1262_v40 = vsub.f32 %v5604_v36, %v6854_v50 }
 0x110   : > { %v5605_v41 = vld [vmem:[%s6359_s17 + $0x50] sm:$0xf]  ;;  %1500 = vst.msk [vmem:[#allocation2 + $0x14] sm:$0xf] %vm15_vm0, %v1419_v32  ;;  %v1421_v42 = vadd.f32 %v1340_v33, %v1178_v30  ;;  %v1342_v43 = vand.u32 2147483647, %v1261_v35 }
 0x111   : > { %v1181_v44 = vld [vmem:[#allocation2 + $0x28] sm:$0xf]  ;;  %v1263_v45 = vsub.f32 %v5605_v41, %v6854_v50  ;;  %v5606_v46 = vld [vmem:[%s6359_s17 + $0x54] sm:$0xf]  ;;  %1501 = vst.msk [vmem:[#allocation2 + $0x18] sm:$0xf] %vm15_vm0, %v1420_v37  ;;  %v1422_v47 = vadd.f32 %v1341_v38, %v1179_v34 }
 0x112   : > { %v1343_v48 = vand.u32 2147483647, %v1262_v40  ;;  %v1182_v49 = vld [vmem:[#allocation2 + $0x2c] sm:$0xf]  ;;  %v1264_v51 = vsub.f32 %v5606_v46, %v6854_v50  ;;  %v5607_v52 = vld [vmem:[%s6359_s17 + $0x58] sm:$0xf]  ;;  %v1423_v53 = vadd.f32 %v1342_v43, %v1180_v39 }
 0x113   : > { %1502 = vst.msk [vmem:[#allocation2 + $0x1c] sm:$0xf] %vm15_vm0, %v1421_v42  ;;  %v1344_v54 = vand.u32 2147483647, %v1263_v45  ;;  %v1183_v55 = vld [vmem:[#allocation2 + $0x30] sm:$0xf]  ;;  %v1265_v56 = vsub.f32 %v5607_v52, %v6854_v50 }
 0x114   : > { %v5608_v57 = vld [vmem:[%s6359_s17 + $0x5c] sm:$0xf]  ;;  %1503 = vst.msk [vmem:[#allocation2 + $0x20] sm:$0xf] %vm15_vm0, %v1422_v47  ;;  %v1424_v58 = vadd.f32 %v1343_v48, %v1181_v44  ;;  %v1345_v25 = vand.u32 2147483647, %v1264_v51 }
 0x115   : > { %v1184_v59 = vld [vmem:[#allocation2 + $0x34] sm:$0xf]  ;;  %v1266_v60 = vsub.f32 %v5608_v57, %v6854_v50  ;;  %v5609_v61 = vld [vmem:[%s6359_s17 + $0x60] sm:$0xf]  ;;  %1504 = vst.msk [vmem:[#allocation2 + $0x24] sm:$0xf] %vm15_vm0, %v1423_v53  ;;  %v1425_v62 = vadd.f32 %v1344_v54, %v1182_v49 }
 0x116   : > { %v1346_v63 = vand.u32 2147483647, %v1265_v56  ;;  %v1185_v0 = vld [vmem:[#allocation2 + $0x38] sm:$0xf]  ;;  %v1267_v1 = vsub.f32 %v5609_v61, %v6854_v50  ;;  %v5610_v3 = vld [vmem:[%s6359_s17 + $0x64] sm:$0xf]  ;;  %v1426_v4 = vadd.f32 %v1345_v25, %v1183_v55 }
 0x117   : > { %1505 = vst.msk [vmem:[#allocation2 + $0x28] sm:$0xf] %vm15_vm0, %v1424_v58  ;;  %v1347_v5 = vand.u32 2147483647, %v1266_v60  ;;  %v1186_v6 = vld [vmem:[#allocation2 + $0x3c] sm:$0xf]  ;;  %v1268_v7 = vsub.f32 %v5610_v3, %v6854_v50 }
 0x118   : > { %v5611_v8 = vld [vmem:[%s6359_s17 + $0x68] sm:$0xf]  ;;  %1506 = vst.msk [vmem:[#allocation2 + $0x2c] sm:$0xf] %vm15_vm0, %v1425_v62  ;;  %v1427_v9 = vadd.f32 %v1346_v63, %v1184_v59  ;;  %v1348_v10 = vand.u32 2147483647, %v1267_v1 }
 0x119   : > { %v1187_v11 = vld [vmem:[#allocation2 + $0x40] sm:$0xf]  ;;  %v1269_v12 = vsub.f32 %v5611_v8, %v6854_v50  ;;  %v5612_v13 = vld [vmem:[%s6359_s17 + $0x88] sm:$0xf]  ;;  %1507 = vst.msk [vmem:[#allocation2 + $0x30] sm:$0xf] %vm15_vm0, %v1426_v4  ;;  %v1428_v14 = vadd.f32 %v1347_v5, %v1185_v0 }
 0x11a   : > { %v1349_v15 = vand.u32 2147483647, %v1268_v7  ;;  %v1188_v16 = vld [vmem:[#allocation2 + $0x44] sm:$0xf]  ;;  %v1270_v17 = vsub.f32 %v5612_v13, %v6854_v50  ;;  %v5613_v18 = vld [vmem:[%s6359_s17 + $0x8c] sm:$0xf]  ;;  %v1429_v19 = vadd.f32 %v1348_v10, %v1186_v6 }
 0x11b   : > { %1508 = vst.msk [vmem:[#allocation2 + $0x34] sm:$0xf] %vm15_vm0, %v1427_v9  ;;  %v1350_v20 = vand.u32 2147483647, %v1269_v12  ;;  %v1189_v21 = vld [vmem:[#allocation2 + $0x48] sm:$0xf]  ;;  %v1271_v22 = vsub.f32 %v5613_v18, %v6854_v50 }
 0x11c   : > { %v5614_v23 = vld [vmem:[%s6359_s17 + $0x90] sm:$0xf]  ;;  %1509 = vst.msk [vmem:[#allocation2 + $0x38] sm:$0xf] %vm15_vm0, %v1428_v14  ;;  %v1430_v24 = vadd.f32 %v1349_v15, %v1187_v11  ;;  %v1351_v26 = vand.u32 2147483647, %v1270_v17 }
 0x11d   : > { %v1190_v27 = vld [vmem:[#allocation2 + $0x4c] sm:$0xf]  ;;  %v1272_v28 = vsub.f32 %v5614_v23, %v6854_v50  ;;  %v5615_v29 = vld [vmem:[%s6359_s17 + $0x94] sm:$0xf]  ;;  %1510 = vst.msk [vmem:[#allocation2 + $0x3c] sm:$0xf] %vm15_vm0, %v1429_v19  ;;  %v1431_v30 = vadd.f32 %v1350_v20, %v1188_v16 }
 0x11e   : > { %v1352_v31 = vand.u32 2147483647, %v1271_v22  ;;  %v1191_v2 = vld [vmem:[#allocation2 + $0x50] sm:$0xf]  ;;  %v1273_v32 = vsub.f32 %v5615_v29, %v6854_v50  ;;  %v5616_v33 = vld [vmem:[%s6359_s17 + $0x98] sm:$0xf]  ;;  %v1432_v34 = vadd.f32 %v1351_v26, %v1189_v21 }
 0x11f   : > { %1511 = vst.msk [vmem:[#allocation2 + $0x40] sm:$0xf] %vm15_vm0, %v1430_v24  ;;  %v1353_v35 = vand.u32 2147483647, %v1272_v28  ;;  %v1192_v36 = vld [vmem:[#allocation2 + $0x54] sm:$0xf]  ;;  %v1274_v37 = vsub.f32 %v5616_v33, %v6854_v50 }
 0x120   : > { %v5617_v38 = vld [vmem:[%s6359_s17 + $0x9c] sm:$0xf]  ;;  %1512 = vst.msk [vmem:[#allocation2 + $0x44] sm:$0xf] %vm15_vm0, %v1431_v30  ;;  %v1433_v39 = vadd.f32 %v1352_v31, %v1190_v27  ;;  %v1354_v40 = vand.u32 2147483647, %v1273_v32 }
 0x121   : > { %v1193_v41 = vld [vmem:[#allocation2 + $0x58] sm:$0xf]  ;;  %v1275_v42 = vsub.f32 %v5617_v38, %v6854_v50  ;;  %v5618_v43 = vld [vmem:[%s6359_s17 + $0xa0] sm:$0xf]  ;;  %1513 = vst.msk [vmem:[#allocation2 + $0x48] sm:$0xf] %vm15_vm0, %v1432_v34  ;;  %v1434_v44 = vadd.f32 %v1353_v35, %v1191_v2 }
 0x122   : > { %v1355_v45 = vand.u32 2147483647, %v1274_v37  ;;  %v1194_v46 = vld [vmem:[#allocation2 + $0x5c] sm:$0xf]  ;;  %v1276_v47 = vsub.f32 %v5618_v43, %v6854_v50  ;;  %v5619_v48 = vld [vmem:[%s6359_s17 + $0xa4] sm:$0xf]  ;;  %v1435_v49 = vadd.f32 %v1354_v40, %v1192_v36 }
 0x123   : > { %1514 = vst.msk [vmem:[#allocation2 + $0x4c] sm:$0xf] %vm15_vm0, %v1433_v39  ;;  %v1356_v51 = vand.u32 2147483647, %v1275_v42  ;;  %v1195_v52 = vld [vmem:[#allocation2 + $0x60] sm:$0xf]  ;;  %v1277_v53 = vsub.f32 %v5619_v48, %v6854_v50 }
 0x124   : > { %v5620_v54 = vld [vmem:[%s6359_s17 + $0xa8] sm:$0xf]  ;;  %1515 = vst.msk [vmem:[#allocation2 + $0x50] sm:$0xf] %vm15_vm0, %v1434_v44  ;;  %v1436_v55 = vadd.f32 %v1355_v45, %v1193_v41  ;;  %v1357_v56 = vand.u32 2147483647, %v1276_v47 }
 0x125   : > { %v1196_v57 = vld [vmem:[#allocation2 + $0x64] sm:$0xf]  ;;  %v1278_v58 = vsub.f32 %v5620_v54, %v6854_v50  ;;  %v5621_v25 = vld [vmem:[%s6359_s17 + $0xc8] sm:$0xf]  ;;  %1516 = vst.msk [vmem:[#allocation2 + $0x54] sm:$0xf] %vm15_vm0, %v1435_v49  ;;  %v1437_v59 = vadd.f32 %v1356_v51, %v1194_v46 }
 0x126   : > { %v1358_v60 = vand.u32 2147483647, %v1277_v53  ;;  %v1197_v61 = vld [vmem:[#allocation2 + $0x68] sm:$0xf]  ;;  %v1279_v62 = vsub.f32 %v5621_v25, %v6854_v50  ;;  %v5622_v63 = vld [vmem:[%s6359_s17 + $0xcc] sm:$0xf]  ;;  %v1438_v0 = vadd.f32 %v1357_v56, %v1195_v52 }
 0x127   : > { %1517 = vst.msk [vmem:[#allocation2 + $0x58] sm:$0xf] %vm15_vm0, %v1436_v55  ;;  %v1359_v1 = vand.u32 2147483647, %v1278_v58  ;;  %v1198_v3 = vld [vmem:[#allocation2 + $0x6c] sm:$0xf]  ;;  %v1280_v4 = vsub.f32 %v5622_v63, %v6854_v50 }
 0x128   : > { %v5623_v5 = vld [vmem:[%s6359_s17 + $0xd0] sm:$0xf]  ;;  %1518 = vst.msk [vmem:[#allocation2 + $0x5c] sm:$0xf] %vm15_vm0, %v1437_v59  ;;  %v1439_v6 = vadd.f32 %v1358_v60, %v1196_v57  ;;  %v1360_v7 = vand.u32 2147483647, %v1279_v62 }
 0x129   : > { %v1199_v8 = vld [vmem:[#allocation2 + $0x70] sm:$0xf]  ;;  %v1281_v9 = vsub.f32 %v5623_v5, %v6854_v50  ;;  %v5624_v10 = vld [vmem:[%s6359_s17 + $0xd4] sm:$0xf]  ;;  %1519 = vst.msk [vmem:[#allocation2 + $0x60] sm:$0xf] %vm15_vm0, %v1438_v0  ;;  %v1440_v11 = vadd.f32 %v1359_v1, %v1197_v61 }
 0x12a   : > { %v1361_v12 = vand.u32 2147483647, %v1280_v4  ;;  %v1200_v13 = vld [vmem:[#allocation2 + $0x74] sm:$0xf]  ;;  %v1282_v14 = vsub.f32 %v5624_v10, %v6854_v50  ;;  %v5625_v15 = vld [vmem:[%s6359_s17 + $0xd8] sm:$0xf]  ;;  %v1441_v16 = vadd.f32 %v1360_v7, %v1198_v3 }
 0x12b   : > { %1520 = vst.msk [vmem:[#allocation2 + $0x64] sm:$0xf] %vm15_vm0, %v1439_v6  ;;  %v1362_v17 = vand.u32 2147483647, %v1281_v9  ;;  %v1201_v18 = vld [vmem:[#allocation2 + $0x78] sm:$0xf]  ;;  %v1283_v19 = vsub.f32 %v5625_v15, %v6854_v50 }
 0x12c   : > { %v5626_v20 = vld [vmem:[%s6359_s17 + $0xdc] sm:$0xf]  ;;  %1521 = vst.msk [vmem:[#allocation2 + $0x68] sm:$0xf] %vm15_vm0, %v1440_v11  ;;  %v1442_v21 = vadd.f32 %v1361_v12, %v1199_v8  ;;  %v1363_v22 = vand.u32 2147483647, %v1282_v14 }
 0x12d   : > { %v1202_v23 = vld [vmem:[#allocation2 + $0x7c] sm:$0xf]  ;;  %v1284_v24 = vsub.f32 %v5626_v20, %v6854_v50  ;;  %v5627_v26 = vld [vmem:[%s6359_s17 + $0xe0] sm:$0xf]  ;;  %1522 = vst.msk [vmem:[#allocation2 + $0x6c] sm:$0xf] %vm15_vm0, %v1441_v16  ;;  %v1443_v27 = vadd.f32 %v1362_v17, %v1200_v13 }
 0x12e   : > { %v1364_v28 = vand.u32 2147483647, %v1283_v19  ;;  %v1203_v29 = vld [vmem:[#allocation2 + $0x80] sm:$0xf]  ;;  %v1285_v30 = vsub.f32 %v5627_v26, %v6854_v50  ;;  %v5628_v31 = vld [vmem:[%s6359_s17 + $0xe4] sm:$0xf]  ;;  %v1444_v2 = vadd.f32 %v1363_v22, %v1201_v18 }
 0x12f   : > { %1523 = vst.msk [vmem:[#allocation2 + $0x70] sm:$0xf] %vm15_vm0, %v1442_v21  ;;  %v1365_v32 = vand.u32 2147483647, %v1284_v24  ;;  %v1204_v33 = vld [vmem:[#allocation2 + $0x84] sm:$0xf]  ;;  %v1286_v34 = vsub.f32 %v5628_v31, %v6854_v50 }
 0x130   : > { %v5629_v35 = vld [vmem:[%s6359_s17 + $0xe8] sm:$0xf]  ;;  %1524 = vst.msk [vmem:[#allocation2 + $0x74] sm:$0xf] %vm15_vm0, %v1443_v27  ;;  %v1445_v36 = vadd.f32 %v1364_v28, %v1202_v23  ;;  %v1366_v37 = vand.u32 2147483647, %v1285_v30 }
 0x131   : > { %v1205_v38 = vld [vmem:[#allocation2 + $0x88] sm:$0xf]  ;;  %v1287_v39 = vsub.f32 %v5629_v35, %v6854_v50  ;;  %1525 = vst.msk [vmem:[#allocation2 + $0x78] sm:$0xf] %vm15_vm0, %v1444_v2  ;;  %v1446_v41 = vadd.f32 %v1365_v32, %v1203_v29  ;;  %v1367_v42 = vand.u32 2147483647, %v1286_v34 }
 0x132   : > { %v5630_v40 = vld [vmem:[%s6359_s17 + $0x108] sm:$0xf]  ;;  %v1206_v43 = vld [vmem:[#allocation2 + $0x8c] sm:$0xf]  ;;  %1526 = vst.msk [vmem:[#allocation2 + $0x7c] sm:$0xf] %vm15_vm0, %v1445_v36  ;;  %v1447_v46 = vadd.f32 %v1366_v37, %v1204_v33 }
 0x133   : > { %v1288_v44 = vsub.f32 %v5630_v40, %v6854_v50  ;;  %v5631_v45 = vld [vmem:[%s6359_s17 + $0x10c] sm:$0xf]  ;;  %v1368_v47 = vand.u32 2147483647, %v1287_v39  ;;  %v1207_v48 = vld [vmem:[#allocation2 + $0x90] sm:$0xf]  ;;  %v1448_v52 = vadd.f32 %v1367_v42, %v1205_v38 }
 0x134   : > { %v1289_v49 = vsub.f32 %v5631_v45, %v6854_v50  ;;  %v5632_v51 = vld [vmem:[%s6359_s17 + $0x110] sm:$0xf]  ;;  %1527 = vst.msk [vmem:[#allocation2 + $0x80] sm:$0xf] %vm15_vm0, %v1446_v41  ;;  %v1208_v54 = vld [vmem:[#allocation2 + $0x94] sm:$0xf] }
 0x135   : > { %v1369_v53 = vand.u32 2147483647, %v1288_v44  ;;  %v1290_v55 = vsub.f32 %v5632_v51, %v6854_v50  ;;  %v5633_v56 = vld [vmem:[%s6359_s17 + $0x114] sm:$0xf]  ;;  %1528 = vst.msk [vmem:[#allocation2 + $0x84] sm:$0xf] %vm15_vm0, %v1447_v46  ;;  %v1449_v57 = vadd.f32 %v1368_v47, %v1206_v43 }
 0x136   : > { %v1370_v58 = vand.u32 2147483647, %v1289_v49  ;;  %v1209_v25 = vld [vmem:[#allocation2 + $0x98] sm:$0xf]  ;;  %v1291_v59 = vsub.f32 %v5633_v56, %v6854_v50  ;;  %1529 = vst.msk [vmem:[#allocation2 + $0x88] sm:$0xf] %vm15_vm0, %v1448_v52 }
 0x137   : > { %v5634_v60 = vld [vmem:[%s6359_s17 + $0x118] sm:$0xf]  ;;  %v1450_v61 = vadd.f32 %v1369_v53, %v1207_v48  ;;  %v1371_v62 = vand.u32 2147483647, %v1290_v55  ;;  %v1210_v63 = vld [vmem:[#allocation2 + $0x9c] sm:$0xf] }
 0x138   : > { %v1292_v0 = vsub.f32 %v5634_v60, %v6854_v50  ;;  %v5635_v1 = vld [vmem:[%s6359_s17 + $0x11c] sm:$0xf]  ;;  %1530 = vst.msk [vmem:[#allocation2 + $0x8c] sm:$0xf] %vm15_vm0, %v1449_v57  ;;  %v1451_v3 = vadd.f32 %v1370_v58, %v1208_v54  ;;  %v1372_v4 = vand.u32 2147483647, %v1291_v59 }
 0x139   : > { %v1211_v5 = vld [vmem:[#allocation2 + $0xa0] sm:$0xf]  ;;  %v1293_v6 = vsub.f32 %v5635_v1, %v6854_v50  ;;  %1531 = vst.msk [vmem:[#allocation2 + $0x90] sm:$0xf] %vm15_vm0, %v1450_v61  ;;  %v1452_v8 = vadd.f32 %v1371_v62, %v1209_v25  ;;  %v1212_v10 = vld [vmem:[#allocation2 + $0xa4] sm:$0xf] }
 0x13a   : > { %v5636_v7 = vld [vmem:[%s6359_s17 + $0x120] sm:$0xf]  ;;  %v1373_v9 = vand.u32 2147483647, %v1292_v0  ;;  %v5637_v12 = vld [vmem:[%s6359_s17 + $0x124] sm:$0xf]  ;;  %v1453_v13 = vadd.f32 %v1372_v4, %v1210_v63 }
 0x13b   : > { %v1294_v11 = vsub.f32 %v5636_v7, %v6854_v50  ;;  %1532 = vst.msk [vmem:[#allocation2 + $0x94] sm:$0xf] %vm15_vm0, %v1451_v3  ;;  %v1374_v14 = vand.u32 2147483647, %v1293_v6  ;;  %v1213_v15 = vld [vmem:[#allocation2 + $0xa8] sm:$0xf]  ;;  %v1295_v16 = vsub.f32 %v5637_v12, %v6854_v50 }
 0x13c   : > { %v5638_v17 = vld [vmem:[%s6359_s17 + $0x128] sm:$0xf]  ;;  %1533 = vst.msk [vmem:[#allocation2 + $0x98] sm:$0xf] %vm15_vm0, %v1452_v8  ;;  %v1454_v18 = vadd.f32 %v1373_v9, %v1211_v5  ;;  %v1214_v20 = vld [vmem:[#allocation2 + $0xac] sm:$0xf] }
 0x13d   : > { %v1375_v19 = vand.u32 2147483647, %v1294_v11  ;;  %v1296_v21 = vsub.f32 %v5638_v17, %v6854_v50  ;;  %v5639_v22 = vld [vmem:[%s6359_s17 + $0x148] sm:$0xf]  ;;  %1534 = vst.msk [vmem:[#allocation2 + $0x9c] sm:$0xf] %vm15_vm0, %v1453_v13  ;;  %v1455_v23 = vadd.f32 %v1374_v14, %v1212_v10 }
 0x13e   : > { %v1376_v24 = vand.u32 2147483647, %v1295_v16  ;;  %v1215_v26 = vld [vmem:[#allocation2 + $0xb0] sm:$0xf]  ;;  %v1297_v27 = vsub.f32 %v5639_v22, %v6854_v50  ;;  %v5640_v28 = vld [vmem:[%s6359_s17 + $0x14c] sm:$0xf] }
 0x13f   : > { %1535 = vst.msk [vmem:[#allocation2 + $0xa0] sm:$0xf] %vm15_vm0, %v1454_v18  ;;  %v1456_v29 = vadd.f32 %v1375_v19, %v1213_v15  ;;  %v1377_v30 = vand.u32 2147483647, %v1296_v21  ;;  %v1216_v31 = vld [vmem:[#allocation2 + $0xb4] sm:$0xf]  ;;  %v1298_v2 = vsub.f32 %v5640_v28, %v6854_v50 }
 0x140   : > { %v5641_v32 = vld [vmem:[%s6359_s17 + $0x150] sm:$0xf]  ;;  %1536 = vst.msk [vmem:[#allocation2 + $0xa4] sm:$0xf] %vm15_vm0, %v1455_v23  ;;  %v1457_v33 = vadd.f32 %v1376_v24, %v1214_v20  ;;  %v1378_v34 = vand.u32 2147483647, %v1297_v27 }
 0x141   : > { %v1217_v35 = vld [vmem:[#allocation2 + $0xb8] sm:$0xf]  ;;  %v1299_v36 = vsub.f32 %v5641_v32, %v6854_v50  ;;  %v5642_v37 = vld [vmem:[%s6359_s17 + $0x154] sm:$0xf]  ;;  %1537 = vst.msk [vmem:[#allocation2 + $0xa8] sm:$0xf] %vm15_vm0, %v1456_v29  ;;  %v1458_v38 = vadd.f32 %v1377_v30, %v1215_v26 }
 0x142   : > { %v1379_v39 = vand.u32 2147483647, %v1298_v2  ;;  %v1218_v40 = vld [vmem:[#allocation2 + $0xbc] sm:$0xf]  ;;  %v1300_v41 = vsub.f32 %v5642_v37, %v6854_v50  ;;  %v5643_v42 = vld [vmem:[%s6359_s17 + $0x158] sm:$0xf]  ;;  %v1459_v43 = vadd.f32 %v1378_v34, %v1216_v31 }
 0x143   : > { %1538 = vst.msk [vmem:[#allocation2 + $0xac] sm:$0xf] %vm15_vm0, %v1457_v33  ;;  %v1380_v44 = vand.u32 2147483647, %v1299_v36  ;;  %v1219_v45 = vld [vmem:[#allocation2 + $0xc0] sm:$0xf]  ;;  %v1301_v46 = vsub.f32 %v5643_v42, %v6854_v50 }
 0x144   : > { %v5644_v47 = vld [vmem:[%s6359_s17 + $0x15c] sm:$0xf]  ;;  %1539 = vst.msk [vmem:[#allocation2 + $0xb0] sm:$0xf] %vm15_vm0, %v1458_v38  ;;  %v1460_v48 = vadd.f32 %v1379_v39, %v1217_v35  ;;  %v1381_v49 = vand.u32 2147483647, %v1300_v41 }
 0x145   : > { %v1220_v51 = vld [vmem:[#allocation2 + $0xc4] sm:$0xf]  ;;  %v1302_v52 = vsub.f32 %v5644_v47, %v6854_v50  ;;  %v5645_v53 = vld [vmem:[%s6359_s17 + $0x160] sm:$0xf]  ;;  %1540 = vst.msk [vmem:[#allocation2 + $0xb4] sm:$0xf] %vm15_vm0, %v1459_v43  ;;  %v1461_v54 = vadd.f32 %v1380_v44, %v1218_v40 }
 0x146   : > { %v1382_v55 = vand.u32 2147483647, %v1301_v46  ;;  %v1221_v56 = vld [vmem:[#allocation2 + $0xc8] sm:$0xf]  ;;  %v1303_v57 = vsub.f32 %v5645_v53, %v6854_v50  ;;  %v5646_v58 = vld [vmem:[%s6359_s17 + $0x164] sm:$0xf]  ;;  %v1462_v25 = vadd.f32 %v1381_v49, %v1219_v45 }
 0x147   : > { %1541 = vst.msk [vmem:[#allocation2 + $0xb8] sm:$0xf] %vm15_vm0, %v1460_v48  ;;  %v1383_v59 = vand.u32 2147483647, %v1302_v52  ;;  %v1222_v60 = vld [vmem:[#allocation2 + $0xcc] sm:$0xf]  ;;  %v1304_v61 = vsub.f32 %v5646_v58, %v6854_v50 }
 0x148   : > { %v5647_v62 = vld [vmem:[%s6359_s17 + $0x168] sm:$0xf]  ;;  %1542 = vst.msk [vmem:[#allocation2 + $0xbc] sm:$0xf] %vm15_vm0, %v1461_v54  ;;  %v1463_v63 = vadd.f32 %v1382_v55, %v1220_v51  ;;  %v1384_v0 = vand.u32 2147483647, %v1303_v57 }
 0x149   : > { %v1223_v1 = vld [vmem:[#allocation2 + $0xd0] sm:$0xf]  ;;  %v1305_v3 = vsub.f32 %v5647_v62, %v6854_v50  ;;  %v5648_v4 = vld [vmem:[%s6359_s17 + $0x188] sm:$0xf]  ;;  %1543 = vst.msk [vmem:[#allocation2 + $0xc0] sm:$0xf] %vm15_vm0, %v1462_v25  ;;  %v1464_v5 = vadd.f32 %v1383_v59, %v1221_v56 }
 0x14a   : > { %v1385_v6 = vand.u32 2147483647, %v1304_v61  ;;  %v1224_v7 = vld [vmem:[#allocation2 + $0xd4] sm:$0xf]  ;;  %v1306_v8 = vsub.f32 %v5648_v4, %v6854_v50  ;;  %v5649_v9 = vld [vmem:[%s6359_s17 + $0x18c] sm:$0xf]  ;;  %v1465_v10 = vadd.f32 %v1384_v0, %v1222_v60 }
 0x14b   : > { %1544 = vst.msk [vmem:[#allocation2 + $0xc4] sm:$0xf] %vm15_vm0, %v1463_v63  ;;  %v1386_v11 = vand.u32 2147483647, %v1305_v3  ;;  %v1225_v12 = vld [vmem:[#allocation2 + $0xd8] sm:$0xf]  ;;  %v1307_v13 = vsub.f32 %v5649_v9, %v6854_v50 }
 0x14c   : > { %v5650_v14 = vld [vmem:[%s6359_s17 + $0x190] sm:$0xf]  ;;  %1545 = vst.msk [vmem:[#allocation2 + $0xc8] sm:$0xf] %vm15_vm0, %v1464_v5  ;;  %v1466_v15 = vadd.f32 %v1385_v6, %v1223_v1  ;;  %v1387_v16 = vand.u32 2147483647, %v1306_v8 }
 0x14d   : > { %v1226_v17 = vld [vmem:[#allocation2 + $0xdc] sm:$0xf]  ;;  %v1308_v18 = vsub.f32 %v5650_v14, %v6854_v50  ;;  %v5651_v19 = vld [vmem:[%s6359_s17 + $0x194] sm:$0xf]  ;;  %1546 = vst.msk [vmem:[#allocation2 + $0xcc] sm:$0xf] %vm15_vm0, %v1465_v10  ;;  %v1467_v20 = vadd.f32 %v1386_v11, %v1224_v7 }
 0x14e   : > { %v1388_v21 = vand.u32 2147483647, %v1307_v13  ;;  %v1227_v22 = vld [vmem:[#allocation2 + $0xe0] sm:$0xf]  ;;  %v1309_v23 = vsub.f32 %v5651_v19, %v6854_v50  ;;  %v5652_v24 = vld [vmem:[%s6359_s17 + $0x198] sm:$0xf]  ;;  %v1468_v26 = vadd.f32 %v1387_v16, %v1225_v12 }
 0x14f   : > { %1547 = vst.msk [vmem:[#allocation2 + $0xd0] sm:$0xf] %vm15_vm0, %v1466_v15  ;;  %v1389_v27 = vand.u32 2147483647, %v1308_v18  ;;  %v1228_v28 = vld [vmem:[#allocation2 + $0xe4] sm:$0xf]  ;;  %v1310_v29 = vsub.f32 %v5652_v24, %v6854_v50 }
 0x150   : > { %v5653_v30 = vld [vmem:[%s6359_s17 + $0x19c] sm:$0xf]  ;;  %1548 = vst.msk [vmem:[#allocation2 + $0xd4] sm:$0xf] %vm15_vm0, %v1467_v20  ;;  %v1469_v31 = vadd.f32 %v1388_v21, %v1226_v17  ;;  %v1390_v2 = vand.u32 2147483647, %v1309_v23 }
 0x151   : > { %v1229_v32 = vld [vmem:[#allocation2 + $0xe8] sm:$0xf]  ;;  %v1311_v33 = vsub.f32 %v5653_v30, %v6854_v50  ;;  %v5654_v34 = vld [vmem:[%s6359_s17 + $0x1a0] sm:$0xf]  ;;  %1549 = vst.msk [vmem:[#allocation2 + $0xd8] sm:$0xf] %vm15_vm0, %v1468_v26  ;;  %v1470_v35 = vadd.f32 %v1389_v27, %v1227_v22 }
 0x152   : > { %v1391_v36 = vand.u32 2147483647, %v1310_v29  ;;  %v1230_v37 = vld [vmem:[#allocation2 + $0xec] sm:$0xf]  ;;  %v1312_v38 = vsub.f32 %v5654_v34, %v6854_v50  ;;  %v5655_v39 = vld [vmem:[%s6359_s17 + $0x1a4] sm:$0xf]  ;;  %v1471_v40 = vadd.f32 %v1390_v2, %v1228_v28 }
 0x153   : > { %1550 = vst.msk [vmem:[#allocation2 + $0xdc] sm:$0xf] %vm15_vm0, %v1469_v31  ;;  %v1392_v41 = vand.u32 2147483647, %v1311_v33  ;;  %v1231_v42 = vld [vmem:[#allocation2 + $0xf0] sm:$0xf]  ;;  %v1313_v43 = vsub.f32 %v5655_v39, %v6854_v50 }
 0x154   : > { %v5656_v44 = vld [vmem:[%s6359_s17 + $0x1a8] sm:$0xf]  ;;  %1551 = vst.msk [vmem:[#allocation2 + $0xe0] sm:$0xf] %vm15_vm0, %v1470_v35  ;;  %v1472_v45 = vadd.f32 %v1391_v36, %v1229_v32  ;;  %v1393_v46 = vand.u32 2147483647, %v1312_v38 }
 0x155   : > { %v1232_v47 = vld [vmem:[#allocation2 + $0xf4] sm:$0xf]  ;;  %v1314_v48 = vsub.f32 %v5656_v44, %v6854_v50  ;;  %v5657_v49 = vld [vmem:[%s6359_s17 + $0x1c8] sm:$0xf]  ;;  %1552 = vst.msk [vmem:[#allocation2 + $0xe4] sm:$0xf] %vm15_vm0, %v1471_v40  ;;  %v1473_v51 = vadd.f32 %v1392_v41, %v1230_v37 }
 0x156   : > { %v1394_v52 = vand.u32 2147483647, %v1313_v43  ;;  %v1233_v53 = vld [vmem:[#allocation2 + $0xf8] sm:$0xf]  ;;  %v1315_v54 = vsub.f32 %v5657_v49, %v6854_v50  ;;  %v5658_v55 = vld [vmem:[%s6359_s17 + $0x1cc] sm:$0xf]  ;;  %v1474_v56 = vadd.f32 %v1393_v46, %v1231_v42 }
 0x157   : > { %1553 = vst.msk [vmem:[#allocation2 + $0xe8] sm:$0xf] %vm15_vm0, %v1472_v45  ;;  %v1395_v57 = vand.u32 2147483647, %v1314_v48  ;;  %v1234_v58 = vld [vmem:[#allocation2 + $0xfc] sm:$0xf]  ;;  %v1316_v25 = vsub.f32 %v5658_v55, %v6854_v50 }
 0x158   : > { %v5659_v59 = vld [vmem:[%s6359_s17 + $0x1d0] sm:$0xf]  ;;  %1554 = vst.msk [vmem:[#allocation2 + $0xec] sm:$0xf] %vm15_vm0, %v1473_v51  ;;  %v1475_v60 = vadd.f32 %v1394_v52, %v1232_v47  ;;  %v1396_v61 = vand.u32 2147483647, %v1315_v54 }
 0x159   : > { %v1235_v62 = vld [vmem:[#allocation2 + $0x100] sm:$0xf]  ;;  %v1317_v63 = vsub.f32 %v5659_v59, %v6854_v50  ;;  %v5660_v0 = vld [vmem:[%s6359_s17 + $0x1d4] sm:$0xf]  ;;  %1555 = vst.msk [vmem:[#allocation2 + $0xf0] sm:$0xf] %vm15_vm0, %v1474_v56  ;;  %v1476_v1 = vadd.f32 %v1395_v57, %v1233_v53 }
 0x15a   : > { %v1397_v3 = vand.u32 2147483647, %v1316_v25  ;;  %v1236_v4 = vld [vmem:[#allocation2 + $0x104] sm:$0xf]  ;;  %v1318_v5 = vsub.f32 %v5660_v0, %v6854_v50  ;;  %v5661_v6 = vld [vmem:[%s6359_s17 + $0x1d8] sm:$0xf]  ;;  %v1477_v7 = vadd.f32 %v1396_v61, %v1234_v58 }
 0x15b   : > { %1556 = vst.msk [vmem:[#allocation2 + $0xf4] sm:$0xf] %vm15_vm0, %v1475_v60  ;;  %v1398_v8 = vand.u32 2147483647, %v1317_v63  ;;  %v1237_v9 = vld [vmem:[#allocation2 + $0x108] sm:$0xf]  ;;  %v1319_v10 = vsub.f32 %v5661_v6, %v6854_v50 }
 0x15c   : > { %v5662_v11 = vld [vmem:[%s6359_s17 + $0x1dc] sm:$0xf]  ;;  %1557 = vst.msk [vmem:[#allocation2 + $0xf8] sm:$0xf] %vm15_vm0, %v1476_v1  ;;  %v1478_v12 = vadd.f32 %v1397_v3, %v1235_v62  ;;  %v1399_v13 = vand.u32 2147483647, %v1318_v5 }
 0x15d   : > { %v1238_v14 = vld [vmem:[#allocation2 + $0x10c] sm:$0xf]  ;;  %v1320_v15 = vsub.f32 %v5662_v11, %v6854_v50  ;;  %v5663_v16 = vld [vmem:[%s6359_s17 + $0x1e0] sm:$0xf]  ;;  %1558 = vst.msk [vmem:[#allocation2 + $0xfc] sm:$0xf] %vm15_vm0, %v1477_v7  ;;  %v1479_v17 = vadd.f32 %v1398_v8, %v1236_v4 }
 0x15e   : > { %v1400_v18 = vand.u32 2147483647, %v1319_v10  ;;  %v1239_v19 = vld [vmem:[#allocation2 + $0x110] sm:$0xf]  ;;  %v1321_v20 = vsub.f32 %v5663_v16, %v6854_v50  ;;  %v5664_v21 = vld [vmem:[%s6359_s17 + $0x1e4] sm:$0xf]  ;;  %v1480_v22 = vadd.f32 %v1399_v13, %v1237_v9 }
 0x15f   : > { %1559 = vst.msk [vmem:[#allocation2 + $0x100] sm:$0xf] %vm15_vm0, %v1478_v12  ;;  %v1401_v23 = vand.u32 2147483647, %v1320_v15  ;;  %v1240_v24 = vld [vmem:[#allocation2 + $0x114] sm:$0xf]  ;;  %v1322_v26 = vsub.f32 %v5664_v21, %v6854_v50 }
 0x160   : > { %v5665_v27 = vld [vmem:[%s6359_s17 + $0x1e8] sm:$0xf]  ;;  %1560 = vst.msk [vmem:[#allocation2 + $0x104] sm:$0xf] %vm15_vm0, %v1479_v17  ;;  %v1481_v28 = vadd.f32 %v1400_v18, %v1238_v14  ;;  %v1402_v29 = vand.u32 2147483647, %v1321_v20 }
 0x161   : > { %v1241_v30 = vld [vmem:[#allocation2 + $0x118] sm:$0xf]  ;;  %v1323_v31 = vsub.f32 %v5665_v27, %v6854_v50  ;;  %v5666_v2 = vld [vmem:[%s6359_s17 + $0x208] sm:$0xf]  ;;  %1561 = vst.msk [vmem:[#allocation2 + $0x108] sm:$0xf] %vm15_vm0, %v1480_v22  ;;  %v1482_v32 = vadd.f32 %v1401_v23, %v1239_v19 }
 0x162   : > { %v1403_v33 = vand.u32 2147483647, %v1322_v26  ;;  %v1242_v34 = vld [vmem:[#allocation2 + $0x11c] sm:$0xf]  ;;  %v1324_v35 = vsub.f32 %v5666_v2, %v6854_v50  ;;  %v5667_v36 = vld [vmem:[%s6359_s17 + $0x20c] sm:$0xf]  ;;  %v1483_v37 = vadd.f32 %v1402_v29, %v1240_v24 }
 0x163   : > { %1562 = vst.msk [vmem:[#allocation2 + $0x10c] sm:$0xf] %vm15_vm0, %v1481_v28  ;;  %v1404_v38 = vand.u32 2147483647, %v1323_v31  ;;  %v1243_v39 = vld [vmem:[#allocation2 + $0x120] sm:$0xf]  ;;  %v1325_v40 = vsub.f32 %v5667_v36, %v6854_v50 }
 0x164   : > { %v5668_v41 = vld [vmem:[%s6359_s17 + $0x210] sm:$0xf]  ;;  %1563 = vst.msk [vmem:[#allocation2 + $0x110] sm:$0xf] %vm15_vm0, %v1482_v32  ;;  %v1484_v42 = vadd.f32 %v1403_v33, %v1241_v30  ;;  %v1405_v43 = vand.u32 2147483647, %v1324_v35 }
 0x165   : > { %v1244_v44 = vld [vmem:[#allocation2 + $0x124] sm:$0xf]  ;;  %v1326_v45 = vsub.f32 %v5668_v41, %v6854_v50  ;;  %v5669_v46 = vld [vmem:[%s6359_s17 + $0x214] sm:$0xf]  ;;  %1564 = vst.msk [vmem:[#allocation2 + $0x114] sm:$0xf] %vm15_vm0, %v1483_v37  ;;  %v1485_v47 = vadd.f32 %v1404_v38, %v1242_v34 }
 0x166   : > { %v1406_v48 = vand.u32 2147483647, %v1325_v40  ;;  %v1245_v49 = vld [vmem:[#allocation2 + $0x128] sm:$0xf]  ;;  %v1327_v51 = vsub.f32 %v5669_v46, %v6854_v50  ;;  %v5670_v52 = vld [vmem:[%s6359_s17 + $0x218] sm:$0xf]  ;;  %v1486_v53 = vadd.f32 %v1405_v43, %v1243_v39 }
 0x167   : > { %1565 = vst.msk [vmem:[#allocation2 + $0x118] sm:$0xf] %vm15_vm0, %v1484_v42  ;;  %v1407_v54 = vand.u32 2147483647, %v1326_v45  ;;  %v1246_v55 = vld [vmem:[#allocation2 + $0x12c] sm:$0xf]  ;;  %v1328_v56 = vsub.f32 %v5670_v52, %v6854_v50 }
 0x168   : > { %v5671_v57 = vld [vmem:[%s6359_s17 + $0x21c] sm:$0xf]  ;;  %1566 = vst.msk [vmem:[#allocation2 + $0x11c] sm:$0xf] %vm15_vm0, %v1485_v47  ;;  %v1487_v58 = vadd.f32 %v1406_v48, %v1244_v44  ;;  %v1408_v25 = vand.u32 2147483647, %v1327_v51 }
 0x169   : > { %v1247_v59 = vld [vmem:[#allocation2 + $0x130] sm:$0xf]  ;;  %v1329_v60 = vsub.f32 %v5671_v57, %v6854_v50  ;;  %v5672_v61 = vld [vmem:[%s6359_s17 + $0x220] sm:$0xf]  ;;  %1567 = vst.msk [vmem:[#allocation2 + $0x120] sm:$0xf] %vm15_vm0, %v1486_v53  ;;  %v1488_v62 = vadd.f32 %v1407_v54, %v1245_v49 }
 0x16a   : > { %v1409_v63 = vand.u32 2147483647, %v1328_v56  ;;  %v1248_v0 = vld [vmem:[#allocation2 + $0x134] sm:$0xf]  ;;  %v1330_v1 = vsub.f32 %v5672_v61, %v6854_v50  ;;  %v5673_v3 = vld [vmem:[%s6359_s17 + $0x224] sm:$0xf]  ;;  %v1489_v4 = vadd.f32 %v1408_v25, %v1246_v55 }
 0x16b   : > { %1568 = vst.msk [vmem:[#allocation2 + $0x124] sm:$0xf] %vm15_vm0, %v1487_v58  ;;  %v1410_v5 = vand.u32 2147483647, %v1329_v60  ;;  %v1249_v6 = vld [vmem:[#allocation2 + $0x138] sm:$0xf]  ;;  %v1331_v7 = vsub.f32 %v5673_v3, %v6854_v50 }
 0x16c   : > { %v5674_v8 = vld [vmem:[%s6359_s17 + $0x228] sm:$0xf]  ;;  %1569 = vst.msk [vmem:[#allocation2 + $0x128] sm:$0xf] %vm15_vm0, %v1488_v62  ;;  %v1490_v9 = vadd.f32 %v1409_v63, %v1247_v59  ;;  %v1411_v10 = vand.u32 2147483647, %v1330_v1 }
 0x16d   : > { %v1250_v11 = vld [vmem:[#allocation2 + $0x13c] sm:$0xf]  ;;  %v1332_v12 = vsub.f32 %v5674_v8, %v6854_v50  ;;  %v5678_v13 = vld [vmem:[%s6359_s17 + $0xc] sm:$0xf]  ;;  %1570 = vst.msk [vmem:[#allocation2 + $0x12c] sm:$0xf] %vm15_vm0, %v1489_v4  ;;  %v1491_v14 = vadd.f32 %v1410_v5, %v1248_v0 }
 0x16e   : > { %v1412_v15 = vand.u32 2147483647, %v1331_v7  ;;  %v1251_v16 = vld [vmem:[#allocation2 + $0x140] sm:$0xf]  ;;  %v7101_v17 = vld [vmem:[%s6364_s20 + $0xc] sm:$0xf]  ;;  %v1492_v18 = vadd.f32 %v1411_v10, %v1249_v6 }
 0x16f   : > { %1571 = vst.msk [vmem:[#allocation2 + $0x130] sm:$0xf] %vm15_vm0, %v1490_v9  ;;  %v1413_v19 = vand.u32 2147483647, %v1332_v12  ;;  %v1662_v20 = vld [vmem:[#allocation2] sm:$0xf]  ;;  %v1743_v21 = vsub.f32 %v5678_v13, %v7101_v17 }
 0x170   : > { %v5679_v22 = vld [vmem:[%s6359_s17 + $0x10] sm:$0xf]  ;;  %1572 = vst.msk [vmem:[#allocation2 + $0x134] sm:$0xf] %vm15_vm0, %v1491_v14  ;;  %v1493_v50 = vadd.f32 %v1412_v15, %v1250_v11  ;;  %v1663_v23 = vld [vmem:[#allocation2 + $0x4] sm:$0xf] }
 0x171   : > { %v1744_v24 = vsub.f32 %v5679_v22, %v7101_v17  ;;  %v5680_v26 = vld [vmem:[%s6359_s17 + $0x14] sm:$0xf]  ;;  %v5681_v27 = vld [vmem:[%s6359_s17 + $0x18] sm:$0xf]  ;;  %1573 = vst.msk [vmem:[#allocation2 + $0x138] sm:$0xf] %vm15_vm0, %v1492_v18  ;;  %v1494_v28 = vadd.f32 %v1413_v19, %v1251_v16 }
 0x172   : > { %v1824_v29 = vand.u32 2147483647, %v1743_v21  ;;  %v1664_v30 = vld [vmem:[#allocation2 + $0x8] sm:$0xf]  ;;  %v1745_v31 = vsub.f32 %v5680_v26, %v7101_v17  ;;  %v1746_v2 = vsub.f32 %v5681_v27, %v7101_v17  ;;  %v5682_v32 = vld [vmem:[%s6359_s17 + $0x1c] sm:$0xf] }
 0x173   : > { %1574 = vst.msk [vmem:[#allocation2 + $0x13c] sm:$0xf] %vm15_vm0, %v1493_v50  ;;  %v1825_v33 = vand.u32 2147483647, %v1744_v24  ;;  %v1665_v34 = vld [vmem:[#allocation2 + $0xc] sm:$0xf]  ;;  %v1747_v35 = vsub.f32 %v5682_v32, %v7101_v17 }
 0x174   : > { %v5683_v36 = vld [vmem:[%s6359_s17 + $0x20] sm:$0xf]  ;;  %1575 = vst.msk [vmem:[#allocation2 + $0x140] sm:$0xf] %vm15_vm0, %v1494_v28  ;;  %v1905_v37 = vadd.f32 %v1824_v29, %v1662_v20  ;;  %v1826_v38 = vand.u32 2147483647, %v1745_v31 }
 0x175   : > { %v1827_v39 = vand.u32 2147483647, %v1746_v2  ;;  %v1666_v40 = vld [vmem:[#allocation2 + $0x10] sm:$0xf]  ;;  %v1748_v41 = vsub.f32 %v5683_v36, %v7101_v17  ;;  %v1906_v42 = vadd.f32 %v1825_v33, %v1663_v23  ;;  %v1828_v43 = vand.u32 2147483647, %v1747_v35 }
 0x176   : > { %v1667_v44 = vld [vmem:[#allocation2 + $0x14] sm:$0xf]  ;;  %v5684_v45 = vld [vmem:[%s6359_s17 + $0x24] sm:$0xf]  ;;  %1986 = vst.msk [vmem:[#allocation2] sm:$0xf] %vm15_vm0, %v1905_v37  ;;  %v1907_v46 = vadd.f32 %v1826_v38, %v1664_v30 }
 0x177   : > { %v1908_v47 = vadd.f32 %v1827_v39, %v1665_v34  ;;  %v1829_v48 = vand.u32 2147483647, %v1748_v41  ;;  %v1668_v49 = vld [vmem:[#allocation2 + $0x18] sm:$0xf]  ;;  %v1749_v51 = vsub.f32 %v5684_v45, %v7101_v17  ;;  %v5685_v52 = vld [vmem:[%s6359_s17 + $0x28] sm:$0xf]  ;;  %v1909_v53 = vadd.f32 %v1828_v43, %v1666_v40 }
 0x178   : > { %1987 = vst.msk [vmem:[#allocation2 + $0x4] sm:$0xf] %vm15_vm0, %v1906_v42  ;;  %v1669_v54 = vld [vmem:[#allocation2 + $0x1c] sm:$0xf]  ;;  %v1750_v55 = vsub.f32 %v5685_v52, %v7101_v17  ;;  %v5686_v56 = vld [vmem:[%s6359_s17 + $0x2c] sm:$0xf] }
 0x179   : > { %v5687_v57 = vld [vmem:[%s6359_s17 + $0x4c] sm:$0xf]  ;;  %1988 = vst.msk [vmem:[#allocation2 + $0x8] sm:$0xf] %vm15_vm0, %v1907_v46  ;;  %1989 = vst.msk [vmem:[#allocation2 + $0xc] sm:$0xf] %vm15_vm0, %v1908_v47  ;;  %v1910_v58 = vadd.f32 %v1829_v48, %v1667_v44  ;;  %v1751_v60 = vsub.f32 %v5686_v56, %v7101_v17 }
 0x17a   : > { %v1830_v25 = vand.u32 2147483647, %v1749_v51  ;;  %v1670_v59 = vld [vmem:[#allocation2 + $0x20] sm:$0xf]  ;;  %v1752_v61 = vsub.f32 %v5687_v57, %v7101_v17  ;;  %v5688_v62 = vld [vmem:[%s6359_s17 + $0x50] sm:$0xf] }
 0x17b   : > { %1990 = vst.msk [vmem:[#allocation2 + $0x10] sm:$0xf] %vm15_vm0, %v1909_v53  ;;  %v1831_v63 = vand.u32 2147483647, %v1750_v55  ;;  %v1671_v0 = vld [vmem:[#allocation2 + $0x24] sm:$0xf]  ;;  %v1753_v1 = vsub.f32 %v5688_v62, %v7101_v17 }
 0x17c   : > { %v5689_v3 = vld [vmem:[%s6359_s17 + $0x54] sm:$0xf]  ;;  %1991 = vst.msk [vmem:[#allocation2 + $0x14] sm:$0xf] %vm15_vm0, %v1910_v58  ;;  %v1911_v4 = vadd.f32 %v1830_v25, %v1668_v49  ;;  %v1832_v5 = vand.u32 2147483647, %v1751_v60 }
 0x17d   : > { %v1833_v6 = vand.u32 2147483647, %v1752_v61  ;;  %v1672_v7 = vld [vmem:[#allocation2 + $0x28] sm:$0xf]  ;;  %v1754_v8 = vsub.f32 %v5689_v3, %v7101_v17  ;;  %v1912_v9 = vadd.f32 %v1831_v63, %v1669_v54  ;;  %v1834_v10 = vand.u32 2147483647, %v1753_v1 }
 0x17e   : > { %v1673_v11 = vld [vmem:[#allocation2 + $0x2c] sm:$0xf]  ;;  %v5690_v12 = vld [vmem:[%s6359_s17 + $0x58] sm:$0xf]  ;;  %1992 = vst.msk [vmem:[#allocation2 + $0x18] sm:$0xf] %vm15_vm0, %v1911_v4  ;;  %v1913_v13 = vadd.f32 %v1832_v5, %v1670_v59 }
 0x17f   : > { %v1914_v14 = vadd.f32 %v1833_v6, %v1671_v0  ;;  %v1835_v15 = vand.u32 2147483647, %v1754_v8  ;;  %v1674_v16 = vld [vmem:[#allocation2 + $0x30] sm:$0xf]  ;;  %v1755_v18 = vsub.f32 %v5690_v12, %v7101_v17  ;;  %v5691_v19 = vld [vmem:[%s6359_s17 + $0x5c] sm:$0xf]  ;;  %v1915_v20 = vadd.f32 %v1834_v10, %v1672_v7 }
 0x180   : > { %1993 = vst.msk [vmem:[#allocation2 + $0x1c] sm:$0xf] %vm15_vm0, %v1912_v9  ;;  %v1675_v21 = vld [vmem:[#allocation2 + $0x34] sm:$0xf]  ;;  %v1756_v22 = vsub.f32 %v5691_v19, %v7101_v17  ;;  %v5692_v50 = vld [vmem:[%s6359_s17 + $0x60] sm:$0xf] }
 0x181   : > { %v5693_v23 = vld [vmem:[%s6359_s17 + $0x64] sm:$0xf]  ;;  %1994 = vst.msk [vmem:[#allocation2 + $0x20] sm:$0xf] %vm15_vm0, %v1913_v13  ;;  %1995 = vst.msk [vmem:[#allocation2 + $0x24] sm:$0xf] %vm15_vm0, %v1914_v14  ;;  %v1916_v24 = vadd.f32 %v1835_v15, %v1673_v11  ;;  %v1757_v28 = vsub.f32 %v5692_v50, %v7101_v17 }
 0x182   : > { %v1836_v26 = vand.u32 2147483647, %v1755_v18  ;;  %v1676_v27 = vld [vmem:[#allocation2 + $0x38] sm:$0xf]  ;;  %v1758_v29 = vsub.f32 %v5693_v23, %v7101_v17  ;;  %v5694_v30 = vld [vmem:[%s6359_s17 + $0x68] sm:$0xf] }
 0x183   : > { %1996 = vst.msk [vmem:[#allocation2 + $0x28] sm:$0xf] %vm15_vm0, %v1915_v20  ;;  %v1837_v31 = vand.u32 2147483647, %v1756_v22  ;;  %v1677_v2 = vld [vmem:[#allocation2 + $0x3c] sm:$0xf]  ;;  %v1759_v32 = vsub.f32 %v5694_v30, %v7101_v17 }
 0x184   : > { %v5695_v33 = vld [vmem:[%s6359_s17 + $0x6c] sm:$0xf]  ;;  %1997 = vst.msk [vmem:[#allocation2 + $0x2c] sm:$0xf] %vm15_vm0, %v1916_v24  ;;  %v1917_v34 = vadd.f32 %v1836_v26, %v1674_v16  ;;  %v1838_v35 = vand.u32 2147483647, %v1757_v28 }
 0x185   : > { %v1839_v36 = vand.u32 2147483647, %v1758_v29  ;;  %v1678_v37 = vld [vmem:[#allocation2 + $0x40] sm:$0xf]  ;;  %v1760_v38 = vsub.f32 %v5695_v33, %v7101_v17  ;;  %v1918_v39 = vadd.f32 %v1837_v31, %v1675_v21  ;;  %v1840_v40 = vand.u32 2147483647, %v1759_v32 }
 0x186   : > { %v1679_v41 = vld [vmem:[#allocation2 + $0x44] sm:$0xf]  ;;  %v5696_v42 = vld [vmem:[%s6359_s17 + $0x8c] sm:$0xf]  ;;  %1998 = vst.msk [vmem:[#allocation2 + $0x30] sm:$0xf] %vm15_vm0, %v1917_v34  ;;  %v1919_v43 = vadd.f32 %v1838_v35, %v1676_v27 }
 0x187   : > { %v1920_v44 = vadd.f32 %v1839_v36, %v1677_v2  ;;  %v1841_v45 = vand.u32 2147483647, %v1760_v38  ;;  %v1680_v46 = vld [vmem:[#allocation2 + $0x48] sm:$0xf]  ;;  %v1761_v47 = vsub.f32 %v5696_v42, %v7101_v17  ;;  %v5697_v48 = vld [vmem:[%s6359_s17 + $0x90] sm:$0xf]  ;;  %v1921_v49 = vadd.f32 %v1840_v40, %v1678_v37 }
 0x188   : > { %1999 = vst.msk [vmem:[#allocation2 + $0x34] sm:$0xf] %vm15_vm0, %v1918_v39  ;;  %v1681_v51 = vld [vmem:[#allocation2 + $0x4c] sm:$0xf]  ;;  %v1762_v52 = vsub.f32 %v5697_v48, %v7101_v17  ;;  %v5698_v53 = vld [vmem:[%s6359_s17 + $0x94] sm:$0xf] }
 0x189   : > { %v5699_v54 = vld [vmem:[%s6359_s17 + $0x98] sm:$0xf]  ;;  %2000 = vst.msk [vmem:[#allocation2 + $0x38] sm:$0xf] %vm15_vm0, %v1919_v43  ;;  %2001 = vst.msk [vmem:[#allocation2 + $0x3c] sm:$0xf] %vm15_vm0, %v1920_v44  ;;  %v1922_v55 = vadd.f32 %v1841_v45, %v1679_v41  ;;  %v1763_v58 = vsub.f32 %v5698_v53, %v7101_v17 }
 0x18a   : > { %v1842_v56 = vand.u32 2147483647, %v1761_v47  ;;  %v1682_v57 = vld [vmem:[#allocation2 + $0x50] sm:$0xf]  ;;  %v1764_v25 = vsub.f32 %v5699_v54, %v7101_v17  ;;  %v5700_v59 = vld [vmem:[%s6359_s17 + $0x9c] sm:$0xf] }
 0x18b   : > { %2002 = vst.msk [vmem:[#allocation2 + $0x40] sm:$0xf] %vm15_vm0, %v1921_v49  ;;  %v1843_v60 = vand.u32 2147483647, %v1762_v52  ;;  %v1683_v61 = vld [vmem:[#allocation2 + $0x54] sm:$0xf]  ;;  %v1765_v62 = vsub.f32 %v5700_v59, %v7101_v17 }
 0x18c   : > { %v5701_v63 = vld [vmem:[%s6359_s17 + $0xa0] sm:$0xf]  ;;  %2003 = vst.msk [vmem:[#allocation2 + $0x44] sm:$0xf] %vm15_vm0, %v1922_v55  ;;  %v1923_v0 = vadd.f32 %v1842_v56, %v1680_v46  ;;  %v1844_v1 = vand.u32 2147483647, %v1763_v58 }
 0x18d   : > { %v1845_v3 = vand.u32 2147483647, %v1764_v25  ;;  %v1684_v4 = vld [vmem:[#allocation2 + $0x58] sm:$0xf]  ;;  %v1766_v5 = vsub.f32 %v5701_v63, %v7101_v17  ;;  %v1924_v6 = vadd.f32 %v1843_v60, %v1681_v51  ;;  %v1846_v7 = vand.u32 2147483647, %v1765_v62 }
 0x18e   : > { %v1685_v8 = vld [vmem:[#allocation2 + $0x5c] sm:$0xf]  ;;  %v5702_v9 = vld [vmem:[%s6359_s17 + $0xa4] sm:$0xf]  ;;  %2004 = vst.msk [vmem:[#allocation2 + $0x48] sm:$0xf] %vm15_vm0, %v1923_v0  ;;  %v1925_v10 = vadd.f32 %v1844_v1, %v1682_v57 }
 0x18f   : > { %v1926_v11 = vadd.f32 %v1845_v3, %v1683_v61  ;;  %v1847_v12 = vand.u32 2147483647, %v1766_v5  ;;  %v1686_v13 = vld [vmem:[#allocation2 + $0x60] sm:$0xf]  ;;  %v1767_v14 = vsub.f32 %v5702_v9, %v7101_v17  ;;  %v5703_v15 = vld [vmem:[%s6359_s17 + $0xa8] sm:$0xf]  ;;  %v1927_v16 = vadd.f32 %v1846_v7, %v1684_v4 }
 0x190   : > { %2005 = vst.msk [vmem:[#allocation2 + $0x4c] sm:$0xf] %vm15_vm0, %v1924_v6  ;;  %v1687_v18 = vld [vmem:[#allocation2 + $0x64] sm:$0xf]  ;;  %v1768_v19 = vsub.f32 %v5703_v15, %v7101_v17  ;;  %v5704_v20 = vld [vmem:[%s6359_s17 + $0xac] sm:$0xf] }
 0x191   : > { %v5705_v21 = vld [vmem:[%s6359_s17 + $0xcc] sm:$0xf]  ;;  %2006 = vst.msk [vmem:[#allocation2 + $0x50] sm:$0xf] %vm15_vm0, %v1925_v10  ;;  %2007 = vst.msk [vmem:[#allocation2 + $0x54] sm:$0xf] %vm15_vm0, %v1926_v11  ;;  %v1928_v22 = vadd.f32 %v1847_v12, %v1685_v8  ;;  %v1769_v24 = vsub.f32 %v5704_v20, %v7101_v17 }
 0x192   : > { %v1848_v50 = vand.u32 2147483647, %v1767_v14  ;;  %v1688_v23 = vld [vmem:[#allocation2 + $0x68] sm:$0xf]  ;;  %v1770_v26 = vsub.f32 %v5705_v21, %v7101_v17  ;;  %v5706_v27 = vld [vmem:[%s6359_s17 + $0xd0] sm:$0xf] }
 0x193   : > { %2008 = vst.msk [vmem:[#allocation2 + $0x58] sm:$0xf] %vm15_vm0, %v1927_v16  ;;  %v1849_v28 = vand.u32 2147483647, %v1768_v19  ;;  %v1689_v29 = vld [vmem:[#allocation2 + $0x6c] sm:$0xf]  ;;  %v1771_v30 = vsub.f32 %v5706_v27, %v7101_v17 }
 0x194   : > { %v5707_v31 = vld [vmem:[%s6359_s17 + $0xd4] sm:$0xf]  ;;  %2009 = vst.msk [vmem:[#allocation2 + $0x5c] sm:$0xf] %vm15_vm0, %v1928_v22  ;;  %v1929_v2 = vadd.f32 %v1848_v50, %v1686_v13  ;;  %v1850_v32 = vand.u32 2147483647, %v1769_v24 }
 0x195   : > { %v1851_v33 = vand.u32 2147483647, %v1770_v26  ;;  %v1690_v34 = vld [vmem:[#allocation2 + $0x70] sm:$0xf]  ;;  %v1772_v35 = vsub.f32 %v5707_v31, %v7101_v17  ;;  %v1930_v36 = vadd.f32 %v1849_v28, %v1687_v18  ;;  %v1852_v37 = vand.u32 2147483647, %v1771_v30 }
 0x196   : > { %v1691_v38 = vld [vmem:[#allocation2 + $0x74] sm:$0xf]  ;;  %v5708_v39 = vld [vmem:[%s6359_s17 + $0xd8] sm:$0xf]  ;;  %2010 = vst.msk [vmem:[#allocation2 + $0x60] sm:$0xf] %vm15_vm0, %v1929_v2  ;;  %v1931_v40 = vadd.f32 %v1850_v32, %v1688_v23 }
 0x197   : > { %v1932_v41 = vadd.f32 %v1851_v33, %v1689_v29  ;;  %v1853_v42 = vand.u32 2147483647, %v1772_v35  ;;  %v1692_v43 = vld [vmem:[#allocation2 + $0x78] sm:$0xf]  ;;  %v1773_v44 = vsub.f32 %v5708_v39, %v7101_v17  ;;  %v5709_v45 = vld [vmem:[%s6359_s17 + $0xdc] sm:$0xf]  ;;  %v1933_v46 = vadd.f32 %v1852_v37, %v1690_v34 }
 0x198   : > { %2011 = vst.msk [vmem:[#allocation2 + $0x64] sm:$0xf] %vm15_vm0, %v1930_v36  ;;  %v1693_v47 = vld [vmem:[#allocation2 + $0x7c] sm:$0xf]  ;;  %v1774_v48 = vsub.f32 %v5709_v45, %v7101_v17  ;;  %v5710_v49 = vld [vmem:[%s6359_s17 + $0xe0] sm:$0xf] }
 0x199   : > { %v5711_v51 = vld [vmem:[%s6359_s17 + $0xe4] sm:$0xf]  ;;  %2012 = vst.msk [vmem:[#allocation2 + $0x68] sm:$0xf] %vm15_vm0, %v1931_v40  ;;  %2013 = vst.msk [vmem:[#allocation2 + $0x6c] sm:$0xf] %vm15_vm0, %v1932_v41  ;;  %v1934_v52 = vadd.f32 %v1853_v42, %v1691_v38  ;;  %v1775_v55 = vsub.f32 %v5710_v49, %v7101_v17 }
 0x19a   : > { %v1854_v53 = vand.u32 2147483647, %v1773_v44  ;;  %v1694_v54 = vld [vmem:[#allocation2 + $0x80] sm:$0xf]  ;;  %v1776_v56 = vsub.f32 %v5711_v51, %v7101_v17  ;;  %v5712_v57 = vld [vmem:[%s6359_s17 + $0xe8] sm:$0xf] }
 0x19b   : > { %2014 = vst.msk [vmem:[#allocation2 + $0x70] sm:$0xf] %vm15_vm0, %v1933_v46  ;;  %v1855_v58 = vand.u32 2147483647, %v1774_v48  ;;  %v1695_v25 = vld [vmem:[#allocation2 + $0x84] sm:$0xf]  ;;  %v1777_v59 = vsub.f32 %v5712_v57, %v7101_v17 }
 0x19c   : > { %v5713_v60 = vld [vmem:[%s6359_s17 + $0xec] sm:$0xf]  ;;  %2015 = vst.msk [vmem:[#allocation2 + $0x74] sm:$0xf] %vm15_vm0, %v1934_v52  ;;  %v1935_v61 = vadd.f32 %v1854_v53, %v1692_v43  ;;  %v1856_v62 = vand.u32 2147483647, %v1775_v55 }
 0x19d   : > { %v1857_v63 = vand.u32 2147483647, %v1776_v56  ;;  %v1696_v0 = vld [vmem:[#allocation2 + $0x88] sm:$0xf]  ;;  %v1778_v1 = vsub.f32 %v5713_v60, %v7101_v17  ;;  %v1936_v3 = vadd.f32 %v1855_v58, %v1693_v47  ;;  %v1858_v4 = vand.u32 2147483647, %v1777_v59 }
 0x19e   : > { %v1697_v5 = vld [vmem:[#allocation2 + $0x8c] sm:$0xf]  ;;  %2016 = vst.msk [vmem:[#allocation2 + $0x78] sm:$0xf] %vm15_vm0, %v1935_v61  ;;  %v1937_v7 = vadd.f32 %v1856_v62, %v1694_v54  ;;  %v1698_v10 = vld [vmem:[#allocation2 + $0x90] sm:$0xf] }
 0x19f   : > { %v5714_v6 = vld [vmem:[%s6359_s17 + $0x10c] sm:$0xf]  ;;  %v1938_v8 = vadd.f32 %v1857_v63, %v1695_v25  ;;  %v1859_v9 = vand.u32 2147483647, %v1778_v1  ;;  %v5715_v12 = vld [vmem:[%s6359_s17 + $0x110] sm:$0xf]  ;;  %v1939_v13 = vadd.f32 %v1858_v4, %v1696_v0 }
 0x1a0   : > { %v1779_v11 = vsub.f32 %v5714_v6, %v7101_v17  ;;  %2017 = vst.msk [vmem:[#allocation2 + $0x7c] sm:$0xf] %vm15_vm0, %v1936_v3  ;;  %v1699_v14 = vld [vmem:[#allocation2 + $0x94] sm:$0xf]  ;;  %v1780_v15 = vsub.f32 %v5715_v12, %v7101_v17  ;;  %v5717_v18 = vld [vmem:[%s6359_s17 + $0x118] sm:$0xf] }
 0x1a1   : > { %v5716_v16 = vld [vmem:[%s6359_s17 + $0x114] sm:$0xf]  ;;  %2018 = vst.msk [vmem:[#allocation2 + $0x80] sm:$0xf] %vm15_vm0, %v1937_v7  ;;  %2019 = vst.msk [vmem:[#allocation2 + $0x84] sm:$0xf] %vm15_vm0, %v1938_v8  ;;  %v1940_v19 = vadd.f32 %v1859_v9, %v1697_v5  ;;  %v1782_v50 = vsub.f32 %v5717_v18, %v7101_v17 }
 0x1a2   : > { %v1860_v20 = vand.u32 2147483647, %v1779_v11  ;;  %v1700_v21 = vld [vmem:[#allocation2 + $0x98] sm:$0xf]  ;;  %v1781_v22 = vsub.f32 %v5716_v16, %v7101_v17  ;;  %v5718_v23 = vld [vmem:[%s6359_s17 + $0x11c] sm:$0xf] }
 0x1a3   : > { %2020 = vst.msk [vmem:[#allocation2 + $0x88] sm:$0xf] %vm15_vm0, %v1939_v13  ;;  %v1861_v24 = vand.u32 2147483647, %v1780_v15  ;;  %v1701_v26 = vld [vmem:[#allocation2 + $0x9c] sm:$0xf]  ;;  %v1783_v27 = vsub.f32 %v5718_v23, %v7101_v17 }
 0x1a4   : > { %v5719_v28 = vld [vmem:[%s6359_s17 + $0x120] sm:$0xf]  ;;  %2021 = vst.msk [vmem:[#allocation2 + $0x8c] sm:$0xf] %vm15_vm0, %v1940_v19  ;;  %v1941_v29 = vadd.f32 %v1860_v20, %v1698_v10  ;;  %v1862_v30 = vand.u32 2147483647, %v1781_v22 }
 0x1a5   : > { %v1863_v31 = vand.u32 2147483647, %v1782_v50  ;;  %v1702_v2 = vld [vmem:[#allocation2 + $0xa0] sm:$0xf]  ;;  %v1784_v32 = vsub.f32 %v5719_v28, %v7101_v17  ;;  %v1942_v33 = vadd.f32 %v1861_v24, %v1699_v14  ;;  %v1864_v34 = vand.u32 2147483647, %v1783_v27 }
 0x1a6   : > { %v1703_v35 = vld [vmem:[#allocation2 + $0xa4] sm:$0xf]  ;;  %2022 = vst.msk [vmem:[#allocation2 + $0x90] sm:$0xf] %vm15_vm0, %v1941_v29  ;;  %v1943_v37 = vadd.f32 %v1862_v30, %v1700_v21  ;;  %v1704_v40 = vld [vmem:[#allocation2 + $0xa8] sm:$0xf] }
 0x1a7   : > { %v5720_v36 = vld [vmem:[%s6359_s17 + $0x124] sm:$0xf]  ;;  %v1944_v38 = vadd.f32 %v1863_v31, %v1701_v26  ;;  %v1865_v39 = vand.u32 2147483647, %v1784_v32  ;;  %v5721_v42 = vld [vmem:[%s6359_s17 + $0x128] sm:$0xf]  ;;  %v1945_v43 = vadd.f32 %v1864_v34, %v1702_v2 }
 0x1a8   : > { %v1785_v41 = vsub.f32 %v5720_v36, %v7101_v17  ;;  %2023 = vst.msk [vmem:[#allocation2 + $0x94] sm:$0xf] %vm15_vm0, %v1942_v33  ;;  %v1705_v44 = vld [vmem:[#allocation2 + $0xac] sm:$0xf]  ;;  %v1786_v45 = vsub.f32 %v5721_v42, %v7101_v17  ;;  %2024 = vst.msk [vmem:[#allocation2 + $0x98] sm:$0xf] %vm15_vm0, %v1943_v37 }
 0x1a9   : > { %v5722_v46 = vld [vmem:[%s6359_s17 + $0x12c] sm:$0xf]  ;;  %2025 = vst.msk [vmem:[#allocation2 + $0x9c] sm:$0xf] %vm15_vm0, %v1944_v38  ;;  %v1946_v48 = vadd.f32 %v1865_v39, %v1703_v35  ;;  %v1706_v51 = vld [vmem:[#allocation2 + $0xb0] sm:$0xf] }
 0x1aa   : > { %v5723_v47 = vld [vmem:[%s6359_s17 + $0x14c] sm:$0xf]  ;;  %v1866_v49 = vand.u32 2147483647, %v1785_v41  ;;  %v1787_v52 = vsub.f32 %v5722_v46, %v7101_v17  ;;  %v5724_v54 = vld [vmem:[%s6359_s17 + $0x150] sm:$0xf] }
 0x1ab   : > { %v1788_v53 = vsub.f32 %v5723_v47, %v7101_v17  ;;  %2026 = vst.msk [vmem:[#allocation2 + $0xa0] sm:$0xf] %vm15_vm0, %v1945_v43  ;;  %v1867_v55 = vand.u32 2147483647, %v1786_v45  ;;  %v1707_v56 = vld [vmem:[#allocation2 + $0xb4] sm:$0xf]  ;;  %v1789_v57 = vsub.f32 %v5724_v54, %v7101_v17 }
 0x1ac   : > { %v5725_v58 = vld [vmem:[%s6359_s17 + $0x154] sm:$0xf]  ;;  %2027 = vst.msk [vmem:[#allocation2 + $0xa4] sm:$0xf] %vm15_vm0, %v1946_v48  ;;  %v1947_v25 = vadd.f32 %v1866_v49, %v1704_v40  ;;  %v1868_v59 = vand.u32 2147483647, %v1787_v52 }
 0x1ad   : > { %v1869_v60 = vand.u32 2147483647, %v1788_v53  ;;  %v1708_v61 = vld [vmem:[#allocation2 + $0xb8] sm:$0xf]  ;;  %v1790_v62 = vsub.f32 %v5725_v58, %v7101_v17  ;;  %v1948_v63 = vadd.f32 %v1867_v55, %v1705_v44  ;;  %v1870_v0 = vand.u32 2147483647, %v1789_v57 }
 0x1ae   : > { %v1709_v1 = vld [vmem:[#allocation2 + $0xbc] sm:$0xf]  ;;  %v5726_v3 = vld [vmem:[%s6359_s17 + $0x158] sm:$0xf]  ;;  %2028 = vst.msk [vmem:[#allocation2 + $0xa8] sm:$0xf] %vm15_vm0, %v1947_v25  ;;  %v1949_v4 = vadd.f32 %v1868_v59, %v1706_v51 }
 0x1af   : > { %v1950_v5 = vadd.f32 %v1869_v60, %v1707_v56  ;;  %v1871_v6 = vand.u32 2147483647, %v1790_v62  ;;  %v1710_v7 = vld [vmem:[#allocation2 + $0xc0] sm:$0xf]  ;;  %v1791_v8 = vsub.f32 %v5726_v3, %v7101_v17  ;;  %v5727_v9 = vld [vmem:[%s6359_s17 + $0x15c] sm:$0xf]  ;;  %v1951_v10 = vadd.f32 %v1870_v0, %v1708_v61 }
 0x1b0   : > { %2029 = vst.msk [vmem:[#allocation2 + $0xac] sm:$0xf] %vm15_vm0, %v1948_v63  ;;  %v1711_v11 = vld [vmem:[#allocation2 + $0xc4] sm:$0xf]  ;;  %v1792_v12 = vsub.f32 %v5727_v9, %v7101_v17  ;;  %v5728_v13 = vld [vmem:[%s6359_s17 + $0x160] sm:$0xf] }
 0x1b1   : > { %v5729_v14 = vld [vmem:[%s6359_s17 + $0x164] sm:$0xf]  ;;  %2030 = vst.msk [vmem:[#allocation2 + $0xb0] sm:$0xf] %vm15_vm0, %v1949_v4  ;;  %2031 = vst.msk [vmem:[#allocation2 + $0xb4] sm:$0xf] %vm15_vm0, %v1950_v5  ;;  %v1952_v15 = vadd.f32 %v1871_v6, %v1709_v1  ;;  %v1793_v19 = vsub.f32 %v5728_v13, %v7101_v17 }
 0x1b2   : > { %v1872_v16 = vand.u32 2147483647, %v1791_v8  ;;  %v1712_v18 = vld [vmem:[#allocation2 + $0xc8] sm:$0xf]  ;;  %v1794_v20 = vsub.f32 %v5729_v14, %v7101_v17  ;;  %2032 = vst.msk [vmem:[#allocation2 + $0xb8] sm:$0xf] %vm15_vm0, %v1951_v10 }
 0x1b3   : > { %v5730_v21 = vld [vmem:[%s6359_s17 + $0x168] sm:$0xf]  ;;  %v1873_v22 = vand.u32 2147483647, %v1792_v12  ;;  %v1713_v50 = vld [vmem:[#allocation2 + $0xcc] sm:$0xf] }
 0x1b4   : > { %v1795_v23 = vsub.f32 %v5730_v21, %v7101_v17  ;;  %v5731_v24 = vld [vmem:[%s6359_s17 + $0x16c] sm:$0xf]  ;;  %2033 = vst.msk [vmem:[#allocation2 + $0xbc] sm:$0xf] %vm15_vm0, %v1952_v15  ;;  %v1953_v26 = vadd.f32 %v1872_v16, %v1710_v7  ;;  %v1874_v27 = vand.u32 2147483647, %v1793_v19 }
 0x1b5   : > { %v1875_v28 = vand.u32 2147483647, %v1794_v20  ;;  %v1714_v29 = vld [vmem:[#allocation2 + $0xd0] sm:$0xf]  ;;  %v1796_v30 = vsub.f32 %v5731_v24, %v7101_v17  ;;  %v1954_v31 = vadd.f32 %v1873_v22, %v1711_v11  ;;  %v1715_v32 = vld [vmem:[#allocation2 + $0xd4] sm:$0xf] }
 0x1b6   : > { %v1876_v2 = vand.u32 2147483647, %v1795_v23  ;;  %v5732_v33 = vld [vmem:[%s6359_s17 + $0x18c] sm:$0xf]  ;;  %2034 = vst.msk [vmem:[#allocation2 + $0xc0] sm:$0xf] %vm15_vm0, %v1953_v26  ;;  %v1955_v34 = vadd.f32 %v1874_v27, %v1712_v18 }
 0x1b7   : > { %v1956_v35 = vadd.f32 %v1875_v28, %v1713_v50  ;;  %v1877_v36 = vand.u32 2147483647, %v1796_v30  ;;  %v1716_v37 = vld [vmem:[#allocation2 + $0xd8] sm:$0xf]  ;;  %v1797_v38 = vsub.f32 %v5732_v33, %v7101_v17  ;;  %v5733_v39 = vld [vmem:[%s6359_s17 + $0x190] sm:$0xf] }
 0x1b8   : > { %2035 = vst.msk [vmem:[#allocation2 + $0xc4] sm:$0xf] %vm15_vm0, %v1954_v31  ;;  %v1957_v40 = vadd.f32 %v1876_v2, %v1714_v29  ;;  %v1717_v41 = vld [vmem:[#allocation2 + $0xdc] sm:$0xf]  ;;  %v1798_v42 = vsub.f32 %v5733_v39, %v7101_v17  ;;  %v5734_v43 = vld [vmem:[%s6359_s17 + $0x194] sm:$0xf] }
 0x1b9   : > { %v5735_v44 = vld [vmem:[%s6359_s17 + $0x198] sm:$0xf]  ;;  %2036 = vst.msk [vmem:[#allocation2 + $0xc8] sm:$0xf] %vm15_vm0, %v1955_v34  ;;  %2037 = vst.msk [vmem:[#allocation2 + $0xcc] sm:$0xf] %vm15_vm0, %v1956_v35  ;;  %v1958_v45 = vadd.f32 %v1877_v36, %v1715_v32  ;;  %v1799_v48 = vsub.f32 %v5734_v43, %v7101_v17 }
 0x1ba   : > { %v1878_v46 = vand.u32 2147483647, %v1797_v38  ;;  %v1718_v47 = vld [vmem:[#allocation2 + $0xe0] sm:$0xf]  ;;  %v1800_v49 = vsub.f32 %v5735_v44, %v7101_v17  ;;  %v5736_v51 = vld [vmem:[%s6359_s17 + $0x19c] sm:$0xf] }
 0x1bb   : > { %2038 = vst.msk [vmem:[#allocation2 + $0xd0] sm:$0xf] %vm15_vm0, %v1957_v40  ;;  %v1879_v52 = vand.u32 2147483647, %v1798_v42  ;;  %v1719_v53 = vld [vmem:[#allocation2 + $0xe4] sm:$0xf]  ;;  %v1801_v54 = vsub.f32 %v5736_v51, %v7101_v17 }
 0x1bc   : > { %v5737_v55 = vld [vmem:[%s6359_s17 + $0x1a0] sm:$0xf]  ;;  %2039 = vst.msk [vmem:[#allocation2 + $0xd4] sm:$0xf] %vm15_vm0, %v1958_v45  ;;  %v1959_v56 = vadd.f32 %v1878_v46, %v1716_v37  ;;  %v1880_v57 = vand.u32 2147483647, %v1799_v48 }
 0x1bd   : > { %v1881_v58 = vand.u32 2147483647, %v1800_v49  ;;  %v1720_v25 = vld [vmem:[#allocation2 + $0xe8] sm:$0xf]  ;;  %v1802_v59 = vsub.f32 %v5737_v55, %v7101_v17  ;;  %v1960_v60 = vadd.f32 %v1879_v52, %v1717_v41  ;;  %v1882_v61 = vand.u32 2147483647, %v1801_v54 }
 0x1be   : > { %v1721_v62 = vld [vmem:[#allocation2 + $0xec] sm:$0xf]  ;;  %v5738_v63 = vld [vmem:[%s6359_s17 + $0x1a4] sm:$0xf]  ;;  %2040 = vst.msk [vmem:[#allocation2 + $0xd8] sm:$0xf] %vm15_vm0, %v1959_v56  ;;  %v1961_v0 = vadd.f32 %v1880_v57, %v1718_v47 }
 0x1bf   : > { %v1962_v1 = vadd.f32 %v1881_v58, %v1719_v53  ;;  %v1883_v3 = vand.u32 2147483647, %v1802_v59  ;;  %v1722_v4 = vld [vmem:[#allocation2 + $0xf0] sm:$0xf]  ;;  %v1803_v5 = vsub.f32 %v5738_v63, %v7101_v17  ;;  %v5739_v6 = vld [vmem:[%s6359_s17 + $0x1a8] sm:$0xf]  ;;  %v1963_v7 = vadd.f32 %v1882_v61, %v1720_v25 }
 0x1c0   : > { %2041 = vst.msk [vmem:[#allocation2 + $0xdc] sm:$0xf] %vm15_vm0, %v1960_v60  ;;  %v1723_v8 = vld [vmem:[#allocation2 + $0xf4] sm:$0xf]  ;;  %v1804_v9 = vsub.f32 %v5739_v6, %v7101_v17  ;;  %v5740_v10 = vld [vmem:[%s6359_s17 + $0x1ac] sm:$0xf] }
 0x1c1   : > { %v5741_v11 = vld [vmem:[%s6359_s17 + $0x1cc] sm:$0xf]  ;;  %2042 = vst.msk [vmem:[#allocation2 + $0xe0] sm:$0xf] %vm15_vm0, %v1961_v0  ;;  %2043 = vst.msk [vmem:[#allocation2 + $0xe4] sm:$0xf] %vm15_vm0, %v1962_v1  ;;  %v1964_v12 = vadd.f32 %v1883_v3, %v1721_v62  ;;  %v1805_v15 = vsub.f32 %v5740_v10, %v7101_v17 }
 0x1c2   : > { %v1884_v13 = vand.u32 2147483647, %v1803_v5  ;;  %v1724_v14 = vld [vmem:[#allocation2 + $0xf8] sm:$0xf]  ;;  %v1806_v16 = vsub.f32 %v5741_v11, %v7101_v17  ;;  %v5742_v18 = vld [vmem:[%s6359_s17 + $0x1d0] sm:$0xf] }
 0x1c3   : > { %2044 = vst.msk [vmem:[#allocation2 + $0xe8] sm:$0xf] %vm15_vm0, %v1963_v7  ;;  %v1885_v19 = vand.u32 2147483647, %v1804_v9  ;;  %v1725_v20 = vld [vmem:[#allocation2 + $0xfc] sm:$0xf]  ;;  %v1807_v21 = vsub.f32 %v5742_v18, %v7101_v17 }
 0x1c4   : > { %v5743_v22 = vld [vmem:[%s6359_s17 + $0x1d4] sm:$0xf]  ;;  %2045 = vst.msk [vmem:[#allocation2 + $0xec] sm:$0xf] %vm15_vm0, %v1964_v12  ;;  %v1965_v50 = vadd.f32 %v1884_v13, %v1722_v4  ;;  %v1886_v23 = vand.u32 2147483647, %v1805_v15 }
 0x1c5   : > { %v1887_v24 = vand.u32 2147483647, %v1806_v16  ;;  %v1726_v26 = vld [vmem:[#allocation2 + $0x100] sm:$0xf]  ;;  %v1808_v27 = vsub.f32 %v5743_v22, %v7101_v17  ;;  %v1966_v28 = vadd.f32 %v1885_v19, %v1723_v8  ;;  %v1888_v29 = vand.u32 2147483647, %v1807_v21 }
 0x1c6   : > { %v1727_v30 = vld [vmem:[#allocation2 + $0x104] sm:$0xf]  ;;  %v5744_v31 = vld [vmem:[%s6359_s17 + $0x1d8] sm:$0xf]  ;;  %2046 = vst.msk [vmem:[#allocation2 + $0xf0] sm:$0xf] %vm15_vm0, %v1965_v50  ;;  %v1967_v2 = vadd.f32 %v1886_v23, %v1724_v14 }
 0x1c7   : > { %v1968_v32 = vadd.f32 %v1887_v24, %v1725_v20  ;;  %v1889_v33 = vand.u32 2147483647, %v1808_v27  ;;  %v1728_v34 = vld [vmem:[#allocation2 + $0x108] sm:$0xf]  ;;  %v1809_v35 = vsub.f32 %v5744_v31, %v7101_v17  ;;  %v5745_v36 = vld [vmem:[%s6359_s17 + $0x1dc] sm:$0xf]  ;;  %v1969_v37 = vadd.f32 %v1888_v29, %v1726_v26 }
 0x1c8   : > { %2047 = vst.msk [vmem:[#allocation2 + $0xf4] sm:$0xf] %vm15_vm0, %v1966_v28  ;;  %v1729_v38 = vld [vmem:[#allocation2 + $0x10c] sm:$0xf]  ;;  %v1810_v39 = vsub.f32 %v5745_v36, %v7101_v17  ;;  %v5746_v40 = vld [vmem:[%s6359_s17 + $0x1e0] sm:$0xf] }
 0x1c9   : > { %v5747_v41 = vld [vmem:[%s6359_s17 + $0x1e4] sm:$0xf]  ;;  %2048 = vst.msk [vmem:[#allocation2 + $0xf8] sm:$0xf] %vm15_vm0, %v1967_v2  ;;  %2049 = vst.msk [vmem:[#allocation2 + $0xfc] sm:$0xf] %vm15_vm0, %v1968_v32  ;;  %v1970_v42 = vadd.f32 %v1889_v33, %v1727_v30  ;;  %v1811_v45 = vsub.f32 %v5746_v40, %v7101_v17 }
 0x1ca   : > { %v1890_v43 = vand.u32 2147483647, %v1809_v35  ;;  %v1730_v44 = vld [vmem:[#allocation2 + $0x110] sm:$0xf]  ;;  %v1812_v46 = vsub.f32 %v5747_v41, %v7101_v17  ;;  %v5748_v47 = vld [vmem:[%s6359_s17 + $0x1e8] sm:$0xf] }
 0x1cb   : > { %2050 = vst.msk [vmem:[#allocation2 + $0x100] sm:$0xf] %vm15_vm0, %v1969_v37  ;;  %v1891_v48 = vand.u32 2147483647, %v1810_v39  ;;  %v1731_v49 = vld [vmem:[#allocation2 + $0x114] sm:$0xf]  ;;  %v1813_v51 = vsub.f32 %v5748_v47, %v7101_v17 }
 0x1cc   : > { %v5749_v52 = vld [vmem:[%s6359_s17 + $0x1ec] sm:$0xf]  ;;  %2051 = vst.msk [vmem:[#allocation2 + $0x104] sm:$0xf] %vm15_vm0, %v1970_v42  ;;  %v1971_v53 = vadd.f32 %v1890_v43, %v1728_v34  ;;  %v1892_v54 = vand.u32 2147483647, %v1811_v45 }
 0x1cd   : > { %v1893_v55 = vand.u32 2147483647, %v1812_v46  ;;  %v1732_v56 = vld [vmem:[#allocation2 + $0x118] sm:$0xf]  ;;  %v1814_v57 = vsub.f32 %v5749_v52, %v7101_v17  ;;  %v1972_v58 = vadd.f32 %v1891_v48, %v1729_v38  ;;  %v1894_v25 = vand.u32 2147483647, %v1813_v51 }
 0x1ce   : > { %v1733_v59 = vld [vmem:[#allocation2 + $0x11c] sm:$0xf]  ;;  %v5750_v60 = vld [vmem:[%s6359_s17 + $0x20c] sm:$0xf]  ;;  %2052 = vst.msk [vmem:[#allocation2 + $0x108] sm:$0xf] %vm15_vm0, %v1971_v53  ;;  %v1973_v61 = vadd.f32 %v1892_v54, %v1730_v44 }
 0x1cf   : > { %v1974_v62 = vadd.f32 %v1893_v55, %v1731_v49  ;;  %v1895_v63 = vand.u32 2147483647, %v1814_v57  ;;  %v1734_v0 = vld [vmem:[#allocation2 + $0x120] sm:$0xf]  ;;  %v1815_v1 = vsub.f32 %v5750_v60, %v7101_v17  ;;  %v5751_v3 = vld [vmem:[%s6359_s17 + $0x210] sm:$0xf]  ;;  %v1975_v4 = vadd.f32 %v1894_v25, %v1732_v56 }
 0x1d0   : > { %2053 = vst.msk [vmem:[#allocation2 + $0x10c] sm:$0xf] %vm15_vm0, %v1972_v58  ;;  %v1735_v5 = vld [vmem:[#allocation2 + $0x124] sm:$0xf]  ;;  %v1816_v6 = vsub.f32 %v5751_v3, %v7101_v17  ;;  %v5752_v7 = vld [vmem:[%s6359_s17 + $0x214] sm:$0xf] }
 0x1d1   : > { %v5753_v8 = vld [vmem:[%s6359_s17 + $0x218] sm:$0xf]  ;;  %2054 = vst.msk [vmem:[#allocation2 + $0x110] sm:$0xf] %vm15_vm0, %v1973_v61  ;;  %2055 = vst.msk [vmem:[#allocation2 + $0x114] sm:$0xf] %vm15_vm0, %v1974_v62  ;;  %v1976_v9 = vadd.f32 %v1895_v63, %v1733_v59  ;;  %v1817_v12 = vsub.f32 %v5752_v7, %v7101_v17 }
 0x1d2   : > { %v1896_v10 = vand.u32 2147483647, %v1815_v1  ;;  %v1736_v11 = vld [vmem:[#allocation2 + $0x128] sm:$0xf]  ;;  %v1818_v13 = vsub.f32 %v5753_v8, %v7101_v17  ;;  %v5754_v14 = vld [vmem:[%s6359_s17 + $0x21c] sm:$0xf] }
 0x1d3   : > { %2056 = vst.msk [vmem:[#allocation2 + $0x118] sm:$0xf] %vm15_vm0, %v1975_v4  ;;  %v1897_v15 = vand.u32 2147483647, %v1816_v6  ;;  %v1737_v16 = vld [vmem:[#allocation2 + $0x12c] sm:$0xf]  ;;  %v1819_v18 = vsub.f32 %v5754_v14, %v7101_v17 }
 0x1d4   : > { %v5755_v19 = vld [vmem:[%s6359_s17 + $0x220] sm:$0xf]  ;;  %2057 = vst.msk [vmem:[#allocation2 + $0x11c] sm:$0xf] %vm15_vm0, %v1976_v9  ;;  %v1977_v20 = vadd.f32 %v1896_v10, %v1734_v0  ;;  %v1898_v21 = vand.u32 2147483647, %v1817_v12 }
 0x1d5   : > { %v1899_v22 = vand.u32 2147483647, %v1818_v13  ;;  %v1738_v50 = vld [vmem:[#allocation2 + $0x130] sm:$0xf]  ;;  %v1820_v23 = vsub.f32 %v5755_v19, %v7101_v17  ;;  %v1978_v24 = vadd.f32 %v1897_v15, %v1735_v5  ;;  %v1900_v26 = vand.u32 2147483647, %v1819_v18 }
 0x1d6   : > { %v1739_v27 = vld [vmem:[#allocation2 + $0x134] sm:$0xf]  ;;  %v5756_v28 = vld [vmem:[%s6359_s17 + $0x224] sm:$0xf]  ;;  %2058 = vst.msk [vmem:[#allocation2 + $0x120] sm:$0xf] %vm15_vm0, %v1977_v20  ;;  %v1979_v29 = vadd.f32 %v1898_v21, %v1736_v11 }
 0x1d7   : > { %v1980_v30 = vadd.f32 %v1899_v22, %v1737_v16  ;;  %v1901_v31 = vand.u32 2147483647, %v1820_v23  ;;  %v1740_v2 = vld [vmem:[#allocation2 + $0x138] sm:$0xf]  ;;  %v1821_v32 = vsub.f32 %v5756_v28, %v7101_v17  ;;  %v5757_v33 = vld [vmem:[%s6359_s17 + $0x228] sm:$0xf]  ;;  %v1981_v34 = vadd.f32 %v1900_v26, %v1738_v50 }
 0x1d8   : > { %2059 = vst.msk [vmem:[#allocation2 + $0x124] sm:$0xf] %vm15_vm0, %v1978_v24  ;;  %v1741_v35 = vld [vmem:[#allocation2 + $0x13c] sm:$0xf]  ;;  %v1822_v36 = vsub.f32 %v5757_v33, %v7101_v17  ;;  %v5758_v37 = vld [vmem:[%s6359_s17 + $0x22c] sm:$0xf] }
 0x1d9   : > { %v5762_v38 = vld [vmem:[%s6359_s17 + $0x10] sm:$0xf]  ;;  %2060 = vst.msk [vmem:[#allocation2 + $0x128] sm:$0xf] %vm15_vm0, %v1979_v29  ;;  %2061 = vst.msk [vmem:[#allocation2 + $0x12c] sm:$0xf] %vm15_vm0, %v1980_v30  ;;  %v1982_v39 = vadd.f32 %v1901_v31, %v1739_v27  ;;  %v1823_v42 = vsub.f32 %v5758_v37, %v7101_v17 }
 0x1da   : > { %v1902_v40 = vand.u32 2147483647, %v1821_v32  ;;  %v1742_v41 = vld [vmem:[#allocation2 + $0x140] sm:$0xf]  ;;  %v7347_v43 = vld [vmem:[%s6364_s20 + $0x10] sm:$0xf] }
 0x1db   : > { %2062 = vst.msk [vmem:[#allocation2 + $0x130] sm:$0xf] %vm15_vm0, %v1981_v34  ;;  %v1903_v44 = vand.u32 2147483647, %v1822_v36  ;;  %v2153_v45 = vld [vmem:[#allocation2] sm:$0xf]  ;;  %v2234_v46 = vsub.f32 %v5762_v38, %v7347_v43 }
 0x1dc   : > { %v5763_v47 = vld [vmem:[%s6359_s17 + $0x14] sm:$0xf]  ;;  %2063 = vst.msk [vmem:[#allocation2 + $0x134] sm:$0xf] %vm15_vm0, %v1982_v39  ;;  %v1983_v48 = vadd.f32 %v1902_v40, %v1740_v2  ;;  %v1904_v49 = vand.u32 2147483647, %v1823_v42 }
 0x1dd   : > { %v2154_v51 = vld [vmem:[#allocation2 + $0x4] sm:$0xf]  ;;  %v2235_v52 = vsub.f32 %v5763_v47, %v7347_v43  ;;  %v5764_v53 = vld [vmem:[%s6359_s17 + $0x18] sm:$0xf]  ;;  %v1984_v17 = vadd.f32 %v1903_v44, %v1741_v35  ;;  %v2315_v54 = vand.u32 2147483647, %v2234_v46 }
 0x1de   : > { %v2155_v55 = vld [vmem:[#allocation2 + $0x8] sm:$0xf]  ;;  %v2236_v56 = vsub.f32 %v5764_v53, %v7347_v43  ;;  %v5765_v57 = vld [vmem:[%s6359_s17 + $0x1c] sm:$0xf]  ;;  %2064 = vst.msk [vmem:[#allocation2 + $0x138] sm:$0xf] %vm15_vm0, %v1983_v48  ;;  %v1985_v58 = vadd.f32 %v1904_v49, %v1742_v41 }
 0x1df   : > { %v2316_v25 = vand.u32 2147483647, %v2235_v52  ;;  %v2156_v59 = vld [vmem:[#allocation2 + $0xc] sm:$0xf]  ;;  %v2237_v60 = vsub.f32 %v5765_v57, %v7347_v43  ;;  %v5766_v61 = vld [vmem:[%s6359_s17 + $0x20] sm:$0xf]  ;;  %v2396_v62 = vadd.f32 %v2315_v54, %v2153_v45 }
 0x1e0   : > { %2065 = vst.msk [vmem:[#allocation2 + $0x13c] sm:$0xf] %vm15_vm0, %v1984_v17  ;;  %v2317_v63 = vand.u32 2147483647, %v2236_v56  ;;  %v2157_v0 = vld [vmem:[#allocation2 + $0x10] sm:$0xf]  ;;  %v2238_v1 = vsub.f32 %v5766_v61, %v7347_v43 }
 0x1e1   : > { %v5767_v3 = vld [vmem:[%s6359_s17 + $0x24] sm:$0xf]  ;;  %2066 = vst.msk [vmem:[#allocation2 + $0x140] sm:$0xf] %vm15_vm0, %v1985_v58  ;;  %v2397_v4 = vadd.f32 %v2316_v25, %v2154_v51  ;;  %v2318_v5 = vand.u32 2147483647, %v2237_v60 }
 0x1e2   : > { %v2158_v6 = vld [vmem:[#allocation2 + $0x14] sm:$0xf]  ;;  %v2239_v7 = vsub.f32 %v5767_v3, %v7347_v43  ;;  %v5768_v8 = vld [vmem:[%s6359_s17 + $0x28] sm:$0xf]  ;;  %2477 = vst.msk [vmem:[#allocation2] sm:$0xf] %vm15_vm0, %v2396_v62  ;;  %v2398_v9 = vadd.f32 %v2317_v63, %v2155_v55 }
 0x1e3   : > { %v2319_v10 = vand.u32 2147483647, %v2238_v1  ;;  %v2159_v11 = vld [vmem:[#allocation2 + $0x18] sm:$0xf]  ;;  %v2240_v12 = vsub.f32 %v5768_v8, %v7347_v43  ;;  %v5769_v13 = vld [vmem:[%s6359_s17 + $0x2c] sm:$0xf]  ;;  %v2399_v14 = vadd.f32 %v2318_v5, %v2156_v59 }
 0x1e4   : > { %2478 = vst.msk [vmem:[#allocation2 + $0x4] sm:$0xf] %vm15_vm0, %v2397_v4  ;;  %v2320_v15 = vand.u32 2147483647, %v2239_v7  ;;  %v2160_v16 = vld [vmem:[#allocation2 + $0x1c] sm:$0xf]  ;;  %v2241_v18 = vsub.f32 %v5769_v13, %v7347_v43 }
 0x1e5   : > { %v5770_v19 = vld [vmem:[%s6359_s17 + $0x30] sm:$0xf]  ;;  %2479 = vst.msk [vmem:[#allocation2 + $0x8] sm:$0xf] %vm15_vm0, %v2398_v9  ;;  %v2400_v20 = vadd.f32 %v2319_v10, %v2157_v0  ;;  %v2321_v21 = vand.u32 2147483647, %v2240_v12 }
 0x1e6   : > { %v2161_v22 = vld [vmem:[#allocation2 + $0x20] sm:$0xf]  ;;  %v2242_v50 = vsub.f32 %v5770_v19, %v7347_v43  ;;  %v5771_v23 = vld [vmem:[%s6359_s17 + $0x50] sm:$0xf]  ;;  %2480 = vst.msk [vmem:[#allocation2 + $0xc] sm:$0xf] %vm15_vm0, %v2399_v14  ;;  %v2401_v24 = vadd.f32 %v2320_v15, %v2158_v6 }
 0x1e7   : > { %v2322_v26 = vand.u32 2147483647, %v2241_v18  ;;  %v2162_v27 = vld [vmem:[#allocation2 + $0x24] sm:$0xf]  ;;  %v2243_v28 = vsub.f32 %v5771_v23, %v7347_v43  ;;  %v5772_v29 = vld [vmem:[%s6359_s17 + $0x54] sm:$0xf]  ;;  %v2402_v30 = vadd.f32 %v2321_v21, %v2159_v11 }
 0x1e8   : > { %2481 = vst.msk [vmem:[#allocation2 + $0x10] sm:$0xf] %vm15_vm0, %v2400_v20  ;;  %v2323_v31 = vand.u32 2147483647, %v2242_v50  ;;  %v2163_v2 = vld [vmem:[#allocation2 + $0x28] sm:$0xf]  ;;  %v2244_v32 = vsub.f32 %v5772_v29, %v7347_v43 }
 0x1e9   : > { %v5773_v33 = vld [vmem:[%s6359_s17 + $0x58] sm:$0xf]  ;;  %2482 = vst.msk [vmem:[#allocation2 + $0x14] sm:$0xf] %vm15_vm0, %v2401_v24  ;;  %v2403_v34 = vadd.f32 %v2322_v26, %v2160_v16  ;;  %v2324_v35 = vand.u32 2147483647, %v2243_v28 }
 0x1ea   : > { %v2164_v36 = vld [vmem:[#allocation2 + $0x2c] sm:$0xf]  ;;  %v2245_v37 = vsub.f32 %v5773_v33, %v7347_v43  ;;  %v5774_v38 = vld [vmem:[%s6359_s17 + $0x5c] sm:$0xf]  ;;  %2483 = vst.msk [vmem:[#allocation2 + $0x18] sm:$0xf] %vm15_vm0, %v2402_v30  ;;  %v2404_v39 = vadd.f32 %v2323_v31, %v2161_v22 }
 0x1eb   : > { %v2325_v40 = vand.u32 2147483647, %v2244_v32  ;;  %v2165_v41 = vld [vmem:[#allocation2 + $0x30] sm:$0xf]  ;;  %v2246_v42 = vsub.f32 %v5774_v38, %v7347_v43  ;;  %v5775_v44 = vld [vmem:[%s6359_s17 + $0x60] sm:$0xf]  ;;  %v2405_v45 = vadd.f32 %v2324_v35, %v2162_v27 }
 0x1ec   : > { %2484 = vst.msk [vmem:[#allocation2 + $0x1c] sm:$0xf] %vm15_vm0, %v2403_v34  ;;  %v2326_v46 = vand.u32 2147483647, %v2245_v37  ;;  %v2166_v47 = vld [vmem:[#allocation2 + $0x34] sm:$0xf]  ;;  %v2247_v48 = vsub.f32 %v5775_v44, %v7347_v43 }
 0x1ed   : > { %v5776_v49 = vld [vmem:[%s6359_s17 + $0x64] sm:$0xf]  ;;  %2485 = vst.msk [vmem:[#allocation2 + $0x20] sm:$0xf] %vm15_vm0, %v2404_v39  ;;  %v2406_v51 = vadd.f32 %v2325_v40, %v2163_v2  ;;  %v2327_v52 = vand.u32 2147483647, %v2246_v42 }
 0x1ee   : > { %v2167_v53 = vld [vmem:[#allocation2 + $0x38] sm:$0xf]  ;;  %v2248_v17 = vsub.f32 %v5776_v49, %v7347_v43  ;;  %v5777_v54 = vld [vmem:[%s6359_s17 + $0x68] sm:$0xf]  ;;  %2486 = vst.msk [vmem:[#allocation2 + $0x24] sm:$0xf] %vm15_vm0, %v2405_v45  ;;  %v2407_v55 = vadd.f32 %v2326_v46, %v2164_v36 }
 0x1ef   : > { %v2328_v56 = vand.u32 2147483647, %v2247_v48  ;;  %v2168_v57 = vld [vmem:[#allocation2 + $0x3c] sm:$0xf]  ;;  %v2249_v58 = vsub.f32 %v5777_v54, %v7347_v43  ;;  %v5778_v25 = vld [vmem:[%s6359_s17 + $0x6c] sm:$0xf]  ;;  %v2408_v59 = vadd.f32 %v2327_v52, %v2165_v41 }
 0x1f0   : > { %2487 = vst.msk [vmem:[#allocation2 + $0x28] sm:$0xf] %vm15_vm0, %v2406_v51  ;;  %v2329_v60 = vand.u32 2147483647, %v2248_v17  ;;  %v2169_v61 = vld [vmem:[#allocation2 + $0x40] sm:$0xf]  ;;  %v2250_v62 = vsub.f32 %v5778_v25, %v7347_v43 }
 0x1f1   : > { %v5779_v63 = vld [vmem:[%s6359_s17 + $0x70] sm:$0xf]  ;;  %2488 = vst.msk [vmem:[#allocation2 + $0x2c] sm:$0xf] %vm15_vm0, %v2407_v55  ;;  %v2409_v0 = vadd.f32 %v2328_v56, %v2166_v47  ;;  %v2330_v1 = vand.u32 2147483647, %v2249_v58 }
 0x1f2   : > { %v2170_v3 = vld [vmem:[#allocation2 + $0x44] sm:$0xf]  ;;  %v2251_v4 = vsub.f32 %v5779_v63, %v7347_v43  ;;  %v5780_v5 = vld [vmem:[%s6359_s17 + $0x90] sm:$0xf]  ;;  %2489 = vst.msk [vmem:[#allocation2 + $0x30] sm:$0xf] %vm15_vm0, %v2408_v59  ;;  %v2410_v6 = vadd.f32 %v2329_v60, %v2167_v53 }
 0x1f3   : > { %v2331_v7 = vand.u32 2147483647, %v2250_v62  ;;  %v2171_v8 = vld [vmem:[#allocation2 + $0x48] sm:$0xf]  ;;  %v2252_v9 = vsub.f32 %v5780_v5, %v7347_v43  ;;  %v5781_v10 = vld [vmem:[%s6359_s17 + $0x94] sm:$0xf]  ;;  %v2411_v11 = vadd.f32 %v2330_v1, %v2168_v57 }
 0x1f4   : > { %2490 = vst.msk [vmem:[#allocation2 + $0x34] sm:$0xf] %vm15_vm0, %v2409_v0  ;;  %v2332_v12 = vand.u32 2147483647, %v2251_v4  ;;  %v2172_v13 = vld [vmem:[#allocation2 + $0x4c] sm:$0xf]  ;;  %v2253_v14 = vsub.f32 %v5781_v10, %v7347_v43 }
 0x1f5   : > { %v5782_v15 = vld [vmem:[%s6359_s17 + $0x98] sm:$0xf]  ;;  %2491 = vst.msk [vmem:[#allocation2 + $0x38] sm:$0xf] %vm15_vm0, %v2410_v6  ;;  %v2412_v16 = vadd.f32 %v2331_v7, %v2169_v61  ;;  %v2333_v18 = vand.u32 2147483647, %v2252_v9 }
 0x1f6   : > { %v2173_v19 = vld [vmem:[#allocation2 + $0x50] sm:$0xf]  ;;  %v2254_v20 = vsub.f32 %v5782_v15, %v7347_v43  ;;  %v5783_v21 = vld [vmem:[%s6359_s17 + $0x9c] sm:$0xf]  ;;  %2492 = vst.msk [vmem:[#allocation2 + $0x3c] sm:$0xf] %vm15_vm0, %v2411_v11  ;;  %v2413_v22 = vadd.f32 %v2332_v12, %v2170_v3 }
 0x1f7   : > { %v2334_v50 = vand.u32 2147483647, %v2253_v14  ;;  %v2174_v23 = vld [vmem:[#allocation2 + $0x54] sm:$0xf]  ;;  %v2255_v24 = vsub.f32 %v5783_v21, %v7347_v43  ;;  %v5784_v26 = vld [vmem:[%s6359_s17 + $0xa0] sm:$0xf]  ;;  %v2414_v27 = vadd.f32 %v2333_v18, %v2171_v8 }
 0x1f8   : > { %2493 = vst.msk [vmem:[#allocation2 + $0x40] sm:$0xf] %vm15_vm0, %v2412_v16  ;;  %v2335_v28 = vand.u32 2147483647, %v2254_v20  ;;  %v2175_v29 = vld [vmem:[#allocation2 + $0x58] sm:$0xf]  ;;  %v2256_v30 = vsub.f32 %v5784_v26, %v7347_v43 }
 0x1f9   : > { %v5785_v31 = vld [vmem:[%s6359_s17 + $0xa4] sm:$0xf]  ;;  %2494 = vst.msk [vmem:[#allocation2 + $0x44] sm:$0xf] %vm15_vm0, %v2413_v22  ;;  %v2415_v2 = vadd.f32 %v2334_v50, %v2172_v13  ;;  %v2336_v32 = vand.u32 2147483647, %v2255_v24 }
 0x1fa   : > { %v2176_v33 = vld [vmem:[#allocation2 + $0x5c] sm:$0xf]  ;;  %v2257_v34 = vsub.f32 %v5785_v31, %v7347_v43  ;;  %v5786_v35 = vld [vmem:[%s6359_s17 + $0xa8] sm:$0xf]  ;;  %2495 = vst.msk [vmem:[#allocation2 + $0x48] sm:$0xf] %vm15_vm0, %v2414_v27  ;;  %v2416_v36 = vadd.f32 %v2335_v28, %v2173_v19 }
 0x1fb   : > { %v2337_v37 = vand.u32 2147483647, %v2256_v30  ;;  %v2177_v38 = vld [vmem:[#allocation2 + $0x60] sm:$0xf]  ;;  %v2258_v39 = vsub.f32 %v5786_v35, %v7347_v43  ;;  %v5787_v40 = vld [vmem:[%s6359_s17 + $0xac] sm:$0xf]  ;;  %v2417_v41 = vadd.f32 %v2336_v32, %v2174_v23 }
 0x1fc   : > { %2496 = vst.msk [vmem:[#allocation2 + $0x4c] sm:$0xf] %vm15_vm0, %v2415_v2  ;;  %v2338_v42 = vand.u32 2147483647, %v2257_v34  ;;  %v2178_v44 = vld [vmem:[#allocation2 + $0x64] sm:$0xf]  ;;  %v2259_v45 = vsub.f32 %v5787_v40, %v7347_v43 }
 0x1fd   : > { %v5788_v46 = vld [vmem:[%s6359_s17 + $0xb0] sm:$0xf]  ;;  %2497 = vst.msk [vmem:[#allocation2 + $0x50] sm:$0xf] %vm15_vm0, %v2416_v36  ;;  %v2418_v47 = vadd.f32 %v2337_v37, %v2175_v29  ;;  %v2339_v48 = vand.u32 2147483647, %v2258_v39 }
 0x1fe   : > { %v2179_v49 = vld [vmem:[#allocation2 + $0x68] sm:$0xf]  ;;  %v2260_v51 = vsub.f32 %v5788_v46, %v7347_v43  ;;  %v5789_v52 = vld [vmem:[%s6359_s17 + $0xd0] sm:$0xf]  ;;  %2498 = vst.msk [vmem:[#allocation2 + $0x54] sm:$0xf] %vm15_vm0, %v2417_v41  ;;  %v2419_v53 = vadd.f32 %v2338_v42, %v2176_v33 }
 0x1ff   : > { %v2340_v17 = vand.u32 2147483647, %v2259_v45  ;;  %v2180_v54 = vld [vmem:[#allocation2 + $0x6c] sm:$0xf]  ;;  %v2261_v55 = vsub.f32 %v5789_v52, %v7347_v43  ;;  %v5790_v56 = vld [vmem:[%s6359_s17 + $0xd4] sm:$0xf]  ;;  %v2420_v57 = vadd.f32 %v2339_v48, %v2177_v38 }
 0x200   : > { %2499 = vst.msk [vmem:[#allocation2 + $0x58] sm:$0xf] %vm15_vm0, %v2418_v47  ;;  %v2341_v58 = vand.u32 2147483647, %v2260_v51  ;;  %v2181_v25 = vld [vmem:[#allocation2 + $0x70] sm:$0xf]  ;;  %v2262_v59 = vsub.f32 %v5790_v56, %v7347_v43 }
 0x201   : > { %v5791_v60 = vld [vmem:[%s6359_s17 + $0xd8] sm:$0xf]  ;;  %2500 = vst.msk [vmem:[#allocation2 + $0x5c] sm:$0xf] %vm15_vm0, %v2419_v53  ;;  %v2421_v61 = vadd.f32 %v2340_v17, %v2178_v44  ;;  %v2342_v62 = vand.u32 2147483647, %v2261_v55 }
 0x202   : > { %v2182_v63 = vld [vmem:[#allocation2 + $0x74] sm:$0xf]  ;;  %v2263_v0 = vsub.f32 %v5791_v60, %v7347_v43  ;;  %v5792_v1 = vld [vmem:[%s6359_s17 + $0xdc] sm:$0xf]  ;;  %2501 = vst.msk [vmem:[#allocation2 + $0x60] sm:$0xf] %vm15_vm0, %v2420_v57  ;;  %v2422_v3 = vadd.f32 %v2341_v58, %v2179_v49 }
 0x203   : > { %v2343_v4 = vand.u32 2147483647, %v2262_v59  ;;  %v2183_v5 = vld [vmem:[#allocation2 + $0x78] sm:$0xf]  ;;  %v2264_v6 = vsub.f32 %v5792_v1, %v7347_v43  ;;  %v5793_v7 = vld [vmem:[%s6359_s17 + $0xe0] sm:$0xf]  ;;  %v2423_v8 = vadd.f32 %v2342_v62, %v2180_v54 }
 0x204   : > { %2502 = vst.msk [vmem:[#allocation2 + $0x64] sm:$0xf] %vm15_vm0, %v2421_v61  ;;  %v2344_v9 = vand.u32 2147483647, %v2263_v0  ;;  %v2184_v10 = vld [vmem:[#allocation2 + $0x7c] sm:$0xf]  ;;  %v2265_v11 = vsub.f32 %v5793_v7, %v7347_v43 }
 0x205   : > { %v5794_v12 = vld [vmem:[%s6359_s17 + $0xe4] sm:$0xf]  ;;  %2503 = vst.msk [vmem:[#allocation2 + $0x68] sm:$0xf] %vm15_vm0, %v2422_v3  ;;  %v2424_v13 = vadd.f32 %v2343_v4, %v2181_v25  ;;  %v2345_v14 = vand.u32 2147483647, %v2264_v6 }
 0x206   : > { %v2185_v15 = vld [vmem:[#allocation2 + $0x80] sm:$0xf]  ;;  %v2266_v16 = vsub.f32 %v5794_v12, %v7347_v43  ;;  %v5795_v18 = vld [vmem:[%s6359_s17 + $0xe8] sm:$0xf]  ;;  %2504 = vst.msk [vmem:[#allocation2 + $0x6c] sm:$0xf] %vm15_vm0, %v2423_v8  ;;  %v2425_v19 = vadd.f32 %v2344_v9, %v2182_v63 }
 0x207   : > { %v2346_v20 = vand.u32 2147483647, %v2265_v11  ;;  %v2186_v21 = vld [vmem:[#allocation2 + $0x84] sm:$0xf]  ;;  %v2267_v22 = vsub.f32 %v5795_v18, %v7347_v43  ;;  %v5796_v50 = vld [vmem:[%s6359_s17 + $0xec] sm:$0xf]  ;;  %v2426_v23 = vadd.f32 %v2345_v14, %v2183_v5 }
 0x208   : > { %2505 = vst.msk [vmem:[#allocation2 + $0x70] sm:$0xf] %vm15_vm0, %v2424_v13  ;;  %v2347_v24 = vand.u32 2147483647, %v2266_v16  ;;  %v2187_v26 = vld [vmem:[#allocation2 + $0x88] sm:$0xf]  ;;  %v2268_v27 = vsub.f32 %v5796_v50, %v7347_v43 }
 0x209   : > { %v5797_v28 = vld [vmem:[%s6359_s17 + $0xf0] sm:$0xf]  ;;  %2506 = vst.msk [vmem:[#allocation2 + $0x74] sm:$0xf] %vm15_vm0, %v2425_v19  ;;  %v2427_v29 = vadd.f32 %v2346_v20, %v2184_v10  ;;  %v2348_v30 = vand.u32 2147483647, %v2267_v22 }
 0x20a   : > { %v2188_v31 = vld [vmem:[#allocation2 + $0x8c] sm:$0xf]  ;;  %v2269_v2 = vsub.f32 %v5797_v28, %v7347_v43  ;;  %v5798_v32 = vld [vmem:[%s6359_s17 + $0x110] sm:$0xf]  ;;  %2507 = vst.msk [vmem:[#allocation2 + $0x78] sm:$0xf] %vm15_vm0, %v2426_v23  ;;  %v2428_v33 = vadd.f32 %v2347_v24, %v2185_v15 }
 0x20b   : > { %v2349_v34 = vand.u32 2147483647, %v2268_v27  ;;  %v2189_v35 = vld [vmem:[#allocation2 + $0x90] sm:$0xf]  ;;  %v2270_v36 = vsub.f32 %v5798_v32, %v7347_v43  ;;  %v5799_v37 = vld [vmem:[%s6359_s17 + $0x114] sm:$0xf]  ;;  %v2429_v38 = vadd.f32 %v2348_v30, %v2186_v21 }
 0x20c   : > { %2508 = vst.msk [vmem:[#allocation2 + $0x7c] sm:$0xf] %vm15_vm0, %v2427_v29  ;;  %v2350_v39 = vand.u32 2147483647, %v2269_v2  ;;  %v2190_v40 = vld [vmem:[#allocation2 + $0x94] sm:$0xf]  ;;  %v2271_v41 = vsub.f32 %v5799_v37, %v7347_v43 }
 0x20d   : > { %v5800_v42 = vld [vmem:[%s6359_s17 + $0x118] sm:$0xf]  ;;  %2509 = vst.msk [vmem:[#allocation2 + $0x80] sm:$0xf] %vm15_vm0, %v2428_v33  ;;  %v2430_v44 = vadd.f32 %v2349_v34, %v2187_v26  ;;  %v2351_v45 = vand.u32 2147483647, %v2270_v36 }
 0x20e   : > { %v2191_v46 = vld [vmem:[#allocation2 + $0x98] sm:$0xf]  ;;  %v2272_v47 = vsub.f32 %v5800_v42, %v7347_v43  ;;  %v5801_v48 = vld [vmem:[%s6359_s17 + $0x11c] sm:$0xf]  ;;  %2510 = vst.msk [vmem:[#allocation2 + $0x84] sm:$0xf] %vm15_vm0, %v2429_v38  ;;  %v2431_v49 = vadd.f32 %v2350_v39, %v2188_v31 }
 0x20f   : > { %v2352_v51 = vand.u32 2147483647, %v2271_v41  ;;  %v2192_v52 = vld [vmem:[#allocation2 + $0x9c] sm:$0xf]  ;;  %v2273_v53 = vsub.f32 %v5801_v48, %v7347_v43  ;;  %v5802_v17 = vld [vmem:[%s6359_s17 + $0x120] sm:$0xf]  ;;  %v2432_v54 = vadd.f32 %v2351_v45, %v2189_v35 }
 0x210   : > { %2511 = vst.msk [vmem:[#allocation2 + $0x88] sm:$0xf] %vm15_vm0, %v2430_v44  ;;  %v2353_v55 = vand.u32 2147483647, %v2272_v47  ;;  %v2193_v56 = vld [vmem:[#allocation2 + $0xa0] sm:$0xf]  ;;  %v2274_v57 = vsub.f32 %v5802_v17, %v7347_v43 }
 0x211   : > { %v5803_v58 = vld [vmem:[%s6359_s17 + $0x124] sm:$0xf]  ;;  %2512 = vst.msk [vmem:[#allocation2 + $0x8c] sm:$0xf] %vm15_vm0, %v2431_v49  ;;  %v2433_v25 = vadd.f32 %v2352_v51, %v2190_v40  ;;  %v2354_v59 = vand.u32 2147483647, %v2273_v53 }
 0x212   : > { %v2194_v60 = vld [vmem:[#allocation2 + $0xa4] sm:$0xf]  ;;  %v2275_v61 = vsub.f32 %v5803_v58, %v7347_v43  ;;  %v5804_v62 = vld [vmem:[%s6359_s17 + $0x128] sm:$0xf]  ;;  %2513 = vst.msk [vmem:[#allocation2 + $0x90] sm:$0xf] %vm15_vm0, %v2432_v54  ;;  %v2434_v63 = vadd.f32 %v2353_v55, %v2191_v46 }
 0x213   : > { %v2355_v0 = vand.u32 2147483647, %v2274_v57  ;;  %v2195_v1 = vld [vmem:[#allocation2 + $0xa8] sm:$0xf]  ;;  %v2276_v3 = vsub.f32 %v5804_v62, %v7347_v43  ;;  %v5805_v4 = vld [vmem:[%s6359_s17 + $0x12c] sm:$0xf]  ;;  %v2435_v5 = vadd.f32 %v2354_v59, %v2192_v52 }
 0x214   : > { %2514 = vst.msk [vmem:[#allocation2 + $0x94] sm:$0xf] %vm15_vm0, %v2433_v25  ;;  %v2356_v6 = vand.u32 2147483647, %v2275_v61  ;;  %v2196_v7 = vld [vmem:[#allocation2 + $0xac] sm:$0xf]  ;;  %v2277_v8 = vsub.f32 %v5805_v4, %v7347_v43 }
 0x215   : > { %v5806_v9 = vld [vmem:[%s6359_s17 + $0x130] sm:$0xf]  ;;  %2515 = vst.msk [vmem:[#allocation2 + $0x98] sm:$0xf] %vm15_vm0, %v2434_v63  ;;  %v2436_v10 = vadd.f32 %v2355_v0, %v2193_v56  ;;  %v2357_v11 = vand.u32 2147483647, %v2276_v3 }
 0x216   : > { %v2197_v12 = vld [vmem:[#allocation2 + $0xb0] sm:$0xf]  ;;  %v2278_v13 = vsub.f32 %v5806_v9, %v7347_v43  ;;  %2516 = vst.msk [vmem:[#allocation2 + $0x9c] sm:$0xf] %vm15_vm0, %v2435_v5  ;;  %v2437_v15 = vadd.f32 %v2356_v6, %v2194_v60  ;;  %v2358_v16 = vand.u32 2147483647, %v2277_v8 }
 0x217   : > { %v5807_v14 = vld [vmem:[%s6359_s17 + $0x150] sm:$0xf]  ;;  %v2198_v18 = vld [vmem:[#allocation2 + $0xb4] sm:$0xf]  ;;  %2517 = vst.msk [vmem:[#allocation2 + $0xa0] sm:$0xf] %vm15_vm0, %v2436_v10  ;;  %v2438_v21 = vadd.f32 %v2357_v11, %v2195_v1 }
 0x218   : > { %v2279_v19 = vsub.f32 %v5807_v14, %v7347_v43  ;;  %v5808_v20 = vld [vmem:[%s6359_s17 + $0x154] sm:$0xf]  ;;  %v2359_v22 = vand.u32 2147483647, %v2278_v13  ;;  %v2199_v50 = vld [vmem:[#allocation2 + $0xb8] sm:$0xf]  ;;  %v2439_v26 = vadd.f32 %v2358_v16, %v2196_v7 }
 0x219   : > { %v2280_v23 = vsub.f32 %v5808_v20, %v7347_v43  ;;  %v5809_v24 = vld [vmem:[%s6359_s17 + $0x158] sm:$0xf]  ;;  %2518 = vst.msk [vmem:[#allocation2 + $0xa4] sm:$0xf] %vm15_vm0, %v2437_v15  ;;  %v2200_v28 = vld [vmem:[#allocation2 + $0xbc] sm:$0xf] }
 0x21a   : > { %v2360_v27 = vand.u32 2147483647, %v2279_v19  ;;  %v2281_v29 = vsub.f32 %v5809_v24, %v7347_v43  ;;  %v5810_v30 = vld [vmem:[%s6359_s17 + $0x15c] sm:$0xf]  ;;  %2519 = vst.msk [vmem:[#allocation2 + $0xa8] sm:$0xf] %vm15_vm0, %v2438_v21  ;;  %v2440_v31 = vadd.f32 %v2359_v22, %v2197_v12 }
 0x21b   : > { %v2361_v2 = vand.u32 2147483647, %v2280_v23  ;;  %v2201_v32 = vld [vmem:[#allocation2 + $0xc0] sm:$0xf]  ;;  %v2282_v33 = vsub.f32 %v5810_v30, %v7347_v43  ;;  %2520 = vst.msk [vmem:[#allocation2 + $0xac] sm:$0xf] %vm15_vm0, %v2439_v26 }
 0x21c   : > { %v5811_v34 = vld [vmem:[%s6359_s17 + $0x160] sm:$0xf]  ;;  %v2441_v35 = vadd.f32 %v2360_v27, %v2198_v18  ;;  %v2362_v36 = vand.u32 2147483647, %v2281_v29  ;;  %v2202_v37 = vld [vmem:[#allocation2 + $0xc4] sm:$0xf] }
 0x21d   : > { %v2283_v38 = vsub.f32 %v5811_v34, %v7347_v43  ;;  %v5812_v39 = vld [vmem:[%s6359_s17 + $0x164] sm:$0xf]  ;;  %2521 = vst.msk [vmem:[#allocation2 + $0xb0] sm:$0xf] %vm15_vm0, %v2440_v31  ;;  %v2442_v40 = vadd.f32 %v2361_v2, %v2199_v50  ;;  %v2363_v41 = vand.u32 2147483647, %v2282_v33 }
 0x21e   : > { %v2203_v42 = vld [vmem:[#allocation2 + $0xc8] sm:$0xf]  ;;  %v2284_v44 = vsub.f32 %v5812_v39, %v7347_v43  ;;  %2522 = vst.msk [vmem:[#allocation2 + $0xb4] sm:$0xf] %vm15_vm0, %v2441_v35  ;;  %v2443_v46 = vadd.f32 %v2362_v36, %v2200_v28  ;;  %v2204_v48 = vld [vmem:[#allocation2 + $0xcc] sm:$0xf] }
 0x21f   : > { %v5813_v45 = vld [vmem:[%s6359_s17 + $0x168] sm:$0xf]  ;;  %v2364_v47 = vand.u32 2147483647, %v2283_v38  ;;  %v5814_v51 = vld [vmem:[%s6359_s17 + $0x16c] sm:$0xf]  ;;  %v2444_v52 = vadd.f32 %v2363_v41, %v2201_v32 }
 0x220   : > { %v2285_v49 = vsub.f32 %v5813_v45, %v7347_v43  ;;  %2523 = vst.msk [vmem:[#allocation2 + $0xb8] sm:$0xf] %vm15_vm0, %v2442_v40  ;;  %v2365_v53 = vand.u32 2147483647, %v2284_v44  ;;  %v2205_v17 = vld [vmem:[#allocation2 + $0xd0] sm:$0xf]  ;;  %v2286_v54 = vsub.f32 %v5814_v51, %v7347_v43 }
 0x221   : > { %v5815_v55 = vld [vmem:[%s6359_s17 + $0x170] sm:$0xf]  ;;  %2524 = vst.msk [vmem:[#allocation2 + $0xbc] sm:$0xf] %vm15_vm0, %v2443_v46  ;;  %v2445_v56 = vadd.f32 %v2364_v47, %v2202_v37  ;;  %v2206_v58 = vld [vmem:[#allocation2 + $0xd4] sm:$0xf] }
 0x222   : > { %v2366_v57 = vand.u32 2147483647, %v2285_v49  ;;  %v2287_v25 = vsub.f32 %v5815_v55, %v7347_v43  ;;  %v5816_v59 = vld [vmem:[%s6359_s17 + $0x190] sm:$0xf]  ;;  %2525 = vst.msk [vmem:[#allocation2 + $0xc0] sm:$0xf] %vm15_vm0, %v2444_v52  ;;  %v2446_v60 = vadd.f32 %v2365_v53, %v2203_v42 }
 0x223   : > { %v2367_v61 = vand.u32 2147483647, %v2286_v54  ;;  %v2207_v62 = vld [vmem:[#allocation2 + $0xd8] sm:$0xf]  ;;  %v2288_v63 = vsub.f32 %v5816_v59, %v7347_v43  ;;  %v5817_v0 = vld [vmem:[%s6359_s17 + $0x194] sm:$0xf] }
 0x224   : > { %2526 = vst.msk [vmem:[#allocation2 + $0xc4] sm:$0xf] %vm15_vm0, %v2445_v56  ;;  %v2447_v1 = vadd.f32 %v2366_v57, %v2204_v48  ;;  %v2368_v3 = vand.u32 2147483647, %v2287_v25  ;;  %v2208_v4 = vld [vmem:[#allocation2 + $0xdc] sm:$0xf]  ;;  %v2289_v5 = vsub.f32 %v5817_v0, %v7347_v43 }
 0x225   : > { %v5818_v6 = vld [vmem:[%s6359_s17 + $0x198] sm:$0xf]  ;;  %2527 = vst.msk [vmem:[#allocation2 + $0xc8] sm:$0xf] %vm15_vm0, %v2446_v60  ;;  %v2448_v7 = vadd.f32 %v2367_v61, %v2205_v17  ;;  %v2369_v8 = vand.u32 2147483647, %v2288_v63 }
 0x226   : > { %v2209_v9 = vld [vmem:[#allocation2 + $0xe0] sm:$0xf]  ;;  %v2290_v10 = vsub.f32 %v5818_v6, %v7347_v43  ;;  %v5819_v11 = vld [vmem:[%s6359_s17 + $0x19c] sm:$0xf]  ;;  %2528 = vst.msk [vmem:[#allocation2 + $0xcc] sm:$0xf] %vm15_vm0, %v2447_v1  ;;  %v2449_v12 = vadd.f32 %v2368_v3, %v2206_v58 }
 0x227   : > { %v2370_v13 = vand.u32 2147483647, %v2289_v5  ;;  %v2210_v14 = vld [vmem:[#allocation2 + $0xe4] sm:$0xf]  ;;  %v2291_v15 = vsub.f32 %v5819_v11, %v7347_v43  ;;  %v5820_v16 = vld [vmem:[%s6359_s17 + $0x1a0] sm:$0xf]  ;;  %v2450_v18 = vadd.f32 %v2369_v8, %v2207_v62 }
 0x228   : > { %2529 = vst.msk [vmem:[#allocation2 + $0xd0] sm:$0xf] %vm15_vm0, %v2448_v7  ;;  %v2371_v19 = vand.u32 2147483647, %v2290_v10  ;;  %v2211_v20 = vld [vmem:[#allocation2 + $0xe8] sm:$0xf]  ;;  %v2292_v21 = vsub.f32 %v5820_v16, %v7347_v43 }
 0x229   : > { %v5821_v22 = vld [vmem:[%s6359_s17 + $0x1a4] sm:$0xf]  ;;  %2530 = vst.msk [vmem:[#allocation2 + $0xd4] sm:$0xf] %vm15_vm0, %v2449_v12  ;;  %v2451_v50 = vadd.f32 %v2370_v13, %v2208_v4  ;;  %v2372_v23 = vand.u32 2147483647, %v2291_v15 }
 0x22a   : > { %v2212_v24 = vld [vmem:[#allocation2 + $0xec] sm:$0xf]  ;;  %v2293_v26 = vsub.f32 %v5821_v22, %v7347_v43  ;;  %v5822_v27 = vld [vmem:[%s6359_s17 + $0x1a8] sm:$0xf]  ;;  %2531 = vst.msk [vmem:[#allocation2 + $0xd8] sm:$0xf] %vm15_vm0, %v2450_v18  ;;  %v2452_v28 = vadd.f32 %v2371_v19, %v2209_v9 }
 0x22b   : > { %v2373_v29 = vand.u32 2147483647, %v2292_v21  ;;  %v2213_v30 = vld [vmem:[#allocation2 + $0xf0] sm:$0xf]  ;;  %v2294_v31 = vsub.f32 %v5822_v27, %v7347_v43  ;;  %v5823_v2 = vld [vmem:[%s6359_s17 + $0x1ac] sm:$0xf]  ;;  %v2453_v32 = vadd.f32 %v2372_v23, %v2210_v14 }
 0x22c   : > { %2532 = vst.msk [vmem:[#allocation2 + $0xdc] sm:$0xf] %vm15_vm0, %v2451_v50  ;;  %v2374_v33 = vand.u32 2147483647, %v2293_v26  ;;  %v2214_v34 = vld [vmem:[#allocation2 + $0xf4] sm:$0xf]  ;;  %v2295_v35 = vsub.f32 %v5823_v2, %v7347_v43 }
 0x22d   : > { %v5824_v36 = vld [vmem:[%s6359_s17 + $0x1b0] sm:$0xf]  ;;  %2533 = vst.msk [vmem:[#allocation2 + $0xe0] sm:$0xf] %vm15_vm0, %v2452_v28  ;;  %v2454_v37 = vadd.f32 %v2373_v29, %v2211_v20  ;;  %v2375_v38 = vand.u32 2147483647, %v2294_v31 }
 0x22e   : > { %v2215_v39 = vld [vmem:[#allocation2 + $0xf8] sm:$0xf]  ;;  %v2296_v40 = vsub.f32 %v5824_v36, %v7347_v43  ;;  %v5825_v41 = vld [vmem:[%s6359_s17 + $0x1d0] sm:$0xf]  ;;  %2534 = vst.msk [vmem:[#allocation2 + $0xe4] sm:$0xf] %vm15_vm0, %v2453_v32  ;;  %v2455_v42 = vadd.f32 %v2374_v33, %v2212_v24 }
 0x22f   : > { %v2376_v44 = vand.u32 2147483647, %v2295_v35  ;;  %v2216_v45 = vld [vmem:[#allocation2 + $0xfc] sm:$0xf]  ;;  %v2297_v46 = vsub.f32 %v5825_v41, %v7347_v43  ;;  %v5826_v47 = vld [vmem:[%s6359_s17 + $0x1d4] sm:$0xf]  ;;  %v2456_v48 = vadd.f32 %v2375_v38, %v2213_v30 }
 0x230   : > { %2535 = vst.msk [vmem:[#allocation2 + $0xe8] sm:$0xf] %vm15_vm0, %v2454_v37  ;;  %v2377_v49 = vand.u32 2147483647, %v2296_v40  ;;  %v2217_v51 = vld [vmem:[#allocation2 + $0x100] sm:$0xf]  ;;  %v2298_v52 = vsub.f32 %v5826_v47, %v7347_v43 }
 0x231   : > { %v5827_v53 = vld [vmem:[%s6359_s17 + $0x1d8] sm:$0xf]  ;;  %2536 = vst.msk [vmem:[#allocation2 + $0xec] sm:$0xf] %vm15_vm0, %v2455_v42  ;;  %v2457_v17 = vadd.f32 %v2376_v44, %v2214_v34  ;;  %v2378_v54 = vand.u32 2147483647, %v2297_v46 }
 0x232   : > { %v2218_v55 = vld [vmem:[#allocation2 + $0x104] sm:$0xf]  ;;  %v2299_v56 = vsub.f32 %v5827_v53, %v7347_v43  ;;  %v5828_v57 = vld [vmem:[%s6359_s17 + $0x1dc] sm:$0xf]  ;;  %2537 = vst.msk [vmem:[#allocation2 + $0xf0] sm:$0xf] %vm15_vm0, %v2456_v48  ;;  %v2458_v58 = vadd.f32 %v2377_v49, %v2215_v39 }
 0x233   : > { %v2379_v25 = vand.u32 2147483647, %v2298_v52  ;;  %v2219_v59 = vld [vmem:[#allocation2 + $0x108] sm:$0xf]  ;;  %v2300_v60 = vsub.f32 %v5828_v57, %v7347_v43  ;;  %v5829_v61 = vld [vmem:[%s6359_s17 + $0x1e0] sm:$0xf]  ;;  %v2459_v62 = vadd.f32 %v2378_v54, %v2216_v45 }
 0x234   : > { %2538 = vst.msk [vmem:[#allocation2 + $0xf4] sm:$0xf] %vm15_vm0, %v2457_v17  ;;  %v2380_v63 = vand.u32 2147483647, %v2299_v56  ;;  %v2220_v0 = vld [vmem:[#allocation2 + $0x10c] sm:$0xf]  ;;  %v2301_v1 = vsub.f32 %v5829_v61, %v7347_v43 }
 0x235   : > { %v5830_v3 = vld [vmem:[%s6359_s17 + $0x1e4] sm:$0xf]  ;;  %2539 = vst.msk [vmem:[#allocation2 + $0xf8] sm:$0xf] %vm15_vm0, %v2458_v58  ;;  %v2460_v4 = vadd.f32 %v2379_v25, %v2217_v51  ;;  %v2381_v5 = vand.u32 2147483647, %v2300_v60 }
 0x236   : > { %v2221_v6 = vld [vmem:[#allocation2 + $0x110] sm:$0xf]  ;;  %v2302_v7 = vsub.f32 %v5830_v3, %v7347_v43  ;;  %v5831_v8 = vld [vmem:[%s6359_s17 + $0x1e8] sm:$0xf]  ;;  %2540 = vst.msk [vmem:[#allocation2 + $0xfc] sm:$0xf] %vm15_vm0, %v2459_v62  ;;  %v2461_v9 = vadd.f32 %v2380_v63, %v2218_v55 }
 0x237   : > { %v2382_v10 = vand.u32 2147483647, %v2301_v1  ;;  %v2222_v11 = vld [vmem:[#allocation2 + $0x114] sm:$0xf]  ;;  %v2303_v12 = vsub.f32 %v5831_v8, %v7347_v43  ;;  %v5832_v13 = vld [vmem:[%s6359_s17 + $0x1ec] sm:$0xf]  ;;  %v2462_v14 = vadd.f32 %v2381_v5, %v2219_v59 }
 0x238   : > { %2541 = vst.msk [vmem:[#allocation2 + $0x100] sm:$0xf] %vm15_vm0, %v2460_v4  ;;  %v2383_v15 = vand.u32 2147483647, %v2302_v7  ;;  %v2223_v16 = vld [vmem:[#allocation2 + $0x118] sm:$0xf]  ;;  %v2304_v18 = vsub.f32 %v5832_v13, %v7347_v43 }
 0x239   : > { %v5833_v19 = vld [vmem:[%s6359_s17 + $0x1f0] sm:$0xf]  ;;  %2542 = vst.msk [vmem:[#allocation2 + $0x104] sm:$0xf] %vm15_vm0, %v2461_v9  ;;  %v2463_v20 = vadd.f32 %v2382_v10, %v2220_v0  ;;  %v2384_v21 = vand.u32 2147483647, %v2303_v12 }
 0x23a   : > { %v2224_v22 = vld [vmem:[#allocation2 + $0x11c] sm:$0xf]  ;;  %v2305_v50 = vsub.f32 %v5833_v19, %v7347_v43  ;;  %v5834_v23 = vld [vmem:[%s6359_s17 + $0x210] sm:$0xf]  ;;  %2543 = vst.msk [vmem:[#allocation2 + $0x108] sm:$0xf] %vm15_vm0, %v2462_v14  ;;  %v2464_v24 = vadd.f32 %v2383_v15, %v2221_v6 }
 0x23b   : > { %v2385_v26 = vand.u32 2147483647, %v2304_v18  ;;  %v2225_v27 = vld [vmem:[#allocation2 + $0x120] sm:$0xf]  ;;  %v2306_v28 = vsub.f32 %v5834_v23, %v7347_v43  ;;  %v5835_v29 = vld [vmem:[%s6359_s17 + $0x214] sm:$0xf]  ;;  %v2465_v30 = vadd.f32 %v2384_v21, %v2222_v11 }
 0x23c   : > { %2544 = vst.msk [vmem:[#allocation2 + $0x10c] sm:$0xf] %vm15_vm0, %v2463_v20  ;;  %v2386_v31 = vand.u32 2147483647, %v2305_v50  ;;  %v2226_v2 = vld [vmem:[#allocation2 + $0x124] sm:$0xf]  ;;  %v2307_v32 = vsub.f32 %v5835_v29, %v7347_v43 }
 0x23d   : > { %v5836_v33 = vld [vmem:[%s6359_s17 + $0x218] sm:$0xf]  ;;  %2545 = vst.msk [vmem:[#allocation2 + $0x110] sm:$0xf] %vm15_vm0, %v2464_v24  ;;  %v2466_v34 = vadd.f32 %v2385_v26, %v2223_v16  ;;  %v2387_v35 = vand.u32 2147483647, %v2306_v28 }
 0x23e   : > { %v2227_v36 = vld [vmem:[#allocation2 + $0x128] sm:$0xf]  ;;  %v2308_v37 = vsub.f32 %v5836_v33, %v7347_v43  ;;  %v5837_v38 = vld [vmem:[%s6359_s17 + $0x21c] sm:$0xf]  ;;  %2546 = vst.msk [vmem:[#allocation2 + $0x114] sm:$0xf] %vm15_vm0, %v2465_v30  ;;  %v2467_v39 = vadd.f32 %v2386_v31, %v2224_v22 }
 0x23f   : > { %v2388_v40 = vand.u32 2147483647, %v2307_v32  ;;  %v2228_v41 = vld [vmem:[#allocation2 + $0x12c] sm:$0xf]  ;;  %v2309_v42 = vsub.f32 %v5837_v38, %v7347_v43  ;;  %v5838_v44 = vld [vmem:[%s6359_s17 + $0x220] sm:$0xf]  ;;  %v2468_v45 = vadd.f32 %v2387_v35, %v2225_v27 }
 0x240   : > { %2547 = vst.msk [vmem:[#allocation2 + $0x118] sm:$0xf] %vm15_vm0, %v2466_v34  ;;  %v2389_v46 = vand.u32 2147483647, %v2308_v37  ;;  %v2229_v47 = vld [vmem:[#allocation2 + $0x130] sm:$0xf]  ;;  %v2310_v48 = vsub.f32 %v5838_v44, %v7347_v43 }
 0x241   : > { %v5839_v49 = vld [vmem:[%s6359_s17 + $0x224] sm:$0xf]  ;;  %2548 = vst.msk [vmem:[#allocation2 + $0x11c] sm:$0xf] %vm15_vm0, %v2467_v39  ;;  %v2469_v51 = vadd.f32 %v2388_v40, %v2226_v2  ;;  %v2390_v52 = vand.u32 2147483647, %v2309_v42 }
 0x242   : > { %v2230_v53 = vld [vmem:[#allocation2 + $0x134] sm:$0xf]  ;;  %v2311_v17 = vsub.f32 %v5839_v49, %v7347_v43  ;;  %v5840_v54 = vld [vmem:[%s6359_s17 + $0x228] sm:$0xf]  ;;  %2549 = vst.msk [vmem:[#allocation2 + $0x120] sm:$0xf] %vm15_vm0, %v2468_v45  ;;  %v2470_v55 = vadd.f32 %v2389_v46, %v2227_v36 }
 0x243   : > { %v2391_v56 = vand.u32 2147483647, %v2310_v48  ;;  %v2231_v57 = vld [vmem:[#allocation2 + $0x138] sm:$0xf]  ;;  %v2312_v58 = vsub.f32 %v5840_v54, %v7347_v43  ;;  %v5841_v25 = vld [vmem:[%s6359_s17 + $0x22c] sm:$0xf]  ;;  %v2471_v59 = vadd.f32 %v2390_v52, %v2228_v41 }
 0x244   : > { %2550 = vst.msk [vmem:[#allocation2 + $0x124] sm:$0xf] %vm15_vm0, %v2469_v51  ;;  %v2392_v60 = vand.u32 2147483647, %v2311_v17  ;;  %v2232_v61 = vld [vmem:[#allocation2 + $0x13c] sm:$0xf]  ;;  %v2313_v62 = vsub.f32 %v5841_v25, %v7347_v43 }
 0x245   : > { %v5842_v63 = vld [vmem:[%s6359_s17 + $0x230] sm:$0xf]  ;;  %2551 = vst.msk [vmem:[#allocation2 + $0x128] sm:$0xf] %vm15_vm0, %v2470_v55  ;;  %v2472_v0 = vadd.f32 %v2391_v56, %v2229_v47  ;;  %v2393_v1 = vand.u32 2147483647, %v2312_v58 }
 0x246   : > { %v2314_v3 = vsub.f32 %v5842_v63, %v7347_v43  ;;  %v5846_v4 = vld [vmem:[%s6359_s17 + $0x14] sm:$0xf]  ;;  %2552 = vst.msk [vmem:[#allocation2 + $0x12c] sm:$0xf] %vm15_vm0, %v2471_v59  ;;  %v2473_v6 = vadd.f32 %v2392_v60, %v2230_v53  ;;  %v2394_v7 = vand.u32 2147483647, %v2313_v62 }
 0x247   : > { %v7592_v5 = vld [vmem:[%s6364_s20 + $0x14] sm:$0xf]  ;;  %v2233_v8 = vld [vmem:[#allocation2 + $0x140] sm:$0xf]  ;;  %v5847_v10 = vld [vmem:[%s6359_s17 + $0x18] sm:$0xf]  ;;  %v2474_v11 = vadd.f32 %v2393_v1, %v2231_v57 }
 0x248   : > { %v2725_v9 = vsub.f32 %v5846_v4, %v7592_v5  ;;  %2553 = vst.msk [vmem:[#allocation2 + $0x130] sm:$0xf] %vm15_vm0, %v2472_v0  ;;  %v2395_v12 = vand.u32 2147483647, %v2314_v3  ;;  %v2644_v13 = vld [vmem:[#allocation2] sm:$0xf]  ;;  %v2726_v43 = vsub.f32 %v5847_v10, %v7592_v5  ;;  %v2475_v15 = vadd.f32 %v2394_v7, %v2232_v61 }
 0x249   : > { %v5848_v14 = vld [vmem:[%s6359_s17 + $0x1c] sm:$0xf]  ;;  %2554 = vst.msk [vmem:[#allocation2 + $0x134] sm:$0xf] %vm15_vm0, %v2473_v6  ;;  %v2645_v18 = vld [vmem:[#allocation2 + $0x4] sm:$0xf] }
 0x24a   : > { %v2806_v16 = vand.u32 2147483647, %v2725_v9  ;;  %v2727_v19 = vsub.f32 %v5848_v14, %v7592_v5  ;;  %v5849_v20 = vld [vmem:[%s6359_s17 + $0x20] sm:$0xf]  ;;  %2555 = vst.msk [vmem:[#allocation2 + $0x138] sm:$0xf] %vm15_vm0, %v2474_v11  ;;  %v2476_v21 = vadd.f32 %v2395_v12, %v2233_v8 }
 0x24b   : > { %v2807_v22 = vand.u32 2147483647, %v2726_v43  ;;  %v2646_v50 = vld [vmem:[#allocation2 + $0x8] sm:$0xf]  ;;  %v2728_v23 = vsub.f32 %v5849_v20, %v7592_v5  ;;  %v5850_v24 = vld [vmem:[%s6359_s17 + $0x24] sm:$0xf] }
 0x24c   : > { %2556 = vst.msk [vmem:[#allocation2 + $0x13c] sm:$0xf] %vm15_vm0, %v2475_v15  ;;  %v2887_v26 = vadd.f32 %v2806_v16, %v2644_v13  ;;  %v2808_v27 = vand.u32 2147483647, %v2727_v19  ;;  %v2647_v28 = vld [vmem:[#allocation2 + $0xc] sm:$0xf]  ;;  %v2729_v29 = vsub.f32 %v5850_v24, %v7592_v5 }
 0x24d   : > { %v5851_v30 = vld [vmem:[%s6359_s17 + $0x28] sm:$0xf]  ;;  %2557 = vst.msk [vmem:[#allocation2 + $0x140] sm:$0xf] %vm15_vm0, %v2476_v21  ;;  %v2888_v31 = vadd.f32 %v2807_v22, %v2645_v18  ;;  %v2809_v2 = vand.u32 2147483647, %v2728_v23 }
 0x24e   : > { %v2648_v32 = vld [vmem:[#allocation2 + $0x10] sm:$0xf]  ;;  %v2730_v33 = vsub.f32 %v5851_v30, %v7592_v5  ;;  %v5852_v34 = vld [vmem:[%s6359_s17 + $0x2c] sm:$0xf]  ;;  %2968 = vst.msk [vmem:[#allocation2] sm:$0xf] %vm15_vm0, %v2887_v26  ;;  %v2889_v35 = vadd.f32 %v2808_v27, %v2646_v50 }
 0x24f   : > { %v2810_v36 = vand.u32 2147483647, %v2729_v29  ;;  %v2649_v37 = vld [vmem:[#allocation2 + $0x14] sm:$0xf]  ;;  %v2731_v38 = vsub.f32 %v5852_v34, %v7592_v5  ;;  %v5853_v39 = vld [vmem:[%s6359_s17 + $0x30] sm:$0xf]  ;;  %v2890_v40 = vadd.f32 %v2809_v2, %v2647_v28 }
 0x250   : > { %2969 = vst.msk [vmem:[#allocation2 + $0x4] sm:$0xf] %vm15_vm0, %v2888_v31  ;;  %v2811_v41 = vand.u32 2147483647, %v2730_v33  ;;  %v2650_v42 = vld [vmem:[#allocation2 + $0x18] sm:$0xf]  ;;  %v2732_v44 = vsub.f32 %v5853_v39, %v7592_v5 }
 0x251   : > { %v5854_v45 = vld [vmem:[%s6359_s17 + $0x34] sm:$0xf]  ;;  %2970 = vst.msk [vmem:[#allocation2 + $0x8] sm:$0xf] %vm15_vm0, %v2889_v35  ;;  %v2891_v46 = vadd.f32 %v2810_v36, %v2648_v32  ;;  %v2812_v47 = vand.u32 2147483647, %v2731_v38 }
 0x252   : > { %v2651_v48 = vld [vmem:[#allocation2 + $0x1c] sm:$0xf]  ;;  %v2733_v49 = vsub.f32 %v5854_v45, %v7592_v5  ;;  %v5855_v51 = vld [vmem:[%s6359_s17 + $0x54] sm:$0xf]  ;;  %2971 = vst.msk [vmem:[#allocation2 + $0xc] sm:$0xf] %vm15_vm0, %v2890_v40  ;;  %v2892_v52 = vadd.f32 %v2811_v41, %v2649_v37 }
 0x253   : > { %v2813_v53 = vand.u32 2147483647, %v2732_v44  ;;  %v2652_v17 = vld [vmem:[#allocation2 + $0x20] sm:$0xf]  ;;  %v2734_v54 = vsub.f32 %v5855_v51, %v7592_v5  ;;  %v5856_v55 = vld [vmem:[%s6359_s17 + $0x58] sm:$0xf]  ;;  %v2893_v56 = vadd.f32 %v2812_v47, %v2650_v42 }
 0x254   : > { %2972 = vst.msk [vmem:[#allocation2 + $0x10] sm:$0xf] %vm15_vm0, %v2891_v46  ;;  %v2814_v57 = vand.u32 2147483647, %v2733_v49  ;;  %v2653_v58 = vld [vmem:[#allocation2 + $0x24] sm:$0xf]  ;;  %v2735_v25 = vsub.f32 %v5856_v55, %v7592_v5 }
 0x255   : > { %v5857_v59 = vld [vmem:[%s6359_s17 + $0x5c] sm:$0xf]  ;;  %2973 = vst.msk [vmem:[#allocation2 + $0x14] sm:$0xf] %vm15_vm0, %v2892_v52  ;;  %v2894_v60 = vadd.f32 %v2813_v53, %v2651_v48  ;;  %v2815_v61 = vand.u32 2147483647, %v2734_v54 }
 0x256   : > { %v2654_v62 = vld [vmem:[#allocation2 + $0x28] sm:$0xf]  ;;  %v2736_v63 = vsub.f32 %v5857_v59, %v7592_v5  ;;  %v5858_v0 = vld [vmem:[%s6359_s17 + $0x60] sm:$0xf]  ;;  %2974 = vst.msk [vmem:[#allocation2 + $0x18] sm:$0xf] %vm15_vm0, %v2893_v56  ;;  %v2895_v1 = vadd.f32 %v2814_v57, %v2652_v17 }
 0x257   : > { %v2816_v3 = vand.u32 2147483647, %v2735_v25  ;;  %v2655_v4 = vld [vmem:[#allocation2 + $0x2c] sm:$0xf]  ;;  %v2737_v6 = vsub.f32 %v5858_v0, %v7592_v5  ;;  %v5859_v7 = vld [vmem:[%s6359_s17 + $0x64] sm:$0xf]  ;;  %v2896_v8 = vadd.f32 %v2815_v61, %v2653_v58 }
 0x258   : > { %2975 = vst.msk [vmem:[#allocation2 + $0x1c] sm:$0xf] %vm15_vm0, %v2894_v60  ;;  %v2817_v9 = vand.u32 2147483647, %v2736_v63  ;;  %v2656_v10 = vld [vmem:[#allocation2 + $0x30] sm:$0xf]  ;;  %v2738_v11 = vsub.f32 %v5859_v7, %v7592_v5 }
 0x259   : > { %v5860_v12 = vld [vmem:[%s6359_s17 + $0x68] sm:$0xf]  ;;  %2976 = vst.msk [vmem:[#allocation2 + $0x20] sm:$0xf] %vm15_vm0, %v2895_v1  ;;  %v2897_v13 = vadd.f32 %v2816_v3, %v2654_v62  ;;  %v2818_v43 = vand.u32 2147483647, %v2737_v6 }
 0x25a   : > { %v2657_v14 = vld [vmem:[#allocation2 + $0x34] sm:$0xf]  ;;  %v2739_v15 = vsub.f32 %v5860_v12, %v7592_v5  ;;  %v5861_v16 = vld [vmem:[%s6359_s17 + $0x6c] sm:$0xf]  ;;  %2977 = vst.msk [vmem:[#allocation2 + $0x24] sm:$0xf] %vm15_vm0, %v2896_v8  ;;  %v2898_v18 = vadd.f32 %v2817_v9, %v2655_v4 }
 0x25b   : > { %v2819_v19 = vand.u32 2147483647, %v2738_v11  ;;  %v2658_v20 = vld [vmem:[#allocation2 + $0x38] sm:$0xf]  ;;  %v2740_v21 = vsub.f32 %v5861_v16, %v7592_v5  ;;  %v5862_v22 = vld [vmem:[%s6359_s17 + $0x70] sm:$0xf]  ;;  %v2899_v50 = vadd.f32 %v2818_v43, %v2656_v10 }
 0x25c   : > { %2978 = vst.msk [vmem:[#allocation2 + $0x28] sm:$0xf] %vm15_vm0, %v2897_v13  ;;  %v2820_v23 = vand.u32 2147483647, %v2739_v15  ;;  %v2659_v24 = vld [vmem:[#allocation2 + $0x3c] sm:$0xf]  ;;  %v2741_v26 = vsub.f32 %v5862_v22, %v7592_v5 }
 0x25d   : > { %v5863_v27 = vld [vmem:[%s6359_s17 + $0x74] sm:$0xf]  ;;  %2979 = vst.msk [vmem:[#allocation2 + $0x2c] sm:$0xf] %vm15_vm0, %v2898_v18  ;;  %v2900_v28 = vadd.f32 %v2819_v19, %v2657_v14  ;;  %v2821_v29 = vand.u32 2147483647, %v2740_v21 }
 0x25e   : > { %v2660_v30 = vld [vmem:[#allocation2 + $0x40] sm:$0xf]  ;;  %v2742_v31 = vsub.f32 %v5863_v27, %v7592_v5  ;;  %v5864_v2 = vld [vmem:[%s6359_s17 + $0x94] sm:$0xf]  ;;  %2980 = vst.msk [vmem:[#allocation2 + $0x30] sm:$0xf] %vm15_vm0, %v2899_v50  ;;  %v2901_v32 = vadd.f32 %v2820_v23, %v2658_v20 }
 0x25f   : > { %v2822_v33 = vand.u32 2147483647, %v2741_v26  ;;  %v2661_v34 = vld [vmem:[#allocation2 + $0x44] sm:$0xf]  ;;  %v2743_v35 = vsub.f32 %v5864_v2, %v7592_v5  ;;  %v5865_v36 = vld [vmem:[%s6359_s17 + $0x98] sm:$0xf]  ;;  %v2902_v37 = vadd.f32 %v2821_v29, %v2659_v24 }
 0x260   : > { %2981 = vst.msk [vmem:[#allocation2 + $0x34] sm:$0xf] %vm15_vm0, %v2900_v28  ;;  %v2823_v38 = vand.u32 2147483647, %v2742_v31  ;;  %v2662_v39 = vld [vmem:[#allocation2 + $0x48] sm:$0xf]  ;;  %v2744_v40 = vsub.f32 %v5865_v36, %v7592_v5 }
 0x261   : > { %v5866_v41 = vld [vmem:[%s6359_s17 + $0x9c] sm:$0xf]  ;;  %2982 = vst.msk [vmem:[#allocation2 + $0x38] sm:$0xf] %vm15_vm0, %v2901_v32  ;;  %v2903_v42 = vadd.f32 %v2822_v33, %v2660_v30  ;;  %v2824_v44 = vand.u32 2147483647, %v2743_v35 }
 0x262   : > { %v2663_v45 = vld [vmem:[#allocation2 + $0x4c] sm:$0xf]  ;;  %v2745_v46 = vsub.f32 %v5866_v41, %v7592_v5  ;;  %v5867_v47 = vld [vmem:[%s6359_s17 + $0xa0] sm:$0xf]  ;;  %2983 = vst.msk [vmem:[#allocation2 + $0x3c] sm:$0xf] %vm15_vm0, %v2902_v37  ;;  %v2904_v48 = vadd.f32 %v2823_v38, %v2661_v34 }
 0x263   : > { %v2825_v49 = vand.u32 2147483647, %v2744_v40  ;;  %v2664_v51 = vld [vmem:[#allocation2 + $0x50] sm:$0xf]  ;;  %v2746_v52 = vsub.f32 %v5867_v47, %v7592_v5  ;;  %v5868_v53 = vld [vmem:[%s6359_s17 + $0xa4] sm:$0xf]  ;;  %v2905_v17 = vadd.f32 %v2824_v44, %v2662_v39 }
 0x264   : > { %2984 = vst.msk [vmem:[#allocation2 + $0x40] sm:$0xf] %vm15_vm0, %v2903_v42  ;;  %v2826_v54 = vand.u32 2147483647, %v2745_v46  ;;  %v2665_v55 = vld [vmem:[#allocation2 + $0x54] sm:$0xf]  ;;  %v2747_v56 = vsub.f32 %v5868_v53, %v7592_v5 }
 0x265   : > { %v5869_v57 = vld [vmem:[%s6359_s17 + $0xa8] sm:$0xf]  ;;  %2985 = vst.msk [vmem:[#allocation2 + $0x44] sm:$0xf] %vm15_vm0, %v2904_v48  ;;  %v2906_v58 = vadd.f32 %v2825_v49, %v2663_v45  ;;  %v2827_v25 = vand.u32 2147483647, %v2746_v52 }
 0x266   : > { %v2666_v59 = vld [vmem:[#allocation2 + $0x58] sm:$0xf]  ;;  %v2748_v60 = vsub.f32 %v5869_v57, %v7592_v5  ;;  %v5870_v61 = vld [vmem:[%s6359_s17 + $0xac] sm:$0xf]  ;;  %2986 = vst.msk [vmem:[#allocation2 + $0x48] sm:$0xf] %vm15_vm0, %v2905_v17  ;;  %v2907_v62 = vadd.f32 %v2826_v54, %v2664_v51 }
 0x267   : > { %v2828_v63 = vand.u32 2147483647, %v2747_v56  ;;  %v2667_v0 = vld [vmem:[#allocation2 + $0x5c] sm:$0xf]  ;;  %v2749_v1 = vsub.f32 %v5870_v61, %v7592_v5  ;;  %v5871_v3 = vld [vmem:[%s6359_s17 + $0xb0] sm:$0xf]  ;;  %v2908_v4 = vadd.f32 %v2827_v25, %v2665_v55 }
 0x268   : > { %2987 = vst.msk [vmem:[#allocation2 + $0x4c] sm:$0xf] %vm15_vm0, %v2906_v58  ;;  %v2829_v6 = vand.u32 2147483647, %v2748_v60  ;;  %v2668_v7 = vld [vmem:[#allocation2 + $0x60] sm:$0xf]  ;;  %v2750_v8 = vsub.f32 %v5871_v3, %v7592_v5 }
 0x269   : > { %v5872_v9 = vld [vmem:[%s6359_s17 + $0xb4] sm:$0xf]  ;;  %2988 = vst.msk [vmem:[#allocation2 + $0x50] sm:$0xf] %vm15_vm0, %v2907_v62  ;;  %v2909_v10 = vadd.f32 %v2828_v63, %v2666_v59  ;;  %v2830_v11 = vand.u32 2147483647, %v2749_v1 }
 0x26a   : > { %v2669_v12 = vld [vmem:[#allocation2 + $0x64] sm:$0xf]  ;;  %v2751_v13 = vsub.f32 %v5872_v9, %v7592_v5  ;;  %v5873_v43 = vld [vmem:[%s6359_s17 + $0xd4] sm:$0xf]  ;;  %2989 = vst.msk [vmem:[#allocation2 + $0x54] sm:$0xf] %vm15_vm0, %v2908_v4  ;;  %v2910_v14 = vadd.f32 %v2829_v6, %v2667_v0 }
 0x26b   : > { %v2831_v15 = vand.u32 2147483647, %v2750_v8  ;;  %v2670_v16 = vld [vmem:[#allocation2 + $0x68] sm:$0xf]  ;;  %v2752_v18 = vsub.f32 %v5873_v43, %v7592_v5  ;;  %v5874_v19 = vld [vmem:[%s6359_s17 + $0xd8] sm:$0xf]  ;;  %v2911_v20 = vadd.f32 %v2830_v11, %v2668_v7 }
 0x26c   : > { %2990 = vst.msk [vmem:[#allocation2 + $0x58] sm:$0xf] %vm15_vm0, %v2909_v10  ;;  %v2832_v21 = vand.u32 2147483647, %v2751_v13  ;;  %v2671_v22 = vld [vmem:[#allocation2 + $0x6c] sm:$0xf]  ;;  %v2753_v50 = vsub.f32 %v5874_v19, %v7592_v5 }
 0x26d   : > { %v5875_v23 = vld [vmem:[%s6359_s17 + $0xdc] sm:$0xf]  ;;  %2991 = vst.msk [vmem:[#allocation2 + $0x5c] sm:$0xf] %vm15_vm0, %v2910_v14  ;;  %v2912_v24 = vadd.f32 %v2831_v15, %v2669_v12  ;;  %v2833_v26 = vand.u32 2147483647, %v2752_v18 }
 0x26e   : > { %v2672_v27 = vld [vmem:[#allocation2 + $0x70] sm:$0xf]  ;;  %v2754_v28 = vsub.f32 %v5875_v23, %v7592_v5  ;;  %v5876_v29 = vld [vmem:[%s6359_s17 + $0xe0] sm:$0xf]  ;;  %2992 = vst.msk [vmem:[#allocation2 + $0x60] sm:$0xf] %vm15_vm0, %v2911_v20  ;;  %v2913_v30 = vadd.f32 %v2832_v21, %v2670_v16 }
 0x26f   : > { %v2834_v31 = vand.u32 2147483647, %v2753_v50  ;;  %v2673_v2 = vld [vmem:[#allocation2 + $0x74] sm:$0xf]  ;;  %v2755_v32 = vsub.f32 %v5876_v29, %v7592_v5  ;;  %v5877_v33 = vld [vmem:[%s6359_s17 + $0xe4] sm:$0xf]  ;;  %v2914_v34 = vadd.f32 %v2833_v26, %v2671_v22 }
 0x270   : > { %2993 = vst.msk [vmem:[#allocation2 + $0x64] sm:$0xf] %vm15_vm0, %v2912_v24  ;;  %v2835_v35 = vand.u32 2147483647, %v2754_v28  ;;  %v2674_v36 = vld [vmem:[#allocation2 + $0x78] sm:$0xf]  ;;  %v2756_v37 = vsub.f32 %v5877_v33, %v7592_v5 }
 0x271   : > { %v5878_v38 = vld [vmem:[%s6359_s17 + $0xe8] sm:$0xf]  ;;  %2994 = vst.msk [vmem:[#allocation2 + $0x68] sm:$0xf] %vm15_vm0, %v2913_v30  ;;  %v2915_v39 = vadd.f32 %v2834_v31, %v2672_v27  ;;  %v2836_v40 = vand.u32 2147483647, %v2755_v32 }
 0x272   : > { %v2675_v41 = vld [vmem:[#allocation2 + $0x7c] sm:$0xf]  ;;  %v2757_v42 = vsub.f32 %v5878_v38, %v7592_v5  ;;  %v5879_v44 = vld [vmem:[%s6359_s17 + $0xec] sm:$0xf]  ;;  %2995 = vst.msk [vmem:[#allocation2 + $0x6c] sm:$0xf] %vm15_vm0, %v2914_v34  ;;  %v2916_v45 = vadd.f32 %v2835_v35, %v2673_v2 }
 0x273   : > { %v2837_v46 = vand.u32 2147483647, %v2756_v37  ;;  %v2676_v47 = vld [vmem:[#allocation2 + $0x80] sm:$0xf]  ;;  %v2758_v48 = vsub.f32 %v5879_v44, %v7592_v5  ;;  %v5880_v49 = vld [vmem:[%s6359_s17 + $0xf0] sm:$0xf]  ;;  %v2917_v51 = vadd.f32 %v2836_v40, %v2674_v36 }
 0x274   : > { %2996 = vst.msk [vmem:[#allocation2 + $0x70] sm:$0xf] %vm15_vm0, %v2915_v39  ;;  %v2838_v52 = vand.u32 2147483647, %v2757_v42  ;;  %v2677_v53 = vld [vmem:[#allocation2 + $0x84] sm:$0xf]  ;;  %v2759_v17 = vsub.f32 %v5880_v49, %v7592_v5 }
 0x275   : > { %v5881_v54 = vld [vmem:[%s6359_s17 + $0xf4] sm:$0xf]  ;;  %2997 = vst.msk [vmem:[#allocation2 + $0x74] sm:$0xf] %vm15_vm0, %v2916_v45  ;;  %v2918_v55 = vadd.f32 %v2837_v46, %v2675_v41  ;;  %v2839_v56 = vand.u32 2147483647, %v2758_v48 }
 0x276   : > { %v2678_v57 = vld [vmem:[#allocation2 + $0x88] sm:$0xf]  ;;  %v2760_v58 = vsub.f32 %v5881_v54, %v7592_v5  ;;  %v5882_v25 = vld [vmem:[%s6359_s17 + $0x114] sm:$0xf]  ;;  %2998 = vst.msk [vmem:[#allocation2 + $0x78] sm:$0xf] %vm15_vm0, %v2917_v51  ;;  %v2919_v59 = vadd.f32 %v2838_v52, %v2676_v47 }
 0x277   : > { %v2840_v60 = vand.u32 2147483647, %v2759_v17  ;;  %v2679_v61 = vld [vmem:[#allocation2 + $0x8c] sm:$0xf]  ;;  %v2761_v62 = vsub.f32 %v5882_v25, %v7592_v5  ;;  %v5883_v63 = vld [vmem:[%s6359_s17 + $0x118] sm:$0xf]  ;;  %v2920_v0 = vadd.f32 %v2839_v56, %v2677_v53 }
 0x278   : > { %2999 = vst.msk [vmem:[#allocation2 + $0x7c] sm:$0xf] %vm15_vm0, %v2918_v55  ;;  %v2841_v1 = vand.u32 2147483647, %v2760_v58  ;;  %v2680_v3 = vld [vmem:[#allocation2 + $0x90] sm:$0xf]  ;;  %v2762_v4 = vsub.f32 %v5883_v63, %v7592_v5 }
 0x279   : > { %v5884_v6 = vld [vmem:[%s6359_s17 + $0x11c] sm:$0xf]  ;;  %3000 = vst.msk [vmem:[#allocation2 + $0x80] sm:$0xf] %vm15_vm0, %v2919_v59  ;;  %v2921_v7 = vadd.f32 %v2840_v60, %v2678_v57  ;;  %v2842_v8 = vand.u32 2147483647, %v2761_v62 }
 0x27a   : > { %v2681_v9 = vld [vmem:[#allocation2 + $0x94] sm:$0xf]  ;;  %v2763_v10 = vsub.f32 %v5884_v6, %v7592_v5  ;;  %v5885_v11 = vld [vmem:[%s6359_s17 + $0x120] sm:$0xf]  ;;  %3001 = vst.msk [vmem:[#allocation2 + $0x84] sm:$0xf] %vm15_vm0, %v2920_v0  ;;  %v2922_v12 = vadd.f32 %v2841_v1, %v2679_v61 }
 0x27b   : > { %v2843_v13 = vand.u32 2147483647, %v2762_v4  ;;  %v2682_v43 = vld [vmem:[#allocation2 + $0x98] sm:$0xf]  ;;  %v2764_v14 = vsub.f32 %v5885_v11, %v7592_v5  ;;  %v5886_v15 = vld [vmem:[%s6359_s17 + $0x124] sm:$0xf]  ;;  %v2923_v16 = vadd.f32 %v2842_v8, %v2680_v3 }
 0x27c   : > { %3002 = vst.msk [vmem:[#allocation2 + $0x88] sm:$0xf] %vm15_vm0, %v2921_v7  ;;  %v2844_v18 = vand.u32 2147483647, %v2763_v10  ;;  %v2683_v19 = vld [vmem:[#allocation2 + $0x9c] sm:$0xf]  ;;  %v2765_v20 = vsub.f32 %v5886_v15, %v7592_v5 }
 0x27d   : > { %v5887_v21 = vld [vmem:[%s6359_s17 + $0x128] sm:$0xf]  ;;  %3003 = vst.msk [vmem:[#allocation2 + $0x8c] sm:$0xf] %vm15_vm0, %v2922_v12  ;;  %v2924_v22 = vadd.f32 %v2843_v13, %v2681_v9  ;;  %v2845_v50 = vand.u32 2147483647, %v2764_v14 }
 0x27e   : > { %v2684_v23 = vld [vmem:[#allocation2 + $0xa0] sm:$0xf]  ;;  %v2766_v24 = vsub.f32 %v5887_v21, %v7592_v5  ;;  %v5888_v26 = vld [vmem:[%s6359_s17 + $0x12c] sm:$0xf]  ;;  %3004 = vst.msk [vmem:[#allocation2 + $0x90] sm:$0xf] %vm15_vm0, %v2923_v16  ;;  %v2925_v27 = vadd.f32 %v2844_v18, %v2682_v43 }
 0x27f   : > { %v2846_v28 = vand.u32 2147483647, %v2765_v20  ;;  %v2685_v29 = vld [vmem:[#allocation2 + $0xa4] sm:$0xf]  ;;  %v2767_v30 = vsub.f32 %v5888_v26, %v7592_v5  ;;  %v5889_v31 = vld [vmem:[%s6359_s17 + $0x130] sm:$0xf]  ;;  %v2926_v2 = vadd.f32 %v2845_v50, %v2683_v19 }
 0x280   : > { %3005 = vst.msk [vmem:[#allocation2 + $0x94] sm:$0xf] %vm15_vm0, %v2924_v22  ;;  %v2847_v32 = vand.u32 2147483647, %v2766_v24  ;;  %v2686_v33 = vld [vmem:[#allocation2 + $0xa8] sm:$0xf]  ;;  %v2768_v34 = vsub.f32 %v5889_v31, %v7592_v5 }
 0x281   : > { %v5890_v35 = vld [vmem:[%s6359_s17 + $0x134] sm:$0xf]  ;;  %3006 = vst.msk [vmem:[#allocation2 + $0x98] sm:$0xf] %vm15_vm0, %v2925_v27  ;;  %v2927_v36 = vadd.f32 %v2846_v28, %v2684_v23  ;;  %v2848_v37 = vand.u32 2147483647, %v2767_v30 }
 0x282   : > { %v2687_v38 = vld [vmem:[#allocation2 + $0xac] sm:$0xf]  ;;  %v2769_v39 = vsub.f32 %v5890_v35, %v7592_v5  ;;  %v5891_v40 = vld [vmem:[%s6359_s17 + $0x154] sm:$0xf]  ;;  %3007 = vst.msk [vmem:[#allocation2 + $0x9c] sm:$0xf] %vm15_vm0, %v2926_v2  ;;  %v2928_v41 = vadd.f32 %v2847_v32, %v2685_v29 }
 0x283   : > { %v2849_v42 = vand.u32 2147483647, %v2768_v34  ;;  %v2688_v44 = vld [vmem:[#allocation2 + $0xb0] sm:$0xf]  ;;  %v2770_v45 = vsub.f32 %v5891_v40, %v7592_v5  ;;  %v5892_v46 = vld [vmem:[%s6359_s17 + $0x158] sm:$0xf]  ;;  %v2929_v47 = vadd.f32 %v2848_v37, %v2686_v33 }
 0x284   : > { %3008 = vst.msk [vmem:[#allocation2 + $0xa0] sm:$0xf] %vm15_vm0, %v2927_v36  ;;  %v2850_v48 = vand.u32 2147483647, %v2769_v39  ;;  %v2689_v49 = vld [vmem:[#allocation2 + $0xb4] sm:$0xf]  ;;  %v2771_v51 = vsub.f32 %v5892_v46, %v7592_v5 }
 0x285   : > { %v5893_v52 = vld [vmem:[%s6359_s17 + $0x15c] sm:$0xf]  ;;  %3009 = vst.msk [vmem:[#allocation2 + $0xa4] sm:$0xf] %vm15_vm0, %v2928_v41  ;;  %v2930_v53 = vadd.f32 %v2849_v42, %v2687_v38  ;;  %v2851_v17 = vand.u32 2147483647, %v2770_v45 }
 0x286   : > { %v2690_v54 = vld [vmem:[#allocation2 + $0xb8] sm:$0xf]  ;;  %v2772_v55 = vsub.f32 %v5893_v52, %v7592_v5  ;;  %v5894_v56 = vld [vmem:[%s6359_s17 + $0x160] sm:$0xf]  ;;  %3010 = vst.msk [vmem:[#allocation2 + $0xa8] sm:$0xf] %vm15_vm0, %v2929_v47  ;;  %v2931_v57 = vadd.f32 %v2850_v48, %v2688_v44 }
 0x287   : > { %v2852_v58 = vand.u32 2147483647, %v2771_v51  ;;  %v2691_v25 = vld [vmem:[#allocation2 + $0xbc] sm:$0xf]  ;;  %v2773_v59 = vsub.f32 %v5894_v56, %v7592_v5  ;;  %v5895_v60 = vld [vmem:[%s6359_s17 + $0x164] sm:$0xf]  ;;  %v2932_v61 = vadd.f32 %v2851_v17, %v2689_v49 }
 0x288   : > { %3011 = vst.msk [vmem:[#allocation2 + $0xac] sm:$0xf] %vm15_vm0, %v2930_v53  ;;  %v2853_v62 = vand.u32 2147483647, %v2772_v55  ;;  %v2692_v63 = vld [vmem:[#allocation2 + $0xc0] sm:$0xf]  ;;  %v2774_v0 = vsub.f32 %v5895_v60, %v7592_v5 }
 0x289   : > { %v5896_v1 = vld [vmem:[%s6359_s17 + $0x168] sm:$0xf]  ;;  %3012 = vst.msk [vmem:[#allocation2 + $0xb0] sm:$0xf] %vm15_vm0, %v2931_v57  ;;  %v2933_v3 = vadd.f32 %v2852_v58, %v2690_v54  ;;  %v2854_v4 = vand.u32 2147483647, %v2773_v59 }
 0x28a   : > { %v2693_v6 = vld [vmem:[#allocation2 + $0xc4] sm:$0xf]  ;;  %v2775_v7 = vsub.f32 %v5896_v1, %v7592_v5  ;;  %v5897_v8 = vld [vmem:[%s6359_s17 + $0x16c] sm:$0xf]  ;;  %3013 = vst.msk [vmem:[#allocation2 + $0xb4] sm:$0xf] %vm15_vm0, %v2932_v61  ;;  %v2934_v9 = vadd.f32 %v2853_v62, %v2691_v25 }
 0x28b   : > { %v2855_v10 = vand.u32 2147483647, %v2774_v0  ;;  %v2694_v11 = vld [vmem:[#allocation2 + $0xc8] sm:$0xf]  ;;  %v2776_v12 = vsub.f32 %v5897_v8, %v7592_v5  ;;  %v5898_v13 = vld [vmem:[%s6359_s17 + $0x170] sm:$0xf]  ;;  %v2935_v43 = vadd.f32 %v2854_v4, %v2692_v63 }
 0x28c   : > { %3014 = vst.msk [vmem:[#allocation2 + $0xb8] sm:$0xf] %vm15_vm0, %v2933_v3  ;;  %v2856_v14 = vand.u32 2147483647, %v2775_v7  ;;  %v2695_v15 = vld [vmem:[#allocation2 + $0xcc] sm:$0xf]  ;;  %v2777_v16 = vsub.f32 %v5898_v13, %v7592_v5 }
 0x28d   : > { %v5899_v18 = vld [vmem:[%s6359_s17 + $0x174] sm:$0xf]  ;;  %3015 = vst.msk [vmem:[#allocation2 + $0xbc] sm:$0xf] %vm15_vm0, %v2934_v9  ;;  %v2936_v19 = vadd.f32 %v2855_v10, %v2693_v6  ;;  %v2857_v20 = vand.u32 2147483647, %v2776_v12 }
 0x28e   : > { %v2696_v21 = vld [vmem:[#allocation2 + $0xd0] sm:$0xf]  ;;  %v2778_v22 = vsub.f32 %v5899_v18, %v7592_v5  ;;  %v5900_v50 = vld [vmem:[%s6359_s17 + $0x194] sm:$0xf]  ;;  %3016 = vst.msk [vmem:[#allocation2 + $0xc0] sm:$0xf] %vm15_vm0, %v2935_v43  ;;  %v2937_v23 = vadd.f32 %v2856_v14, %v2694_v11 }
 0x28f   : > { %v2858_v24 = vand.u32 2147483647, %v2777_v16  ;;  %v2697_v26 = vld [vmem:[#allocation2 + $0xd4] sm:$0xf]  ;;  %v2779_v27 = vsub.f32 %v5900_v50, %v7592_v5  ;;  %v5901_v28 = vld [vmem:[%s6359_s17 + $0x198] sm:$0xf]  ;;  %v2938_v29 = vadd.f32 %v2857_v20, %v2695_v15 }
 0x290   : > { %3017 = vst.msk [vmem:[#allocation2 + $0xc4] sm:$0xf] %vm15_vm0, %v2936_v19  ;;  %v2859_v30 = vand.u32 2147483647, %v2778_v22  ;;  %v2698_v31 = vld [vmem:[#allocation2 + $0xd8] sm:$0xf]  ;;  %v2780_v2 = vsub.f32 %v5901_v28, %v7592_v5 }
 0x291   : > { %v5902_v32 = vld [vmem:[%s6359_s17 + $0x19c] sm:$0xf]  ;;  %3018 = vst.msk [vmem:[#allocation2 + $0xc8] sm:$0xf] %vm15_vm0, %v2937_v23  ;;  %v2939_v33 = vadd.f32 %v2858_v24, %v2696_v21  ;;  %v2860_v34 = vand.u32 2147483647, %v2779_v27 }
 0x292   : > { %v2699_v35 = vld [vmem:[#allocation2 + $0xdc] sm:$0xf]  ;;  %v2781_v36 = vsub.f32 %v5902_v32, %v7592_v5  ;;  %v5903_v37 = vld [vmem:[%s6359_s17 + $0x1a0] sm:$0xf]  ;;  %3019 = vst.msk [vmem:[#allocation2 + $0xcc] sm:$0xf] %vm15_vm0, %v2938_v29  ;;  %v2940_v38 = vadd.f32 %v2859_v30, %v2697_v26 }
 0x293   : > { %v2861_v39 = vand.u32 2147483647, %v2780_v2  ;;  %v2700_v40 = vld [vmem:[#allocation2 + $0xe0] sm:$0xf]  ;;  %v2782_v41 = vsub.f32 %v5903_v37, %v7592_v5  ;;  %v5904_v42 = vld [vmem:[%s6359_s17 + $0x1a4] sm:$0xf]  ;;  %v2941_v44 = vadd.f32 %v2860_v34, %v2698_v31 }
 0x294   : > { %3020 = vst.msk [vmem:[#allocation2 + $0xd0] sm:$0xf] %vm15_vm0, %v2939_v33  ;;  %v2862_v45 = vand.u32 2147483647, %v2781_v36  ;;  %v2701_v46 = vld [vmem:[#allocation2 + $0xe4] sm:$0xf]  ;;  %v2783_v47 = vsub.f32 %v5904_v42, %v7592_v5 }
 0x295   : > { %v5905_v48 = vld [vmem:[%s6359_s17 + $0x1a8] sm:$0xf]  ;;  %3021 = vst.msk [vmem:[#allocation2 + $0xd4] sm:$0xf] %vm15_vm0, %v2940_v38  ;;  %v2942_v49 = vadd.f32 %v2861_v39, %v2699_v35  ;;  %v2863_v51 = vand.u32 2147483647, %v2782_v41 }
 0x296   : > { %v2702_v52 = vld [vmem:[#allocation2 + $0xe8] sm:$0xf]  ;;  %v2784_v53 = vsub.f32 %v5905_v48, %v7592_v5  ;;  %v5906_v17 = vld [vmem:[%s6359_s17 + $0x1ac] sm:$0xf]  ;;  %3022 = vst.msk [vmem:[#allocation2 + $0xd8] sm:$0xf] %vm15_vm0, %v2941_v44  ;;  %v2943_v54 = vadd.f32 %v2862_v45, %v2700_v40 }
 0x297   : > { %v2864_v55 = vand.u32 2147483647, %v2783_v47  ;;  %v2703_v56 = vld [vmem:[#allocation2 + $0xec] sm:$0xf]  ;;  %v2785_v57 = vsub.f32 %v5906_v17, %v7592_v5  ;;  %v5907_v58 = vld [vmem:[%s6359_s17 + $0x1b0] sm:$0xf]  ;;  %v2944_v25 = vadd.f32 %v2863_v51, %v2701_v46 }
 0x298   : > { %3023 = vst.msk [vmem:[#allocation2 + $0xdc] sm:$0xf] %vm15_vm0, %v2942_v49  ;;  %v2865_v59 = vand.u32 2147483647, %v2784_v53  ;;  %v2704_v60 = vld [vmem:[#allocation2 + $0xf0] sm:$0xf]  ;;  %v2786_v61 = vsub.f32 %v5907_v58, %v7592_v5 }
 0x299   : > { %v5908_v62 = vld [vmem:[%s6359_s17 + $0x1b4] sm:$0xf]  ;;  %3024 = vst.msk [vmem:[#allocation2 + $0xe0] sm:$0xf] %vm15_vm0, %v2943_v54  ;;  %v2945_v63 = vadd.f32 %v2864_v55, %v2702_v52  ;;  %v2866_v0 = vand.u32 2147483647, %v2785_v57 }
 0x29a   : > { %v2705_v1 = vld [vmem:[#allocation2 + $0xf4] sm:$0xf]  ;;  %v2787_v3 = vsub.f32 %v5908_v62, %v7592_v5  ;;  %3025 = vst.msk [vmem:[#allocation2 + $0xe4] sm:$0xf] %vm15_vm0, %v2944_v25  ;;  %v2946_v6 = vadd.f32 %v2865_v59, %v2703_v56  ;;  %v2867_v7 = vand.u32 2147483647, %v2786_v61 }
 0x29b   : > { %v5909_v4 = vld [vmem:[%s6359_s17 + $0x1d4] sm:$0xf]  ;;  %v2706_v8 = vld [vmem:[#allocation2 + $0xf8] sm:$0xf]  ;;  %3026 = vst.msk [vmem:[#allocation2 + $0xe8] sm:$0xf] %vm15_vm0, %v2945_v63  ;;  %v2947_v11 = vadd.f32 %v2866_v0, %v2704_v60 }
 0x29c   : > { %v2788_v9 = vsub.f32 %v5909_v4, %v7592_v5  ;;  %v5910_v10 = vld [vmem:[%s6359_s17 + $0x1d8] sm:$0xf]  ;;  %v2868_v12 = vand.u32 2147483647, %v2787_v3  ;;  %v2707_v13 = vld [vmem:[#allocation2 + $0xfc] sm:$0xf]  ;;  %v2948_v15 = vadd.f32 %v2867_v7, %v2705_v1 }
 0x29d   : > { %v2789_v43 = vsub.f32 %v5910_v10, %v7592_v5  ;;  %v5911_v14 = vld [vmem:[%s6359_s17 + $0x1dc] sm:$0xf]  ;;  %3027 = vst.msk [vmem:[#allocation2 + $0xec] sm:$0xf] %vm15_vm0, %v2946_v6  ;;  %v2708_v18 = vld [vmem:[#allocation2 + $0x100] sm:$0xf] }
 0x29e   : > { %v2869_v16 = vand.u32 2147483647, %v2788_v9  ;;  %v2790_v19 = vsub.f32 %v5911_v14, %v7592_v5  ;;  %v5912_v20 = vld [vmem:[%s6359_s17 + $0x1e0] sm:$0xf]  ;;  %3028 = vst.msk [vmem:[#allocation2 + $0xf0] sm:$0xf] %vm15_vm0, %v2947_v11  ;;  %v2949_v21 = vadd.f32 %v2868_v12, %v2706_v8 }
 0x29f   : > { %v2870_v22 = vand.u32 2147483647, %v2789_v43  ;;  %v2709_v50 = vld [vmem:[#allocation2 + $0x104] sm:$0xf]  ;;  %v2791_v23 = vsub.f32 %v5912_v20, %v7592_v5  ;;  %3029 = vst.msk [vmem:[#allocation2 + $0xf4] sm:$0xf] %vm15_vm0, %v2948_v15 }
 0x2a0   : > { %v5913_v24 = vld [vmem:[%s6359_s17 + $0x1e4] sm:$0xf]  ;;  %v2950_v26 = vadd.f32 %v2869_v16, %v2707_v13  ;;  %v2871_v27 = vand.u32 2147483647, %v2790_v19  ;;  %v2710_v28 = vld [vmem:[#allocation2 + $0x108] sm:$0xf] }
 0x2a1   : > { %v2792_v29 = vsub.f32 %v5913_v24, %v7592_v5  ;;  %v5914_v30 = vld [vmem:[%s6359_s17 + $0x1e8] sm:$0xf]  ;;  %3030 = vst.msk [vmem:[#allocation2 + $0xf8] sm:$0xf] %vm15_vm0, %v2949_v21  ;;  %v2951_v31 = vadd.f32 %v2870_v22, %v2708_v18  ;;  %v2872_v2 = vand.u32 2147483647, %v2791_v23 }
 0x2a2   : > { %v2711_v32 = vld [vmem:[#allocation2 + $0x10c] sm:$0xf]  ;;  %v2793_v33 = vsub.f32 %v5914_v30, %v7592_v5  ;;  %3031 = vst.msk [vmem:[#allocation2 + $0xfc] sm:$0xf] %vm15_vm0, %v2950_v26  ;;  %v2952_v35 = vadd.f32 %v2871_v27, %v2709_v50  ;;  %v2712_v37 = vld [vmem:[#allocation2 + $0x110] sm:$0xf] }
 0x2a3   : > { %v5915_v34 = vld [vmem:[%s6359_s17 + $0x1ec] sm:$0xf]  ;;  %v2873_v36 = vand.u32 2147483647, %v2792_v29  ;;  %v5916_v39 = vld [vmem:[%s6359_s17 + $0x1f0] sm:$0xf]  ;;  %v2953_v40 = vadd.f32 %v2872_v2, %v2710_v28 }
 0x2a4   : > { %v2794_v38 = vsub.f32 %v5915_v34, %v7592_v5  ;;  %3032 = vst.msk [vmem:[#allocation2 + $0x100] sm:$0xf] %vm15_vm0, %v2951_v31  ;;  %v2874_v41 = vand.u32 2147483647, %v2793_v33  ;;  %v2713_v42 = vld [vmem:[#allocation2 + $0x114] sm:$0xf]  ;;  %v2795_v44 = vsub.f32 %v5916_v39, %v7592_v5 }
 0x2a5   : > { %v5917_v45 = vld [vmem:[%s6359_s17 + $0x1f4] sm:$0xf]  ;;  %3033 = vst.msk [vmem:[#allocation2 + $0x104] sm:$0xf] %vm15_vm0, %v2952_v35  ;;  %v2954_v46 = vadd.f32 %v2873_v36, %v2711_v32  ;;  %v2714_v48 = vld [vmem:[#allocation2 + $0x118] sm:$0xf] }
 0x2a6   : > { %v2875_v47 = vand.u32 2147483647, %v2794_v38  ;;  %v2796_v49 = vsub.f32 %v5917_v45, %v7592_v5  ;;  %v5918_v51 = vld [vmem:[%s6359_s17 + $0x214] sm:$0xf]  ;;  %3034 = vst.msk [vmem:[#allocation2 + $0x108] sm:$0xf] %vm15_vm0, %v2953_v40  ;;  %v2955_v52 = vadd.f32 %v2874_v41, %v2712_v37 }
 0x2a7   : > { %v2876_v53 = vand.u32 2147483647, %v2795_v44  ;;  %v2715_v17 = vld [vmem:[#allocation2 + $0x11c] sm:$0xf]  ;;  %v2797_v54 = vsub.f32 %v5918_v51, %v7592_v5  ;;  %v5919_v55 = vld [vmem:[%s6359_s17 + $0x218] sm:$0xf] }
 0x2a8   : > { %3035 = vst.msk [vmem:[#allocation2 + $0x10c] sm:$0xf] %vm15_vm0, %v2954_v46  ;;  %v2956_v56 = vadd.f32 %v2875_v47, %v2713_v42  ;;  %v2877_v57 = vand.u32 2147483647, %v2796_v49  ;;  %v2716_v58 = vld [vmem:[#allocation2 + $0x120] sm:$0xf]  ;;  %v2798_v25 = vsub.f32 %v5919_v55, %v7592_v5 }
 0x2a9   : > { %v5920_v59 = vld [vmem:[%s6359_s17 + $0x21c] sm:$0xf]  ;;  %3036 = vst.msk [vmem:[#allocation2 + $0x110] sm:$0xf] %vm15_vm0, %v2955_v52  ;;  %v2957_v60 = vadd.f32 %v2876_v53, %v2714_v48  ;;  %v2878_v61 = vand.u32 2147483647, %v2797_v54 }
 0x2aa   : > { %v2717_v62 = vld [vmem:[#allocation2 + $0x124] sm:$0xf]  ;;  %v2799_v63 = vsub.f32 %v5920_v59, %v7592_v5  ;;  %v5921_v0 = vld [vmem:[%s6359_s17 + $0x220] sm:$0xf]  ;;  %3037 = vst.msk [vmem:[#allocation2 + $0x114] sm:$0xf] %vm15_vm0, %v2956_v56  ;;  %v2958_v1 = vadd.f32 %v2877_v57, %v2715_v17 }
 0x2ab   : > { %v2879_v3 = vand.u32 2147483647, %v2798_v25  ;;  %v2718_v4 = vld [vmem:[#allocation2 + $0x128] sm:$0xf]  ;;  %v2800_v6 = vsub.f32 %v5921_v0, %v7592_v5  ;;  %v5922_v7 = vld [vmem:[%s6359_s17 + $0x224] sm:$0xf]  ;;  %v2959_v8 = vadd.f32 %v2878_v61, %v2716_v58 }
 0x2ac   : > { %3038 = vst.msk [vmem:[#allocation2 + $0x118] sm:$0xf] %vm15_vm0, %v2957_v60  ;;  %v2880_v9 = vand.u32 2147483647, %v2799_v63  ;;  %v2719_v10 = vld [vmem:[#allocation2 + $0x12c] sm:$0xf]  ;;  %v2801_v11 = vsub.f32 %v5922_v7, %v7592_v5 }
 0x2ad   : > { %v5923_v12 = vld [vmem:[%s6359_s17 + $0x228] sm:$0xf]  ;;  %3039 = vst.msk [vmem:[#allocation2 + $0x11c] sm:$0xf] %vm15_vm0, %v2958_v1  ;;  %v2960_v13 = vadd.f32 %v2879_v3, %v2717_v62  ;;  %v2881_v43 = vand.u32 2147483647, %v2800_v6 }
 0x2ae   : > { %v2720_v14 = vld [vmem:[#allocation2 + $0x130] sm:$0xf]  ;;  %v2802_v15 = vsub.f32 %v5923_v12, %v7592_v5  ;;  %v5924_v16 = vld [vmem:[%s6359_s17 + $0x22c] sm:$0xf]  ;;  %3040 = vst.msk [vmem:[#allocation2 + $0x120] sm:$0xf] %vm15_vm0, %v2959_v8  ;;  %v2961_v18 = vadd.f32 %v2880_v9, %v2718_v4 }
 0x2af   : > { %v2882_v19 = vand.u32 2147483647, %v2801_v11  ;;  %v2721_v20 = vld [vmem:[#allocation2 + $0x134] sm:$0xf]  ;;  %v2803_v21 = vsub.f32 %v5924_v16, %v7592_v5  ;;  %v5925_v22 = vld [vmem:[%s6359_s17 + $0x230] sm:$0xf]  ;;  %v2962_v50 = vadd.f32 %v2881_v43, %v2719_v10 }
 0x2b0   : > { %3041 = vst.msk [vmem:[#allocation2 + $0x124] sm:$0xf] %vm15_vm0, %v2960_v13  ;;  %v2883_v23 = vand.u32 2147483647, %v2802_v15  ;;  %v2722_v24 = vld [vmem:[#allocation2 + $0x138] sm:$0xf]  ;;  %v2804_v26 = vsub.f32 %v5925_v22, %v7592_v5 }
 0x2b1   : > { %v5926_v27 = vld [vmem:[%s6359_s17 + $0x234] sm:$0xf]  ;;  %3042 = vst.msk [vmem:[#allocation2 + $0x128] sm:$0xf] %vm15_vm0, %v2961_v18  ;;  %v2963_v28 = vadd.f32 %v2882_v19, %v2720_v14  ;;  %v2884_v29 = vand.u32 2147483647, %v2803_v21 }
 0x2b2   : > { %v2723_v30 = vld [vmem:[#allocation2 + $0x13c] sm:$0xf]  ;;  %v2805_v31 = vsub.f32 %v5926_v27, %v7592_v5  ;;  %v5930_v2 = vld [vmem:[%s6359_s17 + $0x18] sm:$0xf]  ;;  %3043 = vst.msk [vmem:[#allocation2 + $0x12c] sm:$0xf] %vm15_vm0, %v2962_v50  ;;  %v2964_v32 = vadd.f32 %v2883_v23, %v2721_v20 }
 0x2b3   : > { %v2885_v33 = vand.u32 2147483647, %v2804_v26  ;;  %v2724_v34 = vld [vmem:[#allocation2 + $0x140] sm:$0xf]  ;;  %v7839_v35 = vld [vmem:[%s6364_s20 + $0x18] sm:$0xf]  ;;  %v2965_v36 = vadd.f32 %v2884_v29, %v2722_v24 }
 0x2b4   : > { %3044 = vst.msk [vmem:[#allocation2 + $0x130] sm:$0xf] %vm15_vm0, %v2963_v28  ;;  %v2886_v37 = vand.u32 2147483647, %v2805_v31  ;;  %v3135_v38 = vld [vmem:[#allocation2] sm:$0xf]  ;;  %v3216_v39 = vsub.f32 %v5930_v2, %v7839_v35 }
 0x2b5   : > { %v5931_v40 = vld [vmem:[%s6359_s17 + $0x1c] sm:$0xf]  ;;  %3045 = vst.msk [vmem:[#allocation2 + $0x134] sm:$0xf] %vm15_vm0, %v2964_v32  ;;  %v2966_v5 = vadd.f32 %v2885_v33, %v2723_v30  ;;  %v3136_v41 = vld [vmem:[#allocation2 + $0x4] sm:$0xf] }
 0x2b6   : > { %v3217_v42 = vsub.f32 %v5931_v40, %v7839_v35  ;;  %v5932_v44 = vld [vmem:[%s6359_s17 + $0x20] sm:$0xf]  ;;  %v5933_v45 = vld [vmem:[%s6359_s17 + $0x24] sm:$0xf]  ;;  %3046 = vst.msk [vmem:[#allocation2 + $0x138] sm:$0xf] %vm15_vm0, %v2965_v36  ;;  %v2967_v46 = vadd.f32 %v2886_v37, %v2724_v34 }
 0x2b7   : > { %v3297_v47 = vand.u32 2147483647, %v3216_v39  ;;  %v3137_v48 = vld [vmem:[#allocation2 + $0x8] sm:$0xf]  ;;  %v3218_v49 = vsub.f32 %v5932_v44, %v7839_v35  ;;  %v3219_v51 = vsub.f32 %v5933_v45, %v7839_v35  ;;  %3047 = vst.msk [vmem:[#allocation2 + $0x13c] sm:$0xf] %vm15_vm0, %v2966_v5 }
 0x2b8   : > { %v5934_v52 = vld [vmem:[%s6359_s17 + $0x28] sm:$0xf]  ;;  %v3298_v53 = vand.u32 2147483647, %v3217_v42  ;;  %v3138_v17 = vld [vmem:[#allocation2 + $0xc] sm:$0xf] }
 0x2b9   : > { %v3220_v54 = vsub.f32 %v5934_v52, %v7839_v35  ;;  %v5935_v55 = vld [vmem:[%s6359_s17 + $0x2c] sm:$0xf]  ;;  %3048 = vst.msk [vmem:[#allocation2 + $0x140] sm:$0xf] %vm15_vm0, %v2967_v46  ;;  %v3378_v56 = vadd.f32 %v3297_v47, %v3135_v38  ;;  %v3299_v57 = vand.u32 2147483647, %v3218_v49 }
 0x2ba   : > { %v3300_v58 = vand.u32 2147483647, %v3219_v51  ;;  %v3139_v25 = vld [vmem:[#allocation2 + $0x10] sm:$0xf]  ;;  %v3221_v59 = vsub.f32 %v5935_v55, %v7839_v35  ;;  %v3379_v60 = vadd.f32 %v3298_v53, %v3136_v41  ;;  %v3140_v62 = vld [vmem:[#allocation2 + $0x14] sm:$0xf] }
 0x2bb   : > { %v3301_v61 = vand.u32 2147483647, %v3220_v54  ;;  %v5936_v63 = vld [vmem:[%s6359_s17 + $0x30] sm:$0xf]  ;;  %3459 = vst.msk [vmem:[#allocation2] sm:$0xf] %vm15_vm0, %v3378_v56  ;;  %v3380_v0 = vadd.f32 %v3299_v57, %v3137_v48 }
 0x2bc   : > { %v3381_v1 = vadd.f32 %v3300_v58, %v3138_v17  ;;  %v3302_v3 = vand.u32 2147483647, %v3221_v59  ;;  %v3141_v4 = vld [vmem:[#allocation2 + $0x18] sm:$0xf]  ;;  %v3222_v6 = vsub.f32 %v5936_v63, %v7839_v35  ;;  %v5937_v7 = vld [vmem:[%s6359_s17 + $0x34] sm:$0xf] }
 0x2bd   : > { %3460 = vst.msk [vmem:[#allocation2 + $0x4] sm:$0xf] %vm15_vm0, %v3379_v60  ;;  %v3382_v8 = vadd.f32 %v3301_v61, %v3139_v25  ;;  %v3142_v9 = vld [vmem:[#allocation2 + $0x1c] sm:$0xf]  ;;  %v3223_v10 = vsub.f32 %v5937_v7, %v7839_v35  ;;  %v5938_v11 = vld [vmem:[%s6359_s17 + $0x38] sm:$0xf] }
 0x2be   : > { %v5939_v12 = vld [vmem:[%s6359_s17 + $0x58] sm:$0xf]  ;;  %3461 = vst.msk [vmem:[#allocation2 + $0x8] sm:$0xf] %vm15_vm0, %v3380_v0  ;;  %3462 = vst.msk [vmem:[#allocation2 + $0xc] sm:$0xf] %vm15_vm0, %v3381_v1  ;;  %v3383_v13 = vadd.f32 %v3302_v3, %v3140_v62  ;;  %v3224_v15 = vsub.f32 %v5938_v11, %v7839_v35 }
 0x2bf   : > { %v3303_v43 = vand.u32 2147483647, %v3222_v6  ;;  %v3143_v14 = vld [vmem:[#allocation2 + $0x20] sm:$0xf]  ;;  %v3225_v16 = vsub.f32 %v5939_v12, %v7839_v35  ;;  %v5940_v18 = vld [vmem:[%s6359_s17 + $0x5c] sm:$0xf] }
 0x2c0   : > { %3463 = vst.msk [vmem:[#allocation2 + $0x10] sm:$0xf] %vm15_vm0, %v3382_v8  ;;  %v3304_v19 = vand.u32 2147483647, %v3223_v10  ;;  %v3144_v20 = vld [vmem:[#allocation2 + $0x24] sm:$0xf]  ;;  %v3226_v21 = vsub.f32 %v5940_v18, %v7839_v35 }
 0x2c1   : > { %v5941_v22 = vld [vmem:[%s6359_s17 + $0x60] sm:$0xf]  ;;  %3464 = vst.msk [vmem:[#allocation2 + $0x14] sm:$0xf] %vm15_vm0, %v3383_v13  ;;  %v3384_v50 = vadd.f32 %v3303_v43, %v3141_v4  ;;  %v3305_v23 = vand.u32 2147483647, %v3224_v15 }
 0x2c2   : > { %v3306_v24 = vand.u32 2147483647, %v3225_v16  ;;  %v3145_v26 = vld [vmem:[#allocation2 + $0x28] sm:$0xf]  ;;  %v3227_v27 = vsub.f32 %v5941_v22, %v7839_v35  ;;  %v3385_v28 = vadd.f32 %v3304_v19, %v3142_v9  ;;  %v3307_v29 = vand.u32 2147483647, %v3226_v21 }
 0x2c3   : > { %v3146_v30 = vld [vmem:[#allocation2 + $0x2c] sm:$0xf]  ;;  %v5942_v31 = vld [vmem:[%s6359_s17 + $0x64] sm:$0xf]  ;;  %3465 = vst.msk [vmem:[#allocation2 + $0x18] sm:$0xf] %vm15_vm0, %v3384_v50  ;;  %v3386_v2 = vadd.f32 %v3305_v23, %v3143_v14 }
 0x2c4   : > { %v3387_v32 = vadd.f32 %v3306_v24, %v3144_v20  ;;  %v3308_v33 = vand.u32 2147483647, %v3227_v27  ;;  %v3147_v34 = vld [vmem:[#allocation2 + $0x30] sm:$0xf]  ;;  %v3228_v36 = vsub.f32 %v5942_v31, %v7839_v35  ;;  %v5943_v37 = vld [vmem:[%s6359_s17 + $0x68] sm:$0xf]  ;;  %v3388_v38 = vadd.f32 %v3307_v29, %v3145_v26 }
 0x2c5   : > { %3466 = vst.msk [vmem:[#allocation2 + $0x1c] sm:$0xf] %vm15_vm0, %v3385_v28  ;;  %v3148_v39 = vld [vmem:[#allocation2 + $0x34] sm:$0xf]  ;;  %v3229_v40 = vsub.f32 %v5943_v37, %v7839_v35  ;;  %v5944_v5 = vld [vmem:[%s6359_s17 + $0x6c] sm:$0xf] }
 0x2c6   : > { %v5945_v41 = vld [vmem:[%s6359_s17 + $0x70] sm:$0xf]  ;;  %3467 = vst.msk [vmem:[#allocation2 + $0x20] sm:$0xf] %vm15_vm0, %v3386_v2  ;;  %3468 = vst.msk [vmem:[#allocation2 + $0x24] sm:$0xf] %vm15_vm0, %v3387_v32  ;;  %v3389_v42 = vadd.f32 %v3308_v33, %v3146_v30  ;;  %v3230_v46 = vsub.f32 %v5944_v5, %v7839_v35 }
 0x2c7   : > { %v3309_v44 = vand.u32 2147483647, %v3228_v36  ;;  %v3149_v45 = vld [vmem:[#allocation2 + $0x38] sm:$0xf]  ;;  %v3231_v47 = vsub.f32 %v5945_v41, %v7839_v35  ;;  %v5946_v48 = vld [vmem:[%s6359_s17 + $0x74] sm:$0xf] }
 0x2c8   : > { %3469 = vst.msk [vmem:[#allocation2 + $0x28] sm:$0xf] %vm15_vm0, %v3388_v38  ;;  %v3310_v49 = vand.u32 2147483647, %v3229_v40  ;;  %v3150_v51 = vld [vmem:[#allocation2 + $0x3c] sm:$0xf]  ;;  %v3232_v52 = vsub.f32 %v5946_v48, %v7839_v35 }
 0x2c9   : > { %v5947_v53 = vld [vmem:[%s6359_s17 + $0x78] sm:$0xf]  ;;  %3470 = vst.msk [vmem:[#allocation2 + $0x2c] sm:$0xf] %vm15_vm0, %v3389_v42  ;;  %v3390_v17 = vadd.f32 %v3309_v44, %v3147_v34  ;;  %v3311_v54 = vand.u32 2147483647, %v3230_v46 }
 0x2ca   : > { %v3312_v55 = vand.u32 2147483647, %v3231_v47  ;;  %v3151_v56 = vld [vmem:[#allocation2 + $0x40] sm:$0xf]  ;;  %v3233_v57 = vsub.f32 %v5947_v53, %v7839_v35  ;;  %v3391_v58 = vadd.f32 %v3310_v49, %v3148_v39  ;;  %v3313_v25 = vand.u32 2147483647, %v3232_v52 }
 0x2cb   : > { %v3152_v59 = vld [vmem:[#allocation2 + $0x44] sm:$0xf]  ;;  %v5948_v60 = vld [vmem:[%s6359_s17 + $0x98] sm:$0xf]  ;;  %3471 = vst.msk [vmem:[#allocation2 + $0x30] sm:$0xf] %vm15_vm0, %v3390_v17  ;;  %v3392_v61 = vadd.f32 %v3311_v54, %v3149_v45 }
 0x2cc   : > { %v3393_v62 = vadd.f32 %v3312_v55, %v3150_v51  ;;  %v3314_v63 = vand.u32 2147483647, %v3233_v57  ;;  %v3153_v0 = vld [vmem:[#allocation2 + $0x48] sm:$0xf]  ;;  %v3234_v1 = vsub.f32 %v5948_v60, %v7839_v35  ;;  %v5949_v3 = vld [vmem:[%s6359_s17 + $0x9c] sm:$0xf]  ;;  %v3394_v4 = vadd.f32 %v3313_v25, %v3151_v56 }
 0x2cd   : > { %3472 = vst.msk [vmem:[#allocation2 + $0x34] sm:$0xf] %vm15_vm0, %v3391_v58  ;;  %v3154_v6 = vld [vmem:[#allocation2 + $0x4c] sm:$0xf]  ;;  %v3235_v7 = vsub.f32 %v5949_v3, %v7839_v35  ;;  %v5950_v8 = vld [vmem:[%s6359_s17 + $0xa0] sm:$0xf] }
 0x2ce   : > { %v5951_v9 = vld [vmem:[%s6359_s17 + $0xa4] sm:$0xf]  ;;  %3473 = vst.msk [vmem:[#allocation2 + $0x38] sm:$0xf] %vm15_vm0, %v3392_v61  ;;  %3474 = vst.msk [vmem:[#allocation2 + $0x3c] sm:$0xf] %vm15_vm0, %v3393_v62  ;;  %v3395_v10 = vadd.f32 %v3314_v63, %v3152_v59  ;;  %v3236_v13 = vsub.f32 %v5950_v8, %v7839_v35 }
 0x2cf   : > { %v3315_v11 = vand.u32 2147483647, %v3234_v1  ;;  %v3155_v12 = vld [vmem:[#allocation2 + $0x50] sm:$0xf]  ;;  %v3237_v43 = vsub.f32 %v5951_v9, %v7839_v35  ;;  %v5952_v14 = vld [vmem:[%s6359_s17 + $0xa8] sm:$0xf] }
 0x2d0   : > { %3475 = vst.msk [vmem:[#allocation2 + $0x40] sm:$0xf] %vm15_vm0, %v3394_v4  ;;  %v3316_v15 = vand.u32 2147483647, %v3235_v7  ;;  %v3156_v16 = vld [vmem:[#allocation2 + $0x54] sm:$0xf]  ;;  %v3238_v18 = vsub.f32 %v5952_v14, %v7839_v35 }
 0x2d1   : > { %v5953_v19 = vld [vmem:[%s6359_s17 + $0xac] sm:$0xf]  ;;  %3476 = vst.msk [vmem:[#allocation2 + $0x44] sm:$0xf] %vm15_vm0, %v3395_v10  ;;  %v3396_v20 = vadd.f32 %v3315_v11, %v3153_v0  ;;  %v3317_v21 = vand.u32 2147483647, %v3236_v13 }
 0x2d2   : > { %v3318_v22 = vand.u32 2147483647, %v3237_v43  ;;  %v3157_v50 = vld [vmem:[#allocation2 + $0x58] sm:$0xf]  ;;  %v3239_v23 = vsub.f32 %v5953_v19, %v7839_v35  ;;  %v3397_v24 = vadd.f32 %v3316_v15, %v3154_v6  ;;  %v3319_v26 = vand.u32 2147483647, %v3238_v18 }
 0x2d3   : > { %v3158_v27 = vld [vmem:[#allocation2 + $0x5c] sm:$0xf]  ;;  %v5954_v28 = vld [vmem:[%s6359_s17 + $0xb0] sm:$0xf]  ;;  %3477 = vst.msk [vmem:[#allocation2 + $0x48] sm:$0xf] %vm15_vm0, %v3396_v20  ;;  %v3398_v29 = vadd.f32 %v3317_v21, %v3155_v12 }
 0x2d4   : > { %v3399_v30 = vadd.f32 %v3318_v22, %v3156_v16  ;;  %v3320_v31 = vand.u32 2147483647, %v3239_v23  ;;  %v3159_v2 = vld [vmem:[#allocation2 + $0x60] sm:$0xf]  ;;  %v3240_v32 = vsub.f32 %v5954_v28, %v7839_v35  ;;  %v5955_v33 = vld [vmem:[%s6359_s17 + $0xb4] sm:$0xf]  ;;  %v3400_v34 = vadd.f32 %v3319_v26, %v3157_v50 }
 0x2d5   : > { %3478 = vst.msk [vmem:[#allocation2 + $0x4c] sm:$0xf] %vm15_vm0, %v3397_v24  ;;  %v3160_v36 = vld [vmem:[#allocation2 + $0x64] sm:$0xf]  ;;  %v3241_v37 = vsub.f32 %v5955_v33, %v7839_v35  ;;  %v5956_v38 = vld [vmem:[%s6359_s17 + $0xb8] sm:$0xf] }
 0x2d6   : > { %v5957_v39 = vld [vmem:[%s6359_s17 + $0xd8] sm:$0xf]  ;;  %3479 = vst.msk [vmem:[#allocation2 + $0x50] sm:$0xf] %vm15_vm0, %v3398_v29  ;;  %3480 = vst.msk [vmem:[#allocation2 + $0x54] sm:$0xf] %vm15_vm0, %v3399_v30  ;;  %v3401_v40 = vadd.f32 %v3320_v31, %v3158_v27  ;;  %v3242_v42 = vsub.f32 %v5956_v38, %v7839_v35 }
 0x2d7   : > { %v3321_v5 = vand.u32 2147483647, %v3240_v32  ;;  %v3161_v41 = vld [vmem:[#allocation2 + $0x68] sm:$0xf]  ;;  %v3243_v44 = vsub.f32 %v5957_v39, %v7839_v35  ;;  %v5958_v45 = vld [vmem:[%s6359_s17 + $0xdc] sm:$0xf] }
 0x2d8   : > { %3481 = vst.msk [vmem:[#allocation2 + $0x58] sm:$0xf] %vm15_vm0, %v3400_v34  ;;  %v3322_v46 = vand.u32 2147483647, %v3241_v37  ;;  %v3162_v47 = vld [vmem:[#allocation2 + $0x6c] sm:$0xf]  ;;  %v3244_v48 = vsub.f32 %v5958_v45, %v7839_v35 }
 0x2d9   : > { %v5959_v49 = vld [vmem:[%s6359_s17 + $0xe0] sm:$0xf]  ;;  %3482 = vst.msk [vmem:[#allocation2 + $0x5c] sm:$0xf] %vm15_vm0, %v3401_v40  ;;  %v3402_v51 = vadd.f32 %v3321_v5, %v3159_v2  ;;  %v3323_v52 = vand.u32 2147483647, %v3242_v42 }
 0x2da   : > { %v3324_v53 = vand.u32 2147483647, %v3243_v44  ;;  %v3163_v17 = vld [vmem:[#allocation2 + $0x70] sm:$0xf]  ;;  %v3245_v54 = vsub.f32 %v5959_v49, %v7839_v35  ;;  %v3403_v55 = vadd.f32 %v3322_v46, %v3160_v36  ;;  %v3325_v56 = vand.u32 2147483647, %v3244_v48 }
 0x2db   : > { %v3164_v57 = vld [vmem:[#allocation2 + $0x74] sm:$0xf]  ;;  %v5960_v58 = vld [vmem:[%s6359_s17 + $0xe4] sm:$0xf]  ;;  %3483 = vst.msk [vmem:[#allocation2 + $0x60] sm:$0xf] %vm15_vm0, %v3402_v51  ;;  %v3404_v25 = vadd.f32 %v3323_v52, %v3161_v41 }
 0x2dc   : > { %v3405_v59 = vadd.f32 %v3324_v53, %v3162_v47  ;;  %v3326_v60 = vand.u32 2147483647, %v3245_v54  ;;  %v3165_v61 = vld [vmem:[#allocation2 + $0x78] sm:$0xf]  ;;  %v3246_v62 = vsub.f32 %v5960_v58, %v7839_v35  ;;  %v5961_v63 = vld [vmem:[%s6359_s17 + $0xe8] sm:$0xf]  ;;  %v3406_v0 = vadd.f32 %v3325_v56, %v3163_v17 }
 0x2dd   : > { %3484 = vst.msk [vmem:[#allocation2 + $0x64] sm:$0xf] %vm15_vm0, %v3403_v55  ;;  %v3166_v1 = vld [vmem:[#allocation2 + $0x7c] sm:$0xf]  ;;  %v3247_v3 = vsub.f32 %v5961_v63, %v7839_v35  ;;  %v5962_v4 = vld [vmem:[%s6359_s17 + $0xec] sm:$0xf] }
 0x2de   : > { %v5963_v6 = vld [vmem:[%s6359_s17 + $0xf0] sm:$0xf]  ;;  %3485 = vst.msk [vmem:[#allocation2 + $0x68] sm:$0xf] %vm15_vm0, %v3404_v25  ;;  %3486 = vst.msk [vmem:[#allocation2 + $0x6c] sm:$0xf] %vm15_vm0, %v3405_v59  ;;  %v3407_v7 = vadd.f32 %v3326_v60, %v3164_v57  ;;  %v3248_v10 = vsub.f32 %v5962_v4, %v7839_v35 }
 0x2df   : > { %v3327_v8 = vand.u32 2147483647, %v3246_v62  ;;  %v3167_v9 = vld [vmem:[#allocation2 + $0x80] sm:$0xf]  ;;  %v3249_v11 = vsub.f32 %v5963_v6, %v7839_v35  ;;  %v5964_v12 = vld [vmem:[%s6359_s17 + $0xf4] sm:$0xf] }
 0x2e0   : > { %3487 = vst.msk [vmem:[#allocation2 + $0x70] sm:$0xf] %vm15_vm0, %v3406_v0  ;;  %v3328_v13 = vand.u32 2147483647, %v3247_v3  ;;  %v3168_v43 = vld [vmem:[#allocation2 + $0x84] sm:$0xf]  ;;  %v3250_v14 = vsub.f32 %v5964_v12, %v7839_v35 }
 0x2e1   : > { %v5965_v15 = vld [vmem:[%s6359_s17 + $0xf8] sm:$0xf]  ;;  %3488 = vst.msk [vmem:[#allocation2 + $0x74] sm:$0xf] %vm15_vm0, %v3407_v7  ;;  %v3408_v16 = vadd.f32 %v3327_v8, %v3165_v61  ;;  %v3329_v18 = vand.u32 2147483647, %v3248_v10 }
 0x2e2   : > { %v3330_v19 = vand.u32 2147483647, %v3249_v11  ;;  %v3169_v20 = vld [vmem:[#allocation2 + $0x88] sm:$0xf]  ;;  %v3251_v21 = vsub.f32 %v5965_v15, %v7839_v35  ;;  %v3409_v22 = vadd.f32 %v3328_v13, %v3166_v1  ;;  %v3331_v50 = vand.u32 2147483647, %v3250_v14 }
 0x2e3   : > { %v3170_v23 = vld [vmem:[#allocation2 + $0x8c] sm:$0xf]  ;;  %v5966_v24 = vld [vmem:[%s6359_s17 + $0x118] sm:$0xf]  ;;  %3489 = vst.msk [vmem:[#allocation2 + $0x78] sm:$0xf] %vm15_vm0, %v3408_v16  ;;  %v3410_v26 = vadd.f32 %v3329_v18, %v3167_v9 }
 0x2e4   : > { %v3411_v27 = vadd.f32 %v3330_v19, %v3168_v43  ;;  %v3332_v28 = vand.u32 2147483647, %v3251_v21  ;;  %v3171_v29 = vld [vmem:[#allocation2 + $0x90] sm:$0xf]  ;;  %v3252_v30 = vsub.f32 %v5966_v24, %v7839_v35  ;;  %v5967_v31 = vld [vmem:[%s6359_s17 + $0x11c] sm:$0xf]  ;;  %v3412_v2 = vadd.f32 %v3331_v50, %v3169_v20 }
 0x2e5   : > { %3490 = vst.msk [vmem:[#allocation2 + $0x7c] sm:$0xf] %vm15_vm0, %v3409_v22  ;;  %v3172_v32 = vld [vmem:[#allocation2 + $0x94] sm:$0xf]  ;;  %v3253_v33 = vsub.f32 %v5967_v31, %v7839_v35  ;;  %v5968_v34 = vld [vmem:[%s6359_s17 + $0x120] sm:$0xf] }
 0x2e6   : > { %v5969_v36 = vld [vmem:[%s6359_s17 + $0x124] sm:$0xf]  ;;  %3491 = vst.msk [vmem:[#allocation2 + $0x80] sm:$0xf] %vm15_vm0, %v3410_v26  ;;  %3492 = vst.msk [vmem:[#allocation2 + $0x84] sm:$0xf] %vm15_vm0, %v3411_v27  ;;  %v3413_v37 = vadd.f32 %v3332_v28, %v3170_v23  ;;  %v3254_v40 = vsub.f32 %v5968_v34, %v7839_v35 }
 0x2e7   : > { %v3333_v38 = vand.u32 2147483647, %v3252_v30  ;;  %v3173_v39 = vld [vmem:[#allocation2 + $0x98] sm:$0xf]  ;;  %v3255_v5 = vsub.f32 %v5969_v36, %v7839_v35  ;;  %v5970_v41 = vld [vmem:[%s6359_s17 + $0x128] sm:$0xf] }
 0x2e8   : > { %3493 = vst.msk [vmem:[#allocation2 + $0x88] sm:$0xf] %vm15_vm0, %v3412_v2  ;;  %v3334_v42 = vand.u32 2147483647, %v3253_v33  ;;  %v3174_v44 = vld [vmem:[#allocation2 + $0x9c] sm:$0xf]  ;;  %v3256_v45 = vsub.f32 %v5970_v41, %v7839_v35 }
 0x2e9   : > { %v5971_v46 = vld [vmem:[%s6359_s17 + $0x12c] sm:$0xf]  ;;  %3494 = vst.msk [vmem:[#allocation2 + $0x8c] sm:$0xf] %vm15_vm0, %v3413_v37  ;;  %v3414_v47 = vadd.f32 %v3333_v38, %v3171_v29  ;;  %v3335_v48 = vand.u32 2147483647, %v3254_v40 }
 0x2ea   : > { %v3336_v49 = vand.u32 2147483647, %v3255_v5  ;;  %v3175_v51 = vld [vmem:[#allocation2 + $0xa0] sm:$0xf]  ;;  %v3257_v52 = vsub.f32 %v5971_v46, %v7839_v35  ;;  %v3415_v53 = vadd.f32 %v3334_v42, %v3172_v32  ;;  %v3337_v17 = vand.u32 2147483647, %v3256_v45 }
 0x2eb   : > { %v3176_v54 = vld [vmem:[#allocation2 + $0xa4] sm:$0xf]  ;;  %v5972_v55 = vld [vmem:[%s6359_s17 + $0x130] sm:$0xf]  ;;  %3495 = vst.msk [vmem:[#allocation2 + $0x90] sm:$0xf] %vm15_vm0, %v3414_v47  ;;  %v3416_v56 = vadd.f32 %v3335_v48, %v3173_v39 }
 0x2ec   : > { %v3417_v57 = vadd.f32 %v3336_v49, %v3174_v44  ;;  %v3338_v58 = vand.u32 2147483647, %v3257_v52  ;;  %v3177_v25 = vld [vmem:[#allocation2 + $0xa8] sm:$0xf]  ;;  %v3258_v59 = vsub.f32 %v5972_v55, %v7839_v35  ;;  %v5973_v60 = vld [vmem:[%s6359_s17 + $0x134] sm:$0xf]  ;;  %v3418_v61 = vadd.f32 %v3337_v17, %v3175_v51 }
 0x2ed   : > { %3496 = vst.msk [vmem:[#allocation2 + $0x94] sm:$0xf] %vm15_vm0, %v3415_v53  ;;  %v3178_v62 = vld [vmem:[#allocation2 + $0xac] sm:$0xf]  ;;  %v3259_v63 = vsub.f32 %v5973_v60, %v7839_v35  ;;  %v5974_v0 = vld [vmem:[%s6359_s17 + $0x138] sm:$0xf] }
 0x2ee   : > { %v5975_v1 = vld [vmem:[%s6359_s17 + $0x158] sm:$0xf]  ;;  %3497 = vst.msk [vmem:[#allocation2 + $0x98] sm:$0xf] %vm15_vm0, %v3416_v56  ;;  %3498 = vst.msk [vmem:[#allocation2 + $0x9c] sm:$0xf] %vm15_vm0, %v3417_v57  ;;  %v3419_v3 = vadd.f32 %v3338_v58, %v3176_v54  ;;  %v3260_v7 = vsub.f32 %v5974_v0, %v7839_v35 }
 0x2ef   : > { %v3339_v4 = vand.u32 2147483647, %v3258_v59  ;;  %v3179_v6 = vld [vmem:[#allocation2 + $0xb0] sm:$0xf]  ;;  %v3261_v8 = vsub.f32 %v5975_v1, %v7839_v35  ;;  %v5976_v9 = vld [vmem:[%s6359_s17 + $0x15c] sm:$0xf] }
 0x2f0   : > { %3499 = vst.msk [vmem:[#allocation2 + $0xa0] sm:$0xf] %vm15_vm0, %v3418_v61  ;;  %v3340_v10 = vand.u32 2147483647, %v3259_v63  ;;  %v3180_v11 = vld [vmem:[#allocation2 + $0xb4] sm:$0xf]  ;;  %v3262_v12 = vsub.f32 %v5976_v9, %v7839_v35 }
 0x2f1   : > { %v5977_v13 = vld [vmem:[%s6359_s17 + $0x160] sm:$0xf]  ;;  %3500 = vst.msk [vmem:[#allocation2 + $0xa4] sm:$0xf] %vm15_vm0, %v3419_v3  ;;  %v3420_v43 = vadd.f32 %v3339_v4, %v3177_v25  ;;  %v3341_v14 = vand.u32 2147483647, %v3260_v7 }
 0x2f2   : > { %v3342_v15 = vand.u32 2147483647, %v3261_v8  ;;  %v3181_v16 = vld [vmem:[#allocation2 + $0xb8] sm:$0xf]  ;;  %v3263_v18 = vsub.f32 %v5977_v13, %v7839_v35  ;;  %v3421_v19 = vadd.f32 %v3340_v10, %v3178_v62  ;;  %v3343_v20 = vand.u32 2147483647, %v3262_v12 }
 0x2f3   : > { %v3182_v21 = vld [vmem:[#allocation2 + $0xbc] sm:$0xf]  ;;  %v5978_v22 = vld [vmem:[%s6359_s17 + $0x164] sm:$0xf]  ;;  %3501 = vst.msk [vmem:[#allocation2 + $0xa8] sm:$0xf] %vm15_vm0, %v3420_v43  ;;  %v3422_v50 = vadd.f32 %v3341_v14, %v3179_v6 }
 0x2f4   : > { %v3423_v23 = vadd.f32 %v3342_v15, %v3180_v11  ;;  %v3344_v24 = vand.u32 2147483647, %v3263_v18  ;;  %v3183_v26 = vld [vmem:[#allocation2 + $0xc0] sm:$0xf]  ;;  %v3264_v27 = vsub.f32 %v5978_v22, %v7839_v35  ;;  %v5979_v28 = vld [vmem:[%s6359_s17 + $0x168] sm:$0xf]  ;;  %v3424_v29 = vadd.f32 %v3343_v20, %v3181_v16 }
 0x2f5   : > { %3502 = vst.msk [vmem:[#allocation2 + $0xac] sm:$0xf] %vm15_vm0, %v3421_v19  ;;  %v3184_v30 = vld [vmem:[#allocation2 + $0xc4] sm:$0xf]  ;;  %v3265_v31 = vsub.f32 %v5979_v28, %v7839_v35  ;;  %v5980_v2 = vld [vmem:[%s6359_s17 + $0x16c] sm:$0xf] }
 0x2f6   : > { %v5981_v32 = vld [vmem:[%s6359_s17 + $0x170] sm:$0xf]  ;;  %3503 = vst.msk [vmem:[#allocation2 + $0xb0] sm:$0xf] %vm15_vm0, %v3422_v50  ;;  %3504 = vst.msk [vmem:[#allocation2 + $0xb4] sm:$0xf] %vm15_vm0, %v3423_v23  ;;  %v3425_v33 = vadd.f32 %v3344_v24, %v3182_v21  ;;  %v3266_v37 = vsub.f32 %v5980_v2, %v7839_v35 }
 0x2f7   : > { %v3345_v34 = vand.u32 2147483647, %v3264_v27  ;;  %v3185_v36 = vld [vmem:[#allocation2 + $0xc8] sm:$0xf]  ;;  %v3267_v38 = vsub.f32 %v5981_v32, %v7839_v35  ;;  %v5982_v39 = vld [vmem:[%s6359_s17 + $0x174] sm:$0xf] }
 0x2f8   : > { %3505 = vst.msk [vmem:[#allocation2 + $0xb8] sm:$0xf] %vm15_vm0, %v3424_v29  ;;  %v3346_v40 = vand.u32 2147483647, %v3265_v31  ;;  %v3186_v5 = vld [vmem:[#allocation2 + $0xcc] sm:$0xf]  ;;  %v3268_v41 = vsub.f32 %v5982_v39, %v7839_v35 }
 0x2f9   : > { %v5983_v42 = vld [vmem:[%s6359_s17 + $0x178] sm:$0xf]  ;;  %3506 = vst.msk [vmem:[#allocation2 + $0xbc] sm:$0xf] %vm15_vm0, %v3425_v33  ;;  %v3426_v44 = vadd.f32 %v3345_v34, %v3183_v26  ;;  %v3347_v45 = vand.u32 2147483647, %v3266_v37 }
 0x2fa   : > { %v3348_v46 = vand.u32 2147483647, %v3267_v38  ;;  %v3187_v47 = vld [vmem:[#allocation2 + $0xd0] sm:$0xf]  ;;  %v3269_v48 = vsub.f32 %v5983_v42, %v7839_v35  ;;  %v3427_v49 = vadd.f32 %v3346_v40, %v3184_v30  ;;  %v3349_v51 = vand.u32 2147483647, %v3268_v41 }
 0x2fb   : > { %v3188_v52 = vld [vmem:[#allocation2 + $0xd4] sm:$0xf]  ;;  %v5984_v53 = vld [vmem:[%s6359_s17 + $0x198] sm:$0xf]  ;;  %3507 = vst.msk [vmem:[#allocation2 + $0xc0] sm:$0xf] %vm15_vm0, %v3426_v44  ;;  %v3428_v17 = vadd.f32 %v3347_v45, %v3185_v36 }
 0x2fc   : > { %v3429_v54 = vadd.f32 %v3348_v46, %v3186_v5  ;;  %v3350_v55 = vand.u32 2147483647, %v3269_v48  ;;  %v3189_v56 = vld [vmem:[#allocation2 + $0xd8] sm:$0xf]  ;;  %v3270_v57 = vsub.f32 %v5984_v53, %v7839_v35  ;;  %v5985_v58 = vld [vmem:[%s6359_s17 + $0x19c] sm:$0xf]  ;;  %v3430_v25 = vadd.f32 %v3349_v51, %v3187_v47 }
 0x2fd   : > { %3508 = vst.msk [vmem:[#allocation2 + $0xc4] sm:$0xf] %vm15_vm0, %v3427_v49  ;;  %v3190_v59 = vld [vmem:[#allocation2 + $0xdc] sm:$0xf]  ;;  %v3271_v60 = vsub.f32 %v5985_v58, %v7839_v35  ;;  %v5986_v61 = vld [vmem:[%s6359_s17 + $0x1a0] sm:$0xf] }
 0x2fe   : > { %v5987_v62 = vld [vmem:[%s6359_s17 + $0x1a4] sm:$0xf]  ;;  %3509 = vst.msk [vmem:[#allocation2 + $0xc8] sm:$0xf] %vm15_vm0, %v3428_v17  ;;  %3510 = vst.msk [vmem:[#allocation2 + $0xcc] sm:$0xf] %vm15_vm0, %v3429_v54  ;;  %v3431_v63 = vadd.f32 %v3350_v55, %v3188_v52  ;;  %v3272_v3 = vsub.f32 %v5986_v61, %v7839_v35 }
 0x2ff   : > { %v3351_v0 = vand.u32 2147483647, %v3270_v57  ;;  %v3191_v1 = vld [vmem:[#allocation2 + $0xe0] sm:$0xf]  ;;  %v3273_v4 = vsub.f32 %v5987_v62, %v7839_v35  ;;  %v5988_v6 = vld [vmem:[%s6359_s17 + $0x1a8] sm:$0xf] }
 0x300   : > { %3511 = vst.msk [vmem:[#allocation2 + $0xd0] sm:$0xf] %vm15_vm0, %v3430_v25  ;;  %v3352_v7 = vand.u32 2147483647, %v3271_v60  ;;  %v3192_v8 = vld [vmem:[#allocation2 + $0xe4] sm:$0xf]  ;;  %v3274_v9 = vsub.f32 %v5988_v6, %v7839_v35 }
 0x301   : > { %v5989_v10 = vld [vmem:[%s6359_s17 + $0x1ac] sm:$0xf]  ;;  %3512 = vst.msk [vmem:[#allocation2 + $0xd4] sm:$0xf] %vm15_vm0, %v3431_v63  ;;  %v3432_v11 = vadd.f32 %v3351_v0, %v3189_v56  ;;  %v3353_v12 = vand.u32 2147483647, %v3272_v3 }
 0x302   : > { %v3354_v13 = vand.u32 2147483647, %v3273_v4  ;;  %v3193_v43 = vld [vmem:[#allocation2 + $0xe8] sm:$0xf]  ;;  %v3275_v14 = vsub.f32 %v5989_v10, %v7839_v35  ;;  %v3433_v15 = vadd.f32 %v3352_v7, %v3190_v59  ;;  %v3355_v16 = vand.u32 2147483647, %v3274_v9 }
 0x303   : > { %v3194_v18 = vld [vmem:[#allocation2 + $0xec] sm:$0xf]  ;;  %v5990_v19 = vld [vmem:[%s6359_s17 + $0x1b0] sm:$0xf]  ;;  %3513 = vst.msk [vmem:[#allocation2 + $0xd8] sm:$0xf] %vm15_vm0, %v3432_v11  ;;  %v3434_v20 = vadd.f32 %v3353_v12, %v3191_v1 }
 0x304   : > { %v3435_v21 = vadd.f32 %v3354_v13, %v3192_v8  ;;  %v3356_v22 = vand.u32 2147483647, %v3275_v14  ;;  %v3195_v50 = vld [vmem:[#allocation2 + $0xf0] sm:$0xf]  ;;  %v3276_v23 = vsub.f32 %v5990_v19, %v7839_v35  ;;  %v5991_v24 = vld [vmem:[%s6359_s17 + $0x1b4] sm:$0xf]  ;;  %v3436_v26 = vadd.f32 %v3355_v16, %v3193_v43 }
 0x305   : > { %3514 = vst.msk [vmem:[#allocation2 + $0xdc] sm:$0xf] %vm15_vm0, %v3433_v15  ;;  %v3196_v27 = vld [vmem:[#allocation2 + $0xf4] sm:$0xf]  ;;  %v3277_v28 = vsub.f32 %v5991_v24, %v7839_v35  ;;  %v5992_v29 = vld [vmem:[%s6359_s17 + $0x1b8] sm:$0xf] }
 0x306   : > { %v5993_v30 = vld [vmem:[%s6359_s17 + $0x1d8] sm:$0xf]  ;;  %3515 = vst.msk [vmem:[#allocation2 + $0xe0] sm:$0xf] %vm15_vm0, %v3434_v20  ;;  %3516 = vst.msk [vmem:[#allocation2 + $0xe4] sm:$0xf] %vm15_vm0, %v3435_v21  ;;  %v3437_v31 = vadd.f32 %v3356_v22, %v3194_v18  ;;  %v3278_v33 = vsub.f32 %v5992_v29, %v7839_v35 }
 0x307   : > { %v3357_v2 = vand.u32 2147483647, %v3276_v23  ;;  %v3197_v32 = vld [vmem:[#allocation2 + $0xf8] sm:$0xf]  ;;  %v3279_v34 = vsub.f32 %v5993_v30, %v7839_v35  ;;  %v5994_v36 = vld [vmem:[%s6359_s17 + $0x1dc] sm:$0xf] }
 0x308   : > { %3517 = vst.msk [vmem:[#allocation2 + $0xe8] sm:$0xf] %vm15_vm0, %v3436_v26  ;;  %v3358_v37 = vand.u32 2147483647, %v3277_v28  ;;  %v3198_v38 = vld [vmem:[#allocation2 + $0xfc] sm:$0xf]  ;;  %v3280_v39 = vsub.f32 %v5994_v36, %v7839_v35 }
 0x309   : > { %v5995_v40 = vld [vmem:[%s6359_s17 + $0x1e0] sm:$0xf]  ;;  %3518 = vst.msk [vmem:[#allocation2 + $0xec] sm:$0xf] %vm15_vm0, %v3437_v31  ;;  %v3438_v5 = vadd.f32 %v3357_v2, %v3195_v50  ;;  %v3359_v41 = vand.u32 2147483647, %v3278_v33 }
 0x30a   : > { %v3360_v42 = vand.u32 2147483647, %v3279_v34  ;;  %v3199_v44 = vld [vmem:[#allocation2 + $0x100] sm:$0xf]  ;;  %v3281_v45 = vsub.f32 %v5995_v40, %v7839_v35  ;;  %v3439_v46 = vadd.f32 %v3358_v37, %v3196_v27  ;;  %v3361_v47 = vand.u32 2147483647, %v3280_v39 }
 0x30b   : > { %v3200_v48 = vld [vmem:[#allocation2 + $0x104] sm:$0xf]  ;;  %3519 = vst.msk [vmem:[#allocation2 + $0xf0] sm:$0xf] %vm15_vm0, %v3438_v5  ;;  %v3440_v51 = vadd.f32 %v3359_v41, %v3197_v32  ;;  %v3201_v17 = vld [vmem:[#allocation2 + $0x108] sm:$0xf] }
 0x30c   : > { %v5996_v49 = vld [vmem:[%s6359_s17 + $0x1e4] sm:$0xf]  ;;  %v3441_v52 = vadd.f32 %v3360_v42, %v3198_v38  ;;  %v3362_v53 = vand.u32 2147483647, %v3281_v45  ;;  %v5997_v55 = vld [vmem:[%s6359_s17 + $0x1e8] sm:$0xf]  ;;  %v3442_v56 = vadd.f32 %v3361_v47, %v3199_v44 }
 0x30d   : > { %v3282_v54 = vsub.f32 %v5996_v49, %v7839_v35  ;;  %3520 = vst.msk [vmem:[#allocation2 + $0xf4] sm:$0xf] %vm15_vm0, %v3439_v46  ;;  %v3202_v57 = vld [vmem:[#allocation2 + $0x10c] sm:$0xf]  ;;  %v3283_v58 = vsub.f32 %v5997_v55, %v7839_v35  ;;  %v5999_v59 = vld [vmem:[%s6359_s17 + $0x1f0] sm:$0xf] }
 0x30e   : > { %v5998_v25 = vld [vmem:[%s6359_s17 + $0x1ec] sm:$0xf]  ;;  %3521 = vst.msk [vmem:[#allocation2 + $0xf8] sm:$0xf] %vm15_vm0, %v3440_v51  ;;  %3522 = vst.msk [vmem:[#allocation2 + $0xfc] sm:$0xf] %vm15_vm0, %v3441_v52  ;;  %v3443_v60 = vadd.f32 %v3362_v53, %v3200_v48  ;;  %v3285_v0 = vsub.f32 %v5999_v59, %v7839_v35 }
 0x30f   : > { %v3363_v61 = vand.u32 2147483647, %v3282_v54  ;;  %v3203_v62 = vld [vmem:[#allocation2 + $0x110] sm:$0xf]  ;;  %v3284_v63 = vsub.f32 %v5998_v25, %v7839_v35  ;;  %v6000_v1 = vld [vmem:[%s6359_s17 + $0x1f4] sm:$0xf] }
 0x310   : > { %3523 = vst.msk [vmem:[#allocation2 + $0x100] sm:$0xf] %vm15_vm0, %v3442_v56  ;;  %v3364_v3 = vand.u32 2147483647, %v3283_v58  ;;  %v3204_v4 = vld [vmem:[#allocation2 + $0x114] sm:$0xf]  ;;  %v3286_v6 = vsub.f32 %v6000_v1, %v7839_v35 }
 0x311   : > { %v6001_v7 = vld [vmem:[%s6359_s17 + $0x1f8] sm:$0xf]  ;;  %3524 = vst.msk [vmem:[#allocation2 + $0x104] sm:$0xf] %vm15_vm0, %v3443_v60  ;;  %v3444_v8 = vadd.f32 %v3363_v61, %v3201_v17  ;;  %v3365_v9 = vand.u32 2147483647, %v3284_v63 }
 0x312   : > { %v3366_v10 = vand.u32 2147483647, %v3285_v0  ;;  %v3205_v11 = vld [vmem:[#allocation2 + $0x118] sm:$0xf]  ;;  %v3287_v12 = vsub.f32 %v6001_v7, %v7839_v35  ;;  %v3445_v13 = vadd.f32 %v3364_v3, %v3202_v57  ;;  %v3367_v43 = vand.u32 2147483647, %v3286_v6 }
 0x313   : > { %v3206_v14 = vld [vmem:[#allocation2 + $0x11c] sm:$0xf]  ;;  %v6002_v15 = vld [vmem:[%s6359_s17 + $0x218] sm:$0xf]  ;;  %3525 = vst.msk [vmem:[#allocation2 + $0x108] sm:$0xf] %vm15_vm0, %v3444_v8  ;;  %v3446_v16 = vadd.f32 %v3365_v9, %v3203_v62 }
 0x314   : > { %v3447_v18 = vadd.f32 %v3366_v10, %v3204_v4  ;;  %v3368_v19 = vand.u32 2147483647, %v3287_v12  ;;  %v3207_v20 = vld [vmem:[#allocation2 + $0x120] sm:$0xf]  ;;  %v3288_v21 = vsub.f32 %v6002_v15, %v7839_v35  ;;  %v6003_v22 = vld [vmem:[%s6359_s17 + $0x21c] sm:$0xf]  ;;  %v3448_v50 = vadd.f32 %v3367_v43, %v3205_v11 }
 0x315   : > { %3526 = vst.msk [vmem:[#allocation2 + $0x10c] sm:$0xf] %vm15_vm0, %v3445_v13  ;;  %v3208_v23 = vld [vmem:[#allocation2 + $0x124] sm:$0xf]  ;;  %v3289_v24 = vsub.f32 %v6003_v22, %v7839_v35  ;;  %v6004_v26 = vld [vmem:[%s6359_s17 + $0x220] sm:$0xf] }
 0x316   : > { %v6005_v27 = vld [vmem:[%s6359_s17 + $0x224] sm:$0xf]  ;;  %3527 = vst.msk [vmem:[#allocation2 + $0x110] sm:$0xf] %vm15_vm0, %v3446_v16  ;;  %3528 = vst.msk [vmem:[#allocation2 + $0x114] sm:$0xf] %vm15_vm0, %v3447_v18  ;;  %v3449_v28 = vadd.f32 %v3368_v19, %v3206_v14  ;;  %v3290_v31 = vsub.f32 %v6004_v26, %v7839_v35 }
 0x317   : > { %v3369_v29 = vand.u32 2147483647, %v3288_v21  ;;  %v3209_v30 = vld [vmem:[#allocation2 + $0x128] sm:$0xf]  ;;  %v3291_v2 = vsub.f32 %v6005_v27, %v7839_v35  ;;  %3529 = vst.msk [vmem:[#allocation2 + $0x118] sm:$0xf] %vm15_vm0, %v3448_v50 }
 0x318   : > { %v6006_v32 = vld [vmem:[%s6359_s17 + $0x228] sm:$0xf]  ;;  %v3370_v33 = vand.u32 2147483647, %v3289_v24  ;;  %v3210_v34 = vld [vmem:[#allocation2 + $0x12c] sm:$0xf] }
 0x319   : > { %v3292_v36 = vsub.f32 %v6006_v32, %v7839_v35  ;;  %v6007_v37 = vld [vmem:[%s6359_s17 + $0x22c] sm:$0xf]  ;;  %3530 = vst.msk [vmem:[#allocation2 + $0x11c] sm:$0xf] %vm15_vm0, %v3449_v28  ;;  %v3450_v38 = vadd.f32 %v3369_v29, %v3207_v20  ;;  %v3371_v39 = vand.u32 2147483647, %v3290_v31 }
 0x31a   : > { %v3372_v40 = vand.u32 2147483647, %v3291_v2  ;;  %v3211_v5 = vld [vmem:[#allocation2 + $0x130] sm:$0xf]  ;;  %v3293_v41 = vsub.f32 %v6007_v37, %v7839_v35  ;;  %v3451_v42 = vadd.f32 %v3370_v33, %v3208_v23  ;;  %v3212_v45 = vld [vmem:[#allocation2 + $0x134] sm:$0xf] }
 0x31b   : > { %v3373_v44 = vand.u32 2147483647, %v3292_v36  ;;  %v6008_v46 = vld [vmem:[%s6359_s17 + $0x230] sm:$0xf]  ;;  %3531 = vst.msk [vmem:[#allocation2 + $0x120] sm:$0xf] %vm15_vm0, %v3450_v38  ;;  %v3452_v47 = vadd.f32 %v3371_v39, %v3209_v30 }
 0x31c   : > { %v3453_v48 = vadd.f32 %v3372_v40, %v3210_v34  ;;  %v3374_v49 = vand.u32 2147483647, %v3293_v41  ;;  %v3294_v51 = vsub.f32 %v6008_v46, %v7839_v35  ;;  %v6009_v52 = vld [vmem:[%s6359_s17 + $0x234] sm:$0xf]  ;;  %3532 = vst.msk [vmem:[#allocation2 + $0x124] sm:$0xf] %vm15_vm0, %v3451_v42 }
 0x31d   : > { %v3454_v53 = vadd.f32 %v3373_v44, %v3211_v5  ;;  %v3213_v17 = vld [vmem:[#allocation2 + $0x138] sm:$0xf]  ;;  %v3295_v54 = vsub.f32 %v6009_v52, %v7839_v35  ;;  %v6014_v56 = vld [vmem:[%s6359_s17 + $0x1c] sm:$0xf]  ;;  %3533 = vst.msk [vmem:[#allocation2 + $0x128] sm:$0xf] %vm15_vm0, %v3452_v47 }
 0x31e   : > { %v6010_v55 = vld [vmem:[%s6359_s17 + $0x238] sm:$0xf]  ;;  %3534 = vst.msk [vmem:[#allocation2 + $0x12c] sm:$0xf] %vm15_vm0, %v3453_v48  ;;  %v3455_v57 = vadd.f32 %v3374_v49, %v3212_v45  ;;  %v3375_v58 = vand.u32 2147483647, %v3294_v51 }
 0x31f   : > { %v3214_v25 = vld [vmem:[#allocation2 + $0x13c] sm:$0xf]  ;;  %v3296_v59 = vsub.f32 %v6010_v55, %v7839_v35  ;;  %3535 = vst.msk [vmem:[#allocation2 + $0x130] sm:$0xf] %vm15_vm0, %v3454_v53  ;;  %v3376_v61 = vand.u32 2147483647, %v3295_v54 }
 0x320   : > { %v8085_v60 = vld [vmem:[%s6364_s20 + $0x1c] sm:$0xf]  ;;  %v3215_v62 = vld [vmem:[#allocation2 + $0x140] sm:$0xf]  ;;  %3536 = vst.msk [vmem:[#allocation2 + $0x134] sm:$0xf] %vm15_vm0, %v3455_v57  ;;  %v3456_v1 = vadd.f32 %v3375_v58, %v3213_v17 }
 0x321   : > { %v3707_v63 = vsub.f32 %v6014_v56, %v8085_v60  ;;  %v6015_v0 = vld [vmem:[%s6359_s17 + $0x20] sm:$0xf]  ;;  %v3377_v3 = vand.u32 2147483647, %v3296_v59  ;;  %v6016_v7 = vld [vmem:[%s6359_s17 + $0x24] sm:$0xf]  ;;  %v3457_v35 = vadd.f32 %v3376_v61, %v3214_v25 }
 0x322   : > { %v3626_v4 = vld [vmem:[#allocation2] sm:$0xf]  ;;  %v3708_v6 = vsub.f32 %v6015_v0, %v8085_v60  ;;  %v3627_v9 = vld [vmem:[#allocation2 + $0x4] sm:$0xf]  ;;  %v3709_v10 = vsub.f32 %v6016_v7, %v8085_v60  ;;  %v6017_v11 = vld [vmem:[%s6359_s17 + $0x28] sm:$0xf] }
 0x323   : > { %v3788_v8 = vand.u32 2147483647, %v3707_v63  ;;  %3537 = vst.msk [vmem:[#allocation2 + $0x138] sm:$0xf] %vm15_vm0, %v3456_v1  ;;  %v3458_v12 = vadd.f32 %v3377_v3, %v3215_v62  ;;  %v3628_v43 = vld [vmem:[#allocation2 + $0x8] sm:$0xf]  ;;  %v3710_v14 = vsub.f32 %v6017_v11, %v8085_v60 }
 0x324   : > { %v3789_v13 = vand.u32 2147483647, %v3708_v6  ;;  %v6018_v15 = vld [vmem:[%s6359_s17 + $0x2c] sm:$0xf]  ;;  %3538 = vst.msk [vmem:[#allocation2 + $0x13c] sm:$0xf] %vm15_vm0, %v3457_v35 }
 0x325   : > { %v3869_v16 = vadd.f32 %v3788_v8, %v3626_v4  ;;  %v3790_v18 = vand.u32 2147483647, %v3709_v10  ;;  %v3629_v19 = vld [vmem:[#allocation2 + $0xc] sm:$0xf]  ;;  %v3711_v20 = vsub.f32 %v6018_v15, %v8085_v60  ;;  %v6019_v21 = vld [vmem:[%s6359_s17 + $0x30] sm:$0xf] }
 0x326   : > { %3539 = vst.msk [vmem:[#allocation2 + $0x140] sm:$0xf] %vm15_vm0, %v3458_v12  ;;  %v3870_v22 = vadd.f32 %v3789_v13, %v3627_v9  ;;  %v3791_v50 = vand.u32 2147483647, %v3710_v14  ;;  %v3630_v23 = vld [vmem:[#allocation2 + $0x10] sm:$0xf]  ;;  %v3712_v24 = vsub.f32 %v6019_v21, %v8085_v60 }
 0x327   : > { %v6020_v26 = vld [vmem:[%s6359_s17 + $0x34] sm:$0xf]  ;;  %3950 = vst.msk [vmem:[#allocation2] sm:$0xf] %vm15_vm0, %v3869_v16  ;;  %v3871_v27 = vadd.f32 %v3790_v18, %v3628_v43  ;;  %v3792_v28 = vand.u32 2147483647, %v3711_v20 }
 0x328   : > { %v3631_v29 = vld [vmem:[#allocation2 + $0x14] sm:$0xf]  ;;  %v3713_v30 = vsub.f32 %v6020_v26, %v8085_v60  ;;  %v6021_v31 = vld [vmem:[%s6359_s17 + $0x38] sm:$0xf]  ;;  %3951 = vst.msk [vmem:[#allocation2 + $0x4] sm:$0xf] %vm15_vm0, %v3870_v22  ;;  %v3872_v2 = vadd.f32 %v3791_v50, %v3629_v19 }
 0x329   : > { %v3793_v32 = vand.u32 2147483647, %v3712_v24  ;;  %v3632_v33 = vld [vmem:[#allocation2 + $0x18] sm:$0xf]  ;;  %v3714_v34 = vsub.f32 %v6021_v31, %v8085_v60  ;;  %v6022_v36 = vld [vmem:[%s6359_s17 + $0x3c] sm:$0xf]  ;;  %v3873_v37 = vadd.f32 %v3792_v28, %v3630_v23 }
 0x32a   : > { %3952 = vst.msk [vmem:[#allocation2 + $0x8] sm:$0xf] %vm15_vm0, %v3871_v27  ;;  %v3794_v38 = vand.u32 2147483647, %v3713_v30  ;;  %v3633_v39 = vld [vmem:[#allocation2 + $0x1c] sm:$0xf]  ;;  %v3715_v40 = vsub.f32 %v6022_v36, %v8085_v60 }
 0x32b   : > { %v6023_v5 = vld [vmem:[%s6359_s17 + $0x5c] sm:$0xf]  ;;  %3953 = vst.msk [vmem:[#allocation2 + $0xc] sm:$0xf] %vm15_vm0, %v3872_v2  ;;  %v3874_v41 = vadd.f32 %v3793_v32, %v3631_v29  ;;  %v3795_v42 = vand.u32 2147483647, %v3714_v34 }
 0x32c   : > { %v3634_v44 = vld [vmem:[#allocation2 + $0x20] sm:$0xf]  ;;  %v3716_v45 = vsub.f32 %v6023_v5, %v8085_v60  ;;  %3954 = vst.msk [vmem:[#allocation2 + $0x10] sm:$0xf] %vm15_vm0, %v3873_v37  ;;  %v3875_v47 = vadd.f32 %v3794_v38, %v3632_v33  ;;  %v3796_v48 = vand.u32 2147483647, %v3715_v40 }
 0x32d   : > { %v6024_v46 = vld [vmem:[%s6359_s17 + $0x60] sm:$0xf]  ;;  %v3635_v49 = vld [vmem:[#allocation2 + $0x24] sm:$0xf]  ;;  %3955 = vst.msk [vmem:[#allocation2 + $0x14] sm:$0xf] %vm15_vm0, %v3874_v41  ;;  %v3876_v53 = vadd.f32 %v3795_v42, %v3633_v39 }
 0x32e   : > { %v3717_v51 = vsub.f32 %v6024_v46, %v8085_v60  ;;  %v6025_v52 = vld [vmem:[%s6359_s17 + $0x64] sm:$0xf]  ;;  %v3797_v17 = vand.u32 2147483647, %v3716_v45  ;;  %v3636_v54 = vld [vmem:[#allocation2 + $0x28] sm:$0xf]  ;;  %v3877_v57 = vadd.f32 %v3796_v48, %v3634_v44 }
 0x32f   : > { %v3718_v55 = vsub.f32 %v6025_v52, %v8085_v60  ;;  %v6026_v56 = vld [vmem:[%s6359_s17 + $0x68] sm:$0xf]  ;;  %3956 = vst.msk [vmem:[#allocation2 + $0x18] sm:$0xf] %vm15_vm0, %v3875_v47  ;;  %v3637_v25 = vld [vmem:[#allocation2 + $0x2c] sm:$0xf] }
 0x330   : > { %v3798_v58 = vand.u32 2147483647, %v3717_v51  ;;  %v3719_v59 = vsub.f32 %v6026_v56, %v8085_v60  ;;  %v6027_v61 = vld [vmem:[%s6359_s17 + $0x6c] sm:$0xf]  ;;  %3957 = vst.msk [vmem:[#allocation2 + $0x1c] sm:$0xf] %vm15_vm0, %v3876_v53  ;;  %v3878_v62 = vadd.f32 %v3797_v17, %v3635_v49 }
 0x331   : > { %v3799_v63 = vand.u32 2147483647, %v3718_v55  ;;  %v3638_v0 = vld [vmem:[#allocation2 + $0x30] sm:$0xf]  ;;  %v3720_v1 = vsub.f32 %v6027_v61, %v8085_v60  ;;  %3958 = vst.msk [vmem:[#allocation2 + $0x20] sm:$0xf] %vm15_vm0, %v3877_v57 }
 0x332   : > { %v6028_v3 = vld [vmem:[%s6359_s17 + $0x70] sm:$0xf]  ;;  %v3879_v4 = vadd.f32 %v3798_v58, %v3636_v54  ;;  %v3800_v6 = vand.u32 2147483647, %v3719_v59  ;;  %v3639_v7 = vld [vmem:[#allocation2 + $0x34] sm:$0xf] }
 0x333   : > { %v3721_v35 = vsub.f32 %v6028_v3, %v8085_v60  ;;  %v6029_v8 = vld [vmem:[%s6359_s17 + $0x74] sm:$0xf]  ;;  %3959 = vst.msk [vmem:[#allocation2 + $0x24] sm:$0xf] %vm15_vm0, %v3878_v62  ;;  %v3880_v9 = vadd.f32 %v3799_v63, %v3637_v25  ;;  %v3801_v10 = vand.u32 2147483647, %v3720_v1 }
 0x334   : > { %v3640_v11 = vld [vmem:[#allocation2 + $0x38] sm:$0xf]  ;;  %v3722_v12 = vsub.f32 %v6029_v8, %v8085_v60  ;;  %3960 = vst.msk [vmem:[#allocation2 + $0x28] sm:$0xf] %vm15_vm0, %v3879_v4  ;;  %v3881_v43 = vadd.f32 %v3800_v6, %v3638_v0  ;;  %v3641_v15 = vld [vmem:[#allocation2 + $0x3c] sm:$0xf] }
 0x335   : > { %v6030_v13 = vld [vmem:[%s6359_s17 + $0x78] sm:$0xf]  ;;  %v3802_v14 = vand.u32 2147483647, %v3721_v35  ;;  %v6031_v18 = vld [vmem:[%s6359_s17 + $0x7c] sm:$0xf]  ;;  %v3882_v19 = vadd.f32 %v3801_v10, %v3639_v7 }
 0x336   : > { %v3723_v16 = vsub.f32 %v6030_v13, %v8085_v60  ;;  %3961 = vst.msk [vmem:[#allocation2 + $0x2c] sm:$0xf] %vm15_vm0, %v3880_v9  ;;  %v3803_v20 = vand.u32 2147483647, %v3722_v12  ;;  %v3642_v21 = vld [vmem:[#allocation2 + $0x40] sm:$0xf]  ;;  %v3724_v22 = vsub.f32 %v6031_v18, %v8085_v60 }
 0x337   : > { %v6032_v50 = vld [vmem:[%s6359_s17 + $0x9c] sm:$0xf]  ;;  %3962 = vst.msk [vmem:[#allocation2 + $0x30] sm:$0xf] %vm15_vm0, %v3881_v43  ;;  %v3883_v23 = vadd.f32 %v3802_v14, %v3640_v11  ;;  %v3643_v26 = vld [vmem:[#allocation2 + $0x44] sm:$0xf] }
 0x338   : > { %v3804_v24 = vand.u32 2147483647, %v3723_v16  ;;  %v3725_v27 = vsub.f32 %v6032_v50, %v8085_v60  ;;  %v6033_v28 = vld [vmem:[%s6359_s17 + $0xa0] sm:$0xf]  ;;  %3963 = vst.msk [vmem:[#allocation2 + $0x34] sm:$0xf] %vm15_vm0, %v3882_v19  ;;  %v3884_v29 = vadd.f32 %v3803_v20, %v3641_v15 }
 0x339   : > { %v3805_v30 = vand.u32 2147483647, %v3724_v22  ;;  %v3644_v31 = vld [vmem:[#allocation2 + $0x48] sm:$0xf]  ;;  %v3726_v2 = vsub.f32 %v6033_v28, %v8085_v60  ;;  %v6034_v32 = vld [vmem:[%s6359_s17 + $0xa4] sm:$0xf] }
 0x33a   : > { %3964 = vst.msk [vmem:[#allocation2 + $0x38] sm:$0xf] %vm15_vm0, %v3883_v23  ;;  %v3885_v33 = vadd.f32 %v3804_v24, %v3642_v21  ;;  %v3806_v34 = vand.u32 2147483647, %v3725_v27  ;;  %v3645_v36 = vld [vmem:[#allocation2 + $0x4c] sm:$0xf]  ;;  %v3727_v37 = vsub.f32 %v6034_v32, %v8085_v60 }
 0x33b   : > { %v6035_v38 = vld [vmem:[%s6359_s17 + $0xa8] sm:$0xf]  ;;  %3965 = vst.msk [vmem:[#allocation2 + $0x3c] sm:$0xf] %vm15_vm0, %v3884_v29  ;;  %v3886_v39 = vadd.f32 %v3805_v30, %v3643_v26  ;;  %v3807_v40 = vand.u32 2147483647, %v3726_v2 }
 0x33c   : > { %v3646_v5 = vld [vmem:[#allocation2 + $0x50] sm:$0xf]  ;;  %v3728_v41 = vsub.f32 %v6035_v38, %v8085_v60  ;;  %v6036_v42 = vld [vmem:[%s6359_s17 + $0xac] sm:$0xf]  ;;  %3966 = vst.msk [vmem:[#allocation2 + $0x40] sm:$0xf] %vm15_vm0, %v3885_v33  ;;  %v3887_v44 = vadd.f32 %v3806_v34, %v3644_v31 }
 0x33d   : > { %v3808_v45 = vand.u32 2147483647, %v3727_v37  ;;  %v3647_v46 = vld [vmem:[#allocation2 + $0x54] sm:$0xf]  ;;  %v3729_v47 = vsub.f32 %v6036_v42, %v8085_v60  ;;  %v6037_v48 = vld [vmem:[%s6359_s17 + $0xb0] sm:$0xf]  ;;  %v3888_v49 = vadd.f32 %v3807_v40, %v3645_v36 }
 0x33e   : > { %3967 = vst.msk [vmem:[#allocation2 + $0x44] sm:$0xf] %vm15_vm0, %v3886_v39  ;;  %v3809_v51 = vand.u32 2147483647, %v3728_v41  ;;  %v3648_v52 = vld [vmem:[#allocation2 + $0x58] sm:$0xf]  ;;  %v3730_v53 = vsub.f32 %v6037_v48, %v8085_v60 }
 0x33f   : > { %v6038_v17 = vld [vmem:[%s6359_s17 + $0xb4] sm:$0xf]  ;;  %3968 = vst.msk [vmem:[#allocation2 + $0x48] sm:$0xf] %vm15_vm0, %v3887_v44  ;;  %v3889_v54 = vadd.f32 %v3808_v45, %v3646_v5  ;;  %v3810_v55 = vand.u32 2147483647, %v3729_v47 }
 0x340   : > { %v3649_v56 = vld [vmem:[#allocation2 + $0x5c] sm:$0xf]  ;;  %v3731_v57 = vsub.f32 %v6038_v17, %v8085_v60  ;;  %v6039_v58 = vld [vmem:[%s6359_s17 + $0xb8] sm:$0xf]  ;;  %3969 = vst.msk [vmem:[#allocation2 + $0x4c] sm:$0xf] %vm15_vm0, %v3888_v49  ;;  %v3890_v25 = vadd.f32 %v3809_v51, %v3647_v46 }
 0x341   : > { %v3811_v59 = vand.u32 2147483647, %v3730_v53  ;;  %v3650_v61 = vld [vmem:[#allocation2 + $0x60] sm:$0xf]  ;;  %v3732_v62 = vsub.f32 %v6039_v58, %v8085_v60  ;;  %v6040_v63 = vld [vmem:[%s6359_s17 + $0xbc] sm:$0xf]  ;;  %v3891_v0 = vadd.f32 %v3810_v55, %v3648_v52 }
 0x342   : > { %3970 = vst.msk [vmem:[#allocation2 + $0x50] sm:$0xf] %vm15_vm0, %v3889_v54  ;;  %v3812_v1 = vand.u32 2147483647, %v3731_v57  ;;  %v3651_v3 = vld [vmem:[#allocation2 + $0x64] sm:$0xf]  ;;  %v3733_v4 = vsub.f32 %v6040_v63, %v8085_v60 }
 0x343   : > { %v6041_v6 = vld [vmem:[%s6359_s17 + $0xdc] sm:$0xf]  ;;  %3971 = vst.msk [vmem:[#allocation2 + $0x54] sm:$0xf] %vm15_vm0, %v3890_v25  ;;  %v3892_v7 = vadd.f32 %v3811_v59, %v3649_v56  ;;  %v3813_v35 = vand.u32 2147483647, %v3732_v62 }
 0x344   : > { %v3652_v8 = vld [vmem:[#allocation2 + $0x68] sm:$0xf]  ;;  %v3734_v9 = vsub.f32 %v6041_v6, %v8085_v60  ;;  %v6042_v10 = vld [vmem:[%s6359_s17 + $0xe0] sm:$0xf]  ;;  %3972 = vst.msk [vmem:[#allocation2 + $0x58] sm:$0xf] %vm15_vm0, %v3891_v0  ;;  %v3893_v11 = vadd.f32 %v3812_v1, %v3650_v61 }
 0x345   : > { %v3814_v12 = vand.u32 2147483647, %v3733_v4  ;;  %v3653_v13 = vld [vmem:[#allocation2 + $0x6c] sm:$0xf]  ;;  %v3735_v43 = vsub.f32 %v6042_v10, %v8085_v60  ;;  %v6043_v14 = vld [vmem:[%s6359_s17 + $0xe4] sm:$0xf]  ;;  %v3894_v15 = vadd.f32 %v3813_v35, %v3651_v3 }
 0x346   : > { %3973 = vst.msk [vmem:[#allocation2 + $0x5c] sm:$0xf] %vm15_vm0, %v3892_v7  ;;  %v3815_v16 = vand.u32 2147483647, %v3734_v9  ;;  %v3654_v18 = vld [vmem:[#allocation2 + $0x70] sm:$0xf]  ;;  %v3736_v19 = vsub.f32 %v6043_v14, %v8085_v60 }
 0x347   : > { %v6044_v20 = vld [vmem:[%s6359_s17 + $0xe8] sm:$0xf]  ;;  %3974 = vst.msk [vmem:[#allocation2 + $0x60] sm:$0xf] %vm15_vm0, %v3893_v11  ;;  %v3895_v21 = vadd.f32 %v3814_v12, %v3652_v8  ;;  %v3816_v22 = vand.u32 2147483647, %v3735_v43 }
 0x348   : > { %v3655_v50 = vld [vmem:[#allocation2 + $0x74] sm:$0xf]  ;;  %v3737_v23 = vsub.f32 %v6044_v20, %v8085_v60  ;;  %v6045_v24 = vld [vmem:[%s6359_s17 + $0xec] sm:$0xf]  ;;  %3975 = vst.msk [vmem:[#allocation2 + $0x64] sm:$0xf] %vm15_vm0, %v3894_v15  ;;  %v3896_v26 = vadd.f32 %v3815_v16, %v3653_v13 }
 0x349   : > { %v3817_v27 = vand.u32 2147483647, %v3736_v19  ;;  %v3656_v28 = vld [vmem:[#allocation2 + $0x78] sm:$0xf]  ;;  %v3738_v29 = vsub.f32 %v6045_v24, %v8085_v60  ;;  %v6046_v30 = vld [vmem:[%s6359_s17 + $0xf0] sm:$0xf]  ;;  %v3897_v31 = vadd.f32 %v3816_v22, %v3654_v18 }
 0x34a   : > { %3976 = vst.msk [vmem:[#allocation2 + $0x68] sm:$0xf] %vm15_vm0, %v3895_v21  ;;  %v3818_v2 = vand.u32 2147483647, %v3737_v23  ;;  %v3657_v32 = vld [vmem:[#allocation2 + $0x7c] sm:$0xf]  ;;  %v3739_v33 = vsub.f32 %v6046_v30, %v8085_v60 }
 0x34b   : > { %v6047_v34 = vld [vmem:[%s6359_s17 + $0xf4] sm:$0xf]  ;;  %3977 = vst.msk [vmem:[#allocation2 + $0x6c] sm:$0xf] %vm15_vm0, %v3896_v26  ;;  %v3898_v36 = vadd.f32 %v3817_v27, %v3655_v50  ;;  %v3819_v37 = vand.u32 2147483647, %v3738_v29 }
 0x34c   : > { %v3658_v38 = vld [vmem:[#allocation2 + $0x80] sm:$0xf]  ;;  %v3740_v39 = vsub.f32 %v6047_v34, %v8085_v60  ;;  %v6048_v40 = vld [vmem:[%s6359_s17 + $0xf8] sm:$0xf]  ;;  %3978 = vst.msk [vmem:[#allocation2 + $0x70] sm:$0xf] %vm15_vm0, %v3897_v31  ;;  %v3899_v5 = vadd.f32 %v3818_v2, %v3656_v28 }
 0x34d   : > { %v3820_v41 = vand.u32 2147483647, %v3739_v33  ;;  %v3659_v42 = vld [vmem:[#allocation2 + $0x84] sm:$0xf]  ;;  %v3741_v44 = vsub.f32 %v6048_v40, %v8085_v60  ;;  %v6049_v45 = vld [vmem:[%s6359_s17 + $0xfc] sm:$0xf]  ;;  %v3900_v46 = vadd.f32 %v3819_v37, %v3657_v32 }
 0x34e   : > { %3979 = vst.msk [vmem:[#allocation2 + $0x74] sm:$0xf] %vm15_vm0, %v3898_v36  ;;  %v3821_v47 = vand.u32 2147483647, %v3740_v39  ;;  %v3660_v48 = vld [vmem:[#allocation2 + $0x88] sm:$0xf]  ;;  %v3742_v49 = vsub.f32 %v6049_v45, %v8085_v60 }
 0x34f   : > { %v6050_v51 = vld [vmem:[%s6359_s17 + $0x11c] sm:$0xf]  ;;  %3980 = vst.msk [vmem:[#allocation2 + $0x78] sm:$0xf] %vm15_vm0, %v3899_v5  ;;  %v3901_v52 = vadd.f32 %v3820_v41, %v3658_v38  ;;  %v3822_v53 = vand.u32 2147483647, %v3741_v44 }
 0x350   : > { %v3661_v17 = vld [vmem:[#allocation2 + $0x8c] sm:$0xf]  ;;  %v3743_v54 = vsub.f32 %v6050_v51, %v8085_v60  ;;  %v6051_v55 = vld [vmem:[%s6359_s17 + $0x120] sm:$0xf]  ;;  %3981 = vst.msk [vmem:[#allocation2 + $0x7c] sm:$0xf] %vm15_vm0, %v3900_v46  ;;  %v3902_v56 = vadd.f32 %v3821_v47, %v3659_v42 }
 0x351   : > { %v3823_v57 = vand.u32 2147483647, %v3742_v49  ;;  %v3662_v58 = vld [vmem:[#allocation2 + $0x90] sm:$0xf]  ;;  %v3744_v25 = vsub.f32 %v6051_v55, %v8085_v60  ;;  %v6052_v59 = vld [vmem:[%s6359_s17 + $0x124] sm:$0xf]  ;;  %v3903_v61 = vadd.f32 %v3822_v53, %v3660_v48 }
 0x352   : > { %3982 = vst.msk [vmem:[#allocation2 + $0x80] sm:$0xf] %vm15_vm0, %v3901_v52  ;;  %v3824_v62 = vand.u32 2147483647, %v3743_v54  ;;  %v3663_v63 = vld [vmem:[#allocation2 + $0x94] sm:$0xf]  ;;  %v3745_v0 = vsub.f32 %v6052_v59, %v8085_v60 }
 0x353   : > { %v6053_v1 = vld [vmem:[%s6359_s17 + $0x128] sm:$0xf]  ;;  %3983 = vst.msk [vmem:[#allocation2 + $0x84] sm:$0xf] %vm15_vm0, %v3902_v56  ;;  %v3904_v3 = vadd.f32 %v3823_v57, %v3661_v17  ;;  %v3825_v4 = vand.u32 2147483647, %v3744_v25 }
 0x354   : > { %v3664_v6 = vld [vmem:[#allocation2 + $0x98] sm:$0xf]  ;;  %v3746_v7 = vsub.f32 %v6053_v1, %v8085_v60  ;;  %v6054_v35 = vld [vmem:[%s6359_s17 + $0x12c] sm:$0xf]  ;;  %3984 = vst.msk [vmem:[#allocation2 + $0x88] sm:$0xf] %vm15_vm0, %v3903_v61  ;;  %v3905_v8 = vadd.f32 %v3824_v62, %v3662_v58 }
 0x355   : > { %v3826_v9 = vand.u32 2147483647, %v3745_v0  ;;  %v3665_v10 = vld [vmem:[#allocation2 + $0x9c] sm:$0xf]  ;;  %v3747_v11 = vsub.f32 %v6054_v35, %v8085_v60  ;;  %v6055_v12 = vld [vmem:[%s6359_s17 + $0x130] sm:$0xf]  ;;  %v3906_v13 = vadd.f32 %v3825_v4, %v3663_v63 }
 0x356   : > { %3985 = vst.msk [vmem:[#allocation2 + $0x8c] sm:$0xf] %vm15_vm0, %v3904_v3  ;;  %v3827_v43 = vand.u32 2147483647, %v3746_v7  ;;  %v3666_v14 = vld [vmem:[#allocation2 + $0xa0] sm:$0xf]  ;;  %v3748_v15 = vsub.f32 %v6055_v12, %v8085_v60 }
 0x357   : > { %v6056_v16 = vld [vmem:[%s6359_s17 + $0x134] sm:$0xf]  ;;  %3986 = vst.msk [vmem:[#allocation2 + $0x90] sm:$0xf] %vm15_vm0, %v3905_v8  ;;  %v3907_v18 = vadd.f32 %v3826_v9, %v3664_v6  ;;  %v3828_v19 = vand.u32 2147483647, %v3747_v11 }
 0x358   : > { %v3667_v20 = vld [vmem:[#allocation2 + $0xa4] sm:$0xf]  ;;  %v3749_v21 = vsub.f32 %v6056_v16, %v8085_v60  ;;  %v6057_v22 = vld [vmem:[%s6359_s17 + $0x138] sm:$0xf]  ;;  %3987 = vst.msk [vmem:[#allocation2 + $0x94] sm:$0xf] %vm15_vm0, %v3906_v13  ;;  %v3908_v50 = vadd.f32 %v3827_v43, %v3665_v10 }
 0x359   : > { %v3829_v23 = vand.u32 2147483647, %v3748_v15  ;;  %v3668_v24 = vld [vmem:[#allocation2 + $0xa8] sm:$0xf]  ;;  %v3750_v26 = vsub.f32 %v6057_v22, %v8085_v60  ;;  %v6058_v27 = vld [vmem:[%s6359_s17 + $0x13c] sm:$0xf]  ;;  %v3909_v28 = vadd.f32 %v3828_v19, %v3666_v14 }
 0x35a   : > { %3988 = vst.msk [vmem:[#allocation2 + $0x98] sm:$0xf] %vm15_vm0, %v3907_v18  ;;  %v3830_v29 = vand.u32 2147483647, %v3749_v21  ;;  %v3669_v30 = vld [vmem:[#allocation2 + $0xac] sm:$0xf]  ;;  %v3751_v31 = vsub.f32 %v6058_v27, %v8085_v60 }
 0x35b   : > { %v6059_v2 = vld [vmem:[%s6359_s17 + $0x15c] sm:$0xf]  ;;  %3989 = vst.msk [vmem:[#allocation2 + $0x9c] sm:$0xf] %vm15_vm0, %v3908_v50  ;;  %v3910_v32 = vadd.f32 %v3829_v23, %v3667_v20  ;;  %v3831_v33 = vand.u32 2147483647, %v3750_v26 }
 0x35c   : > { %v3670_v34 = vld [vmem:[#allocation2 + $0xb0] sm:$0xf]  ;;  %v3752_v36 = vsub.f32 %v6059_v2, %v8085_v60  ;;  %v6060_v37 = vld [vmem:[%s6359_s17 + $0x160] sm:$0xf]  ;;  %3990 = vst.msk [vmem:[#allocation2 + $0xa0] sm:$0xf] %vm15_vm0, %v3909_v28  ;;  %v3911_v38 = vadd.f32 %v3830_v29, %v3668_v24 }
 0x35d   : > { %v3832_v39 = vand.u32 2147483647, %v3751_v31  ;;  %v3671_v40 = vld [vmem:[#allocation2 + $0xb4] sm:$0xf]  ;;  %v3753_v5 = vsub.f32 %v6060_v37, %v8085_v60  ;;  %v6061_v41 = vld [vmem:[%s6359_s17 + $0x164] sm:$0xf]  ;;  %v3912_v42 = vadd.f32 %v3831_v33, %v3669_v30 }
 0x35e   : > { %3991 = vst.msk [vmem:[#allocation2 + $0xa4] sm:$0xf] %vm15_vm0, %v3910_v32  ;;  %v3833_v44 = vand.u32 2147483647, %v3752_v36  ;;  %v3672_v45 = vld [vmem:[#allocation2 + $0xb8] sm:$0xf]  ;;  %v3754_v46 = vsub.f32 %v6061_v41, %v8085_v60 }
 0x35f   : > { %v6062_v47 = vld [vmem:[%s6359_s17 + $0x168] sm:$0xf]  ;;  %3992 = vst.msk [vmem:[#allocation2 + $0xa8] sm:$0xf] %vm15_vm0, %v3911_v38  ;;  %v3913_v48 = vadd.f32 %v3832_v39, %v3670_v34  ;;  %v3834_v49 = vand.u32 2147483647, %v3753_v5 }
 0x360   : > { %v3673_v51 = vld [vmem:[#allocation2 + $0xbc] sm:$0xf]  ;;  %v3755_v52 = vsub.f32 %v6062_v47, %v8085_v60  ;;  %v6063_v53 = vld [vmem:[%s6359_s17 + $0x16c] sm:$0xf]  ;;  %3993 = vst.msk [vmem:[#allocation2 + $0xac] sm:$0xf] %vm15_vm0, %v3912_v42  ;;  %v3914_v17 = vadd.f32 %v3833_v44, %v3671_v40 }
 0x361   : > { %v3835_v54 = vand.u32 2147483647, %v3754_v46  ;;  %v3674_v55 = vld [vmem:[#allocation2 + $0xc0] sm:$0xf]  ;;  %v3756_v56 = vsub.f32 %v6063_v53, %v8085_v60  ;;  %v6064_v57 = vld [vmem:[%s6359_s17 + $0x170] sm:$0xf]  ;;  %v3915_v58 = vadd.f32 %v3834_v49, %v3672_v45 }
 0x362   : > { %3994 = vst.msk [vmem:[#allocation2 + $0xb0] sm:$0xf] %vm15_vm0, %v3913_v48  ;;  %v3836_v25 = vand.u32 2147483647, %v3755_v52  ;;  %v3675_v59 = vld [vmem:[#allocation2 + $0xc4] sm:$0xf]  ;;  %v3757_v61 = vsub.f32 %v6064_v57, %v8085_v60 }
 0x363   : > { %v6065_v62 = vld [vmem:[%s6359_s17 + $0x174] sm:$0xf]  ;;  %3995 = vst.msk [vmem:[#allocation2 + $0xb4] sm:$0xf] %vm15_vm0, %v3914_v17  ;;  %v3916_v63 = vadd.f32 %v3835_v54, %v3673_v51  ;;  %v3837_v0 = vand.u32 2147483647, %v3756_v56 }
 0x364   : > { %v3676_v1 = vld [vmem:[#allocation2 + $0xc8] sm:$0xf]  ;;  %v3758_v3 = vsub.f32 %v6065_v62, %v8085_v60  ;;  %v6066_v4 = vld [vmem:[%s6359_s17 + $0x178] sm:$0xf]  ;;  %3996 = vst.msk [vmem:[#allocation2 + $0xb8] sm:$0xf] %vm15_vm0, %v3915_v58  ;;  %v3917_v6 = vadd.f32 %v3836_v25, %v3674_v55 }
 0x365   : > { %v3838_v7 = vand.u32 2147483647, %v3757_v61  ;;  %v3677_v35 = vld [vmem:[#allocation2 + $0xcc] sm:$0xf]  ;;  %v3759_v8 = vsub.f32 %v6066_v4, %v8085_v60  ;;  %v6067_v9 = vld [vmem:[%s6359_s17 + $0x17c] sm:$0xf]  ;;  %v3918_v10 = vadd.f32 %v3837_v0, %v3675_v59 }
 0x366   : > { %3997 = vst.msk [vmem:[#allocation2 + $0xbc] sm:$0xf] %vm15_vm0, %v3916_v63  ;;  %v3839_v11 = vand.u32 2147483647, %v3758_v3  ;;  %v3678_v12 = vld [vmem:[#allocation2 + $0xd0] sm:$0xf]  ;;  %v3760_v13 = vsub.f32 %v6067_v9, %v8085_v60 }
 0x367   : > { %v6068_v43 = vld [vmem:[%s6359_s17 + $0x19c] sm:$0xf]  ;;  %3998 = vst.msk [vmem:[#allocation2 + $0xc0] sm:$0xf] %vm15_vm0, %v3917_v6  ;;  %v3919_v14 = vadd.f32 %v3838_v7, %v3676_v1  ;;  %v3840_v15 = vand.u32 2147483647, %v3759_v8 }
 0x368   : > { %v3679_v16 = vld [vmem:[#allocation2 + $0xd4] sm:$0xf]  ;;  %v3761_v18 = vsub.f32 %v6068_v43, %v8085_v60  ;;  %v6069_v19 = vld [vmem:[%s6359_s17 + $0x1a0] sm:$0xf]  ;;  %3999 = vst.msk [vmem:[#allocation2 + $0xc4] sm:$0xf] %vm15_vm0, %v3918_v10  ;;  %v3920_v20 = vadd.f32 %v3839_v11, %v3677_v35 }
 0x369   : > { %v3841_v21 = vand.u32 2147483647, %v3760_v13  ;;  %v3680_v22 = vld [vmem:[#allocation2 + $0xd8] sm:$0xf]  ;;  %v3762_v50 = vsub.f32 %v6069_v19, %v8085_v60  ;;  %v6070_v23 = vld [vmem:[%s6359_s17 + $0x1a4] sm:$0xf]  ;;  %v3921_v24 = vadd.f32 %v3840_v15, %v3678_v12 }
 0x36a   : > { %4000 = vst.msk [vmem:[#allocation2 + $0xc8] sm:$0xf] %vm15_vm0, %v3919_v14  ;;  %v3842_v26 = vand.u32 2147483647, %v3761_v18  ;;  %v3681_v27 = vld [vmem:[#allocation2 + $0xdc] sm:$0xf]  ;;  %v3763_v28 = vsub.f32 %v6070_v23, %v8085_v60 }
 0x36b   : > { %v6071_v29 = vld [vmem:[%s6359_s17 + $0x1a8] sm:$0xf]  ;;  %4001 = vst.msk [vmem:[#allocation2 + $0xcc] sm:$0xf] %vm15_vm0, %v3920_v20  ;;  %v3922_v30 = vadd.f32 %v3841_v21, %v3679_v16  ;;  %v3843_v31 = vand.u32 2147483647, %v3762_v50 }
 0x36c   : > { %v3682_v2 = vld [vmem:[#allocation2 + $0xe0] sm:$0xf]  ;;  %v3764_v32 = vsub.f32 %v6071_v29, %v8085_v60  ;;  %v6072_v33 = vld [vmem:[%s6359_s17 + $0x1ac] sm:$0xf]  ;;  %4002 = vst.msk [vmem:[#allocation2 + $0xd0] sm:$0xf] %vm15_vm0, %v3921_v24  ;;  %v3923_v34 = vadd.f32 %v3842_v26, %v3680_v22 }
 0x36d   : > { %v3844_v36 = vand.u32 2147483647, %v3763_v28  ;;  %v3683_v37 = vld [vmem:[#allocation2 + $0xe4] sm:$0xf]  ;;  %v3765_v38 = vsub.f32 %v6072_v33, %v8085_v60  ;;  %v6073_v39 = vld [vmem:[%s6359_s17 + $0x1b0] sm:$0xf]  ;;  %v3924_v40 = vadd.f32 %v3843_v31, %v3681_v27 }
 0x36e   : > { %4003 = vst.msk [vmem:[#allocation2 + $0xd4] sm:$0xf] %vm15_vm0, %v3922_v30  ;;  %v3845_v5 = vand.u32 2147483647, %v3764_v32  ;;  %v3684_v41 = vld [vmem:[#allocation2 + $0xe8] sm:$0xf]  ;;  %v3766_v42 = vsub.f32 %v6073_v39, %v8085_v60 }
 0x36f   : > { %v6074_v44 = vld [vmem:[%s6359_s17 + $0x1b4] sm:$0xf]  ;;  %4004 = vst.msk [vmem:[#allocation2 + $0xd8] sm:$0xf] %vm15_vm0, %v3923_v34  ;;  %v3925_v45 = vadd.f32 %v3844_v36, %v3682_v2  ;;  %v3846_v46 = vand.u32 2147483647, %v3765_v38 }
 0x370   : > { %v3685_v47 = vld [vmem:[#allocation2 + $0xec] sm:$0xf]  ;;  %v3767_v48 = vsub.f32 %v6074_v44, %v8085_v60  ;;  %v6075_v49 = vld [vmem:[%s6359_s17 + $0x1b8] sm:$0xf]  ;;  %4005 = vst.msk [vmem:[#allocation2 + $0xdc] sm:$0xf] %vm15_vm0, %v3924_v40  ;;  %v3926_v51 = vadd.f32 %v3845_v5, %v3683_v37 }
 0x371   : > { %v3847_v52 = vand.u32 2147483647, %v3766_v42  ;;  %v3686_v53 = vld [vmem:[#allocation2 + $0xf0] sm:$0xf]  ;;  %v3768_v17 = vsub.f32 %v6075_v49, %v8085_v60  ;;  %v6076_v54 = vld [vmem:[%s6359_s17 + $0x1bc] sm:$0xf]  ;;  %v3927_v55 = vadd.f32 %v3846_v46, %v3684_v41 }
 0x372   : > { %4006 = vst.msk [vmem:[#allocation2 + $0xe0] sm:$0xf] %vm15_vm0, %v3925_v45  ;;  %v3848_v56 = vand.u32 2147483647, %v3767_v48  ;;  %v3687_v57 = vld [vmem:[#allocation2 + $0xf4] sm:$0xf]  ;;  %v3769_v58 = vsub.f32 %v6076_v54, %v8085_v60 }
 0x373   : > { %v6077_v25 = vld [vmem:[%s6359_s17 + $0x1dc] sm:$0xf]  ;;  %4007 = vst.msk [vmem:[#allocation2 + $0xe4] sm:$0xf] %vm15_vm0, %v3926_v51  ;;  %v3928_v59 = vadd.f32 %v3847_v52, %v3685_v47  ;;  %v3849_v61 = vand.u32 2147483647, %v3768_v17 }
 0x374   : > { %v3688_v62 = vld [vmem:[#allocation2 + $0xf8] sm:$0xf]  ;;  %v3770_v63 = vsub.f32 %v6077_v25, %v8085_v60  ;;  %v6078_v0 = vld [vmem:[%s6359_s17 + $0x1e0] sm:$0xf]  ;;  %4008 = vst.msk [vmem:[#allocation2 + $0xe8] sm:$0xf] %vm15_vm0, %v3927_v55  ;;  %v3929_v1 = vadd.f32 %v3848_v56, %v3686_v53 }
 0x375   : > { %v3850_v3 = vand.u32 2147483647, %v3769_v58  ;;  %v3689_v4 = vld [vmem:[#allocation2 + $0xfc] sm:$0xf]  ;;  %v3771_v6 = vsub.f32 %v6078_v0, %v8085_v60  ;;  %v6079_v7 = vld [vmem:[%s6359_s17 + $0x1e4] sm:$0xf]  ;;  %v3930_v35 = vadd.f32 %v3849_v61, %v3687_v57 }
 0x376   : > { %4009 = vst.msk [vmem:[#allocation2 + $0xec] sm:$0xf] %vm15_vm0, %v3928_v59  ;;  %v3851_v8 = vand.u32 2147483647, %v3770_v63  ;;  %v3690_v9 = vld [vmem:[#allocation2 + $0x100] sm:$0xf]  ;;  %v3772_v10 = vsub.f32 %v6079_v7, %v8085_v60 }
 0x377   : > { %v6080_v11 = vld [vmem:[%s6359_s17 + $0x1e8] sm:$0xf]  ;;  %4010 = vst.msk [vmem:[#allocation2 + $0xf0] sm:$0xf] %vm15_vm0, %v3929_v1  ;;  %v3931_v12 = vadd.f32 %v3850_v3, %v3688_v62  ;;  %v3852_v13 = vand.u32 2147483647, %v3771_v6 }
 0x378   : > { %v3691_v43 = vld [vmem:[#allocation2 + $0x104] sm:$0xf]  ;;  %v3773_v14 = vsub.f32 %v6080_v11, %v8085_v60  ;;  %v6081_v15 = vld [vmem:[%s6359_s17 + $0x1ec] sm:$0xf]  ;;  %4011 = vst.msk [vmem:[#allocation2 + $0xf4] sm:$0xf] %vm15_vm0, %v3930_v35  ;;  %v3932_v16 = vadd.f32 %v3851_v8, %v3689_v4 }
 0x379   : > { %v3853_v18 = vand.u32 2147483647, %v3772_v10  ;;  %v3692_v19 = vld [vmem:[#allocation2 + $0x108] sm:$0xf]  ;;  %v3774_v20 = vsub.f32 %v6081_v15, %v8085_v60  ;;  %v6082_v21 = vld [vmem:[%s6359_s17 + $0x1f0] sm:$0xf]  ;;  %v3933_v22 = vadd.f32 %v3852_v13, %v3690_v9 }
 0x37a   : > { %4012 = vst.msk [vmem:[#allocation2 + $0xf8] sm:$0xf] %vm15_vm0, %v3931_v12  ;;  %v3854_v50 = vand.u32 2147483647, %v3773_v14  ;;  %v3693_v23 = vld [vmem:[#allocation2 + $0x10c] sm:$0xf]  ;;  %v3775_v24 = vsub.f32 %v6082_v21, %v8085_v60 }
 0x37b   : > { %v6083_v26 = vld [vmem:[%s6359_s17 + $0x1f4] sm:$0xf]  ;;  %4013 = vst.msk [vmem:[#allocation2 + $0xfc] sm:$0xf] %vm15_vm0, %v3932_v16  ;;  %v3934_v27 = vadd.f32 %v3853_v18, %v3691_v43  ;;  %v3855_v28 = vand.u32 2147483647, %v3774_v20 }
 0x37c   : > { %v3694_v29 = vld [vmem:[#allocation2 + $0x110] sm:$0xf]  ;;  %v3776_v30 = vsub.f32 %v6083_v26, %v8085_v60  ;;  %v6084_v31 = vld [vmem:[%s6359_s17 + $0x1f8] sm:$0xf]  ;;  %4014 = vst.msk [vmem:[#allocation2 + $0x100] sm:$0xf] %vm15_vm0, %v3933_v22  ;;  %v3935_v2 = vadd.f32 %v3854_v50, %v3692_v19 }
 0x37d   : > { %v3856_v32 = vand.u32 2147483647, %v3775_v24  ;;  %v3695_v33 = vld [vmem:[#allocation2 + $0x114] sm:$0xf]  ;;  %v3777_v34 = vsub.f32 %v6084_v31, %v8085_v60  ;;  %v6085_v36 = vld [vmem:[%s6359_s17 + $0x1fc] sm:$0xf]  ;;  %v3936_v37 = vadd.f32 %v3855_v28, %v3693_v23 }
 0x37e   : > { %4015 = vst.msk [vmem:[#allocation2 + $0x104] sm:$0xf] %vm15_vm0, %v3934_v27  ;;  %v3857_v38 = vand.u32 2147483647, %v3776_v30  ;;  %v3696_v39 = vld [vmem:[#allocation2 + $0x118] sm:$0xf]  ;;  %v3778_v40 = vsub.f32 %v6085_v36, %v8085_v60 }
 0x37f   : > { %v6086_v5 = vld [vmem:[%s6359_s17 + $0x21c] sm:$0xf]  ;;  %4016 = vst.msk [vmem:[#allocation2 + $0x108] sm:$0xf] %vm15_vm0, %v3935_v2  ;;  %v3937_v41 = vadd.f32 %v3856_v32, %v3694_v29  ;;  %v3858_v42 = vand.u32 2147483647, %v3777_v34 }
 0x380   : > { %v3697_v44 = vld [vmem:[#allocation2 + $0x11c] sm:$0xf]  ;;  %v3779_v45 = vsub.f32 %v6086_v5, %v8085_v60  ;;  %v6087_v46 = vld [vmem:[%s6359_s17 + $0x220] sm:$0xf]  ;;  %4017 = vst.msk [vmem:[#allocation2 + $0x10c] sm:$0xf] %vm15_vm0, %v3936_v37  ;;  %v3938_v47 = vadd.f32 %v3857_v38, %v3695_v33 }
 0x381   : > { %v3859_v48 = vand.u32 2147483647, %v3778_v40  ;;  %v3698_v49 = vld [vmem:[#allocation2 + $0x120] sm:$0xf]  ;;  %v3780_v51 = vsub.f32 %v6087_v46, %v8085_v60  ;;  %v6088_v52 = vld [vmem:[%s6359_s17 + $0x224] sm:$0xf]  ;;  %v3939_v53 = vadd.f32 %v3858_v42, %v3696_v39 }
 0x382   : > { %4018 = vst.msk [vmem:[#allocation2 + $0x110] sm:$0xf] %vm15_vm0, %v3937_v41  ;;  %v3860_v17 = vand.u32 2147483647, %v3779_v45  ;;  %v3699_v54 = vld [vmem:[#allocation2 + $0x124] sm:$0xf]  ;;  %v3781_v55 = vsub.f32 %v6088_v52, %v8085_v60 }
 0x383   : > { %v6089_v56 = vld [vmem:[%s6359_s17 + $0x228] sm:$0xf]  ;;  %4019 = vst.msk [vmem:[#allocation2 + $0x114] sm:$0xf] %vm15_vm0, %v3938_v47  ;;  %v3940_v57 = vadd.f32 %v3859_v48, %v3697_v44  ;;  %v3861_v58 = vand.u32 2147483647, %v3780_v51 }
 0x384   : > { %v3700_v25 = vld [vmem:[#allocation2 + $0x128] sm:$0xf]  ;;  %v3782_v59 = vsub.f32 %v6089_v56, %v8085_v60  ;;  %v6090_v61 = vld [vmem:[%s6359_s17 + $0x22c] sm:$0xf]  ;;  %4020 = vst.msk [vmem:[#allocation2 + $0x118] sm:$0xf] %vm15_vm0, %v3939_v53  ;;  %v3941_v62 = vadd.f32 %v3860_v17, %v3698_v49 }
 0x385   : > { %v3862_v63 = vand.u32 2147483647, %v3781_v55  ;;  %v3701_v0 = vld [vmem:[#allocation2 + $0x12c] sm:$0xf]  ;;  %v3783_v1 = vsub.f32 %v6090_v61, %v8085_v60  ;;  %v6091_v3 = vld [vmem:[%s6359_s17 + $0x230] sm:$0xf]  ;;  %v3942_v4 = vadd.f32 %v3861_v58, %v3699_v54 }
 0x386   : > { %4021 = vst.msk [vmem:[#allocation2 + $0x11c] sm:$0xf] %vm15_vm0, %v3940_v57  ;;  %v3863_v6 = vand.u32 2147483647, %v3782_v59  ;;  %v3702_v7 = vld [vmem:[#allocation2 + $0x130] sm:$0xf]  ;;  %v3784_v35 = vsub.f32 %v6091_v3, %v8085_v60 }
 0x387   : > { %v6092_v8 = vld [vmem:[%s6359_s17 + $0x234] sm:$0xf]  ;;  %4022 = vst.msk [vmem:[#allocation2 + $0x120] sm:$0xf] %vm15_vm0, %v3941_v62  ;;  %v3943_v9 = vadd.f32 %v3862_v63, %v3700_v25  ;;  %v3864_v10 = vand.u32 2147483647, %v3783_v1 }
 0x388   : > { %v3703_v11 = vld [vmem:[#allocation2 + $0x134] sm:$0xf]  ;;  %v3785_v12 = vsub.f32 %v6092_v8, %v8085_v60  ;;  %v6093_v13 = vld [vmem:[%s6359_s17 + $0x238] sm:$0xf]  ;;  %4023 = vst.msk [vmem:[#allocation2 + $0x124] sm:$0xf] %vm15_vm0, %v3942_v4  ;;  %v3944_v43 = vadd.f32 %v3863_v6, %v3701_v0 }
 0x389   : > { %v3865_v14 = vand.u32 2147483647, %v3784_v35  ;;  %v3704_v15 = vld [vmem:[#allocation2 + $0x138] sm:$0xf]  ;;  %v3786_v16 = vsub.f32 %v6093_v13, %v8085_v60  ;;  %v6094_v18 = vld [vmem:[%s6359_s17 + $0x23c] sm:$0xf]  ;;  %v3945_v19 = vadd.f32 %v3864_v10, %v3702_v7 }
 0x38a   : > { %4024 = vst.msk [vmem:[#allocation2 + $0x128] sm:$0xf] %vm15_vm0, %v3943_v9  ;;  %v3866_v20 = vand.u32 2147483647, %v3785_v12  ;;  %v3705_v21 = vld [vmem:[#allocation2 + $0x13c] sm:$0xf]  ;;  %v3787_v22 = vsub.f32 %v6094_v18, %v8085_v60 }
 0x38b   : > { %4025 = vst.msk [vmem:[#allocation2 + $0x12c] sm:$0xf] %vm15_vm0, %v3944_v43  ;;  %v3946_v50 = vadd.f32 %v3865_v14, %v3703_v11  ;;  %v3867_v23 = vand.u32 2147483647, %v3786_v16  ;;  %v3706_v24 = vld [vmem:[#allocation2 + $0x140] sm:$0xf] }
 0x38c   : > { %4026 = vst.msk [vmem:[#allocation2 + $0x130] sm:$0xf] %vm15_vm0, %v3945_v19  ;;  %v3947_v26 = vadd.f32 %v3866_v20, %v3704_v15  ;;  %v3868_v27 = vand.u32 2147483647, %v3787_v22  ;;  %s102_s12 = sadd.s32 1, %s6162_s12  }
 0x38d   : > { %4027 = vst.msk [vmem:[#allocation2 + $0x134] sm:$0xf] %vm15_vm0, %v3946_v50  ;;  %v3948_v28 = vadd.f32 %v3867_v23, %v3705_v21  ;;  %p99_p0 = scmp.ge.s32.totalorder %s102_s12, 8  }
 0x38e   : > { %4028 = vst.msk [vmem:[#allocation2 + $0x138] sm:$0xf] %vm15_vm0, %v3947_v26  ;;  %v3949_v29 = vadd.f32 %v3868_v27, %v3706_v24  ;;  %v4031_v60 = vld [vmem:[#allocation2] sm:$0xf] (%p99_p0)  ;;  %v4032_v30 = vld [vmem:[#allocation2 + $0x4] sm:$0xf] (%p99_p0) }
 0x38f   : > { %4029 = vst.msk [vmem:[#allocation2 + $0x13c] sm:$0xf] %vm15_vm0, %v3948_v28  ;;  %101 = sbr.rel (!%p99_p0) target bundleno = 43 (0x2b), region = 59  ;;  %v4033_v31 = vld [vmem:[#allocation2 + $0x8] sm:$0xf] (%p99_p0)  ;;  %v4112_v37 = vsel (%p99_p0), %vm15_vm0, %v4031_v60, 0.0 }
 0x390   : > { %4030 = vst.msk [vmem:[#allocation2 + $0x140] sm:$0xf] %vm15_vm0, %v3949_v29  ;;  %v4034_v2 = vld [vmem:[#allocation2 + $0xc] sm:$0xf] (%p99_p0)  ;;  %v4035_v32 = vld [vmem:[#allocation2 + $0x10] sm:$0xf] (%p99_p0) }
 0x391   :  { %v4036_v33 = vld [vmem:[#allocation2 + $0x14] sm:$0xf] (%p99_p0)  ;;  %v4037_v34 = vld [vmem:[#allocation2 + $0x18] sm:$0xf] (%p99_p0)  ;;  %v4038_v36 = vld [vmem:[#allocation2 + $0x1c] sm:$0xf] (%p99_p0) }
 0x392   :  { %v4119_v38 = vsel (%p99_p0), %vm15_vm0, %v4032_v30, 0.0  ;;  %v4126_v39 = vsel (%p99_p0), %vm15_vm0, %v4033_v31, 0.0  ;;  %v4133_v40 = vsel (%p99_p0), %vm15_vm0, %v4034_v2, 0.0  ;;  %v4113_v5 = vrot.slane (%p99_p0), %v4112_v37, 4  ;;  %v4039_v35 = vld [vmem:[#allocation2 + $0x20] sm:$0xf] (%p99_p0) }
 0x393   :  { %v4120_v41 = vrot.slane (%p99_p0), %v4119_v38, 4  ;;  %v4127_v42 = vrot.slane (%p99_p0), %v4126_v39, 4  ;;  %v4134_v44 = vrot.slane (%p99_p0), %v4133_v40, 4  ;;  %v4140_v45 = vsel (%p99_p0), %vm15_vm0, %v4035_v32, 0.0  ;;  %v4040_v8 = vld [vmem:[#allocation2 + $0x24] sm:$0xf] (%p99_p0) }
 0x394   :  { %v4147_v46 = vsel (%p99_p0), %vm15_vm0, %v4036_v33, 0.0  ;;  %v4154_v47 = vsel (%p99_p0), %vm15_vm0, %v4037_v34, 0.0  ;;  %v4161_v48 = vsel (%p99_p0), %vm15_vm0, %v4038_v36, 0.0  ;;  %v4114_v49 = vadd.f32 (%p99_p0), %v4113_v5, %v4112_v37  ;;  %v4041_v9 = vld [vmem:[#allocation2 + $0x28] sm:$0xf] (%p99_p0)  ;;  %s6165_s0 = smov (%p99_p0), [#allocation5]  }
 0x395   :  { %v4121_v51 = vadd.f32 (%p99_p0), %v4120_v41, %v4119_v38  ;;  %v4128_v52 = vadd.f32 (%p99_p0), %v4127_v42, %v4126_v39  ;;  %v4135_v53 = vadd.f32 (%p99_p0), %v4134_v44, %v4133_v40  ;;  %v4141_v17 = vrot.slane (%p99_p0), %v4140_v45, 4  ;;  %v4042_v10 = vld [vmem:[#allocation2 + $0x2c] sm:$0xf] (%p99_p0)  ;;  %v4043_v14 = vld [vmem:[#allocation2 + $0x30] sm:$0xf] (%p99_p0)  ;;  %s5444_s1 = sshll.u32 (%p99_p0), %s6165_s0, 4  ;;  %s5445_s1 = int_to_ptr.vmem [resolvable:$true] %s5444_s1 }
 0x396   :  { %v4148_v54 = vrot.slane %v4147_v46, 4  ;;  %v4155_v55 = vrot.slane %v4154_v47, 4  ;;  %v4162_v56 = vrot.slane %v4161_v48, 4  ;;  %v4115_v57 = vrot.slane %v4114_v49, 2  ;;  %v4044_v15 = vld [vmem:[#allocation2 + $0x34] sm:$0xf]  ;;  %p6113_p2 = scmp.lt.s32.totalorder %s5445_s1, %s5445_s1 }
 0x397   :  { %v4122_v58 = vrot.slane %v4121_v51, 2  ;;  %v4129_v25 = vrot.slane %v4128_v52, 2  ;;  %v4136_v59 = vrot.slane %v4135_v53, 2  ;;  %v4142_v61 = vadd.f32 %v4141_v17, %v4140_v45  ;;  %v4045_v16 = vld [vmem:[#allocation2 + $0x38] sm:$0xf]  ;;  %s6108_s21 = scalar_lea.vmem %s5445_s1, 16 }
 0x398   :  { %v4149_v62 = vadd.f32 %v4148_v54, %v4147_v46  ;;  %v4156_v63 = vadd.f32 %v4155_v55, %v4154_v47  ;;  %v4163_v0 = vadd.f32 %v4162_v56, %v4161_v48  ;;  %v8345_v1 = vadd.f32 %v4115_v57, %v4114_v49  ;;  %v4046_v22 = vld [vmem:[#allocation2 + $0x3c] sm:$0xf]  ;;  %p6109_p1 = scmp.ne.s32.totalorder %s5445_s1, %s6108_s21  ;;  %s6112_s22 = scalar_lea.vmem %s5445_s1, 32 }
 0x399   :  { %v8347_v3 = vadd.f32 %v4122_v58, %v4121_v51  ;;  %v8349_v4 = vadd.f32 %v4129_v25, %v4128_v52  ;;  %v8351_v6 = vadd.f32 %v4136_v59, %v4135_v53  ;;  %v4143_v7 = vrot.slane %v4142_v61, 2  ;;  %p6114_p3 = scmp.lt.s32.totalorder %s6112_s22, %s6108_s21 }
 0x39a   :  { %v4150_v12 = vrot.slane %v4149_v62, 2  ;;  %v4157_v13 = vrot.slane %v4156_v63, 2  ;;  %v4164_v43 = vrot.slane %v4163_v0, 2  ;;  %v4117_v18 = vrot.slane %v8345_v1, 1 }
 0x39b   :  { %v8353_v11 = vadd.f32 %v4143_v7, %v4142_v61  ;;  %v4124_v19 = vrot.slane %v8347_v3, 1  ;;  %v4131_v20 = vrot.slane %v8349_v4, 1  ;;  %v4138_v21 = vrot.slane %v8351_v6, 1  ;;  %p6115_p4 = por %p6114_p3, %p6113_p2 }
 0x39c   :  { %v4168_v50 = vsel %vm15_vm0, %v4039_v35, 0.0  ;;  %v4175_v23 = vsel %vm15_vm0, %v4040_v8, 0.0  ;;  %v4182_v24 = vsel %vm15_vm0, %v4041_v9, 0.0  ;;  %v4189_v26 = vsel %vm15_vm0, %v4042_v10, 0.0  ;;  %v4050_v10 = vld [vmem:[#allocation2 + $0x4c] sm:$0xf] }
 0x39d   :  { %v4145_v27 = vrot.slane %v8353_v11, 1  ;;  %v4151_v28 = vadd.f32 %v4150_v12, %v4149_v62  ;;  %v4158_v29 = vadd.f32 %v4157_v13, %v4156_v63  ;;  %v4165_v60 = vadd.f32 %v4164_v43, %v4163_v0  ;;  %v4047_v62 = vld [vmem:[#allocation2 + $0x40] sm:$0xf]  ;;  %v4048_v63 = vld [vmem:[#allocation2 + $0x44] sm:$0xf]  ;;  %p6116_p5 = pnand %p6115_p4, %p6109_p1 }
 0x39e   :  { %v4169_v30 = vrot.slane %v4168_v50, 4  ;;  %v4176_v31 = vrot.slane %v4175_v23, 4  ;;  %v4183_v2 = vrot.slane %v4182_v24, 4  ;;  %v4190_v32 = vrot.slane %v4189_v26, 4  ;;  %v4049_v0 = vld [vmem:[#allocation2 + $0x48] sm:$0xf] }
 0x39f   :  { %v4196_v33 = vsel %vm15_vm0, %v4043_v14, 0.0  ;;  %v4203_v34 = vsel %vm15_vm0, %v4044_v15, 0.0  ;;  %v4210_v36 = vsel %vm15_vm0, %v4045_v16, 0.0  ;;  %v4217_v37 = vsel %vm15_vm0, %v4046_v22, 0.0  ;;  %v4051_v15 = vld [vmem:[#allocation2 + $0x50] sm:$0xf] }
 0x3a0   :  { %v4170_v38 = vadd.f32 %v4169_v30, %v4168_v50  ;;  %v4177_v39 = vadd.f32 %v4176_v31, %v4175_v23  ;;  %v4184_v40 = vadd.f32 %v4183_v2, %v4182_v24  ;;  %v4191_v5 = vadd.f32 %v4190_v32, %v4189_v26  ;;  %v4052_v16 = vld [vmem:[#allocation2 + $0x54] sm:$0xf]  ;;  %v4054_v50 = vld [vmem:[#allocation2 + $0x5c] sm:$0xf] }
 0x3a1   :  { %v4197_v41 = vrot.slane %v4196_v33, 4  ;;  %v4204_v42 = vrot.slane %v4203_v34, 4  ;;  %v4211_v44 = vrot.slane %v4210_v36, 4  ;;  %v4218_v45 = vrot.slane %v4217_v37, 4 }
 0x3a2   :  { %v4171_v46 = vrot.slane %v4170_v38, 2  ;;  %v4178_v47 = vrot.slane %v4177_v39, 2  ;;  %v4185_v48 = vrot.slane %v4184_v40, 2  ;;  %v4192_v49 = vrot.slane %v4191_v5, 2 }
 0x3a3   :  { %v4198_v51 = vadd.f32 %v4197_v41, %v4196_v33  ;;  %v4205_v52 = vadd.f32 %v4204_v42, %v4203_v34  ;;  %v4212_v53 = vadd.f32 %v4211_v44, %v4210_v36  ;;  %v4219_v17 = vadd.f32 %v4218_v45, %v4217_v37 }
 0x3a4   :  { %v4152_v54 = vrot.slane %v4151_v28, 1  ;;  %v4159_v55 = vrot.slane %v4158_v29, 1  ;;  %v4166_v56 = vrot.slane %v4165_v60, 1  ;;  %v8368_v57 = vadd.f32 %v4171_v46, %v4170_v38 }
 0x3a5   :  { %v8370_v58 = vadd.f32 %v4178_v47, %v4177_v39  ;;  %v8372_v25 = vadd.f32 %v4185_v48, %v4184_v40  ;;  %v8374_v59 = vadd.f32 %v4192_v49, %v4191_v5  ;;  %v4199_v61 = vrot.slane %v4198_v51, 2 }
 0x3a6   :  { %v8377_v7 = vadd.f32 %v4117_v18, %v8345_v1  ;;  %v8380_v35 = vadd.f32 %v4124_v19, %v8347_v3  ;;  %v8383_v8 = vadd.f32 %v4131_v20, %v8349_v4  ;;  %v8386_v9 = vadd.f32 %v4138_v21, %v8351_v6  ;;  %v4053_v19 = vld [vmem:[#allocation2 + $0x58] sm:$0xf] }
 0x3a7   :  { %v8388_v12 = vadd.f32 %v4199_v61, %v4198_v51  ;;  %v4206_v13 = vrot.slane %v4205_v52, 2  ;;  %v4213_v43 = vrot.slane %v4212_v53, 2  ;;  %v4220_v14 = vrot.slane %v4219_v17, 2 }
 0x3a8   :  { %v8391_v1 = vadd.f32 %v4145_v27, %v8353_v11  ;;  %v8393_v18 = vadd.f32 %v4152_v54, %v4151_v28  ;;  %v8395_v3 = vadd.f32 %v4159_v55, %v4158_v29  ;;  %v8397_v4 = vadd.f32 %v4166_v56, %v4165_v60 }
 0x3a9   :  { %v4173_v6 = vrot.slane %v8368_v57, 1  ;;  %v4180_v20 = vrot.slane %v8370_v58, 1  ;;  %v4187_v21 = vrot.slane %v8372_v25, 1  ;;  %v4194_v22 = vrot.slane %v8374_v59, 1 }
 0x3aa   :  { %v4224_v23 = vsel %vm15_vm0, %v4047_v62, 0.0  ;;  %v4231_v11 = vsel %vm15_vm0, %v4048_v63, 0.0  ;;  %v4238_v24 = vsel %vm15_vm0, %v4049_v0, 0.0  ;;  %v4245_v26 = vsel %vm15_vm0, %v4050_v10, 0.0 }
 0x3ab   :  { %v4201_v27 = vrot.slane %v8388_v12, 1  ;;  %v4207_v28 = vadd.f32 %v4206_v13, %v4205_v52  ;;  %v4214_v29 = vadd.f32 %v4213_v43, %v4212_v53  ;;  %v4221_v60 = vadd.f32 %v4220_v14, %v4219_v17  ;;  %v4055_v13 = vld [vmem:[#allocation2 + $0x60] sm:$0xf]  ;;  %v4056_v43 = vld [vmem:[#allocation2 + $0x64] sm:$0xf] }
 0x3ac   :  { %v4225_v30 = vrot.slane %v4224_v23, 4  ;;  %v4232_v31 = vrot.slane %v4231_v11, 4  ;;  %v4239_v2 = vrot.slane %v4238_v24, 4  ;;  %v4246_v32 = vrot.slane %v4245_v26, 4  ;;  %v4057_v14 = vld [vmem:[#allocation2 + $0x68] sm:$0xf] }
 0x3ad   :  { %v4252_v33 = vsel %vm15_vm0, %v4051_v15, 0.0  ;;  %v4259_v34 = vsel %vm15_vm0, %v4052_v16, 0.0  ;;  %v4266_v36 = vsel %vm15_vm0, %v4053_v19, 0.0  ;;  %v4273_v37 = vsel %vm15_vm0, %v4054_v50, 0.0 }
 0x3ae   :  { %v4226_v38 = vadd.f32 %v4225_v30, %v4224_v23  ;;  %v4233_v39 = vadd.f32 %v4232_v31, %v4231_v11  ;;  %v4240_v40 = vadd.f32 %v4239_v2, %v4238_v24  ;;  %v4247_v5 = vadd.f32 %v4246_v32, %v4245_v26  ;;  %v4058_v23 = vld [vmem:[#allocation2 + $0x6c] sm:$0xf]  ;;  %v4059_v31 = vld [vmem:[#allocation2 + $0x70] sm:$0xf]  ;;  %v4060_v2 = vld [vmem:[#allocation2 + $0x74] sm:$0xf] }
 0x3af   :  { %v4253_v41 = vrot.slane %v4252_v33, 4  ;;  %v4260_v42 = vrot.slane %v4259_v34, 4  ;;  %v4267_v44 = vrot.slane %v4266_v36, 4  ;;  %v4274_v45 = vrot.slane %v4273_v37, 4 }
 0x3b0   :  { %v4227_v46 = vrot.slane %v4226_v38, 2  ;;  %v4234_v47 = vrot.slane %v4233_v39, 2  ;;  %v4241_v48 = vrot.slane %v4240_v40, 2  ;;  %v4248_v49 = vrot.slane %v4247_v5, 2 }
 0x3b1   :  { %v4254_v51 = vadd.f32 %v4253_v41, %v4252_v33  ;;  %v4261_v52 = vadd.f32 %v4260_v42, %v4259_v34  ;;  %v4268_v53 = vadd.f32 %v4267_v44, %v4266_v36  ;;  %v4275_v17 = vadd.f32 %v4274_v45, %v4273_v37  ;;  %v4062_v33 = vld [vmem:[#allocation2 + $0x7c] sm:$0xf] }
 0x3b2   :  { %v4208_v54 = vrot.slane %v4207_v28, 1  ;;  %v4215_v55 = vrot.slane %v4214_v29, 1  ;;  %v4222_v56 = vrot.slane %v4221_v60, 1  ;;  %v8412_v61 = vadd.f32 %v4227_v46, %v4226_v38 }
 0x3b3   :  { %v8414_v62 = vadd.f32 %v4234_v47, %v4233_v39  ;;  %v8416_v63 = vadd.f32 %v4241_v48, %v4240_v40  ;;  %v8418_v0 = vadd.f32 %v4248_v49, %v4247_v5  ;;  %v4255_v10 = vrot.slane %v4254_v51, 2 }
 0x3b4   :  { %v8421_v15 = vadd.f32 %v4173_v6, %v8368_v57  ;;  %v8424_v16 = vadd.f32 %v4180_v20, %v8370_v58  ;;  %v8427_v19 = vadd.f32 %v4187_v21, %v8372_v25  ;;  %v8430_v50 = vadd.f32 %v4194_v22, %v8374_v59  ;;  %v4061_v20 = vld [vmem:[#allocation2 + $0x78] sm:$0xf] }
 0x3b5   :  { %v8432_v11 = vadd.f32 %v4255_v10, %v4254_v51  ;;  %v4262_v24 = vrot.slane %v4261_v52, 2  ;;  %v4269_v26 = vrot.slane %v4268_v53, 2  ;;  %v4276_v30 = vrot.slane %v4275_v17, 2 }
 0x3b6   :  { %v8435_v57 = vadd.f32 %v4201_v27, %v8388_v12  ;;  %v8437_v6 = vadd.f32 %v4208_v54, %v4207_v28  ;;  %v8439_v58 = vadd.f32 %v4215_v55, %v4214_v29  ;;  %v8441_v25 = vadd.f32 %v4222_v56, %v4221_v60 }
 0x3b7   :  { %v4229_v59 = vrot.slane %v8412_v61, 1  ;;  %v4236_v21 = vrot.slane %v8414_v62, 1  ;;  %v4243_v22 = vrot.slane %v8416_v63, 1  ;;  %v4250_v32 = vrot.slane %v8418_v0, 1 }
 0x3b8   :  { %v4280_v34 = vsel %vm15_vm0, %v4055_v13, 0.0  ;;  %v4287_v12 = vsel %vm15_vm0, %v4056_v43, 0.0  ;;  %v4294_v27 = vsel %vm15_vm0, %v4057_v14, 0.0  ;;  %v4301_v28 = vsel %vm15_vm0, %v4058_v23, 0.0 }
 0x3b9   :  { %v4257_v29 = vrot.slane %v8432_v11, 1  ;;  %v4263_v60 = vadd.f32 %v4262_v24, %v4261_v52  ;;  %v4270_v36 = vadd.f32 %v4269_v26, %v4268_v53  ;;  %v4277_v37 = vadd.f32 %v4276_v30, %v4275_v17 }
 0x3ba   :  { %v4281_v38 = vrot.slane %v4280_v34, 4  ;;  %v4288_v39 = vrot.slane %v4287_v12, 4  ;;  %v4295_v40 = vrot.slane %v4294_v27, 4  ;;  %v4302_v5 = vrot.slane %v4301_v28, 4 }
 0x3bb   :  { %v4308_v41 = vsel %vm15_vm0, %v4059_v31, 0.0  ;;  %v4315_v42 = vsel %vm15_vm0, %v4060_v2, 0.0  ;;  %v4322_v44 = vsel %vm15_vm0, %v4061_v20, 0.0  ;;  %v4329_v45 = vsel %vm15_vm0, %v4062_v33, 0.0 }
 0x3bc   :  { %v4282_v46 = vadd.f32 %v4281_v38, %v4280_v34  ;;  %v4289_v47 = vadd.f32 %v4288_v39, %v4287_v12  ;;  %v4296_v48 = vadd.f32 %v4295_v40, %v4294_v27  ;;  %v4303_v49 = vadd.f32 %v4302_v5, %v4301_v28  ;;  %v4063_v12 = vld [vmem:[#allocation2 + $0x80] sm:$0xf]  ;;  %v4064_v27 = vld [vmem:[#allocation2 + $0x84] sm:$0xf]  ;;  %v4065_v28 = vld [vmem:[#allocation2 + $0x88] sm:$0xf] }
 0x3bd   :  { %v4309_v51 = vrot.slane %v4308_v41, 4  ;;  %v4316_v52 = vrot.slane %v4315_v42, 4  ;;  %v4323_v53 = vrot.slane %v4322_v44, 4  ;;  %v4330_v17 = vrot.slane %v4329_v45, 4 }
 0x3be   :  { %v4283_v54 = vrot.slane %v4282_v46, 2  ;;  %v4290_v55 = vrot.slane %v4289_v47, 2  ;;  %v4297_v56 = vrot.slane %v4296_v48, 2  ;;  %v4304_v10 = vrot.slane %v4303_v49, 2 }
 0x3bf   :  { %v4310_v13 = vadd.f32 %v4309_v51, %v4308_v41  ;;  %v4317_v43 = vadd.f32 %v4316_v52, %v4315_v42  ;;  %v4324_v14 = vadd.f32 %v4323_v53, %v4322_v44  ;;  %v4331_v23 = vadd.f32 %v4330_v17, %v4329_v45  ;;  %v4066_v41 = vld [vmem:[#allocation2 + $0x8c] sm:$0xf]  ;;  %v4070_v51 = vld [vmem:[#allocation2 + $0x9c] sm:$0xf] }
 0x3c0   :  { %v4264_v24 = vrot.slane %v4263_v60, 1  ;;  %v4271_v26 = vrot.slane %v4270_v36, 1  ;;  %v4278_v30 = vrot.slane %v4277_v37, 1  ;;  %v8456_v31 = vadd.f32 %v4283_v54, %v4282_v46 }
 0x3c1   :  { %v8458_v2 = vadd.f32 %v4290_v55, %v4289_v47  ;;  %v8460_v20 = vadd.f32 %v4297_v56, %v4296_v48  ;;  %v8462_v33 = vadd.f32 %v4304_v10, %v4303_v49  ;;  %v4311_v34 = vrot.slane %v4310_v13, 2  ;;  %v4067_v47 = vld [vmem:[#allocation2 + $0x90] sm:$0xf]  ;;  %v4068_v48 = vld [vmem:[#allocation2 + $0x94] sm:$0xf] }
 0x3c2   :  { %v8465_v38 = vadd.f32 %v4229_v59, %v8412_v61  ;;  %v8468_v39 = vadd.f32 %v4236_v21, %v8414_v62  ;;  %v8471_v40 = vadd.f32 %v4243_v22, %v8416_v63  ;;  %v8474_v5 = vadd.f32 %v4250_v32, %v8418_v0  ;;  %v4069_v21 = vld [vmem:[#allocation2 + $0x98] sm:$0xf] }
 0x3c3   :  { %v8476_v42 = vadd.f32 %v4311_v34, %v4310_v13  ;;  %v4318_v44 = vrot.slane %v4317_v43, 2  ;;  %v4325_v45 = vrot.slane %v4324_v14, 2  ;;  %v4332_v46 = vrot.slane %v4331_v23, 2 }
 0x3c4   :  { %10298 = vst [vmem:[#allocation9_spill] sm:$0xff] %v8468_v39  ;;  %10299 = vst [vmem:[#allocation10_spill] sm:$0xff] %v8471_v40  ;;  %v8479_v61 = vadd.f32 %v4257_v29, %v8432_v11  ;;  %v8481_v59 = vadd.f32 %v4264_v24, %v4263_v60  ;;  %v8483_v62 = vadd.f32 %v4271_v26, %v4270_v36  ;;  %v4285_v0 = vrot.slane %v8456_v31, 1  ;;  %v4111_v40 = vld [vmem:[#allocation2 + $0x140] sm:$0xf] }
 0x3c5   :  { %10300 = vst [vmem:[#allocation11_spill] sm:$0xff] %v8474_v5  ;;  %v8485_v63 = vadd.f32 %v4278_v30, %v4277_v37  ;;  %v4292_v22 = vrot.slane %v8458_v2, 1  ;;  %v4299_v32 = vrot.slane %v8460_v20, 1  ;;  %v4306_v49 = vrot.slane %v8462_v33, 1 }
 0x3c6   :  { %10301 = vst [vmem:[#allocation12_spill] sm:$0xff] %v8479_v61  ;;  %10302 = vst [vmem:[#allocation13_spill] sm:$0xff] %v8481_v59  ;;  %v4336_v52 = vsel %vm15_vm0, %v4063_v12, 0.0  ;;  %v4343_v11 = vsel %vm15_vm0, %v4064_v27, 0.0  ;;  %v4350_v29 = vsel %vm15_vm0, %v4065_v28, 0.0  ;;  %v4357_v60 = vsel %vm15_vm0, %v4066_v41, 0.0 }
 0x3c7   :  { %10303 = vst [vmem:[#allocation14_spill] sm:$0xff] %v8483_v62  ;;  %10304 = vst [vmem:[#allocation15_spill] sm:$0xff] %v8485_v63  ;;  %v4313_v36 = vrot.slane %v8476_v42, 1  ;;  %v4319_v37 = vadd.f32 %v4318_v44, %v4317_v43  ;;  %v4326_v53 = vadd.f32 %v4325_v45, %v4324_v14  ;;  %v4333_v17 = vadd.f32 %v4332_v46, %v4331_v23 }
 0x3c8   :  { %v4337_v54 = vrot.slane %v4336_v52, 4  ;;  %v4344_v55 = vrot.slane %v4343_v11, 4  ;;  %v4351_v56 = vrot.slane %v4350_v29, 4  ;;  %v4358_v10 = vrot.slane %v4357_v60, 4 }
 0x3c9   :  { %v4364_v13 = vsel %vm15_vm0, %v4067_v47, 0.0  ;;  %v4371_v24 = vsel %vm15_vm0, %v4068_v48, 0.0  ;;  %v4378_v26 = vsel %vm15_vm0, %v4069_v21, 0.0  ;;  %v4385_v30 = vsel %vm15_vm0, %v4070_v51, 0.0 }
 0x3ca   :  { %v4338_v34 = vadd.f32 %v4337_v54, %v4336_v52  ;;  %v4345_v12 = vadd.f32 %v4344_v55, %v4343_v11  ;;  %v4352_v27 = vadd.f32 %v4351_v56, %v4350_v29  ;;  %v4359_v28 = vadd.f32 %v4358_v10, %v4357_v60  ;;  %v4071_v54 = vld [vmem:[#allocation2 + $0xa0] sm:$0xf]  ;;  %v4072_v55 = vld [vmem:[#allocation2 + $0xa4] sm:$0xf]  ;;  %v4073_v56 = vld [vmem:[#allocation2 + $0xa8] sm:$0xf] }
 0x3cb   :  { %v4365_v41 = vrot.slane %v4364_v13, 4  ;;  %v4372_v43 = vrot.slane %v4371_v24, 4  ;;  %v4379_v14 = vrot.slane %v4378_v26, 4  ;;  %v4386_v23 = vrot.slane %v4385_v30, 4 }
 0x3cc   :  { %v4339_v44 = vrot.slane %v4338_v34, 2  ;;  %v4346_v45 = vrot.slane %v4345_v12, 2  ;;  %v4353_v46 = vrot.slane %v4352_v27, 2  ;;  %v4360_v63 = vrot.slane %v4359_v28, 2 }
 0x3cd   :  { %v4366_v62 = vadd.f32 %v4365_v41, %v4364_v13  ;;  %v4373_v47 = vadd.f32 %v4372_v43, %v4371_v24  ;;  %v4380_v59 = vadd.f32 %v4379_v14, %v4378_v26  ;;  %v4387_v48 = vadd.f32 %v4386_v23, %v4385_v30  ;;  %v4074_v30 = vld [vmem:[#allocation2 + $0xac] sm:$0xf]  ;;  %v4076_v41 = vld [vmem:[#allocation2 + $0xb4] sm:$0xf]  ;;  %v4078_v43 = vld [vmem:[#allocation2 + $0xbc] sm:$0xf] }
 0x3ce   :  { %v4320_v61 = vrot.slane %v4319_v37, 1  ;;  %v4327_v21 = vrot.slane %v4326_v53, 1  ;;  %v4334_v5 = vrot.slane %v4333_v17, 1  ;;  %v8500_v51 = vadd.f32 %v4339_v44, %v4338_v34 }
 0x3cf   :  { %v8502_v52 = vadd.f32 %v4346_v45, %v4345_v12  ;;  %v8504_v11 = vadd.f32 %v4353_v46, %v4352_v27  ;;  %v8506_v29 = vadd.f32 %v4360_v63, %v4359_v28  ;;  %v4367_v60 = vrot.slane %v4366_v62, 2  ;;  %v4075_v28 = vld [vmem:[#allocation2 + $0xb0] sm:$0xf] }
 0x3d0   :  { %v8509_v10 = vadd.f32 %v4285_v0, %v8456_v31  ;;  %v8512_v13 = vadd.f32 %v4292_v22, %v8458_v2  ;;  %v8515_v24 = vadd.f32 %v4299_v32, %v8460_v20  ;;  %v8518_v26 = vadd.f32 %v4306_v49, %v8462_v33  ;;  %v4077_v22 = vld [vmem:[#allocation2 + $0xb8] sm:$0xf] }
 0x3d1   :  { %v8520_v34 = vadd.f32 %v4367_v60, %v4366_v62  ;;  %v4374_v63 = vrot.slane %v4373_v47, 2  ;;  %v4381_v12 = vrot.slane %v4380_v59, 2  ;;  %v4388_v27 = vrot.slane %v4387_v48, 2 }
 0x3d2   :  { %10305 = vst [vmem:[#allocation16_spill] sm:$0xff] %v8509_v10  ;;  %10306 = vst [vmem:[#allocation17_spill] sm:$0xff] %v8512_v13  ;;  %v8523_v31 = vadd.f32 %v4313_v36, %v8476_v42  ;;  %v8525_v0 = vadd.f32 %v4320_v61, %v4319_v37  ;;  %v8527_v2 = vadd.f32 %v4327_v21, %v4326_v53  ;;  %v4341_v33 = vrot.slane %v8500_v51, 1 }
 0x3d3   :  { %10307 = vst [vmem:[#allocation18_spill] sm:$0xff] %v8515_v24  ;;  %10308 = vst [vmem:[#allocation19_spill] sm:$0xff] %v8518_v26  ;;  %v8529_v20 = vadd.f32 %v4334_v5, %v4333_v17  ;;  %v4348_v62 = vrot.slane %v8502_v52, 1  ;;  %v4355_v32 = vrot.slane %v8504_v11, 1  ;;  %v4362_v49 = vrot.slane %v8506_v29, 1 }
 0x3d4   :  { %10309 = vst [vmem:[#allocation20_spill] sm:$0xff] %v8523_v31  ;;  %10310 = vst [vmem:[#allocation21_spill] sm:$0xff] %v8525_v0  ;;  %v4392_v14 = vsel %vm15_vm0, %v4071_v54, 0.0  ;;  %v4399_v42 = vsel %vm15_vm0, %v4072_v55, 0.0  ;;  %v4406_v61 = vsel %vm15_vm0, %v4073_v56, 0.0  ;;  %v4413_v36 = vsel %vm15_vm0, %v4074_v30, 0.0 }
 0x3d5   :  { %10311 = vst [vmem:[#allocation22_spill] sm:$0xff] %v8527_v2  ;;  %10312 = vst [vmem:[#allocation23_spill] sm:$0xff] %v8529_v20  ;;  %v4369_v5 = vrot.slane %v8520_v34, 1  ;;  %v4375_v37 = vadd.f32 %v4374_v63, %v4373_v47  ;;  %v4382_v53 = vadd.f32 %v4381_v12, %v4380_v59  ;;  %v4389_v17 = vadd.f32 %v4388_v27, %v4387_v48 }
 0x3d6   :  { %v4393_v23 = vrot.slane %v4392_v14, 4  ;;  %v4400_v44 = vrot.slane %v4399_v42, 4  ;;  %v4407_v45 = vrot.slane %v4406_v61, 4  ;;  %v4414_v46 = vrot.slane %v4413_v36, 4 }
 0x3d7   :  { %v4420_v21 = vsel %vm15_vm0, %v4075_v28, 0.0  ;;  %v4427_v60 = vsel %vm15_vm0, %v4076_v41, 0.0  ;;  %v4434_v54 = vsel %vm15_vm0, %v4077_v22, 0.0  ;;  %v4441_v55 = vsel %vm15_vm0, %v4078_v43, 0.0 }
 0x3d8   :  { %v4394_v56 = vadd.f32 %v4393_v23, %v4392_v14  ;;  %v4401_v20 = vadd.f32 %v4400_v44, %v4399_v42  ;;  %v4408_v30 = vadd.f32 %v4407_v45, %v4406_v61  ;;  %v4415_v2 = vadd.f32 %v4414_v46, %v4413_v36  ;;  %v4079_v23 = vld [vmem:[#allocation2 + $0xc0] sm:$0xf]  ;;  %v4080_v44 = vld [vmem:[#allocation2 + $0xc4] sm:$0xf]  ;;  %v4081_v45 = vld [vmem:[#allocation2 + $0xc8] sm:$0xf] }
 0x3d9   :  { %v4421_v0 = vrot.slane %v4420_v21, 4  ;;  %v4428_v47 = vrot.slane %v4427_v60, 4  ;;  %v4435_v59 = vrot.slane %v4434_v54, 4  ;;  %v4442_v48 = vrot.slane %v4441_v55, 4 }
 0x3da   :  { %v4395_v63 = vrot.slane %v4394_v56, 2  ;;  %v4402_v12 = vrot.slane %v4401_v20, 2  ;;  %v4409_v27 = vrot.slane %v4408_v30, 2  ;;  %v4416_v31 = vrot.slane %v4415_v2, 2 }
 0x3db   :  { %v4422_v26 = vadd.f32 %v4421_v0, %v4420_v21  ;;  %v4429_v28 = vadd.f32 %v4428_v47, %v4427_v60  ;;  %v4436_v24 = vadd.f32 %v4435_v59, %v4434_v54  ;;  %v4443_v41 = vadd.f32 %v4442_v48, %v4441_v55  ;;  %v4082_v60 = vld [vmem:[#allocation2 + $0xcc] sm:$0xf]  ;;  %v4086_v47 = vld [vmem:[#allocation2 + $0xdc] sm:$0xf] }
 0x3dc   :  { %v4376_v13 = vrot.slane %v4375_v37, 1  ;;  %v4383_v22 = vrot.slane %v4382_v53, 1  ;;  %v4390_v10 = vrot.slane %v4389_v17, 1  ;;  %v8544_v43 = vadd.f32 %v4395_v63, %v4394_v56  ;;  %v4083_v56 = vld [vmem:[#allocation2 + $0xd0] sm:$0xf] }
 0x3dd   :  { %v8546_v14 = vadd.f32 %v4402_v12, %v4401_v20  ;;  %v8548_v42 = vadd.f32 %v4409_v27, %v4408_v30  ;;  %v8550_v61 = vadd.f32 %v4416_v31, %v4415_v2  ;;  %v4423_v36 = vrot.slane %v4422_v26, 2  ;;  %v4084_v30 = vld [vmem:[#allocation2 + $0xd4] sm:$0xf] }
 0x3de   :  { %v8553_v0 = vadd.f32 %v4341_v33, %v8500_v51  ;;  %v8556_v46 = vadd.f32 %v4348_v62, %v8502_v52  ;;  %v8559_v21 = vadd.f32 %v4355_v32, %v8504_v11  ;;  %v8562_v20 = vadd.f32 %v4362_v49, %v8506_v29  ;;  %v4085_v62 = vld [vmem:[#allocation2 + $0xd8] sm:$0xf] }
 0x3df   :  { %v8564_v54 = vadd.f32 %v4423_v36, %v4422_v26  ;;  %v4430_v31 = vrot.slane %v4429_v28, 2  ;;  %v4437_v2 = vrot.slane %v4436_v24, 2  ;;  %v4444_v55 = vrot.slane %v4443_v41, 2 }
 0x3e0   :  { %10313 = vst [vmem:[#allocation24_spill] sm:$0xff] %v8553_v0  ;;  %10314 = vst [vmem:[#allocation25_spill] sm:$0xff] %v8556_v46  ;;  %v8567_v51 = vadd.f32 %v4369_v5, %v8520_v34  ;;  %v8569_v33 = vadd.f32 %v4376_v13, %v4375_v37  ;;  %v8571_v52 = vadd.f32 %v4383_v22, %v4382_v53  ;;  %v4397_v29 = vrot.slane %v8544_v43, 1 }
 0x3e1   :  { %10315 = vst [vmem:[#allocation26_spill] sm:$0xff] %v8559_v21  ;;  %10316 = vst [vmem:[#allocation27_spill] sm:$0xff] %v8562_v20  ;;  %v8573_v11 = vadd.f32 %v4390_v10, %v4389_v17  ;;  %v4404_v26 = vrot.slane %v8546_v14, 1  ;;  %v4411_v32 = vrot.slane %v8548_v42, 1  ;;  %v4418_v49 = vrot.slane %v8550_v61, 1 }
 0x3e2   :  { %10317 = vst [vmem:[#allocation28_spill] sm:$0xff] %v8567_v51  ;;  %10318 = vst [vmem:[#allocation29_spill] sm:$0xff] %v8569_v33  ;;  %v4448_v59 = vsel %vm15_vm0, %v4079_v23, 0.0  ;;  %v4455_v34 = vsel %vm15_vm0, %v4080_v44, 0.0  ;;  %v4462_v13 = vsel %vm15_vm0, %v4081_v45, 0.0  ;;  %v4469_v5 = vsel %vm15_vm0, %v4082_v60, 0.0 }
 0x3e3   :  { %10319 = vst [vmem:[#allocation30_spill] sm:$0xff] %v8571_v52  ;;  %10320 = vst [vmem:[#allocation31_spill] sm:$0xff] %v8573_v11  ;;  %v4425_v10 = vrot.slane %v8564_v54, 1  ;;  %v4431_v37 = vadd.f32 %v4430_v31, %v4429_v28  ;;  %v4438_v53 = vadd.f32 %v4437_v2, %v4436_v24  ;;  %v4445_v17 = vadd.f32 %v4444_v55, %v4443_v41 }
 0x3e4   :  { %v4449_v48 = vrot.slane %v4448_v59, 4  ;;  %v4456_v63 = vrot.slane %v4455_v34, 4  ;;  %v4463_v12 = vrot.slane %v4462_v13, 4  ;;  %v4470_v27 = vrot.slane %v4469_v5, 4 }
 0x3e5   :  { %v4476_v22 = vsel %vm15_vm0, %v4083_v56, 0.0  ;;  %v4483_v36 = vsel %vm15_vm0, %v4084_v30, 0.0  ;;  %v4490_v23 = vsel %vm15_vm0, %v4085_v62, 0.0  ;;  %v4497_v44 = vsel %vm15_vm0, %v4086_v47, 0.0 }
 0x3e6   :  { %v4450_v45 = vadd.f32 %v4449_v48, %v4448_v59  ;;  %v4457_v11 = vadd.f32 %v4456_v63, %v4455_v34  ;;  %v4464_v60 = vadd.f32 %v4463_v12, %v4462_v13  ;;  %v4471_v52 = vadd.f32 %v4470_v27, %v4469_v5  ;;  %v4087_v48 = vld [vmem:[#allocation2 + $0xe0] sm:$0xf]  ;;  %v4088_v63 = vld [vmem:[#allocation2 + $0xe4] sm:$0xf]  ;;  %v4089_v12 = vld [vmem:[#allocation2 + $0xe8] sm:$0xf] }
 0x3e7   :  { %v4477_v33 = vrot.slane %v4476_v22, 4  ;;  %v4484_v28 = vrot.slane %v4483_v36, 4  ;;  %v4491_v24 = vrot.slane %v4490_v23, 4  ;;  %v4498_v41 = vrot.slane %v4497_v44, 4 }
 0x3e8   :  { %v4451_v31 = vrot.slane %v4450_v45, 2  ;;  %v4458_v2 = vrot.slane %v4457_v11, 2  ;;  %v4465_v55 = vrot.slane %v4464_v60, 2  ;;  %v4472_v51 = vrot.slane %v4471_v52, 2 }
 0x3e9   :  { %v4478_v20 = vadd.f32 %v4477_v33, %v4476_v22  ;;  %v4485_v56 = vadd.f32 %v4484_v28, %v4483_v36  ;;  %v4492_v21 = vadd.f32 %v4491_v24, %v4490_v23  ;;  %v4499_v30 = vadd.f32 %v4498_v41, %v4497_v44  ;;  %v4090_v36 = vld [vmem:[#allocation2 + $0xec] sm:$0xf]  ;;  %v4094_v28 = vld [vmem:[#allocation2 + $0xfc] sm:$0xf] }
 0x3ea   :  { %v4432_v46 = vrot.slane %v4431_v37, 1  ;;  %v4439_v62 = vrot.slane %v4438_v53, 1  ;;  %v4446_v0 = vrot.slane %v4445_v17, 1  ;;  %v8588_v47 = vadd.f32 %v4451_v31, %v4450_v45  ;;  %v4091_v45 = vld [vmem:[#allocation2 + $0xf0] sm:$0xf] }
 0x3eb   :  { %v8590_v59 = vadd.f32 %v4458_v2, %v4457_v11  ;;  %v8592_v34 = vadd.f32 %v4465_v55, %v4464_v60  ;;  %v8594_v13 = vadd.f32 %v4472_v51, %v4471_v52  ;;  %v4479_v5 = vrot.slane %v4478_v20, 2  ;;  %v4092_v60 = vld [vmem:[#allocation2 + $0xf4] sm:$0xf] }
 0x3ec   :  { %v8597_v33 = vadd.f32 %v4397_v29, %v8544_v43  ;;  %v8600_v27 = vadd.f32 %v4404_v26, %v8546_v14  ;;  %v8603_v22 = vadd.f32 %v4411_v32, %v8548_v42  ;;  %v8606_v11 = vadd.f32 %v4418_v49, %v8550_v61  ;;  %v4093_v26 = vld [vmem:[#allocation2 + $0xf8] sm:$0xf] }
 0x3ed   :  { %v8608_v23 = vadd.f32 %v4479_v5, %v4478_v20  ;;  %v4486_v51 = vrot.slane %v4485_v56, 2  ;;  %v4493_v52 = vrot.slane %v4492_v21, 2  ;;  %v4500_v44 = vrot.slane %v4499_v30, 2 }
 0x3ee   :  { %10321 = vst [vmem:[#allocation32_spill] sm:$0xff] %v8597_v33  ;;  %10322 = vst [vmem:[#allocation33_spill] sm:$0xff] %v8600_v27  ;;  %v8611_v43 = vadd.f32 %v4425_v10, %v8564_v54  ;;  %v8613_v29 = vadd.f32 %v4432_v46, %v4431_v37  ;;  %v8615_v14 = vadd.f32 %v4439_v62, %v4438_v53  ;;  %v4453_v61 = vrot.slane %v8588_v47, 1 }
 0x3ef   :  { %10323 = vst [vmem:[#allocation34_spill] sm:$0xff] %v8603_v22  ;;  %10324 = vst [vmem:[#allocation35_spill] sm:$0xff] %v8606_v11  ;;  %v8617_v42 = vadd.f32 %v4446_v0, %v4445_v17  ;;  %v4460_v20 = vrot.slane %v8590_v59, 1  ;;  %v4467_v32 = vrot.slane %v8592_v34, 1  ;;  %v4474_v49 = vrot.slane %v8594_v13, 1 }
 0x3f0   :  { %10325 = vst [vmem:[#allocation36_spill] sm:$0xff] %v8611_v43  ;;  %10326 = vst [vmem:[#allocation37_spill] sm:$0xff] %v8613_v29  ;;  %v4504_v24 = vsel %vm15_vm0, %v4087_v48, 0.0  ;;  %v4511_v54 = vsel %vm15_vm0, %v4088_v63, 0.0  ;;  %v4518_v46 = vsel %vm15_vm0, %v4089_v12, 0.0  ;;  %v4525_v10 = vsel %vm15_vm0, %v4090_v36, 0.0 }
 0x3f1   :  { %10327 = vst [vmem:[#allocation38_spill] sm:$0xff] %v8615_v14  ;;  %10328 = vst [vmem:[#allocation39_spill] sm:$0xff] %v8617_v42  ;;  %v4481_v0 = vrot.slane %v8608_v23, 1  ;;  %v4487_v37 = vadd.f32 %v4486_v51, %v4485_v56  ;;  %v4494_v53 = vadd.f32 %v4493_v52, %v4492_v21  ;;  %v4501_v17 = vadd.f32 %v4500_v44, %v4499_v30 }
 0x3f2   :  { %v4505_v41 = vrot.slane %v4504_v24, 4  ;;  %v4512_v31 = vrot.slane %v4511_v54, 4  ;;  %v4519_v2 = vrot.slane %v4518_v46, 4  ;;  %v4526_v55 = vrot.slane %v4525_v10, 4 }
 0x3f3   :  { %v4532_v62 = vsel %vm15_vm0, %v4091_v45, 0.0  ;;  %v4539_v5 = vsel %vm15_vm0, %v4092_v60, 0.0  ;;  %v4546_v48 = vsel %vm15_vm0, %v4093_v26, 0.0  ;;  %v4553_v63 = vsel %vm15_vm0, %v4094_v28, 0.0 }
 0x3f4   :  { %v4506_v12 = vadd.f32 %v4505_v41, %v4504_v24  ;;  %v4513_v42 = vadd.f32 %v4512_v31, %v4511_v54  ;;  %v4520_v36 = vadd.f32 %v4519_v2, %v4518_v46  ;;  %v4527_v14 = vadd.f32 %v4526_v55, %v4525_v10  ;;  %v4095_v41 = vld [vmem:[#allocation2 + $0x100] sm:$0xf]  ;;  %v4096_v31 = vld [vmem:[#allocation2 + $0x104] sm:$0xf]  ;;  %v4097_v2 = vld [vmem:[#allocation2 + $0x108] sm:$0xf] }
 0x3f5   :  { %v4533_v29 = vrot.slane %v4532_v62, 4  ;;  %v4540_v56 = vrot.slane %v4539_v5, 4  ;;  %v4547_v21 = vrot.slane %v4546_v48, 4  ;;  %v4554_v30 = vrot.slane %v4553_v63, 4 }
 0x3f6   :  { %v4507_v51 = vrot.slane %v4506_v12, 2  ;;  %v4514_v52 = vrot.slane %v4513_v42, 2  ;;  %v4521_v44 = vrot.slane %v4520_v36, 2  ;;  %v4528_v43 = vrot.slane %v4527_v14, 2 }
 0x3f7   :  { %v4534_v11 = vadd.f32 %v4533_v29, %v4532_v62  ;;  %v4541_v45 = vadd.f32 %v4540_v56, %v4539_v5  ;;  %v4548_v22 = vadd.f32 %v4547_v21, %v4546_v48  ;;  %v4555_v60 = vadd.f32 %v4554_v30, %v4553_v63  ;;  %v4098_v5 = vld [vmem:[#allocation2 + $0x10c] sm:$0xf]  ;;  %v4102_v56 = vld [vmem:[#allocation2 + $0x11c] sm:$0xf] }
 0x3f8   :  { %v4488_v27 = vrot.slane %v4487_v37, 1  ;;  %v4495_v26 = vrot.slane %v4494_v53, 1  ;;  %v4502_v33 = vrot.slane %v4501_v17, 1  ;;  %v8632_v28 = vadd.f32 %v4507_v51, %v4506_v12  ;;  %v4099_v12 = vld [vmem:[#allocation2 + $0x110] sm:$0xf] }
 0x3f9   :  { %v8634_v24 = vadd.f32 %v4514_v52, %v4513_v42  ;;  %v8636_v54 = vadd.f32 %v4521_v44, %v4520_v36  ;;  %v8638_v46 = vadd.f32 %v4528_v43, %v4527_v14  ;;  %v4535_v10 = vrot.slane %v4534_v11, 2  ;;  %v4100_v36 = vld [vmem:[#allocation2 + $0x114] sm:$0xf] }
 0x3fa   :  { %v8641_v29 = vadd.f32 %v4453_v61, %v8588_v47  ;;  %v8644_v55 = vadd.f32 %v4460_v20, %v8590_v59  ;;  %v8647_v62 = vadd.f32 %v4467_v32, %v8592_v34  ;;  %v8650_v42 = vadd.f32 %v4474_v49, %v8594_v13  ;;  %v4101_v20 = vld [vmem:[#allocation2 + $0x118] sm:$0xf] }
 0x3fb   :  { %v8652_v48 = vadd.f32 %v4535_v10, %v4534_v11  ;;  %v4542_v43 = vrot.slane %v4541_v45, 2  ;;  %v4549_v14 = vrot.slane %v4548_v22, 2  ;;  %v4556_v63 = vrot.slane %v4555_v60, 2 }
 0x3fc   :  { %10329 = vst [vmem:[#allocation40_spill] sm:$0xff] %v8641_v29  ;;  %10330 = vst [vmem:[#allocation41_spill] sm:$0xff] %v8644_v55  ;;  %v8655_v47 = vadd.f32 %v4481_v0, %v8608_v23  ;;  %v8657_v61 = vadd.f32 %v4488_v27, %v4487_v37  ;;  %v8659_v59 = vadd.f32 %v4495_v26, %v4494_v53  ;;  %v4509_v13 = vrot.slane %v8632_v28, 1 }
 0x3fd   :  { %10331 = vst [vmem:[#allocation42_spill] sm:$0xff] %v8647_v62  ;;  %10332 = vst [vmem:[#allocation43_spill] sm:$0xff] %v8650_v42  ;;  %v8661_v34 = vadd.f32 %v4502_v33, %v4501_v17  ;;  %v4516_v11 = vrot.slane %v8634_v24, 1  ;;  %v4523_v32 = vrot.slane %v8636_v54, 1  ;;  %v4530_v49 = vrot.slane %v8638_v46, 1 }
 0x3fe   :  { %10333 = vst [vmem:[#allocation44_spill] sm:$0xff] %v8655_v47  ;;  %10334 = vst [vmem:[#allocation45_spill] sm:$0xff] %v8657_v61  ;;  %v4560_v21 = vsel %vm15_vm0, %v4095_v41, 0.0  ;;  %v4567_v23 = vsel %vm15_vm0, %v4096_v31, 0.0  ;;  %v4574_v27 = vsel %vm15_vm0, %v4097_v2, 0.0  ;;  %v4581_v0 = vsel %vm15_vm0, %v4098_v5, 0.0 }
 0x3ff   :  { %10335 = vst [vmem:[#allocation46_spill] sm:$0xff] %v8659_v59  ;;  %10336 = vst [vmem:[#allocation47_spill] sm:$0xff] %v8661_v34  ;;  %v4537_v33 = vrot.slane %v8652_v48, 1  ;;  %v4543_v37 = vadd.f32 %v4542_v43, %v4541_v45  ;;  %v4550_v53 = vadd.f32 %v4549_v14, %v4548_v22  ;;  %v4557_v17 = vadd.f32 %v4556_v63, %v4555_v60 }
 0x400   :  { %v4561_v30 = vrot.slane %v4560_v21, 4  ;;  %v4568_v51 = vrot.slane %v4567_v23, 4  ;;  %v4575_v52 = vrot.slane %v4574_v27, 4  ;;  %v4582_v44 = vrot.slane %v4581_v0, 4 }
 0x401   :  { %v4588_v26 = vsel %vm15_vm0, %v4099_v12, 0.0  ;;  %v4595_v10 = vsel %vm15_vm0, %v4100_v36, 0.0  ;;  %v4602_v41 = vsel %vm15_vm0, %v4101_v20, 0.0  ;;  %v4609_v31 = vsel %vm15_vm0, %v4102_v56, 0.0 }
 0x402   :  { %v4562_v2 = vadd.f32 %v4561_v30, %v4560_v21  ;;  %v4569_v34 = vadd.f32 %v4568_v51, %v4567_v23  ;;  %v4576_v5 = vadd.f32 %v4575_v52, %v4574_v27  ;;  %v4583_v59 = vadd.f32 %v4582_v44, %v4581_v0  ;;  %v4103_v30 = vld [vmem:[#allocation2 + $0x120] sm:$0xf]  ;;  %v4104_v51 = vld [vmem:[#allocation2 + $0x124] sm:$0xf]  ;;  %v4105_v52 = vld [vmem:[#allocation2 + $0x128] sm:$0xf] }
 0x403   :  { %v4589_v61 = vrot.slane %v4588_v26, 4  ;;  %v4596_v45 = vrot.slane %v4595_v10, 4  ;;  %v4603_v22 = vrot.slane %v4602_v41, 4  ;;  %v4610_v60 = vrot.slane %v4609_v31, 4 }
 0x404   :  { %v4563_v43 = vrot.slane %v4562_v2, 2  ;;  %v4570_v14 = vrot.slane %v4569_v34, 2  ;;  %v4577_v63 = vrot.slane %v4576_v5, 2  ;;  %v4584_v47 = vrot.slane %v4583_v59, 2 }
 0x405   :  { %v4590_v42 = vadd.f32 %v4589_v61, %v4588_v26  ;;  %v4597_v12 = vadd.f32 %v4596_v45, %v4595_v10  ;;  %v4604_v62 = vadd.f32 %v4603_v22, %v4602_v41  ;;  %v4611_v36 = vadd.f32 %v4610_v60, %v4609_v31  ;;  %v4106_v10 = vld [vmem:[#allocation2 + $0x12c] sm:$0xf]  ;;  %v4110_v45 = vld [vmem:[#allocation2 + $0x13c] sm:$0xf] }
 0x406   :  { %v4544_v55 = vrot.slane %v4543_v37, 1  ;;  %v4551_v20 = vrot.slane %v4550_v53, 1  ;;  %v4558_v29 = vrot.slane %v4557_v17, 1  ;;  %v8676_v56 = vadd.f32 %v4563_v43, %v4562_v2  ;;  %v4107_v2 = vld [vmem:[#allocation2 + $0x130] sm:$0xf] }
 0x407   :  { %v8678_v21 = vadd.f32 %v4570_v14, %v4569_v34  ;;  %v8680_v23 = vadd.f32 %v4577_v63, %v4576_v5  ;;  %v8682_v27 = vadd.f32 %v4584_v47, %v4583_v59  ;;  %v4591_v0 = vrot.slane %v4590_v42, 2  ;;  %v4108_v5 = vld [vmem:[#allocation2 + $0x134] sm:$0xf] }
 0x408   :  { %v8685_v61 = vadd.f32 %v4509_v13, %v8632_v28  ;;  %v8688_v44 = vadd.f32 %v4516_v11, %v8634_v24  ;;  %v8691_v26 = vadd.f32 %v4523_v32, %v8636_v54  ;;  %v8694_v34 = vadd.f32 %v4530_v49, %v8638_v46  ;;  %v4109_v11 = vld [vmem:[#allocation2 + $0x138] sm:$0xf] }
 0x409   :  { %v8696_v41 = vadd.f32 %v4591_v0, %v4590_v42  ;;  %v4598_v47 = vrot.slane %v4597_v12, 2  ;;  %v4605_v59 = vrot.slane %v4604_v62, 2  ;;  %v4612_v31 = vrot.slane %v4611_v36, 2 }
 0x40a   :  { %10337 = vst [vmem:[#allocation48_spill] sm:$0xff] %v8685_v61  ;;  %10338 = vst [vmem:[#allocation49_spill] sm:$0xff] %v8688_v44  ;;  %v8699_v28 = vadd.f32 %v4537_v33, %v8652_v48  ;;  %v8701_v13 = vadd.f32 %v4544_v55, %v4543_v37  ;;  %v8703_v24 = vadd.f32 %v4551_v20, %v4550_v53  ;;  %v4565_v46 = vrot.slane %v8676_v56, 1 }
 0x40b   :  { %10339 = vst [vmem:[#allocation50_spill] sm:$0xff] %v8691_v26  ;;  %10340 = vst [vmem:[#allocation51_spill] sm:$0xff] %v8694_v34  ;;  %v8705_v54 = vadd.f32 %v4558_v29, %v4557_v17  ;;  %v4572_v42 = vrot.slane %v8678_v21, 1  ;;  %v4579_v32 = vrot.slane %v8680_v23, 1  ;;  %v4586_v49 = vrot.slane %v8682_v27, 1 }
 0x40c   :  { %10341 = vst [vmem:[#allocation52_spill] sm:$0xff] %v8699_v28  ;;  %10342 = vst [vmem:[#allocation53_spill] sm:$0xff] %v8701_v13  ;;  %v4616_v22 = vsel %vm15_vm0, %v4103_v30, 0.0  ;;  %v4623_v48 = vsel %vm15_vm0, %v4104_v51, 0.0  ;;  %v4630_v55 = vsel %vm15_vm0, %v4105_v52, 0.0  ;;  %v4637_v33 = vsel %vm15_vm0, %v4106_v10, 0.0 }
 0x40d   :  { %10343 = vst [vmem:[#allocation54_spill] sm:$0xff] %v8703_v24  ;;  %10344 = vst [vmem:[#allocation55_spill] sm:$0xff] %v8705_v54  ;;  %v4593_v29 = vrot.slane %v8696_v41, 1  ;;  %v4599_v37 = vadd.f32 %v4598_v47, %v4597_v12  ;;  %v4606_v53 = vadd.f32 %v4605_v59, %v4604_v62  ;;  %v4613_v17 = vadd.f32 %v4612_v31, %v4611_v36 }
 0x40e   :  { %v4617_v60 = vrot.slane %v4616_v22, 4  ;;  %v4624_v43 = vrot.slane %v4623_v48, 4  ;;  %v4631_v14 = vrot.slane %v4630_v55, 4  ;;  %v4638_v63 = vrot.slane %v4637_v33, 4 }
 0x40f   :  { %v4644_v20 = vsel %vm15_vm0, %v4107_v2, 0.0  ;;  %v4651_v0 = vsel %vm15_vm0, %v4108_v5, 0.0  ;;  %v4658_v30 = vsel %vm15_vm0, %v4109_v11, 0.0  ;;  %v4665_v51 = vsel %vm15_vm0, %v4110_v45, 0.0 }
 0x410   :  { %v4618_v52 = vadd.f32 %v4617_v60, %v4616_v22  ;;  %v4625_v54 = vadd.f32 %v4624_v43, %v4623_v48  ;;  %v4632_v10 = vadd.f32 %v4631_v14, %v4630_v55  ;;  %v4639_v24 = vadd.f32 %v4638_v63, %v4637_v33 }
 0x411   :  { %v4645_v13 = vrot.slane %v4644_v20, 4  ;;  %v4652_v12 = vrot.slane %v4651_v0, 4  ;;  %v4659_v62 = vrot.slane %v4658_v30, 4  ;;  %v4666_v36 = vrot.slane %v4665_v51, 4 }
 0x412   :  { %v4619_v47 = vrot.slane %v4618_v52, 2  ;;  %v4626_v59 = vrot.slane %v4625_v54, 2  ;;  %v4633_v31 = vrot.slane %v4632_v10, 2  ;;  %v4640_v28 = vrot.slane %v4639_v24, 2 }
 0x413   :  { %v4646_v34 = vadd.f32 %v4645_v13, %v4644_v20  ;;  %v4653_v2 = vadd.f32 %v4652_v12, %v4651_v0  ;;  %v4660_v26 = vadd.f32 %v4659_v62, %v4658_v30  ;;  %v4667_v5 = vadd.f32 %v4666_v36, %v4665_v51 }
 0x414   :  { %v4620_v44 = vadd.f32 %v4619_v47, %v4618_v52  ;;  %v4627_v11 = vadd.f32 %v4626_v59, %v4625_v54  ;;  %v4634_v61 = vadd.f32 %v4633_v31, %v4632_v10  ;;  %v4641_v45 = vadd.f32 %v4640_v28, %v4639_v24 }
 0x415   :  { %v4647_v22 = vrot.slane %v4646_v34, 2  ;;  %v4654_v48 = vrot.slane %v4653_v2, 2  ;;  %v4661_v55 = vrot.slane %v4660_v26, 2  ;;  %v4668_v33 = vrot.slane %v4667_v5, 2 }
 0x416   :  { %v8721_v60 = vadd.f32 %v4565_v46, %v8676_v56  ;;  %v4600_v43 = vrot.slane %v4599_v37, 1  ;;  %v4607_v14 = vrot.slane %v4606_v53, 1  ;;  %v4614_v63 = vrot.slane %v4613_v17, 1 }
 0x417   :  { %v4648_v39 = vadd.f32 %v4647_v22, %v4646_v34  ;;  %v4655_v13 = vadd.f32 %v4654_v48, %v4653_v2  ;;  %v4662_v20 = vadd.f32 %v4661_v55, %v4660_v26  ;;  %v4669_v0 = vadd.f32 %v4668_v33, %v4667_v5  ;;  %v10360_v55 = vld [vmem:[#allocation12_spill] sm:$0xff] }
 0x418   :  { %v8724_v30 = vadd.f32 %v4572_v42, %v8678_v21  ;;  %v4621_v54 = vrot.slane %v4620_v44, 1  ;;  %v4628_v28 = vrot.slane %v4627_v11, 1  ;;  %v4635_v24 = vrot.slane %v4634_v61, 1 }
 0x419   :  { %v8727_v51 = vadd.f32 %v4579_v32, %v8680_v23  ;;  %v8730_v56 = vadd.f32 %v4586_v49, %v8682_v27  ;;  %v8733_v46 = vadd.f32 %v4593_v29, %v8696_v41  ;;  %v4642_v52 = vrot.slane %v4641_v45, 1 }
 0x41a   :  { %v4649_v34 = vrot.slane %v4648_v39, 1  ;;  %v4656_v10 = vrot.slane %v4655_v13, 1  ;;  %v4663_v26 = vrot.slane %v4662_v20, 1  ;;  %v4672_v12 = vsel %vm15_vm0, %v4111_v40, 0.0 }
 0x41b   :  { %v8736_v21 = vadd.f32 %v4600_v43, %v4599_v37  ;;  %v8738_v42 = vadd.f32 %v4607_v14, %v4606_v53  ;;  %v8740_v62 = vadd.f32 %v4614_v63, %v4613_v17  ;;  %v4670_v23 = vrot.slane %v4669_v0, 1 }
 0x41c   :  { %v8742_v32 = vadd.f32 %v4621_v54, %v4620_v44  ;;  %v8744_v27 = vadd.f32 %v4628_v28, %v4627_v11  ;;  %v8746_v49 = vadd.f32 %v4635_v24, %v4634_v61  ;;  %v4673_v41 = vrot.slane %v4672_v12, 4  ;;  %v10369_v28 = vld [vmem:[#allocation18_spill] sm:$0xff] }
 0x41d   :  { %v8748_v29 = vadd.f32 %v4642_v52, %v4641_v45  ;;  %v8751_v36 = vmul.f32 0.00390625, %v8377_v7  ;;  %v8754_v40 = vmul.f32 0.00390625, %v8380_v35  ;;  %v8757_v37 = vmul.f32 0.00390625, %v8383_v8  ;;  %v10371_v52 = vld [vmem:[#allocation19_spill] sm:$0xff] }
 0x41e   :  { %v8759_v53 = vadd.f32 %v4649_v34, %v4648_v39  ;;  %v8761_v44 = vadd.f32 %v4656_v10, %v4655_v13  ;;  %v8763_v17 = vadd.f32 %v4663_v26, %v4662_v20  ;;  %v4674_v61 = vadd.f32 %v4673_v41, %v4672_v12  ;;  %v10365_v13 = vld [vmem:[#allocation16_spill] sm:$0xff]  ;;  %v10375_v12 = vld [vmem:[#allocation21_spill] sm:$0xff]  ;;  %v10376_v41 = vld [vmem:[#allocation22_spill] sm:$0xff] }
 0x41f   :  { %10345 = vst [vmem:[#allocation56_spill] sm:$0xff] %v8751_v36  ;;  %10346 = vst [vmem:[#allocation57_spill] sm:$0xff] %v8754_v40  ;;  %v8765_v47 = vadd.f32 %v4670_v23, %v4669_v0  ;;  %v8768_v59 = vmul.f32 0.00390625, %v8386_v9  ;;  %v8771_v7 = vmul.f32 0.00390625, %v8391_v1  ;;  %v8774_v35 = vmul.f32 0.00390625, %v8393_v18  ;;  %v10367_v0 = vld [vmem:[#allocation17_spill] sm:$0xff] }
 0x420   :  { %v4675_v8 = vrot.slane %v4674_v61, 2  ;;  %v8777_v39 = vmul.f32 0.00390625, %v8395_v3  ;;  %v8780_v31 = vmul.f32 0.00390625, %v8397_v4  ;;  %v8783_v2 = vmul.f32 0.00390625, %v8421_v15  ;;  %v10373_v10 = vld [vmem:[#allocation20_spill] sm:$0xff] }
 0x421   :  { %v8786_v5 = vmul.f32 0.00390625, %v8424_v16  ;;  %v8789_v9 = vmul.f32 0.00390625, %v8427_v19  ;;  %v8792_v1 = vmul.f32 0.00390625, %v8430_v50  ;;  %v8795_v18 = vmul.f32 0.00390625, %v8435_v57  ;;  %v10355_v19 = vld [vmem:[#allocation9_spill] sm:$0xff]  ;;  %v10357_v50 = vld [vmem:[#allocation10_spill] sm:$0xff] }
 0x422   :  { %10347 = vst [vmem:[#allocation58_spill] sm:$0xff] %v8777_v39  ;;  %10348 = vst [vmem:[#allocation59_spill] sm:$0xff] %v8780_v31  ;;  %v4676_v3 = vadd.f32 %v4675_v8, %v4674_v61  ;;  %v8798_v11 = vmul.f32 0.00390625, %v8437_v6  ;;  %v8801_v4 = vmul.f32 0.00390625, %v8439_v58  ;;  %v8804_v15 = vmul.f32 0.00390625, %v8441_v25  ;;  %v10359_v57 = vld [vmem:[#allocation11_spill] sm:$0xff] }
 0x423   :  { %10349 = vst [vmem:[#allocation60_spill] sm:$0xff] %v8783_v2  ;;  %10350 = vst [vmem:[#allocation61_spill] sm:$0xff] %v8786_v5  ;;  %v8807_v16 = vmul.f32 0.00390625, %v8465_v38  ;;  %v8810_v45 = vmul.f32 0.00390625, %v10355_v19  ;;  %v8813_v22 = vmul.f32 0.00390625, %v10357_v50  ;;  %v8816_v48 = vmul.f32 0.00390625, %v10359_v57 }
 0x424   :  { %10351 = vst [vmem:[#allocation62_spill] sm:$0xff] %v8789_v9  ;;  %10352 = vst [vmem:[#allocation63_spill] sm:$0xff] %v8801_v4  ;;  %v4677_v6 = vrot.slane %v4676_v3, 1  ;;  %v8819_v33 = vmul.f32 0.00390625, %v10360_v55  ;;  %v10361_v58 = vld [vmem:[#allocation13_spill] sm:$0xff]  ;;  %v10362_v25 = vld [vmem:[#allocation14_spill] sm:$0xff] }
 0x425   :  { %10353 = vst [vmem:[#allocation64_spill] sm:$0xff] %v8804_v15  ;;  %10354 = vst [vmem:[#allocation65_spill] sm:$0xff] %v8807_v16  ;;  %v8822_v43 = vmul.f32 0.00390625, %v10361_v58  ;;  %v8825_v14 = vmul.f32 0.00390625, %v10362_v25  ;;  %v10363_v38 = vld [vmem:[#allocation15_spill] sm:$0xff]  ;;  %v8831_v20 = vmul.f32 0.00390625, %v10365_v13 }
 0x426   :  { %10356 = vst [vmem:[#allocation9_spill] sm:$0xff] %v8810_v45  ;;  %10358 = vst [vmem:[#allocation10_spill] sm:$0xff] %v8813_v22  ;;  %v8828_v63 = vmul.f32 0.00390625, %v10363_v38  ;;  %v8834_v54 = vmul.f32 0.00390625, %v10367_v0  ;;  %v8837_v24 = vmul.f32 0.00390625, %v10369_v28  ;;  %v8840_v34 = vmul.f32 0.00390625, %v10371_v52 }
 0x427   :  { %10366 = vst [vmem:[#allocation12_spill] sm:$0xff] %v8831_v20  ;;  %v8843_v26 = vmul.f32 0.00390625, %v10373_v10  ;;  %v8846_v23 = vmul.f32 0.00390625, %v10375_v12  ;;  %v8849_v61 = vmul.f32 0.00390625, %v10376_v41  ;;  %v10377_v8 = vld [vmem:[#allocation23_spill] sm:$0xff]  ;;  %v10378_v50 = vld [vmem:[#allocation24_spill] sm:$0xff]  ;;  %v4678_v13 = vadd.f32 %v4677_v6, %v4676_v3 }
 0x428   :  { %10364 = vst [vmem:[#allocation11_spill] sm:$0xff] %v8828_v63  ;;  %10368 = vst [vmem:[#allocation13_spill] sm:$0xff] %v8834_v54  ;;  %v8852_v19 = vmul.f32 0.00390625, %v10377_v8  ;;  %v8855_v57 = vmul.f32 0.00390625, %v10378_v50  ;;  %v10380_v55 = vld [vmem:[#allocation25_spill] sm:$0xff]  ;;  %v10382_v25 = vld [vmem:[#allocation26_spill] sm:$0xff] }
 0x429   :  { %10370 = vst [vmem:[#allocation14_spill] sm:$0xff] %v8837_v24  ;;  %10372 = vst [vmem:[#allocation15_spill] sm:$0xff] %v8840_v34  ;;  %v8858_v58 = vmul.f32 0.00390625, %v10380_v55  ;;  %v8861_v38 = vmul.f32 0.00390625, %v10382_v25  ;;  %v10384_v0 = vld [vmem:[#allocation27_spill] sm:$0xff]  ;;  %v10386_v52 = vld [vmem:[#allocation28_spill] sm:$0xff] }
 0x42a   :  { %10374 = vst [vmem:[#allocation16_spill] sm:$0xff] %v8843_v26  ;;  %10379 = vst [vmem:[#allocation17_spill] sm:$0xff] %v8855_v57  ;;  %v8864_v28 = vmul.f32 0.00390625, %v10384_v0  ;;  %v8867_v10 = vmul.f32 0.00390625, %v10386_v52  ;;  %v10388_v12 = vld [vmem:[#allocation29_spill] sm:$0xff]  ;;  %v10390_v8 = vld [vmem:[#allocation30_spill] sm:$0xff] }
 0x42b   :  { %10381 = vst [vmem:[#allocation18_spill] sm:$0xff] %v8858_v58  ;;  %10383 = vst [vmem:[#allocation19_spill] sm:$0xff] %v8861_v38  ;;  %v8870_v41 = vmul.f32 0.00390625, %v10388_v12  ;;  %v8873_v24 = vmul.f32 0.00390625, %v10390_v8  ;;  %v10392_v50 = vld [vmem:[#allocation31_spill] sm:$0xff]  ;;  %v10394_v55 = vld [vmem:[#allocation32_spill] sm:$0xff] }
 0x42c   :  { %10385 = vst [vmem:[#allocation20_spill] sm:$0xff] %v8864_v28  ;;  %10387 = vst [vmem:[#allocation21_spill] sm:$0xff] %v8867_v10  ;;  %v8876_v45 = vmul.f32 0.00390625, %v10392_v50  ;;  %v8879_v2 = vmul.f32 0.00390625, %v10394_v55  ;;  %v10396_v25 = vld [vmem:[#allocation33_spill] sm:$0xff]  ;;  %v10398_v6 = vld [vmem:[#allocation34_spill] sm:$0xff] }
 0x42d   :  { %10389 = vst [vmem:[#allocation22_spill] sm:$0xff] %v8870_v41  ;;  %10391 = vst [vmem:[#allocation23_spill] sm:$0xff] %v8873_v24  ;;  %v8882_v3 = vmul.f32 0.00390625, %v10396_v25  ;;  %v8885_v0 = vmul.f32 0.00390625, %v10398_v6  ;;  %v10400_v52 = vld [vmem:[#allocation35_spill] sm:$0xff]  ;;  %v10402_v12 = vld [vmem:[#allocation36_spill] sm:$0xff] }
 0x42e   :  { %10393 = vst [vmem:[#allocation24_spill] sm:$0xff] %v8876_v45  ;;  %10395 = vst [vmem:[#allocation25_spill] sm:$0xff] %v8879_v2  ;;  %v8888_v28 = vmul.f32 0.00390625, %v10400_v52  ;;  %v8891_v38 = vmul.f32 0.00390625, %v10402_v12  ;;  %v10404_v8 = vld [vmem:[#allocation37_spill] sm:$0xff]  ;;  %v10406_v50 = vld [vmem:[#allocation38_spill] sm:$0xff] }
 0x42f   :  { %10397 = vst [vmem:[#allocation26_spill] sm:$0xff] %v8882_v3  ;;  %10399 = vst [vmem:[#allocation27_spill] sm:$0xff] %v8885_v0  ;;  %v8894_v54 = vmul.f32 0.00390625, %v10404_v8  ;;  %v8897_v16 = vmul.f32 0.00390625, %v10406_v50  ;;  %v10408_v55 = vld [vmem:[#allocation39_spill] sm:$0xff]  ;;  %v10410_v25 = vld [vmem:[#allocation40_spill] sm:$0xff] }
 0x430   :  { %10401 = vst [vmem:[#allocation28_spill] sm:$0xff] %v8888_v28  ;;  %10403 = vst [vmem:[#allocation29_spill] sm:$0xff] %v8891_v38  ;;  %v8900_v31 = vmul.f32 0.00390625, %v10408_v55  ;;  %v8903_v58 = vmul.f32 0.00390625, %v10410_v25  ;;  %v10412_v6 = vld [vmem:[#allocation41_spill] sm:$0xff]  ;;  %v10414_v52 = vld [vmem:[#allocation42_spill] sm:$0xff] }
 0x431   :  { %10405 = vst [vmem:[#allocation30_spill] sm:$0xff] %v8894_v54  ;;  %10407 = vst [vmem:[#allocation31_spill] sm:$0xff] %v8897_v16  ;;  %v8906_v0 = vmul.f32 0.00390625, %v10412_v6  ;;  %v8909_v28 = vmul.f32 0.00390625, %v10414_v52  ;;  %v10416_v12 = vld [vmem:[#allocation43_spill] sm:$0xff]  ;;  %v10418_v8 = vld [vmem:[#allocation44_spill] sm:$0xff] }
 0x432   :  { %10409 = vst [vmem:[#allocation32_spill] sm:$0xff] %v8900_v31  ;;  %10411 = vst [vmem:[#allocation33_spill] sm:$0xff] %v8903_v58  ;;  %v8912_v38 = vmul.f32 0.00390625, %v10416_v12  ;;  %v8915_v20 = vmul.f32 0.00390625, %v10418_v8  ;;  %v10420_v50 = vld [vmem:[#allocation45_spill] sm:$0xff]  ;;  %v10422_v55 = vld [vmem:[#allocation46_spill] sm:$0xff] }
 0x433   :  { %10413 = vst [vmem:[#allocation34_spill] sm:$0xff] %v8906_v0  ;;  %10415 = vst [vmem:[#allocation35_spill] sm:$0xff] %v8909_v28  ;;  %v8918_v15 = vmul.f32 0.00390625, %v10420_v50  ;;  %v8921_v39 = vmul.f32 0.00390625, %v10422_v55  ;;  %v10424_v25 = vld [vmem:[#allocation47_spill] sm:$0xff]  ;;  %v10426_v6 = vld [vmem:[#allocation48_spill] sm:$0xff] }
 0x434   :  { %10417 = vst [vmem:[#allocation36_spill] sm:$0xff] %v8912_v38  ;;  %10419 = vst [vmem:[#allocation37_spill] sm:$0xff] %v8915_v20  ;;  %v8924_v3 = vmul.f32 0.00390625, %v10424_v25  ;;  %v8927_v57 = vmul.f32 0.00390625, %v10426_v6  ;;  %v10428_v52 = vld [vmem:[#allocation49_spill] sm:$0xff]  ;;  %v10430_v12 = vld [vmem:[#allocation50_spill] sm:$0xff] }
 0x435   :  { %10421 = vst [vmem:[#allocation38_spill] sm:$0xff] %v8918_v15  ;;  %10423 = vst [vmem:[#allocation39_spill] sm:$0xff] %v8921_v39  ;;  %v8930_v28 = vmul.f32 0.00390625, %v10428_v52  ;;  %v8933_v38 = vmul.f32 0.00390625, %v10430_v12  ;;  %v10432_v8 = vld [vmem:[#allocation51_spill] sm:$0xff]  ;;  %v10434_v50 = vld [vmem:[#allocation52_spill] sm:$0xff] }
 0x436   :  { %10425 = vst [vmem:[#allocation40_spill] sm:$0xff] %v8924_v3  ;;  %10427 = vst [vmem:[#allocation41_spill] sm:$0xff] %v8927_v57  ;;  %v8936_v20 = vmul.f32 0.00390625, %v10432_v8  ;;  %v8939_v15 = vmul.f32 0.00390625, %v10434_v50  ;;  %v10436_v55 = vld [vmem:[#allocation53_spill] sm:$0xff]  ;;  %v10437_v25 = vld [vmem:[#allocation54_spill] sm:$0xff] }
 0x437   :  { %10429 = vst [vmem:[#allocation42_spill] sm:$0xff] %v8930_v28  ;;  %10431 = vst [vmem:[#allocation43_spill] sm:$0xff] %v8933_v38  ;;  %v8942_v0 = vmul.f32 0.00390625, %v10436_v55  ;;  %v8945_v63 = vmul.f32 0.00390625, %v10437_v25  ;;  %v10439_v6 = vld [vmem:[#allocation55_spill] sm:$0xff]  ;;  %v8951_v52 = vmul.f32 0.00390625, %v8721_v60 }
 0x438   :  { %10433 = vst [vmem:[#allocation44_spill] sm:$0xff] %v8936_v20  ;;  %10435 = vst [vmem:[#allocation45_spill] sm:$0xff] %v8939_v15  ;;  %v8948_v4 = vmul.f32 0.00390625, %v10439_v6  ;;  %v8954_v12 = vmul.f32 0.00390625, %v8724_v30  ;;  %v8957_v8 = vmul.f32 0.00390625, %v8727_v51  ;;  %v8960_v50 = vmul.f32 0.00390625, %v8730_v56 }
 0x439   :  { %10438 = vst [vmem:[#allocation46_spill] sm:$0xff] %v8945_v63  ;;  %10441 = vst [vmem:[#allocation48_spill] sm:$0xff] %v8951_v52  ;;  %v8963_v55 = vmul.f32 0.00390625, %v8733_v46  ;;  %v8966_v25 = vmul.f32 0.00390625, %v8736_v21  ;;  %v8969_v6 = vmul.f32 0.00390625, %v8738_v42  ;;  %v8972_v60 = vmul.f32 0.00390625, %v8740_v62 }
 0x43a   :  { %10440 = vst [vmem:[#allocation47_spill] sm:$0xff] %v8948_v4  ;;  %10442 = vst [vmem:[#allocation49_spill] sm:$0xff] %v8954_v12  ;;  %v8975_v30 = vmul.f32 0.00390625, %v8742_v32  ;;  %vm4760_vm1 = vcmask 15360   ;;  %v8978_v51 = vmul.f32 0.00390625, %v8744_v27  ;;  %v8987_v42 = vmul.f32 0.00390625, %v8746_v49 }
 0x43b   :  { %10443 = vst [vmem:[#allocation50_spill] sm:$0xff] %v8957_v8  ;;  %10444 = vst [vmem:[#allocation51_spill] sm:$0xff] %v8960_v50  ;;  %v4761_v56 = vsel %vm4760_vm1, %v8751_v36, inf  ;;  %v4762_v46 = vsel %vm4760_vm1, %v8786_v5, inf  ;;  %v4764_v21 = vsel %vm4760_vm1, %v8813_v22, inf  ;;  %v8990_v62 = vmul.f32 0.00390625, %v8748_v29 }
 0x43c   :  { %10445 = vst [vmem:[#allocation52_spill] sm:$0xff] %v8963_v55  ;;  %10446 = vst [vmem:[#allocation53_spill] sm:$0xff] %v8969_v6  ;;  %v8993_v32 = vmul.f32 0.00390625, %v8759_v53  ;;  %v4763_v27 = vmin.f32 %v4761_v56, %v4762_v46  ;;  %v4766_v36 = vsel %vm4760_vm1, %v8840_v34, inf  ;;  %v4778_v5 = vsel %vm4760_vm1, %v8754_v40, inf }
 0x43d   :  { %10447 = vst [vmem:[#allocation54_spill] sm:$0xff] %v8972_v60  ;;  %10448 = vst [vmem:[#allocation55_spill] sm:$0xff] %v8975_v30  ;;  %v8996_v60 = vmul.f32 0.00390625, %v8761_v44  ;;  %v4779_v49 = vsel %vm4760_vm1, %v8789_v9, inf  ;;  %v9005_v22 = vmul.f32 0.00390625, %v8763_v17  ;;  %v4781_v53 = vsel %vm4760_vm1, %v8816_v48, inf }
 0x43e   :  { %10449 = vst [vmem:[#allocation66_spill] sm:$0xff] %v8978_v51  ;;  %10450 = vst [vmem:[#allocation67_spill] sm:$0xff] %v8987_v42  ;;  %v4765_v29 = vmin.f32 %v4763_v27, %v4764_v21  ;;  %v4780_v63 = vmin.f32 %v4778_v5, %v4779_v49  ;;  %v9010_v44 = vmul.f32 0.00390625, %v8765_v47  ;;  %v9012_v56 = vmul.f32 0.00390625, %v4678_v13 }
 0x43f   :  { %10451 = vst [vmem:[#allocation68_spill] sm:$0xff] %v8990_v62  ;;  %10452 = vst [vmem:[#allocation69_spill] sm:$0xff] %v8993_v32  ;;  %v4768_v46 = vsel %vm4760_vm1, %v8867_v10, inf  ;;  %v4783_v34 = vsel %vm4760_vm1, %v8843_v26, inf  ;;  %v4795_v17 = vsel %vm4760_vm1, %v8757_v37, inf  ;;  %v4770_v21 = vsel %vm4760_vm1, %v8894_v54, inf }
 0x440   :  { %10453 = vst [vmem:[#allocation70_spill] sm:$0xff] %v8996_v60  ;;  %10454 = vst [vmem:[#allocation71_spill] sm:$0xff] %v9005_v22  ;;  %v4767_v9 = vmin.f32 %v4765_v29, %v4766_v36  ;;  %v4782_v40 = vmin.f32 %v4780_v63, %v4781_v53  ;;  %v4785_v47 = vsel %vm4760_vm1, %v8870_v41, inf  ;;  %v4796_v13 = vsel %vm4760_vm1, %v8792_v1, inf }
 0x441   :  { %10455 = vst [vmem:[#allocation72_spill] sm:$0xff] %v9010_v44  ;;  %10456 = vst [vmem:[#allocation73_spill] sm:$0xff] %v9012_v56  ;;  %v4798_v27 = vsel %vm4760_vm1, %v8819_v33, inf  ;;  %v4772_v36 = vsel %vm4760_vm1, %v8921_v39, inf  ;;  %v4797_v29 = vmin.f32 %v4795_v17, %v4796_v13  ;;  %v4774_v53 = vsel %vm4760_vm1, %v8948_v4, inf }
 0x442   :  { %v4769_v49 = vmin.f32 %v4767_v9, %v4768_v46  ;;  %v4784_v63 = vmin.f32 %v4782_v40, %v4783_v34  ;;  %v4787_v5 = vsel %vm4760_vm1, %v8897_v16, inf  ;;  %v4800_v54 = vsel %vm4760_vm1, %v8846_v23, inf }
 0x443   :  { %v4812_v41 = vsel %vm4760_vm1, %v8768_v59, inf  ;;  %v4799_v9 = vmin.f32 %v4797_v29, %v4798_v27  ;;  %v4813_v46 = vsel %vm4760_vm1, %v8795_v18, inf  ;;  %v4776_v40 = vsel %vm4760_vm1, %v8975_v30, inf }
 0x444   :  { %v4771_v10 = vmin.f32 %v4769_v49, %v4770_v21  ;;  %v4786_v26 = vmin.f32 %v4784_v63, %v4785_v47  ;;  %v4802_v34 = vsel %vm4760_vm1, %v8873_v24, inf  ;;  %v4814_v17 = vmin.f32 %v4812_v41, %v4813_v46  ;;  %v10473_v24 = vld [vmem:[#allocation28_spill] sm:$0xff] }
 0x445   :  { %v4815_v13 = vsel %vm4760_vm1, %v8822_v43, inf  ;;  %v4789_v39 = vsel %vm4760_vm1, %v8924_v3, inf  ;;  %v4801_v21 = vmin.f32 %v4799_v9, %v4800_v54  ;;  %v4817_v47 = vsel %vm4760_vm1, %v8849_v61, inf }
 0x446   :  { %v4788_v4 = vmin.f32 %v4786_v26, %v4787_v5  ;;  %v4791_v27 = vsel %vm4760_vm1, %v8951_v52, inf  ;;  %v4804_v49 = vsel %vm4760_vm1, %v8900_v31, inf  ;;  %v4806_v41 = vsel %vm4760_vm1, %v8927_v57, inf  ;;  %v10463_v31 = vld [vmem:[#allocation64_spill] sm:$0xff] }
 0x447   :  { %v4816_v63 = vmin.f32 %v4814_v17, %v4815_v13  ;;  %v4773_v29 = vmin.f32 %v4771_v10, %v4772_v36  ;;  %v4803_v46 = vmin.f32 %v4801_v21, %v4802_v34  ;;  %v4819_v26 = vsel %vm4760_vm1, %v8876_v45, inf }
 0x448   :  { %v4829_v54 = vsel %vm4760_vm1, %v8771_v7, inf  ;;  %v4790_v5 = vmin.f32 %v4788_v4, %v4789_v39  ;;  %v4830_v30 = vsel %vm4760_vm1, %v8798_v11, inf  ;;  %v4832_v52 = vsel %vm4760_vm1, %v8825_v14, inf }
 0x449   :  { %v4818_v9 = vmin.f32 %v4816_v63, %v4817_v47  ;;  %v4793_v57 = vsel %vm4760_vm1, %v8978_v51, inf  ;;  %v4805_v17 = vmin.f32 %v4803_v46, %v4804_v49  ;;  %v4808_v10 = vsel %vm4760_vm1, %v8954_v12, inf }
 0x44a   :  { %v4831_v36 = vmin.f32 %v4829_v54, %v4830_v30  ;;  %v4810_v34 = vsel %vm4760_vm1, %v8987_v42, inf  ;;  %v4821_v39 = vsel %vm4760_vm1, %v8903_v58, inf  ;;  %v4834_v4 = vsel %vm4760_vm1, %v8852_v19, inf }
 0x44b   :  { %v4820_v13 = vmin.f32 %v4818_v9, %v4819_v26  ;;  %v4775_v21 = vmin.f32 %v4773_v29, %v4774_v53  ;;  %v4807_v47 = vmin.f32 %v4805_v17, %v4806_v41  ;;  %v4823_v63 = vsel %vm4760_vm1, %v8930_v28, inf  ;;  %v10457_v26 = vld [vmem:[#allocation63_spill] sm:$0xff] }
 0x44c   :  { %v4833_v49 = vmin.f32 %v4831_v36, %v4832_v52  ;;  %v4792_v46 = vmin.f32 %v4790_v5, %v4791_v27  ;;  %v4836_v30 = vsel %vm4760_vm1, %v8879_v2, inf  ;;  %v4846_v54 = vsel %vm4760_vm1, %v8774_v35, inf  ;;  %v10458_v41 = vld [vmem:[#allocation11_spill] sm:$0xff]  ;;  %v10459_v27 = vld [vmem:[#allocation34_spill] sm:$0xff]  ;;  %v10460_v36 = vld [vmem:[#allocation17_spill] sm:$0xff] }
 0x44d   :  { %v4847_v9 = vsel %vm4760_vm1, %v10457_v26, inf  ;;  %v4825_v42 = vsel %vm4760_vm1, %v8957_v8, inf  ;;  %v4849_v29 = vsel %vm4760_vm1, %v10458_v41, inf  ;;  %v4822_v17 = vmin.f32 %v4820_v13, %v4821_v39  ;;  %v10461_v13 = vld [vmem:[#allocation26_spill] sm:$0xff] }
 0x44e   :  { %v4835_v51 = vmin.f32 %v4833_v49, %v4834_v4  ;;  %v4848_v53 = vmin.f32 %v4846_v54, %v4847_v9  ;;  %v4827_v52 = vsel %vm4760_vm1, %v8990_v62, inf  ;;  %v4838_v5 = vsel %vm4760_vm1, %v10459_v27, inf  ;;  %v10462_v54 = vld [vmem:[#allocation58_spill] sm:$0xff] }
 0x44f   :  { %v4851_v12 = vsel %vm4760_vm1, %v10460_v36, inf  ;;  %v9092_v28 = vmin.f32 %v4775_v21, %v4776_v40  ;;  %v4809_v3 = vmin.f32 %v4807_v47, %v4808_v10  ;;  %v9094_v4 = vmin.f32 %v4792_v46, %v4793_v57  ;;  %v10464_v21 = vld [vmem:[#allocation12_spill] sm:$0xff]  ;;  %v10465_v47 = vld [vmem:[#allocation35_spill] sm:$0xff] }
 0x450   :  { %v4837_v58 = vmin.f32 %v4835_v51, %v4836_v30  ;;  %v4850_v8 = vmin.f32 %v4848_v53, %v4849_v29  ;;  %v4840_v49 = vsel %vm4760_vm1, %v8933_v38, inf  ;;  %v4853_v39 = vsel %vm4760_vm1, %v10461_v13, inf  ;;  %v10468_v13 = vld [vmem:[#allocation27_spill] sm:$0xff] }
 0x451   :  { %v4863_v9 = vsel %vm4760_vm1, %v10462_v54, inf  ;;  %v4864_v40 = vsel %vm4760_vm1, %v10463_v31, inf  ;;  %v4866_v51 = vsel %vm4760_vm1, %v10464_v21, inf  ;;  %v4824_v10 = vmin.f32 %v4822_v17, %v4823_v63  ;;  %v10467_v17 = vld [vmem:[#allocation59_spill] sm:$0xff] }
 0x452   :  { %v4839_v62 = vmin.f32 %v4837_v58, %v4838_v5  ;;  %v4852_v27 = vmin.f32 %v4850_v8, %v4851_v12  ;;  %v4842_v57 = vsel %vm4760_vm1, %v8960_v50, inf  ;;  %v4855_v46 = vsel %vm4760_vm1, %v10465_v47, inf  ;;  %v10466_v12 = vld [vmem:[#allocation18_spill] sm:$0xff] }
 0x453   :  { %v4865_v30 = vmin.f32 %v4863_v9, %v4864_v40  ;;  %v4811_v53 = vmin.f32 %v4809_v3, %v4810_v34  ;;  %v4844_v29 = vsel %vm4760_vm1, %v8993_v32, inf  ;;  %v4868_v8 = vsel %vm4760_vm1, %v10466_v12, inf  ;;  %v10469_v3 = vld [vmem:[#allocation65_spill] sm:$0xff] }
 0x454   :  { %v4854_v58 = vmin.f32 %v4852_v27, %v4853_v39  ;;  %v4841_v5 = vmin.f32 %v4839_v62, %v4840_v49  ;;  %v4857_v38 = vsel %vm4760_vm1, %v8936_v20, inf  ;;  %v4880_v50 = vsel %vm4760_vm1, %v10467_v17, inf  ;;  %v10470_v40 = vld [vmem:[#allocation13_spill] sm:$0xff] }
 0x455   :  { %v4867_v63 = vmin.f32 %v4865_v30, %v4866_v51  ;;  %v4870_v9 = vsel %vm4760_vm1, %v10468_v13, inf  ;;  %v4881_v34 = vsel %vm4760_vm1, %v10469_v3, inf  ;;  %v4883_v27 = vsel %vm4760_vm1, %v10470_v40, inf  ;;  %v10471_v30 = vld [vmem:[#allocation36_spill] sm:$0xff] }
 0x456   :  { %v4856_v16 = vmin.f32 %v4854_v58, %v4855_v46  ;;  %v4826_v39 = vmin.f32 %v4824_v10, %v4825_v42  ;;  %v4859_v62 = vsel %vm4760_vm1, %v8963_v55, inf  ;;  %v4882_v32 = vmin.f32 %v4880_v50, %v4881_v34  ;;  %v10472_v58 = vld [vmem:[#allocation19_spill] sm:$0xff]  ;;  %v10474_v55 = vld [vmem:[#allocation60_spill] sm:$0xff] }
 0x457   :  { %v4869_v49 = vmin.f32 %v4867_v63, %v4868_v8  ;;  %v4872_v20 = vsel %vm4760_vm1, %v10471_v30, inf  ;;  %v4874_v46 = vsel %vm4760_vm1, %v8939_v15, inf  ;;  %v4885_v47 = vsel %vm4760_vm1, %v10472_v58, inf  ;;  %v10476_v8 = vld [vmem:[#allocation14_spill] sm:$0xff] }
 0x458   :  { %v4858_v51 = vmin.f32 %v4856_v16, %v4857_v38  ;;  %v4843_v13 = vmin.f32 %v4841_v5, %v4842_v57  ;;  %v4884_v45 = vmin.f32 %v4882_v32, %v4883_v27  ;;  %v4887_v42 = vsel %vm4760_vm1, %v10473_v24, inf  ;;  %v10475_v16 = vld [vmem:[#allocation9_spill] sm:$0xff] }
 0x459   :  { %v4871_v2 = vmin.f32 %v4869_v49, %v4870_v9  ;;  %v4897_v50 = vsel %vm4760_vm1, %v10474_v55, inf  ;;  %v4898_v38 = vsel %vm4760_vm1, %v10475_v16, inf  ;;  %v4900_v63 = vsel %vm4760_vm1, %v10476_v8, inf  ;;  %v10477_v27 = vld [vmem:[#allocation37_spill] sm:$0xff]  ;;  %v10478_v49 = vld [vmem:[#allocation20_spill] sm:$0xff] }
 0x45a   :  { %v4860_v10 = vmin.f32 %v4858_v51, %v4859_v62  ;;  %v4861_v34 = vsel %vm4760_vm1, %v8996_v60, inf  ;;  %v4886_v57 = vmin.f32 %v4884_v45, %v4885_v47  ;;  %v4899_v5 = vmin.f32 %v4897_v50, %v4898_v38 }
 0x45b   :  { %v4873_v15 = vmin.f32 %v4871_v2, %v4872_v20  ;;  %v4828_v32 = vmin.f32 %v4826_v39, %v4827_v52  ;;  %v4876_v9 = vsel %vm4760_vm1, %v8966_v25, inf  ;;  %v4889_v62 = vsel %vm4760_vm1, %v10477_v27, inf  ;;  %v10479_v20 = vld [vmem:[#allocation29_spill] sm:$0xff] }
 0x45c   :  { %v4902_v51 = vsel %vm4760_vm1, %v10478_v49, inf  ;;  %v4845_v30 = vmin.f32 %v4843_v13, %v4844_v29  ;;  %v4888_v58 = vmin.f32 %v4886_v57, %v4887_v42  ;;  %v4901_v12 = vmin.f32 %v4899_v5, %v4900_v63  ;;  %v10480_v13 = vld [vmem:[#allocation38_spill] sm:$0xff] }
 0x45d   :  { %v4875_v24 = vmin.f32 %v4873_v15, %v4874_v46  ;;  %v4862_v36 = vmin.f32 %v4860_v10, %v4861_v34  ;;  %v4878_v2 = vsel %vm4760_vm1, %v9005_v22, inf  ;;  %v4891_v45 = vsel %vm4760_vm1, %v8942_v0, inf  ;;  %v10482_v57 = vld [vmem:[#allocation46_spill] sm:$0xff] }
 0x45e   :  { %v4904_v52 = vsel %vm4760_vm1, %v10479_v20, inf  ;;  %v4890_v39 = vmin.f32 %v4888_v58, %v4889_v62  ;;  %v4893_v50 = vsel %vm4760_vm1, %v8969_v6, inf  ;;  %v4903_v38 = vmin.f32 %v4901_v12, %v4902_v51 }
 0x45f   :  { %v4877_v47 = vmin.f32 %v4875_v24, %v4876_v9  ;;  %v4895_v15 = vsel %vm4760_vm1, %v9010_v44, inf  ;;  %v4906_v29 = vsel %vm4760_vm1, %v10480_v13, inf  ;;  %v4914_v46 = vsel %vm4760_vm1, %v9092_v28, inf }
 0x460   :  { %v10481_v42 = vlaneseq  ;;  %v4892_v34 = vmin.f32 %v4890_v39, %v4891_v45  ;;  %v4905_v24 = vmin.f32 %v4903_v38, %v4904_v52  ;;  %v4918_v58 = vsel %vm4760_vm1, %v4845_v30, inf  ;;  %v10483_v45 = vld [vmem:[#allocation54_spill] sm:$0xff] }
 0x461   :  { %v4879_v63 = vmin.f32 %v4877_v47, %v4878_v2  ;;  %v4908_v12 = vsel %vm4760_vm1, %v10482_v57, inf  ;;  %v4915_v5 = vsel %vm4760_vm1, %v9094_v4, inf  ;;  %v4920_v9 = vsel %vm4760_vm1, %v4862_v36, inf }
 0x462   :  { %v9163_v10 = vshrl.u32 %v10481_v42, 7  ;;  %v4894_v28 = vmin.f32 %v4892_v34, %v4893_v50  ;;  %v4907_v51 = vmin.f32 %v4905_v24, %v4906_v29  ;;  %v4916_v42 = vsel %vm4760_vm1, %v4811_v53, inf }
 0x463   :  { %v4922_v2 = vsel %vm4760_vm1, %v4879_v63, inf  ;;  %v4910_v30 = vsel %vm4760_vm1, %v10483_v45, inf  ;;  %v4912_v52 = vsel %vm4760_vm1, %v9012_v56, inf  ;;  %v4917_v47 = vsel %vm4760_vm1, %v4828_v32, inf }
 0x464   :  { %v9172_v62 = vadd.s32 8, %v9163_v10  ;;  %v4919_v4 = vmin.f32 %v4914_v46, %v4918_v58  ;;  %v4896_v39 = vmin.f32 %v4894_v28, %v4895_v15  ;;  %v4909_v36 = vmin.f32 %v4907_v51, %v4908_v12 }
 0x465   :  { %v4921_v38 = vmin.f32 %v4915_v5, %v4920_v9  ;;  %v9182_v44 = vadd.s32 9, %v9163_v10  ;;  %v4923_v50 = vmin.f32 %v4916_v42, %v4922_v2  ;;  %v9188_v29 = vadd.s32 18, %v9163_v10 }
 0x466   :  { %v9185_v53 = vadd.s32 9, %v9172_v62  ;;  %v9191_v63 = vadd.s32 27, %v9163_v10  ;;  %v4911_v34 = vmin.f32 %v4909_v36, %v4910_v30  ;;  %v4924_v32 = vsel %vm4760_vm1, %v4896_v39, inf }
 0x467   :  { %v9195_v15 = vadd.s32 18, %v9172_v62  ;;  %v9198_v46 = vadd.s32 27, %v9172_v62  ;;  %v4925_v24 = vmin.f32 %v4917_v47, %v4924_v32  ;;  %v9201_v58 = vadd.s32 36, %v9163_v10 }
 0x468   :  { %v9204_v12 = vadd.s32 36, %v9172_v62  ;;  %v9207_v5 = vadd.s32 45, %v9163_v10  ;;  %v4913_v9 = vmin.f32 %v4911_v34, %v4912_v52  ;;  %v9210_v28 = vadd.s32 45, %v9172_v62 }
 0x469   :  { %10484 = vst [vmem:[#allocation63_spill] sm:$0xff] %v9195_v15  ;;  %10485 = vst [vmem:[#allocation11_spill] sm:$0xff] %v9198_v46  ;;  %v9213_v51 = vadd.s32 54, %v9163_v10  ;;  %v9216_v42 = vadd.s32 54, %v9172_v62  ;;  %vm10290_vm2 = vcmask 8192   ;;  %v9219_v2 = vadd.s32 63, %v9163_v10 }
 0x46a   :  { %10486 = vst [vmem:[#allocation58_spill] sm:$0xff] %v9204_v12  ;;  %10487 = vst [vmem:[#allocation64_spill] sm:$0xff] %v9210_v28  ;;  %v9222_v30 = vadd.s32 63, %v9172_v62  ;;  %v9225_v47 = vadd.s32 72, %v9163_v10  ;;  %v9228_v52 = vadd.s32 72, %v9172_v62  ;;  %v4926_v39 = vsel %vm4760_vm1, %v4913_v9, inf }
 0x46b   :  { %10488 = vst [vmem:[#allocation12_spill] sm:$0xff] %v9216_v42  ;;  %v4927_v42 = vmin.f32 %v4919_v4, %v4926_v39  ;;  %v4929_v28 = vmin.f32 %v4923_v50, %v4925_v24  ;;  %v10491_v46 = vld [vmem:[#allocation56_spill] sm:$0xff] }
 0x46c   :  { %10489 = vst [vmem:[#allocation59_spill] sm:$0xff] %v9222_v30  ;;  %10490 = vst [vmem:[#allocation65_spill] sm:$0xff] %v9228_v52 }
 0x46d   :  { %v4928_v36 = vmin.f32 %v4927_v42, %v4921_v38 }
 0x46f   :  { %v9247_v52 = vmin.f32 %v4928_v36, %v4929_v28  ;;  %v10492_v28 = vld [vmem:[#allocation57_spill] sm:$0xff] }
 0x471   :  { %vm4950_vm3 = vcmp.eq.f32.partialorder %v10491_v46, %v9247_v52  ;;  %vm4951_vm4 = vcmp.eq.f32.partialorder %v10492_v28, %v9247_v52  ;;  %vm4952_vm5 = vcmp.eq.f32.partialorder %v8757_v37, %v9247_v52  ;;  %vm4953_vm6 = vcmp.eq.f32.partialorder %v8768_v59, %v9247_v52  ;;  %5427 = vst.msk [vmem:[#allocation5] sm:$0x1] %vm10290_vm2, %v9247_v52 }
 0x472   :  { %vm4954_vm7 = vcmp.eq.f32.partialorder %v8771_v7, %v9247_v52  ;;  %vm4955_vm8 = vcmp.eq.f32.partialorder %v8774_v35, %v9247_v52  ;;  %vm4956_vm9 = vcmp.eq.f32.partialorder %v10462_v54, %v9247_v52  ;;  %vm4957_vm10 = vcmp.eq.f32.partialorder %v10467_v17, %v9247_v52 }
 0x473   :  { %6119 = shalt.err (!%p6116_p5)
}
 0x474   :  { %s6120_s25 = scalar_lea.hbm %s10193_s3, 16 }
 0x475   :  { %p6121_p6 = scmp.ne.s32.totalorder %s10193_s3, %s6120_s25  ;;  %p6124_p7 = scmp.lt.u32.totalorder %s6120_s25, %s10193_s3 }
 0x477   :  { %p6126_p8 = pnand %p6124_p7, %p6121_p6 }
 0x479   :  { %6129 = shalt.err (!%p6126_p8)
}
 0x47a   :  { %5447 = dma.vmem_to_hbm [thread:$0]  %s5445_s1, 16, %s10193_s3, [#allocation6]   ;;  %vm4958_vm11 = vcmp.eq.f32.partialorder %v10474_v55, %v9247_v52  ;;  %v10493_v36 = vld [vmem:[#allocation61_spill] sm:$0xff]  ;;  %v10494_v39 = vld [vmem:[#allocation62_spill] sm:$0xff]  ;;  %v10496_v50 = vld [vmem:[#allocation15_spill] sm:$0xff]  ;;  %vm5027_vm15 = vcmp.eq.f32.partialorder %v8996_v60, %v9247_v52  ;;  %vm5028_vm0 = vcmp.eq.f32.partialorder %v9005_v22, %v9247_v52  ;;  %v9464_v22 = vsel %vm4950_vm3, %v9163_v10, 1073741824 }
 0x47b   :  { %v10495_v24 = vld [vmem:[#allocation10_spill] sm:$0xff]  ;;  %v10497_v4 = vld [vmem:[#allocation16_spill] sm:$0xff]  ;;  %v10498_v42 = vld [vmem:[#allocation17_spill] sm:$0xff]  ;;  %v10529_v6 = vrot.slane %v9163_v10, 1  ;;  %v10530_v9 = vrot.slane %v9163_v10, 2  ;;  %v10532_v45 = vrot.slane %v9163_v10, 4  ;;  %vm10539_vm3 = vcmp.eq.f32.partialorder %v10493_v36, %v9247_v52 }
 0x47c   :  { %v10499_v38 = vld [vmem:[#allocation18_spill] sm:$0xff]  ;;  %v10509_v30 = vld [vmem:[#allocation31_spill] sm:$0xff]  ;;  %v10515_v32 = vld [vmem:[#allocation40_spill] sm:$0xff]  ;;  %v10533_v28 = vrot.slane %v9163_v10, 5  ;;  %v9519_v35 = vsel %vm4958_vm11, %v9172_v62, 1073741824  ;;  %v9525_v54 = vsel %vm10539_vm3, %v9182_v44, 1073741824  ;;  %vm10555_vm11 = vcmp.eq.f32.partialorder %v10469_v3, %v9247_v52 }
 0x47d   :  { %v10516_v12 = vld [vmem:[#allocation41_spill] sm:$0xff]  ;;  %v10523_v49 = vld [vmem:[#allocation51_spill] sm:$0xff]  ;;  %v9471_v56 = vsel %vm4951_vm4, %v10529_v6, 1073741824  ;;  %v9478_v15 = vsel %vm4952_vm5, %v10530_v9, 1073741824  ;;  %v9492_v6 = vsel %vm4954_vm7, %v10532_v45, 1073741824  ;;  %v10534_v9 = vrot.slane %v9163_v10, 6 }
 0x47e   :  { %vm5006_vm1 = vcmp.eq.f32.partialorder %v10516_v12, %v9247_v52  ;;  %v10521_v12 = vld [vmem:[#allocation49_spill] sm:$0xff]  ;;  %vm5017_vm13 = vcmp.eq.f32.partialorder %v10523_v49, %v9247_v52  ;;  %v10528_v49 = vld [vmem:[#allocation30_spill] sm:$0xff]  ;;  %v9499_v37 = vsel %vm4955_vm8, %v10533_v28, 1073741824  ;;  %10538 = vst [vmem:[#allocation9_spill] sm:$0xff] %v9519_v35  ;;  %v10540_v45 = vld [vmem:[#allocation39_spill] sm:$0xff]  ;;  %vm10542_vm5 = vcmp.eq.f32.partialorder %v10494_v39, %v9247_v52  ;;  %s6166_s3 = smov [#allocation3]  }
 0x47f   :  { %v10526_v27 = vld [vmem:[#allocation69_spill] sm:$0xff]  ;;  %vm4995_vm12 = vcmp.eq.f32.partialorder %v10528_v49, %v9247_v52  ;;  %v9506_v59 = vsel %vm4956_vm9, %v10534_v9, 1073741824  ;;  %vm5004_vm4 = vcmp.eq.f32.partialorder %v10540_v45, %v9247_v52  ;;  %v10543_v55 = vrot.slane %v9182_v44, 2  ;;  %v10599_v34 = vld [vmem:[#allocation19_spill] sm:$0xff]  ;;  %s5434_s5 = sshll.u32 %s6166_s3, 4  ;;  %s5435_s5 = int_to_ptr.vmem [resolvable:$true] %s5434_s5 }
 0x480   :  { %vm5026_vm14 = vcmp.eq.f32.partialorder %v10526_v27, %v9247_v52  ;;  %v10531_v27 = vrot.slane %v9163_v10, 3  ;;  %10535 = vst [vmem:[#allocation13_spill] sm:$0xff] %v9506_v59  ;;  %v10545_v36 = vrot.slane %v9182_v44, 3  ;;  %vm10546_vm7 = vcmp.eq.f32.partialorder %v8795_v18, %v9247_v52  ;;  %v10702_v59 = vld [vmem:[#allocation54_spill] sm:$0xff]  ;;  %s6130_s6 = scalar_lea.vmem %s5435_s5, 16  ;;  %s6134_s7 = scalar_lea.vmem %s5435_s5, 32 }
 0x481   :  { %v10547_v9 = vrot.slane %v9182_v44, 4  ;;  %vm10548_vm8 = vcmp.eq.f32.partialorder %v8798_v11, %v9247_v52  ;;  %vm10550_vm9 = vcmp.eq.f32.partialorder %v10457_v26, %v9247_v52  ;;  %vm10557_vm3 = vcmp.eq.f32.partialorder %v10475_v16, %v9247_v52  ;;  %p6131_p9 = scmp.ne.s32.totalorder %s5435_s5, %s6130_s6  ;;  %p6135_p10 = scmp.lt.s32.totalorder %s5435_s5, %s5435_s5 }
 0x482   :  { %v9485_v46 = vsel %vm4953_vm6, %v10531_v27, 1073741824  ;;  %v10536_v27 = vrot.slane %v9163_v10, 7  ;;  %v10541_v10 = vrot.slane %v9182_v44, 1  ;;  %vm10544_vm6 = vcmp.eq.f32.partialorder %v8792_v1, %v9247_v52  ;;  %p6136_p11 = scmp.lt.s32.totalorder %s6134_s7, %s6130_s6 }
 0x483   :  { %v9541_v62 = vsel %vm10544_vm6, %v10543_v55, 1073741824  ;;  %v9548_v28 = vsel %vm10546_vm7, %v10545_v36, 1073741824  ;;  %v9555_v39 = vsel %vm10548_vm8, %v10547_v9, 1073741824  ;;  %v10554_v55 = vrot.slane %v9182_v44, 7  ;;  %v10559_v36 = vld [vmem:[#allocation47_spill] sm:$0xff] }
 0x484   :  { %v9513_v7 = vsel %vm4957_vm10, %v10536_v27, 1073741824  ;;  %v9534_v17 = vsel %vm10542_vm5, %v10541_v10, 1073741824  ;;  %v10549_v27 = vrot.slane %v9182_v44, 5  ;;  %v10551_v10 = vrot.slane %v9182_v44, 6  ;;  %p6137_p12 = por %p6136_p11, %p6135_p10 }
 0x485   :  { %10537 = vst [vmem:[#allocation60_spill] sm:$0xff] %v9513_v7  ;;  %vm10552_vm10 = vcmp.eq.f32.partialorder %v10463_v31, %v9247_v52  ;;  %v9576_v11 = vsel %vm10555_vm11, %v10554_v55, 1073741824  ;;  %v9582_v26 = vsel %vm10557_vm3, %v9185_v53, 1073741824  ;;  %vm5013_vm5 = vcmp.eq.f32.partialorder %v10559_v36, %v9247_v52  ;;  %v10560_v31 = vld [vmem:[#allocation48_spill] sm:$0xff] }
 0x486   :  { %v9562_v1 = vsel %vm10550_vm9, %v10549_v27, 1073741824  ;;  %v9569_v18 = vsel %vm10552_vm10, %v10551_v10, 1073741824  ;;  %10556 = vst [vmem:[#allocation29_spill] sm:$0xff] %v9576_v11  ;;  %10558 = vst [vmem:[#allocation38_spill] sm:$0xff] %v9582_v26  ;;  %vm5014_vm6 = vcmp.eq.f32.partialorder %v10560_v31, %v9247_v52  ;;  %vm10561_vm7 = vcmp.eq.f32.partialorder %v10495_v24, %v9247_v52  ;;  %v10609_v26 = vld [vmem:[#allocation22_spill] sm:$0xff]  ;;  %v10624_v11 = vld [vmem:[#allocation27_spill] sm:$0xff]  ;;  %p6138_p13 = pnand %p6137_p12, %p6131_p9 }
 0x487   :  { %10553 = vst [vmem:[#allocation14_spill] sm:$0xff] %v9569_v18  ;;  %v9592_v44 = vsel %vm10561_vm7, %v9188_v29, 1073741824  ;;  %v10562_v3 = vrot.slane %v9188_v29, 1  ;;  %vm10563_vm8 = vcmp.eq.f32.partialorder %v8816_v48, %v9247_v52  ;;  %v10564_v53 = vrot.slane %v9188_v29, 2  ;;  %v10628_v7 = vld [vmem:[#allocation28_spill] sm:$0xff]  ;;  %v10673_v18 = vld [vmem:[#allocation45_spill] sm:$0xff] }
 0x488   :  { %vm10565_vm9 = vcmp.eq.f32.partialorder %v8819_v33, %v9247_v52  ;;  %v10566_v27 = vrot.slane %v9188_v29, 3  ;;  %vm10567_vm10 = vcmp.eq.f32.partialorder %v8822_v43, %v9247_v52  ;;  %v10568_v10 = vrot.slane %v9188_v29, 4 }
 0x489   :  { %v9599_v16 = vsel %vm10563_vm8, %v10562_v3, 1073741824  ;;  %v9606_v9 = vsel %vm10565_vm9, %v10564_v53, 1073741824  ;;  %vm10569_vm11 = vcmp.eq.f32.partialorder %v8825_v14, %v9247_v52  ;;  %v10570_v55 = vrot.slane %v9188_v29, 5 }
 0x48a   :  { %v9613_v24 = vsel %vm10567_vm10, %v10566_v27, 1073741824  ;;  %v9620_v48 = vsel %vm10569_vm11, %v10568_v10, 1073741824  ;;  %vm10571_vm3 = vcmp.eq.f32.partialorder %v10458_v41, %v9247_v52  ;;  %v10572_v3 = vrot.slane %v9188_v29, 6  ;;  %v10578_v27 = vld [vmem:[#allocation55_spill] sm:$0xff]  ;;  %v10579_v41 = vld [vmem:[#allocation66_spill] sm:$0xff] }
 0x48b   :  { %v9627_v33 = vsel %vm10571_vm3, %v10570_v55, 1073741824  ;;  %vm10573_vm7 = vcmp.eq.f32.partialorder %v10464_v21, %v9247_v52  ;;  %v10575_v53 = vrot.slane %v9188_v29, 7  ;;  %vm10576_vm8 = vcmp.eq.f32.partialorder %v10470_v40, %v9247_v52  ;;  %v10580_v10 = vld [vmem:[#allocation63_spill] sm:$0xff] }
 0x48c   :  { %v9634_v43 = vsel %vm10573_vm7, %v10572_v3, 1073741824  ;;  %vm5022_vm9 = vcmp.eq.f32.partialorder %v10578_v27, %v9247_v52  ;;  %vm5023_vm10 = vcmp.eq.f32.partialorder %v10579_v41, %v9247_v52  ;;  %vm10581_vm11 = vcmp.eq.f32.partialorder %v10476_v8, %v9247_v52 }
 0x48d   :  { %10574 = vst [vmem:[#allocation46_spill] sm:$0xff] %v9634_v43  ;;  %v9641_v14 = vsel %vm10576_vm8, %v10575_v53, 1073741824  ;;  %v9651_v21 = vsel %vm10581_vm11, %v10580_v10, 1073741824  ;;  %vm10583_vm3 = vcmp.eq.f32.partialorder %v10496_v50, %v9247_v52  ;;  %v10584_v40 = vrot.slane %v9191_v63, 1  ;;  %v10588_v53 = vld [vmem:[#allocation67_spill] sm:$0xff]  ;;  %v10653_v43 = vld [vmem:[#allocation37_spill] sm:$0xff] }
 0x48e   :  { %10577 = vst [vmem:[#allocation56_spill] sm:$0xff] %v9641_v14  ;;  %10582 = vst [vmem:[#allocation57_spill] sm:$0xff] %v9651_v21  ;;  %v5121_v29 = vsel %vm10583_vm3, %v9191_v63, 1073741824  ;;  %vm10585_vm7 = vcmp.eq.f32.partialorder %v10497_v4, %v9247_v52  ;;  %v10586_v3 = vrot.slane %v9191_v63, 2  ;;  %vm10587_vm8 = vcmp.eq.f32.partialorder %v8846_v23, %v9247_v52  ;;  %v10603_v21 = vld [vmem:[#allocation20_spill] sm:$0xff]  ;;  %v10621_v14 = vld [vmem:[#allocation26_spill] sm:$0xff] }
 0x48f   :  { %v9662_v55 = vsel %vm10585_vm7, %v10584_v40, 1073741824  ;;  %vm5024_vm11 = vcmp.eq.f32.partialorder %v10588_v53, %v9247_v52  ;;  %v10589_v50 = vrot.slane %v9191_v63, 3  ;;  %vm10590_vm3 = vcmp.eq.f32.partialorder %v8849_v61, %v9247_v52 }
 0x490   :  { %v9669_v8 = vsel %vm10587_vm8, %v10586_v3, 1073741824  ;;  %v10591_v4 = vrot.slane %v9191_v63, 4  ;;  %vm10592_vm7 = vcmp.eq.f32.partialorder %v8852_v19, %v9247_v52  ;;  %v10593_v23 = vrot.slane %v9191_v63, 5 }
 0x491   :  { %v9678_v10 = vsel %vm10590_vm3, %v10589_v50, 1073741824  ;;  %vm10594_vm8 = vcmp.eq.f32.partialorder %v10498_v42, %v9247_v52  ;;  %v10595_v60 = vrot.slane %v9191_v63, 6  ;;  %vm10596_vm3 = vcmp.eq.f32.partialorder %v10499_v38, %v9247_v52 }
 0x492   :  { %v9685_v40 = vsel %vm10592_vm7, %v10591_v4, 1073741824  ;;  %v9692_v3 = vsel %vm10594_vm8, %v10593_v23, 1073741824  ;;  %v10598_v50 = vrot.slane %v9191_v63, 7  ;;  %vm10600_vm7 = vcmp.eq.f32.partialorder %v10599_v34, %v9247_v52  ;;  %v10602_v4 = vld [vmem:[#allocation11_spill] sm:$0xff]  ;;  %v10606_v23 = vld [vmem:[#allocation21_spill] sm:$0xff] }
 0x493   :  { %v9699_v61 = vsel %vm10596_vm3, %v10595_v60, 1073741824  ;;  %vm10604_vm2 = vcmp.eq.f32.partialorder %v10603_v21, %v9247_v52  ;;  %vm10607_vm8 = vcmp.eq.f32.partialorder %v10606_v23, %v9247_v52  ;;  %v10608_v60 = vrot.slane %v9201_v58, 1 }
 0x494   :  { %10597 = vst [vmem:[#allocation61_spill] sm:$0xff] %v9699_v61  ;;  %v9706_v19 = vsel %vm10600_vm7, %v10598_v50, 1073741824  ;;  %v9712_v42 = vsel %vm10604_vm2, %v10602_v4, 1073741824  ;;  %v5130_v38 = vsel %vm10607_vm8, %v9201_v58, 1073741824  ;;  %vm10610_vm3 = vcmp.eq.f32.partialorder %v10609_v26, %v9247_v52  ;;  %v10612_v50 = vld [vmem:[#allocation23_spill] sm:$0xff]  ;;  %v10649_v61 = vld [vmem:[#allocation36_spill] sm:$0xff] }
 0x495   :  { %10601 = vst [vmem:[#allocation62_spill] sm:$0xff] %v9706_v19  ;;  %10605 = vst [vmem:[#allocation10_spill] sm:$0xff] %v9712_v42  ;;  %v9723_v63 = vsel %vm10610_vm3, %v10608_v60, 1073741824  ;;  %v10611_v34 = vrot.slane %v9201_v58, 2  ;;  %vm10613_vm7 = vcmp.eq.f32.partialorder %v10612_v50, %v9247_v52  ;;  %v10614_v4 = vrot.slane %v9201_v58, 3  ;;  %v10615_v42 = vld [vmem:[#allocation24_spill] sm:$0xff] }
 0x496   :  { %vm10616_vm2 = vcmp.eq.f32.partialorder %v10615_v42, %v9247_v52  ;;  %v10617_v35 = vrot.slane %v9201_v58, 4  ;;  %v10618_v19 = vld [vmem:[#allocation25_spill] sm:$0xff]  ;;  %v10620_v60 = vrot.slane %v9201_v58, 5  ;;  %vm10622_vm3 = vcmp.eq.f32.partialorder %v10621_v14, %v9247_v52 }
 0x497   :  { %v9730_v21 = vsel %vm10613_vm7, %v10611_v34, 1073741824  ;;  %v9737_v23 = vsel %vm10616_vm2, %v10614_v4, 1073741824  ;;  %vm10619_vm8 = vcmp.eq.f32.partialorder %v10618_v19, %v9247_v52  ;;  %v10623_v50 = vrot.slane %v9201_v58, 6  ;;  %v10631_v19 = vld [vmem:[#allocation58_spill] sm:$0xff] }
 0x498   :  { %v9744_v26 = vsel %vm10619_vm8, %v10617_v35, 1073741824  ;;  %v9751_v34 = vsel %vm10622_vm3, %v10620_v60, 1073741824  ;;  %vm10625_vm7 = vcmp.eq.f32.partialorder %v10624_v11, %v9247_v52  ;;  %v10627_v4 = vrot.slane %v9201_v58, 7 }
 0x499   :  { %v9758_v42 = vsel %vm10625_vm7, %v10623_v50, 1073741824  ;;  %vm10629_vm2 = vcmp.eq.f32.partialorder %v10628_v7, %v9247_v52  ;;  %vm10632_vm8 = vcmp.eq.f32.partialorder %v10479_v20, %v9247_v52  ;;  %v5139_v11 = vsel %vm4995_vm12, %v9207_v5, 1073741824  ;;  %v10637_v50 = vld [vmem:[#allocation32_spill] sm:$0xff] }
 0x49a   :  { %10626 = vst [vmem:[#allocation15_spill] sm:$0xff] %v9758_v42  ;;  %v9765_v35 = vsel %vm10629_vm2, %v10627_v4, 1073741824  ;;  %v9771_v14 = vsel %vm10632_vm8, %v10631_v19, 1073741824  ;;  %v10634_v60 = vrot.slane %v9207_v5, 1  ;;  %vm10635_vm3 = vcmp.eq.f32.partialorder %v10509_v30, %v9247_v52  ;;  %v10640_v19 = vld [vmem:[#allocation33_spill] sm:$0xff]  ;;  %v10646_v42 = vld [vmem:[#allocation35_spill] sm:$0xff] }
 0x49b   :  { %10630 = vst [vmem:[#allocation16_spill] sm:$0xff] %v9765_v35  ;;  %10633 = vst [vmem:[#allocation17_spill] sm:$0xff] %v9771_v14  ;;  %v10636_v7 = vrot.slane %v9207_v5, 2  ;;  %vm10638_vm7 = vcmp.eq.f32.partialorder %v10637_v50, %v9247_v52  ;;  %v10639_v20 = vrot.slane %v9207_v5, 3  ;;  %vm10641_vm2 = vcmp.eq.f32.partialorder %v10640_v19, %v9247_v52  ;;  %v10643_v35 = vld [vmem:[#allocation34_spill] sm:$0xff] }
 0x49c   :  { %v5140_v58 = vsel %vm10635_vm3, %v10634_v60, 1073741824  ;;  %v10642_v14 = vrot.slane %v9207_v5, 4  ;;  %vm10644_vm12 = vcmp.eq.f32.partialorder %v10643_v35, %v9247_v52  ;;  %v10645_v60 = vrot.slane %v9207_v5, 5 }
 0x49d   :  { %v9787_v4 = vsel %vm10638_vm7, %v10636_v7, 1073741824  ;;  %v9794_v49 = vsel %vm10641_vm2, %v10639_v20, 1073741824  ;;  %vm10647_vm8 = vcmp.eq.f32.partialorder %v10646_v42, %v9247_v52  ;;  %v10648_v50 = vrot.slane %v9207_v5, 6 }
 0x49e   :  { %v9801_v30 = vsel %vm10644_vm12, %v10642_v14, 1073741824  ;;  %v9808_v7 = vsel %vm10647_vm8, %v10645_v60, 1073741824  ;;  %vm10650_vm3 = vcmp.eq.f32.partialorder %v10649_v61, %v9247_v52  ;;  %v10652_v19 = vrot.slane %v9207_v5, 7  ;;  %v10656_v14 = vld [vmem:[#allocation64_spill] sm:$0xff] }
 0x49f   :  { %v9815_v20 = vsel %vm10650_vm3, %v10648_v50, 1073741824  ;;  %vm10654_vm7 = vcmp.eq.f32.partialorder %v10653_v43, %v9247_v52  ;;  %vm10657_vm2 = vcmp.eq.f32.partialorder %v10480_v13, %v9247_v52  ;;  %v5148_v61 = vsel %vm5004_vm4, %v9213_v51, 1073741824 }
 0x4a0   :  { %10651 = vst [vmem:[#allocation18_spill] sm:$0xff] %v9815_v20  ;;  %v9822_v35 = vsel %vm10654_vm7, %v10652_v19, 1073741824  ;;  %v9828_v42 = vsel %vm10657_vm2, %v10656_v14, 1073741824  ;;  %v10659_v60 = vrot.slane %v9213_v51, 1  ;;  %vm10660_vm12 = vcmp.eq.f32.partialorder %v10515_v32, %v9247_v52  ;;  %v10664_v14 = vld [vmem:[#allocation42_spill] sm:$0xff]  ;;  %v10670_v20 = vld [vmem:[#allocation44_spill] sm:$0xff] }
 0x4a1   :  { %10655 = vst [vmem:[#allocation31_spill] sm:$0xff] %v9822_v35  ;;  %10658 = vst [vmem:[#allocation40_spill] sm:$0xff] %v9828_v42  ;;  %v10661_v43 = vrot.slane %v9213_v51, 2  ;;  %v10663_v13 = vrot.slane %v9213_v51, 3  ;;  %vm10665_vm8 = vcmp.eq.f32.partialorder %v10664_v14, %v9247_v52  ;;  %v10666_v42 = vrot.slane %v9213_v51, 4  ;;  %v10667_v35 = vld [vmem:[#allocation43_spill] sm:$0xff] }
 0x4a2   :  { %v5149_v5 = vsel %vm10660_vm12, %v10659_v60, 1073741824  ;;  %vm10668_vm4 = vcmp.eq.f32.partialorder %v10667_v35, %v9247_v52  ;;  %v10669_v60 = vrot.slane %v9213_v51, 5  ;;  %v10672_v50 = vrot.slane %v9213_v51, 6 }
 0x4a3   :  { %v9844_v19 = vsel %vm5006_vm1, %v10661_v43, 1073741824  ;;  %v9851_v45 = vsel %vm10665_vm8, %v10663_v13, 1073741824  ;;  %v9858_v32 = vsel %vm10668_vm4, %v10666_v42, 1073741824  ;;  %vm10671_vm1 = vcmp.eq.f32.partialorder %v10670_v20, %v9247_v52  ;;  %v10679_v42 = vld [vmem:[#allocation12_spill] sm:$0xff] }
 0x4a4   :  { %v9865_v43 = vsel %vm10671_vm1, %v10669_v60, 1073741824  ;;  %vm10674_vm3 = vcmp.eq.f32.partialorder %v10673_v18, %v9247_v52  ;;  %v10676_v14 = vrot.slane %v9213_v51, 7  ;;  %vm10677_vm7 = vcmp.eq.f32.partialorder %v8942_v0, %v9247_v52 }
 0x4a5   :  { %v9872_v13 = vsel %vm10674_vm3, %v10672_v50, 1073741824  ;;  %vm10680_vm2 = vcmp.eq.f32.partialorder %v10482_v57, %v9247_v52  ;;  %v5157_v18 = vsel %vm5013_vm5, %v9219_v2, 1073741824  ;;  %v10682_v60 = vrot.slane %v9219_v2, 1 }
 0x4a6   :  { %10675 = vst [vmem:[#allocation49_spill] sm:$0xff] %v9872_v13  ;;  %v9879_v35 = vsel %vm10677_vm7, %v10676_v14, 1073741824  ;;  %v9885_v20 = vsel %vm10680_vm2, %v10679_v42, 1073741824  ;;  %v10683_v0 = vrot.slane %v9219_v2, 2  ;;  %vm10684_vm12 = vcmp.eq.f32.partialorder %v10521_v12, %v9247_v52  ;;  %v10686_v14 = vld [vmem:[#allocation50_spill] sm:$0xff]  ;;  %v10698_v13 = vld [vmem:[#allocation53_spill] sm:$0xff] }
 0x4a7   :  { %10678 = vst [vmem:[#allocation30_spill] sm:$0xff] %v9879_v35  ;;  %10681 = vst [vmem:[#allocation39_spill] sm:$0xff] %v9885_v20  ;;  %v5158_v51 = vsel %vm5014_vm6, %v10682_v60, 1073741824  ;;  %v10685_v57 = vrot.slane %v9219_v2, 3  ;;  %vm10687_vm8 = vcmp.eq.f32.partialorder %v10686_v14, %v9247_v52  ;;  %v10688_v42 = vrot.slane %v9219_v2, 4  ;;  %v10691_v35 = vld [vmem:[#allocation52_spill] sm:$0xff] }
 0x4a8   :  { %v9901_v50 = vsel %vm10684_vm12, %v10683_v0, 1073741824  ;;  %v10690_v60 = vrot.slane %v9219_v2, 5  ;;  %vm10692_vm5 = vcmp.eq.f32.partialorder %v10691_v35, %v9247_v52  ;;  %v10694_v0 = vrot.slane %v9219_v2, 6 }
 0x4a9   :  { %v9908_v36 = vsel %vm10687_vm8, %v10685_v57, 1073741824  ;;  %v9915_v31 = vsel %vm5017_vm13, %v10688_v42, 1073741824  ;;  %vm10695_vm6 = vcmp.eq.f32.partialorder %v8966_v25, %v9247_v52  ;;  %v10697_v14 = vrot.slane %v9219_v2, 7  ;;  %v10701_v42 = vld [vmem:[#allocation59_spill] sm:$0xff] }
 0x4aa   :  { %v9922_v12 = vsel %vm10692_vm5, %v10690_v60, 1073741824  ;;  %v9929_v57 = vsel %vm10695_vm6, %v10694_v0, 1073741824  ;;  %vm10699_vm13 = vcmp.eq.f32.partialorder %v10698_v13, %v9247_v52  ;;  %vm10703_vm4 = vcmp.eq.f32.partialorder %v10702_v59, %v9247_v52 }
 0x4ab   :  { %10693 = vst [vmem:[#allocation47_spill] sm:$0xff] %v9922_v12  ;;  %10696 = vst [vmem:[#allocation48_spill] sm:$0xff] %v9929_v57  ;;  %v9936_v20 = vsel %vm10699_vm13, %v10697_v14, 1073741824  ;;  %v9942_v35 = vsel %vm10703_vm4, %v10701_v42, 1073741824  ;;  %v5166_v25 = vsel %vm5022_vm9, %v9225_v47, 1073741824  ;;  %v10705_v60 = vrot.slane %v9225_v47, 1 }
 0x4ac   :  { %10700 = vst [vmem:[#allocation55_spill] sm:$0xff] %v9936_v20  ;;  %10704 = vst [vmem:[#allocation66_spill] sm:$0xff] %v9942_v35  ;;  %v10706_v13 = vrot.slane %v9225_v47, 2  ;;  %v10707_v59 = vrot.slane %v9225_v47, 3  ;;  %v10708_v14 = vld [vmem:[#allocation68_spill] sm:$0xff]  ;;  %v10710_v42 = vrot.slane %v9225_v47, 4 }
 0x4ad   :  { %v5167_v2 = vsel %vm5023_vm10, %v10705_v60, 1073741824  ;;  %vm10709_vm1 = vcmp.eq.f32.partialorder %v10708_v14, %v9247_v52  ;;  %v10712_v60 = vrot.slane %v9225_v47, 5  ;;  %v10717_v14 = vrot.slane %v9225_v47, 7  ;;  %v10718_v12 = vld [vmem:[#allocation72_spill] sm:$0xff] }
 0x4ae   :  { %v9958_v0 = vsel %vm5024_vm11, %v10706_v13, 1073741824  ;;  %v9965_v27 = vsel %vm10709_vm1, %v10707_v59, 1073741824  ;;  %v9972_v41 = vsel %vm5026_vm14, %v10710_v42, 1073741824  ;;  %v10715_v13 = vrot.slane %v9225_v47, 6 }
 0x4af   :  { %v9979_v53 = vsel %vm5027_vm15, %v10712_v60, 1073741824  ;;  %vm10719_vm14 = vcmp.eq.f32.partialorder %v10718_v12, %v9247_v52  ;;  %vm10721_vm9 = vcmask 8192   ;;  %v10723_v60 = vld [vmem:[#allocation65_spill] sm:$0xff] }
 0x4b0   :  { %10714 = vst [vmem:[#allocation63_spill] sm:$0xff] %v9979_v53  ;;  %v9986_v59 = vsel %vm5028_vm0, %v10715_v13, 1073741824  ;;  %v9993_v35 = vsel %vm10719_vm14, %v10717_v14, 1073741824  ;;  %v5176_v42 = vsel %vm10721_vm9, %v9464_v22, 2147483647  ;;  %vm10722_vm15 = vmmov %vm10721_vm9  ;;  %v10724_v53 = vld [vmem:[#allocation73_spill] sm:$0xff] }
 0x4b1   :  { %10720 = vst [vmem:[#allocation67_spill] sm:$0xff] %v9993_v35  ;;  %v5177_v20 = vsel %vm10722_vm15, %v9525_v54, 2147483647  ;;  %vm10725_vm10 = vcmp.eq.f32.partialorder %v10724_v53, %v9247_v52  ;;  %vm10726_vm11 = vmmov %vm10721_vm9 }
 0x4b2   :  { %v10003_v57 = vsel %vm10725_vm10, %v10723_v60, 1073741824  ;;  %vm5178_vm0 = vcmp.lt.s32.totalorder %v5176_v42, %v5177_v20  ;;  %v5180_v47 = vsel %vm10726_vm11, %v9592_v44, 2147483647  ;;  %vm10727_vm3 = vmmov %vm10721_vm9 }
 0x4b3   :  { %v5183_v12 = vsel %vm10727_vm3, %v5121_v29, 2147483647  ;;  %v5179_v13 = vsel %vm5178_vm0, %v5176_v42, %v5177_v20  ;;  %vm10728_vm7 = vmmov %vm10727_vm3 }
 0x4b4   :  { %v5186_v14 = vsel %vm10728_vm7, %v5130_v38, 2147483647  ;;  %vm10729_vm2 = vmmov %vm10727_vm3  ;;  %vm5181_vm8 = vcmp.lt.s32.totalorder %v5179_v13, %v5180_v47 }
 0x4b5   :  { %v5189_v22 = vsel %vm10729_vm2, %v5139_v11, 2147483647  ;;  %vm10730_vm12 = vmmov %vm10729_vm2  ;;  %v5182_v60 = vsel %vm5181_vm8, %v5179_v13, %v5180_v47  ;;  %v5220_v42 = vsel %vm10729_vm2, %v5158_v51, 2147483647 }
 0x4b6   :  { %v5192_v35 = vsel %vm10730_vm12, %v5148_v61, 2147483647  ;;  %vm10731_vm5 = vmmov %vm10729_vm2  ;;  %vm5184_vm9 = vcmp.lt.s32.totalorder %v5182_v60, %v5183_v12 }
 0x4b7   :  { %v5195_v54 = vsel %vm10731_vm5, %v5157_v18, 2147483647  ;;  %vm10732_vm6 = vmmov %vm10729_vm2  ;;  %v5185_v18 = vsel %vm5184_vm9, %v5182_v60, %v5183_v12 }
 0x4b8   :  { %v5201_v52 = vsel %vm10732_vm6, %v9471_v56, 2147483647  ;;  %vm10733_vm13 = vmmov %vm10729_vm2  ;;  %vm5187_vm7 = vcmp.lt.s32.totalorder %v5185_v18, %v5186_v14 }
 0x4b9   :  { %v5202_v53 = vsel %vm10733_vm13, %v9534_v17, 2147483647  ;;  %vm10734_vm4 = vmmov %vm10729_vm2  ;;  %v5188_v20 = vsel %vm5187_vm7, %v5185_v18, %v5186_v14 }
 0x4ba   :  { %v5198_v44 = vsel %vm10734_vm4, %v5166_v25, 2147483647  ;;  %vm5203_vm1 = vcmp.lt.s32.totalorder %v5201_v52, %v5202_v53  ;;  %vm10735_vm14 = vmmov %vm10729_vm2  ;;  %vm5190_vm13 = vcmp.lt.s32.totalorder %v5188_v20, %v5189_v22 }
 0x4bb   :  { %v5205_v29 = vsel %vm10735_vm14, %v9599_v16, 2147483647  ;;  %v5204_v38 = vsel %vm5203_vm1, %v5201_v52, %v5202_v53  ;;  %vm10736_vm15 = vmmov %vm10729_vm2 }
 0x4bc   :  { %v5208_v11 = vsel %vm10736_vm15, %v9662_v55, 2147483647  ;;  %vm10737_vm10 = vmmov %vm10729_vm2  ;;  %vm5206_vm0 = vcmp.lt.s32.totalorder %v5204_v38, %v5205_v29 }
 0x4bd   :  { %v5211_v61 = vsel %vm10737_vm10, %v9723_v63, 2147483647  ;;  %vm10738_vm11 = vmmov %vm10729_vm2  ;;  %v5207_v25 = vsel %vm5206_vm0, %v5204_v38, %v5205_v29 }
 0x4be   :  { %v5214_v56 = vsel %vm10738_vm11, %v5140_v58, 2147483647  ;;  %vm10739_vm3 = vmmov %vm10729_vm2  ;;  %vm5209_vm8 = vcmp.lt.s32.totalorder %v5207_v25, %v5208_v11 }
 0x4bf   :  { %v5217_v17 = vsel %vm10739_vm3, %v5149_v5, 2147483647  ;;  %vm10740_vm12 = vmmov %vm10729_vm2  ;;  %v5210_v47 = vsel %vm5209_vm8, %v5207_v25, %v5208_v11  ;;  %v5191_v5 = vsel %vm5190_vm13, %v5188_v20, %v5189_v22 }
 0x4c0   :  { %v5226_v16 = vsel %vm10740_vm12, %v9478_v15, 2147483647  ;;  %vm10741_vm5 = vmmov %vm10729_vm2  ;;  %vm5212_vm14 = vcmp.lt.s32.totalorder %v5210_v47, %v5211_v61  ;;  %vm5193_vm15 = vcmp.lt.s32.totalorder %v5191_v5, %v5192_v35 }
 0x4c1   :  { %v5227_v55 = vsel %vm10741_vm5, %v9541_v62, 2147483647  ;;  %vm10742_vm6 = vmmov %vm10729_vm2  ;;  %v5213_v15 = vsel %vm5212_vm14, %v5210_v47, %v5211_v61  ;;  %v5194_v13 = vsel %vm5193_vm15, %v5191_v5, %v5192_v35 }
 0x4c2   :  { %v5230_v63 = vsel %vm10742_vm6, %v9606_v9, 2147483647  ;;  %vm10743_vm4 = vmmov %vm10729_vm2  ;;  %vm5228_vm1 = vcmp.lt.s32.totalorder %v5226_v16, %v5227_v55  ;;  %vm5215_vm11 = vcmp.lt.s32.totalorder %v5213_v15, %v5214_v56  ;;  %vm5196_vm7 = vcmp.lt.s32.totalorder %v5194_v13, %v5195_v54 }
 0x4c3   :  { %v5223_v58 = vsel %vm10743_vm4, %v5167_v2, 2147483647  ;;  %v5229_v12 = vsel %vm5228_vm1, %v5226_v16, %v5227_v55  ;;  %vm10744_vm9 = vmmov %vm10729_vm2  ;;  %v5216_v2 = vsel %vm5215_vm11, %v5213_v15, %v5214_v56  ;;  %v5197_v52 = vsel %vm5196_vm7, %v5194_v13, %v5195_v54  ;;  %v10773_v13 = vld [vmem:[#allocation47_spill] sm:$0xff] }
 0x4c4   :  { %v5233_v51 = vsel %vm10744_vm9, %v9669_v8, 2147483647  ;;  %vm5231_vm10 = vcmp.lt.s32.totalorder %v5229_v12, %v5230_v63  ;;  %vm10745_vm0 = vmmov %vm10729_vm2  ;;  %vm5218_vm8 = vcmp.lt.s32.totalorder %v5216_v2, %v5217_v17  ;;  %vm5199_vm6 = vcmp.lt.s32.totalorder %v5197_v52, %v5198_v44 }
 0x4c5   :  { %v5236_v62 = vsel %vm10745_vm0, %v9730_v21, 2147483647  ;;  %v5232_v9 = vsel %vm5231_vm10, %v5229_v12, %v5230_v63  ;;  %vm10746_vm3 = vmmov %vm10745_vm0  ;;  %v5219_v21 = vsel %vm5218_vm8, %v5216_v2, %v5217_v17  ;;  %v10045_v60 = vsel %vm5199_vm6, %v5197_v52, %v5198_v44  ;;  %v10775_v2 = vld [vmem:[#allocation13_spill] sm:$0xff] }
 0x4c6   :  { %v5239_v14 = vsel %vm10746_vm3, %v9787_v4, 2147483647  ;;  %vm5234_vm2 = vcmp.lt.s32.totalorder %v5232_v9, %v5233_v51  ;;  %vm10747_vm12 = vmmov %vm10745_vm0  ;;  %vm5221_vm1 = vcmp.lt.s32.totalorder %v5219_v21, %v5220_v42 }
 0x4c7   :  { %v5242_v22 = vsel %vm10747_vm12, %v9844_v19, 2147483647  ;;  %v5235_v8 = vsel %vm5234_vm2, %v5232_v9, %v5233_v51  ;;  %vm10748_vm5 = vmmov %vm10745_vm0  ;;  %v5222_v19 = vsel %vm5221_vm1, %v5219_v21, %v5220_v42 }
 0x4c8   :  { %v5245_v53 = vsel %vm10748_vm5, %v9901_v50, 2147483647  ;;  %vm5237_vm13 = vcmp.lt.s32.totalorder %v5235_v8, %v5236_v62  ;;  %vm10749_vm4 = vmmov %vm10745_vm0 }
 0x4c9   :  { %v5251_v35 = vsel %vm10749_vm4, %v9485_v46, 2147483647  ;;  %v5238_v4 = vsel %vm5237_vm13, %v5235_v8, %v5236_v62  ;;  %vm10750_vm14 = vmmov %vm10745_vm0  ;;  %v5270_v56 = vsel %vm10749_vm4, %v9908_v36, 2147483647 }
 0x4ca   :  { %v5252_v29 = vsel %vm10750_vm14, %v9548_v28, 2147483647  ;;  %vm5240_vm9 = vcmp.lt.s32.totalorder %v5238_v4, %v5239_v14  ;;  %vm10751_vm10 = vmmov %vm10745_vm0  ;;  %vm5224_vm0 = vcmp.lt.s32.totalorder %v5222_v19, %v5223_v58 }
 0x4cb   :  { %vm5253_vm15 = vcmp.lt.s32.totalorder %v5251_v35, %v5252_v29  ;;  %v5255_v54 = vsel %vm10751_vm10, %v9613_v24, 2147483647  ;;  %v5241_v50 = vsel %vm5240_vm9, %v5238_v4, %v5239_v14  ;;  %vm10752_vm11 = vmmov %vm10746_vm3  ;;  %v10053_v46 = vsel %vm5224_vm0, %v5222_v19, %v5223_v58 }
 0x4cc   :  { %v5254_v38 = vsel %vm5253_vm15, %v5251_v35, %v5252_v29  ;;  %v5258_v11 = vsel %vm10752_vm11, %v9678_v10, 2147483647  ;;  %vm5243_vm3 = vcmp.lt.s32.totalorder %v5241_v50, %v5242_v22  ;;  %vm10753_vm7 = vmmov %vm10749_vm4  ;;  %v10781_v35 = vld [vmem:[#allocation61_spill] sm:$0xff]  ;;  %v10783_v29 = vld [vmem:[#allocation63_spill] sm:$0xff] }
 0x4cd   :  { %v5248_v44 = vsel %vm10753_vm7, %v9958_v0, 2147483647  ;;  %vm5256_vm2 = vcmp.lt.s32.totalorder %v5254_v38, %v5255_v54  ;;  %v5244_v28 = vsel %vm5243_vm3, %v5241_v50, %v5242_v22  ;;  %vm10754_vm12 = vmmov %vm10749_vm4  ;;  %v10777_v22 = vld [vmem:[#allocation14_spill] sm:$0xff] }
 0x4ce   :  { %v5257_v61 = vsel %vm5256_vm2, %v5254_v38, %v5255_v54  ;;  %v5261_v18 = vsel %vm10754_vm12, %v9737_v23, 2147483647  ;;  %vm10755_vm8 = vmmov %vm10749_vm4  ;;  %vm5246_vm5 = vcmp.lt.s32.totalorder %v5244_v28, %v5245_v53 }
 0x4cf   :  { %v5264_v24 = vsel %vm10755_vm8, %v9794_v49, 2147483647  ;;  %vm5259_vm6 = vcmp.lt.s32.totalorder %v5257_v61, %v5258_v11  ;;  %vm10756_vm13 = vmmov %vm10749_vm4  ;;  %v5247_v17 = vsel %vm5246_vm5, %v5244_v28, %v5245_v53  ;;  %v10787_v28 = vld [vmem:[#allocation18_spill] sm:$0xff] }
 0x4d0   :  { %v5267_v10 = vsel %vm10756_vm13, %v9851_v45, 2147483647  ;;  %v5260_v25 = vsel %vm5259_vm6, %v5257_v61, %v5258_v11  ;;  %vm10757_vm1 = vmmov %vm10749_vm4  ;;  %vm5249_vm9 = vcmp.lt.s32.totalorder %v5247_v17, %v5248_v44  ;;  %v10785_v11 = vld [vmem:[#allocation15_spill] sm:$0xff] }
 0x4d1   :  { %v5276_v0 = vsel %vm10757_vm1, %v9492_v6, 2147483647  ;;  %vm10758_vm14 = vmmov %vm10757_vm1  ;;  %vm5262_vm15 = vcmp.lt.s32.totalorder %v5260_v25, %v5261_v18  ;;  %v10071_v49 = vsel %vm5249_vm9, %v5247_v17, %v5248_v44  ;;  %v10790_v17 = vld [vmem:[#allocation48_spill] sm:$0xff] }
 0x4d2   :  { %v5277_v42 = vsel %vm10758_vm14, %v9555_v39, 2147483647  ;;  %vm10759_vm0 = vmmov %vm10757_vm1  ;;  %v5263_v45 = vsel %vm5262_vm15, %v5260_v25, %v5261_v18  ;;  %v10789_v18 = vld [vmem:[#allocation49_spill] sm:$0xff] }
 0x4d3   :  { %vm5278_vm10 = vcmp.lt.s32.totalorder %v5276_v0, %v5277_v42  ;;  %v5280_v23 = vsel %vm10759_vm0, %v9620_v48, 2147483647  ;;  %vm10760_vm11 = vmmov %vm10759_vm0  ;;  %vm5265_vm3 = vcmp.lt.s32.totalorder %v5263_v45, %v5264_v24 }
 0x4d4   :  { %v5279_v16 = vsel %vm5278_vm10, %v5276_v0, %v5277_v42  ;;  %v5283_v36 = vsel %vm10760_vm11, %v9685_v40, 2147483647  ;;  %vm10761_vm7 = vmmov %vm10759_vm0  ;;  %v5266_v20 = vsel %vm5265_vm3, %v5263_v45, %v5264_v24  ;;  %v10792_v0 = vld [vmem:[#allocation60_spill] sm:$0xff] }
 0x4d5   :  { %v5273_v6 = vsel %vm10761_vm7, %v9965_v27, 2147483647  ;;  %vm5281_vm2 = vcmp.lt.s32.totalorder %v5279_v16, %v5280_v23  ;;  %vm10762_vm12 = vmmov %vm10759_vm0  ;;  %vm5268_vm6 = vcmp.lt.s32.totalorder %v5266_v20, %v5267_v10 }
 0x4d6   :  { %v5286_v39 = vsel %vm10762_vm12, %v9744_v26, 2147483647  ;;  %v5282_v55 = vsel %vm5281_vm2, %v5279_v16, %v5280_v23  ;;  %vm10763_vm8 = vmmov %vm10759_vm0  ;;  %v5269_v47 = vsel %vm5268_vm6, %v5266_v20, %v5267_v10  ;;  %v10794_v23 = vld [vmem:[#allocation29_spill] sm:$0xff]  ;;  %v10796_v16 = vld [vmem:[#allocation56_spill] sm:$0xff] }
 0x4d7   :  { %v5289_v48 = vsel %vm10763_vm8, %v9801_v30, 2147483647  ;;  %vm10764_vm5 = vmmov %vm10759_vm0  ;;  %vm5284_vm13 = vcmp.lt.s32.totalorder %v5282_v55, %v5283_v36  ;;  %vm5271_vm15 = vcmp.lt.s32.totalorder %v5269_v47, %v5270_v56  ;;  %v5298_v30 = vsel %vm10759_vm0, %v9972_v41, 2147483647 }
 0x4d8   :  { %v5292_v63 = vsel %vm10764_vm5, %v9858_v32, 2147483647  ;;  %vm10765_vm4 = vmmov %vm10759_vm0  ;;  %v5285_v58 = vsel %vm5284_vm13, %v5282_v55, %v5283_v36  ;;  %v5272_v32 = vsel %vm5271_vm15, %v5269_v47, %v5270_v56  ;;  %v10801_v47 = vld [vmem:[#allocation16_spill] sm:$0xff] }
 0x4d9   :  { %v5295_v40 = vsel %vm10765_vm4, %v9915_v31, 2147483647  ;;  %vm10766_vm1 = vmmov %vm10759_vm0  ;;  %vm5287_vm10 = vcmp.lt.s32.totalorder %v5285_v58, %v5286_v39  ;;  %vm5274_vm7 = vcmp.lt.s32.totalorder %v5272_v32, %v5273_v6 }
 0x4da   :  { %v5301_v27 = vsel %vm10766_vm1, %v9499_v37, 2147483647  ;;  %vm10767_vm14 = vmmov %vm10759_vm0  ;;  %v5288_v12 = vsel %vm5287_vm10, %v5285_v58, %v5286_v39  ;;  %v10097_v51 = vsel %vm5274_vm7, %v5272_v32, %v5273_v6  ;;  %v10805_v32 = vld [vmem:[#allocation30_spill] sm:$0xff] }
 0x4db   :  { %v5302_v26 = vsel %vm10767_vm14, %v9562_v1, 2147483647  ;;  %vm10768_vm9 = vmmov %vm10759_vm0  ;;  %vm5290_vm2 = vcmp.lt.s32.totalorder %v5288_v12, %v5289_v48 }
 0x4dc   :  { %v5305_v5 = vsel %vm10768_vm9, %v9627_v33, 2147483647  ;;  %vm5303_vm11 = vcmp.lt.s32.totalorder %v5301_v27, %v5302_v26  ;;  %vm10769_vm3 = vmmov %vm10759_vm0  ;;  %v5291_v33 = vsel %vm5290_vm2, %v5288_v12, %v5289_v48  ;;  %v10799_v48 = vld [vmem:[#allocation62_spill] sm:$0xff] }
 0x4dd   :  { %v5304_v31 = vsel %vm5303_vm11, %v5301_v27, %v5302_v26  ;;  %v5308_v37 = vsel %vm10769_vm3, %v9692_v3, 2147483647  ;;  %vm10770_vm8 = vmmov %vm10759_vm0  ;;  %vm5293_vm6 = vcmp.lt.s32.totalorder %v5291_v33, %v5292_v63 }
 0x4de   :  { %vm5306_vm12 = vcmp.lt.s32.totalorder %v5304_v31, %v5305_v5  ;;  %v5311_v1 = vsel %vm10770_vm8, %v9751_v34, 2147483647  ;;  %vm10771_vm5 = vmmov %vm10759_vm0  ;;  %v5294_v9 = vsel %vm5293_vm6, %v5291_v33, %v5292_v63 }
 0x4df   :  { %v5307_v15 = vsel %vm5306_vm12, %v5304_v31, %v5305_v5  ;;  %v5314_v41 = vsel %vm10771_vm5, %v9808_v7, 2147483647  ;;  %vm10772_vm4 = vmmov %vm10759_vm0  ;;  %vm5296_vm15 = vcmp.lt.s32.totalorder %v5294_v9, %v5295_v40  ;;  %v10779_v7 = vld [vmem:[#allocation46_spill] sm:$0xff]  ;;  %v10803_v5 = vld [vmem:[#allocation31_spill] sm:$0xff] }
 0x4e0   :  { %vm5309_vm13 = vcmp.lt.s32.totalorder %v5307_v15, %v5308_v37  ;;  %v5317_v62 = vsel %vm10772_vm4, %v9865_v43, 2147483647  ;;  %vm10774_vm1 = vmmov %vm10759_vm0  ;;  %v5297_v53 = vsel %vm5296_vm15, %v5294_v9, %v5295_v40  ;;  %v10807_v31 = vld [vmem:[#allocation55_spill] sm:$0xff] }
 0x4e1   :  { %v5320_v3 = vsel %vm10774_vm1, %v10773_v13, 2147483647  ;;  %v5310_v14 = vsel %vm5309_vm13, %v5307_v15, %v5308_v37  ;;  %vm10776_vm14 = vmmov %vm10759_vm0  ;;  %vm5299_vm7 = vcmp.lt.s32.totalorder %v5297_v53, %v5298_v30  ;;  %v5342_v24 = vsel %vm10774_vm1, %v10789_v18, 2147483647  ;;  %v10812_v13 = vld [vmem:[#allocation57_spill] sm:$0xff] }
 0x4e2   :  { %v5326_v34 = vsel %vm10776_vm14, %v10775_v2, 2147483647  ;;  %vm10778_vm9 = vmmov %vm10759_vm0  ;;  %vm5312_vm10 = vcmp.lt.s32.totalorder %v5310_v14, %v5311_v1  ;;  %v10115_v54 = vsel %vm5299_vm7, %v5297_v53, %v5298_v30  ;;  %v10818_v53 = vld [vmem:[#allocation17_spill] sm:$0xff] }
 0x4e3   :  { %v5327_v52 = vsel %vm10778_vm9, %v10777_v22, 2147483647  ;;  %vm10780_vm11 = vmmov %vm10774_vm1  ;;  %v5313_v21 = vsel %vm5312_vm10, %v5310_v14, %v5311_v1  ;;  %v10809_v1 = vld [vmem:[#allocation9_spill] sm:$0xff]  ;;  %v10814_v14 = vld [vmem:[#allocation67_spill] sm:$0xff] }
 0x4e4   :  { %vm5328_vm0 = vcmp.lt.s32.totalorder %v5326_v34, %v5327_v52  ;;  %v5330_v8 = vsel %vm10780_vm11, %v10779_v7, 2147483647  ;;  %vm10782_vm3 = vmmov %vm10774_vm1  ;;  %vm5315_vm2 = vcmp.lt.s32.totalorder %v5313_v21, %v5314_v41 }
 0x4e5   :  { %v5329_v43 = vsel %vm5328_vm0, %v5326_v34, %v5327_v52  ;;  %v5333_v4 = vsel %vm10782_vm3, %v10781_v35, 2147483647  ;;  %vm10784_vm12 = vmmov %vm10774_vm1  ;;  %v5316_v50 = vsel %vm5315_vm2, %v5313_v21, %v5314_v41  ;;  %v10811_v41 = vld [vmem:[#allocation38_spill] sm:$0xff] }
 0x4e6   :  { %v5323_v19 = vsel %vm10784_vm12, %v10783_v29, 2147483647  ;;  %vm5331_vm8 = vcmp.lt.s32.totalorder %v5329_v43, %v5330_v8  ;;  %vm10786_vm5 = vmmov %vm10774_vm1  ;;  %vm5318_vm6 = vcmp.lt.s32.totalorder %v5316_v50, %v5317_v62  ;;  %v10816_v52 = vld [vmem:[#allocation10_spill] sm:$0xff] }
 0x4e7   :  { %v5332_v38 = vsel %vm5331_vm8, %v5329_v43, %v5330_v8  ;;  %v5336_v44 = vsel %vm10786_vm5, %v10785_v11, 2147483647  ;;  %vm10788_vm4 = vmmov %vm10774_vm1  ;;  %v5319_v10 = vsel %vm5318_vm6, %v5316_v50, %v5317_v62 }
 0x4e8   :  { %vm5334_vm13 = vcmp.lt.s32.totalorder %v5332_v38, %v5333_v4  ;;  %v5339_v61 = vsel %vm10788_vm4, %v10787_v28, 2147483647  ;;  %vm10791_vm14 = vmmov %vm10774_vm1  ;;  %vm5321_vm15 = vcmp.lt.s32.totalorder %v5319_v10, %v5320_v3 }
 0x4e9   :  { %v5335_v56 = vsel %vm5334_vm13, %v5332_v38, %v5333_v4  ;;  %v5345_v25 = vsel %vm10791_vm14, %v10790_v17, 2147483647  ;;  %vm10793_vm9 = vmmov %vm10774_vm1  ;;  %v5322_v6 = vsel %vm5321_vm15, %v5319_v10, %v5320_v3  ;;  %v10820_v4 = vld [vmem:[#allocation40_spill] sm:$0xff]  ;;  %v10824_v38 = vld [vmem:[#allocation66_spill] sm:$0xff] }
 0x4ea   :  { %v5351_v42 = vsel %vm10793_vm9, %v10792_v0, 2147483647  ;;  %vm5337_vm10 = vcmp.lt.s32.totalorder %v5335_v56, %v5336_v44  ;;  %vm10795_vm0 = vmmov %vm10774_vm1  ;;  %vm5324_vm2 = vcmp.lt.s32.totalorder %v5322_v6, %v5323_v19 }
 0x4eb   :  { %v5352_v45 = vsel %vm10795_vm0, %v10794_v23, 2147483647  ;;  %vm10797_vm11 = vmmov %vm10795_vm0  ;;  %v5338_v39 = vsel %vm5337_vm10, %v5335_v56, %v5336_v44  ;;  %v5325_v40 = vsel %vm5324_vm2, %v5322_v6, %v5323_v19  ;;  %v5377_v62 = vsel %vm10795_vm0, %v10811_v41, 2147483647  ;;  %v10822_v19 = vld [vmem:[#allocation39_spill] sm:$0xff] }
 0x4ec   :  { %v5355_v36 = vsel %vm10797_vm11, %v10796_v16, 2147483647  ;;  %vm10798_vm3 = vmmov %vm10795_vm0  ;;  %vm5353_vm7 = vcmp.lt.s32.totalorder %v5351_v42, %v5352_v45  ;;  %vm5340_vm12 = vcmp.lt.s32.totalorder %v5338_v39, %v5339_v61  ;;  %v5402_v18 = vsel %vm10795_vm0, %v10053_v46, 2147483647 }
 0x4ed   :  { %v5348_v20 = vsel %vm10798_vm3, %v9986_v59, 2147483647  ;;  %v5354_v55 = vsel %vm5353_vm7, %v5351_v42, %v5352_v45  ;;  %vm10800_vm8 = vmmov %vm10795_vm0  ;;  %v5341_v27 = vsel %vm5340_vm12, %v5338_v39, %v5339_v61 }
 0x4ee   :  { %v5358_v63 = vsel %vm10800_vm8, %v10799_v48, 2147483647  ;;  %vm5356_vm5 = vcmp.lt.s32.totalorder %v5354_v55, %v5355_v36  ;;  %vm10802_vm6 = vmmov %vm10795_vm0  ;;  %vm5343_vm13 = vcmp.lt.s32.totalorder %v5341_v27, %v5342_v24 }
 0x4ef   :  { %v5361_v58 = vsel %vm10802_vm6, %v10801_v47, 2147483647  ;;  %v5357_v26 = vsel %vm5356_vm5, %v5354_v55, %v5355_v36  ;;  %vm10804_vm4 = vmmov %vm10795_vm0  ;;  %v5344_v12 = vsel %vm5343_vm13, %v5341_v27, %v5342_v24 }
 0x4f0   :  { %v5364_v30 = vsel %vm10804_vm4, %v10803_v5, 2147483647  ;;  %vm10806_vm1 = vmmov %vm10795_vm0  ;;  %vm5359_vm14 = vcmp.lt.s32.totalorder %v5357_v26, %v5358_v63  ;;  %vm5346_vm10 = vcmp.lt.s32.totalorder %v5344_v12, %v5345_v25 }
 0x4f1   :  { %v5367_v59 = vsel %vm10806_vm1, %v10805_v32, 2147483647  ;;  %vm10808_vm9 = vmmov %vm10795_vm0  ;;  %v5360_v15 = vsel %vm5359_vm14, %v5357_v26, %v5358_v63  ;;  %v5347_v9 = vsel %vm5346_vm10, %v5344_v12, %v5345_v25 }
 0x4f2   :  { %v5370_v37 = vsel %vm10808_vm9, %v10807_v31, 2147483647  ;;  %vm10810_vm15 = vmmov %vm10795_vm0  ;;  %vm5362_vm3 = vcmp.lt.s32.totalorder %v5360_v15, %v5361_v58  ;;  %vm5349_vm12 = vcmp.lt.s32.totalorder %v5347_v9, %v5348_v20 }
 0x4f3   :  { %v5376_v33 = vsel %vm10810_vm15, %v10809_v1, 2147483647  ;;  %vm10813_vm11 = vmmov %vm10795_vm0  ;;  %v5363_v34 = vsel %vm5362_vm3, %v5360_v15, %v5361_v58  ;;  %v5350_v8 = vsel %vm5349_vm12, %v5347_v9, %v5348_v20 }
 0x4f4   :  { %v5380_v3 = vsel %vm10813_vm11, %v10812_v13, 2147483647  ;;  %vm10815_vm7 = vmmov %vm10795_vm0  ;;  %vm5378_vm2 = vcmp.lt.s32.totalorder %v5376_v33, %v5377_v62  ;;  %vm5365_vm5 = vcmp.lt.s32.totalorder %v5363_v34, %v5364_v30 }
 0x4f5   :  { %v5373_v2 = vsel %vm10815_vm7, %v10814_v14, 2147483647  ;;  %v5379_v22 = vsel %vm5378_vm2, %v5376_v33, %v5377_v62  ;;  %vm10817_vm8 = vmmov %vm10795_vm0  ;;  %v5366_v43 = vsel %vm5365_vm5, %v5363_v34, %v5364_v30 }
 0x4f6   :  { %v5383_v7 = vsel %vm10817_vm8, %v10816_v52, 2147483647  ;;  %vm5381_vm6 = vcmp.lt.s32.totalorder %v5379_v22, %v5380_v3  ;;  %vm10819_vm13 = vmmov %vm10795_vm0  ;;  %vm5368_vm14 = vcmp.lt.s32.totalorder %v5366_v43, %v5367_v59 }
 0x4f7   :  { %v5386_v21 = vsel %vm10819_vm13, %v10818_v53, 2147483647  ;;  %v5382_v35 = vsel %vm5381_vm6, %v5379_v22, %v5380_v3  ;;  %vm10821_vm4 = vmmov %vm10795_vm0  ;;  %v5369_v28 = vsel %vm5368_vm14, %v5366_v43, %v5367_v59 }
 0x4f8   :  { %v5389_v29 = vsel %vm10821_vm4, %v10820_v4, 2147483647  ;;  %vm10823_vm1 = vmmov %vm10795_vm0  ;;  %vm5384_vm9 = vcmp.lt.s32.totalorder %v5382_v35, %v5383_v7  ;;  %vm5371_vm3 = vcmp.lt.s32.totalorder %v5369_v28, %v5370_v37 }
 0x4f9   :  { %v5392_v50 = vsel %vm10823_vm1, %v10822_v19, 2147483647  ;;  %vm10825_vm15 = vmmov %vm10795_vm0  ;;  %v5385_v61 = vsel %vm5384_vm9, %v5382_v35, %v5383_v7  ;;  %v5372_v17 = vsel %vm5371_vm3, %v5369_v28, %v5370_v37 }
 0x4fa   :  { %v5395_v11 = vsel %vm10825_vm15, %v10824_v38, 2147483647  ;;  %vm10826_vm10 = vmmov %vm10795_vm0  ;;  %vm5387_vm7 = vcmp.lt.s32.totalorder %v5385_v61, %v5386_v21  ;;  %vm5374_vm6 = vcmp.lt.s32.totalorder %v5372_v17, %v5373_v2 }
 0x4fb   :  { %v5401_v44 = vsel %vm10826_vm10, %v10045_v60, 2147483647  ;;  %vm10827_vm11 = vmmov %vm10795_vm0  ;;  %v5388_v25 = vsel %vm5387_vm7, %v5385_v61, %v5386_v21  ;;  %v5375_v46 = vsel %vm5374_vm6, %v5372_v17, %v5373_v2 }
 0x4fc   :  { %v5403_v24 = vsel %vm10827_vm11, %v10071_v49, 2147483647  ;;  %vm10828_vm2 = vmmov %vm10795_vm0  ;;  %vm5390_vm13 = vcmp.lt.s32.totalorder %v5388_v25, %v5389_v29 }
 0x4fd   :  { %v5404_v10 = vsel %vm10828_vm2, %v10097_v51, 2147483647  ;;  %vm10829_vm12 = vmmov %vm10795_vm0  ;;  %v5391_v42 = vsel %vm5390_vm13, %v5388_v25, %v5389_v29 }
 0x4fe   :  { %v5405_v56 = vsel %vm10829_vm12, %v10115_v54, 2147483647  ;;  %vm10830_vm5 = vmmov %vm10795_vm0  ;;  %vm5393_vm14 = vcmp.lt.s32.totalorder %v5391_v42, %v5392_v50 }
 0x4ff   :  { %vm5406_vm8 = vcmp.lt.s32.totalorder %v5401_v44, %v5405_v56  ;;  %v5408_v60 = vsel %vm10830_vm5, %v5325_v40, 2147483647  ;;  %vm10831_vm1 = vmmov %vm10795_vm0  ;;  %v5394_v45 = vsel %vm5393_vm14, %v5391_v42, %v5392_v50 }
 0x500   :  { %v5407_v0 = vsel %vm5406_vm8, %v5401_v44, %v5405_v56  ;;  %vm5409_vm4 = vcmp.lt.s32.totalorder %v5402_v18, %v5408_v60  ;;  %v5411_v23 = vsel %vm10831_vm1, %v5350_v8, 2147483647  ;;  %vm10832_vm15 = vmmov %vm10795_vm0  ;;  %vm5396_vm11 = vcmp.lt.s32.totalorder %v5394_v45, %v5395_v11 }
 0x501   :  { %v5410_v49 = vsel %vm5409_vm4, %v5402_v18, %v5408_v60  ;;  %vm5412_vm9 = vcmp.lt.s32.totalorder %v5403_v24, %v5411_v23  ;;  %v5414_v51 = vsel %vm10832_vm15, %v5375_v46, 2147483647  ;;  %vm10833_vm10 = vmmov %vm10795_vm0  ;;  %v5397_v6 = vsel %vm5396_vm11, %v5394_v45, %v5395_v11 }
 0x502   :  { %v5398_v54 = vsel %vm10833_vm10, %v10003_v57, 2147483647  ;;  %v5413_v16 = vsel %vm5412_vm9, %v5403_v24, %v5411_v23  ;;  %vm5415_vm0 = vcmp.lt.s32.totalorder %v5404_v10, %v5414_v51  ;;  %vm10834_vm2 = vmmov %vm10831_vm1 }
 0x503   :  { %v5416_v36 = vsel %vm5415_vm0, %v5404_v10, %v5414_v51  ;;  %vm5399_vm7 = vcmp.lt.s32.totalorder %v5397_v6, %v5398_v54  ;;  %vm10835_vm6 = vmmov %vm10831_vm1 }
 0x504   :  { %vm5422_vm3 = vcmp.lt.s32.totalorder %v5413_v16, %v5416_v36  ;;  %v5400_v20 = vsel %vm5399_vm7, %v5397_v6, %v5398_v54 }
 0x505   :  { %v5423_v39 = vsel %vm5422_vm3, %v5413_v16, %v5416_v36  ;;  %v5417_v55 = vsel %vm10834_vm2, %v5400_v20, 2147483647 }
 0x506   :  { %vm5418_vm12 = vcmp.lt.s32.totalorder %v5407_v0, %v5417_v55 }
 0x507   :  { %v5419_v48 = vsel %vm5418_vm12, %v5407_v0, %v5417_v55 }
 0x508   :  { %vm5420_vm8 = vcmp.lt.s32.totalorder %v5419_v48, %v5410_v49 }
 0x509   :  { %v5421_v63 = vsel %vm5420_vm8, %v5419_v48, %v5410_v49 }
 0x50a   :  { %vm5424_vm5 = vcmp.lt.s32.totalorder %v5421_v63, %v5423_v39 }
 0x50b   :  { %v5425_v57 = vsel %vm5424_vm5, %v5421_v63, %v5423_v39 }
 0x50c   :  { %5426 = vst.msk [vmem:[#allocation3] sm:$0x1] %vm10835_vm6, %v5425_v57 }
 0x50d   :  { %6141 = shalt.err (!%p6138_p13)
}
 0x50e   :  { %s6142_s10 = scalar_lea.hbm %s10192_s2, 16 }
 0x50f   :  { %p6143_p0 = scmp.ne.s32.totalorder %s10192_s2, %s6142_s10  ;;  %p6146_p1 = scmp.lt.u32.totalorder %s6142_s10, %s10192_s2 }
 0x511   :  { %p6148_p2 = pnand %p6146_p1, %p6143_p0 }
 0x513   :  { %6151 = shalt.err (!%p6148_p2)
}
 0x514   :  { %5437 = dma.vmem_to_hbm [thread:$0]  %s5435_s5, 16, %s10192_s2, [#allocation4]  }
 0x515   :  { %6156 = dma.done.wait [#allocation4], 16  }
 0x516   :  { %6157 = vsyncadd [#allocation4], 4294967280 }
 0x517   :  { %6158 = dma.done.wait [#allocation6], 16  }
 0x518   :  { %6159 = vsyncadd [#allocation6], 4294967280 }
 0x519   :  { %5454 = vsyncpa [#allocation4], 1 }
 0x51a   :  { %5455 = vsyncpa [#allocation6], 1 }

</bundles_post_ra>
